<compile_context>
chip_gen: v7x
topology: tpu7x:2x2x1
jax: 0.10.0
libtpu: 0.0.40
codegen_flags: <defaults>
</compile_context>

<pallas_src>
import numpy as np
import jax
import jax.numpy as jnp
from jax.experimental import pallas as pl
from jax.experimental.pallas import tpu as pltpu


# ----------------------------------------------------------------------------
# Fused Conv2d(3x3, valid) + ReLU + AvgPool2d(5, stride=3) kernel
# One grid step = one full batch element.
# ----------------------------------------------------------------------------
def _cnn_block_kernel(x_ref, wk_ref, b_ref, p_ref, o_ref, carry_ref, vsum_ref):
    """x_ref:  (1, H*Cpad, W)       bf16 channel-flattened input image (VMEM)
       wk_ref: (ndx, Cout, 3*Cpad)  bf16 per-dx merged-(dy, channel) conv weights
       b_ref:  (Cout, 1)            f32 conv bias
       p_ref:  (Wc, Wp)             bf16 banded 5-tap/stride-3 pool (entries 1.0)
       o_ref:  (1, Hp, Cout, Wp)    bf16 whole pooled output of this image
       carry_ref: VMEM (2, Cout, Wc) f32  conv rows shared between pool windows
       vsum_ref:  VMEM (Cout, Wc)    f32  5-row vertical sum accumulator
    """
    ndx = wk_ref.shape[0]                # number of horizontal taps (1 or 3)
    cin3 = wk_ref.shape[2]               # 3 * padded input channels
    cin_pad = cin3 // 3
    wc = p_ref.shape[0]                  # conv output width
    hp = o_ref.shape[1]                  # pooled output height

    bias = b_ref[...]                    # (Cout, 1) f32, hoisted out of all loops

    def conv_row(r):
        # ReLU(conv) of conv-output row r; input rows r..r+2 live at the
        # flattened sublanes [r*cin_pad, (r+3)*cin_pad)  (always 16-aligned).
        start = r * cin_pad
        if not isinstance(start, int):
            start = pl.multiple_of(start, cin_pad)
        xs = x_ref[0, pl.ds(start, cin3), :]                     # (3*Cpad, W) bf16
        acc = jnp.dot(wk_ref[0], xs[:, 0:wc],
                      preferred_element_type=jnp.float32)
        for dx in range(1, ndx):                                 # static unroll
            acc = acc + jnp.dot(wk_ref[dx], xs[:, dx:wc + dx],
                                preferred_element_type=jnp.float32)
        return jnp.maximum(acc + bias, 0.0)                      # (Cout, Wc) f32

    # Seed the 2-row carry with conv rows 0 and 1 (used by pooled row 0).
    carry_ref[0] = conv_row(0)
    carry_ref[1] = conv_row(1)

    def body(j, token):
        base = 3 * j                     # first conv row of this pool window
        # 5-row vertical sum: rows base, base+1 come from the carry, rows
        # base+2..base+4 are computed fresh -> each conv row computed once.
        vsum_ref[...] = carry_ref[0] + carry_ref[1]
        vsum_ref[...] += conv_row(base + 2)
        r3 = conv_row(base + 3)
        vsum_ref[...] += r3
        carry_ref[0] = r3                # becomes row 3*(j+1)
        r4 = conv_row(base + 4)
        vsum_ref[...] += r4
        carry_ref[1] = r4                # becomes row 3*(j+1)+1
        # horizontal 5-tap / stride-3 sum as a bf16 banded matmul; 1/25 in f32.
        pooled = jnp.dot(vsum_ref[...].astype(jnp.bfloat16), p_ref[...],
                         preferred_element_type=jnp.float32) * (1.0 / 25.0)
        o_ref[0, j] = pooled.astype(o_ref.dtype)
        return token

    jax.lax.fori_loop(0, hp, body, 0)


def cnn_block(x_nhcw, w_conv, b):
    """One CNN64x3 block.  x_nhcw: (N, H, Cin_eff, W) -> bf16 (N, Hp, Cout, Wp).

    w_conv: (Cout, Cin_eff, 3, KWe) with KWe in {1, 3}.  KWe == 1 means the
    three horizontal taps were pre-folded into the channel axis by the caller
    (block 1); the conv output width is W - 2 in both cases.
    """
    n, h, cin, w_in = x_nhcw.shape
    cout, _, _, kwe = w_conv.shape
    wc, hc = w_in - 2, h - 2                        # valid 3x3 conv output
    wp, hp = (wc - 5) // 3 + 1, (hc - 5) // 3 + 1   # AvgPool2d(5, stride=3)

    # Pad channels to a multiple of 16 so the flattened bf16 (H*C, W) row
    # windows are aligned on the sublane axis (padded taps get zero weight).
    cin_pad = ((cin + 15) // 16) * 16
    if cin_pad != cin:
        x_nhcw = jnp.pad(x_nhcw, ((0, 0), (0, 0), (0, cin_pad - cin), (0, 0)))
        w_conv = jnp.pad(w_conv, ((0, 0), (0, cin_pad - cin), (0, 0), (0, 0)))
    x_flat = x_nhcw.reshape(n, h * cin_pad, w_in).astype(jnp.bfloat16)

    # Merged-K weights: one (Cout, 3*Cpad) slab per horizontal tap dx, with
    # K = dy*Cpad + cin matching the flattened activation rows.
    w_k = (jnp.transpose(w_conv, (3, 0, 2, 1))
           .reshape(kwe, cout, 3 * cin_pad).astype(jnp.bfloat16))
    b2 = b.reshape(cout, 1).astype(jnp.float32)

    # Banded horizontal 5-tap / stride-3 pool matrix (entries 1.0; the exact
    # 1/25 factor is applied in f32 inside the kernel).
    pool = np.zeros((wc, wp), np.float32)
    for i in range(wp):
        pool[3 * i:3 * i + 5, i] = 1.0
    pool = jnp.asarray(pool, jnp.bfloat16)

    return pl.pallas_call(
        _cnn_block_kernel,
        out_shape=jax.ShapeDtypeStruct((n, hp, cout, wp), jnp.bfloat16),
        grid=(n,),
        in_specs=[
            pl.BlockSpec((1, h * cin_pad, w_in), lambda nn: (nn, 0, 0)),
            pl.BlockSpec((kwe, cout, 3 * cin_pad), lambda nn: (0, 0, 0)),
            pl.BlockSpec((cout, 1), lambda nn: (0, 0)),
            pl.BlockSpec((wc, wp), lambda nn: (0, 0)),
        ],
        out_specs=pl.BlockSpec((1, hp, cout, wp), lambda nn: (nn, 0, 0, 0)),
        scratch_shapes=[
            pltpu.VMEM((2, cout, wc), jnp.float32),   # 2-row conv-row carry
            pltpu.VMEM((cout, wc), jnp.float32),      # 5-row vertical sum
        ],
        compiler_params=pltpu.CompilerParams(
            dimension_semantics=("parallel",),        # batch -> megacore split
            vmem_limit_bytes=48 * 1024 * 1024,        # ~33 MiB worst case (blk 1,
        ),                                            #  bf16, double-buffered)
    )(x_flat, w_k, b2, pool)


# ----------------------------------------------------------------------------
# Block-1 horizontal-tap fold: (3x3) conv over 3 channels == (3x1) conv over 9
# "shifted" channels.  Raises the per-row MXU contraction without extra memory
# (3 or 9 channels both pad to 16 for bf16 sublane alignment).
# ----------------------------------------------------------------------------
def _fold_dx_into_channels(x_nhcw, w_conv):
    n, h, cin, w_in = x_nhcw.shape
    cout = w_conv.shape[0]
    parts = [x_nhcw]
    for dx in (1, 2):
        parts.append(jnp.pad(x_nhcw[..., dx:],
                             ((0, 0), (0, 0), (0, 0), (0, dx))))
    x_aug = jnp.concatenate(parts, axis=2)            # channel j = dx*cin + c
    w_aug = (jnp.transpose(w_conv, (0, 3, 1, 2))      # (o, dx, c, dy)
             .reshape(cout, 3 * cin, 3, 1))           # (o, dx*cin + c, dy, 1)
    return x_aug, w_aug


# ----------------------------------------------------------------------------
# nn.Linear kernel: y = x @ W.T + b   (PyTorch weight layout (A, K))
# ----------------------------------------------------------------------------
def _fc_kernel(x_ref, w_ref, b_ref, o_ref):
    # Contract on dim 1 of both bf16 operands (f32 accumulation): keeps the
    # (A=6, K=20160) weight lane-dense in VMEM.
    y = jax.lax.dot_general(
        x_ref[...], w_ref[...],
        dimension_numbers=(((1,), (1,)), ((), ())),
        preferred_element_type=jnp.float32)
    o_ref[...] = (y + b_ref[...]).astype(o_ref.dtype)


def linear(x, w, b):
    n, k = x.shape
    a = w.shape[0]
    return pl.pallas_call(
        _fc_kernel,
        out_shape=jax.ShapeDtypeStruct((n, a), jnp.float32),
        grid=(1,),
        in_specs=[
            pl.BlockSpec((n, k), lambda i: (0, 0)),
            pl.BlockSpec((a, k), lambda i: (0, 0)),
            pl.BlockSpec((1, a), lambda i: (0, 0)),
        ],
        out_specs=pl.BlockSpec((n, a), lambda i: (0, 0)),
    )(x.astype(jnp.bfloat16), w.astype(jnp.bfloat16),
      b.reshape(1, a).astype(jnp.float32))


# ----------------------------------------------------------------------------
# DeepQNetwork parameters + forward
# ----------------------------------------------------------------------------
def init_params(key, n_actions, input_channels=3):
    def conv_init(k, cin, cout):
        k1, k2 = jax.random.split(k)
        bound = float(1.0 / np.sqrt(cin * 3 * 3))
        w = jax.random.uniform(k1, (cout, cin, 3, 3), jnp.float32, -bound, bound)
        bb = jax.random.uniform(k2, (cout,), jnp.float32, -bound, bound)
        return w, bb

    k1, k2, k3, k4 = jax.random.split(key, 4)
    fc_in = 64 * 21 * 15
    bound = float(1.0 / np.sqrt(fc_in))
    kf1, kf2 = jax.random.split(k4)
    return {
        "conv1": conv_init(k1, input_channels, 64),
        "conv2": conv_init(k2, 64, 64),
        "conv3": conv_init(k3, 64, 64),
        "fc_w": jax.random.uniform(kf1, (n_actions, fc_in), jnp.float32,
                                   -bound, bound),
        "fc_b": jax.random.uniform(kf2, (n_actions,), jnp.float32,
                                   -bound, bound),
    }


def deep_q_forward(params, observation_nchw):
    """observation: (N, C, H, W) float32, PyTorch NCHW convention."""
    x = jnp.asarray(observation_nchw, jnp.float32)
    n = x.shape[0]
    x = jnp.transpose(x, (0, 2, 1, 3))              # NCHW -> (N, H, C, W)

    # Block 1: fold the 3 horizontal taps into the channel axis (free after
    # bf16 channel padding) so each conv row is a single MXU dot.
    w1, b1 = params["conv1"]
    x, w1_aug = _fold_dx_into_channels(x, w1)
    x = cnn_block(x, w1_aug, b1)                    # (N, 205, 64, 151) bf16

    for name in ("conv2", "conv3"):
        w, b = params[name]
        x = cnn_block(x, w, b)                      # (N, 67, 64, 49) / (N, 21, 64, 15)

    # flatten in PyTorch (C, H, W) order: (N, H, C, W) -> (N, C, H, W) -> (N, K)
    x = jnp.transpose(x, (0, 2, 1, 3)).reshape(n, -1)
    return linear(x, params["fc_w"], params["fc_b"])


# ----------------------------------------------------------------------------
# Pure-XLA f32 reference (PyTorch semantics) used to validate the kernels.
# The kernels intentionally use bf16 MXU inputs with f32 accumulation, so the
# comparison tolerance accounts for bf16 activation/weight rounding.
# ----------------------------------------------------------------------------
def _reference_forward(params, observation_nchw):
    x = jnp.asarray(observation_nchw, jnp.float32)
    for name in ("conv1", "conv2", "conv3"):
        w, b = params[name]
        x = jax.lax.conv_general_dilated(
            x, w, window_strides=(1, 1), padding="VALID",
            dimension_numbers=("NCHW", "OIHW", "NCHW"),
            precision=jax.lax.Precision.HIGHEST)
        x = jnp.maximum(x + b.reshape(1, -1, 1, 1), 0.0)
        x = jax.lax.reduce_window(x, 0.0, jax.lax.add,
                                  (1, 1, 5, 5), (1, 1, 3, 3), "VALID") / 25.0
    x = x.reshape(x.shape[0], -1)
    return jnp.dot(x, params["fc_w"].T,
                   precision=jax.lax.Precision.HIGHEST) + params["fc_b"]


if __name__ == "__main__":
    n_actions = 6
    key = jax.random.PRNGKey(0)
    k_obs, k_params = jax.random.split(key)
    # fc = Linear(64*21*15, ...) implies the input spatial size 619 x 457.
    obs = jax.random.uniform(k_obs, (2, 3, 619, 457), jnp.float32)
    params = init_params(k_params, n_actions)

    fwd = jax.jit(deep_q_forward)
    q = jax.block_until_ready(fwd(params, obs))
    assert q.shape == (2, n_actions) and q.dtype == jnp.float32

    q_ref = jax.block_until_ready(jax.jit(_reference_forward)(params, obs))
    np.testing.assert_allclose(np.asarray(q), np.asarray(q_ref),
                               rtol=5e-2, atol=2e-2)
    print("KERNEL_OK")
</pallas_src>

<mosaic_0001>
module attributes {stable_mosaic.version = 11 : i64} {
  func.func @_cnn_block_kernel(%arg0: i32, %arg1: memref<1x9904x457xbf16, #tpu.memory_space<vmem>>, %arg2: memref<1x64x48xbf16, #tpu.memory_space<vmem>>, %arg3: memref<64x1xf32, #tpu.memory_space<vmem>>, %arg4: memref<455x151xbf16, #tpu.memory_space<vmem>>, %arg5: memref<1x205x64x151xbf16, #tpu.memory_space<vmem>>, %arg6: memref<2x64x455xf32, #tpu.memory_space<vmem>>, %arg7: memref<64x455xf32, #tpu.memory_space<vmem>>) attributes {dimension_semantics = [#tpu.dimension_semantics<parallel>], iteration_bounds = array<i64: 2>, scalar_prefetch = 0 : i64, scratch_operands = 2 : i64, tpu.core_type = #tpu.core_type<tc>, window_params = [{transform_indices = @transform_0, window_bounds = array<i64: 1, 9904, 457>}, {pipeline_mode = #tpu.pipeline_mode<synchronous>, transform_indices = @transform_1, window_bounds = array<i64: 1, 64, 48>}, {pipeline_mode = #tpu.pipeline_mode<synchronous>, transform_indices = @transform_2, window_bounds = array<i64: 64, 1>}, {pipeline_mode = #tpu.pipeline_mode<synchronous>, transform_indices = @transform_3, window_bounds = array<i64: 455, 151>}, {transform_indices = @transform_4, window_bounds = array<i64: 1, 205, 64, 151>}]} {
    %c0 = arith.constant 0 : index
    %c0_0 = arith.constant 0 : index
    %0 = vector.load %arg3[%c0, %c0_0] : memref<64x1xf32, #tpu.memory_space<vmem>>, vector<64x1xf32>
    %c0_1 = arith.constant 0 : index
    %c0_2 = arith.constant 0 : index
    %c0_3 = arith.constant 0 : index
    %1 = vector.load %arg1[%c0_1, %c0_2, %c0_3] : memref<1x9904x457xbf16, #tpu.memory_space<vmem>>, vector<1x48x457xbf16>
    %2 = vector.shape_cast %1 : vector<1x48x457xbf16> to vector<48x457xbf16>
    %c0_4 = arith.constant 0 : index
    %c0_5 = arith.constant 0 : index
    %c0_6 = arith.constant 0 : index
    %3 = vector.load %arg2[%c0_4, %c0_5, %c0_6] : memref<1x64x48xbf16, #tpu.memory_space<vmem>>, vector<1x64x48xbf16>
    %4 = vector.shape_cast %3 : vector<1x64x48xbf16> to vector<64x48xbf16>
    %5 = vector.extract_strided_slice %2 {offsets = [0, 0], sizes = [48, 455], strides = [1, 1]} : vector<48x457xbf16> to vector<48x455xbf16>
    %cst = arith.constant dense<0.000000e+00> : vector<64x455xf32>
    %6 = tpu.matmul %4, %5, %cst {dimension_numbers = #tpu.dot_dimension_numbers<[1], [0], [0], [1], [0, 0, 1, 1], [], []>} : vector<64x48xbf16>, vector<48x455xbf16>, vector<64x455xf32> -> vector<64x455xf32>
    %7 = vector.broadcast %0 : vector<64x1xf32> to vector<64x455xf32>
    %8 = arith.addf %6, %7 : vector<64x455xf32>
    %cst_7 = arith.constant 0.000000e+00 : f32
    %9 = vector.broadcast %cst_7 : f32 to vector<64x455xf32>
    %10 = arith.maximumf %8, %9 : vector<64x455xf32>
    %c0_8 = arith.constant 0 : index
    %c0_9 = arith.constant 0 : index
    %c0_10 = arith.constant 0 : index
    %11 = vector.load %arg6[%c0_8, %c0_9, %c0_10] : memref<2x64x455xf32, #tpu.memory_space<vmem>>, vector<1x64x455xf32>
    %12 = vector.shape_cast %11 : vector<1x64x455xf32> to vector<64x455xf32>
    %13 = vector.shape_cast %10 : vector<64x455xf32> to vector<1x64x455xf32>
    tpu.vector_store %arg6[%c0_8, %c0_9, %c0_10], %13 {strides = array<i32>} : memref<2x64x455xf32, #tpu.memory_space<vmem>>, vector<1x64x455xf32>,
    %c0_11 = arith.constant 0 : index
    %c16 = arith.constant 16 : index
    %c0_12 = arith.constant 0 : index
    %14 = vector.load %arg1[%c0_11, %c16, %c0_12] : memref<1x9904x457xbf16, #tpu.memory_space<vmem>>, vector<1x48x457xbf16>
    %15 = vector.shape_cast %14 : vector<1x48x457xbf16> to vector<48x457xbf16>
    %c0_13 = arith.constant 0 : index
    %c0_14 = arith.constant 0 : index
    %c0_15 = arith.constant 0 : index
    %16 = vector.load %arg2[%c0_13, %c0_14, %c0_15] : memref<1x64x48xbf16, #tpu.memory_space<vmem>>, vector<1x64x48xbf16>
    %17 = vector.shape_cast %16 : vector<1x64x48xbf16> to vector<64x48xbf16>
    %18 = vector.extract_strided_slice %15 {offsets = [0, 0], sizes = [48, 455], strides = [1, 1]} : vector<48x457xbf16> to vector<48x455xbf16>
    %cst_16 = arith.constant dense<0.000000e+00> : vector<64x455xf32>
    %19 = tpu.matmul %17, %18, %cst_16 {dimension_numbers = #tpu.dot_dimension_numbers<[1], [0], [0], [1], [0, 0, 1, 1], [], []>} : vector<64x48xbf16>, vector<48x455xbf16>, vector<64x455xf32> -> vector<64x455xf32>
    %20 = vector.broadcast %0 : vector<64x1xf32> to vector<64x455xf32>
    %21 = arith.addf %19, %20 : vector<64x455xf32>
    %cst_17 = arith.constant 0.000000e+00 : f32
    %22 = vector.broadcast %cst_17 : f32 to vector<64x455xf32>
    %23 = arith.maximumf %21, %22 : vector<64x455xf32>
    %c1 = arith.constant 1 : index
    %c0_18 = arith.constant 0 : index
    %c0_19 = arith.constant 0 : index
    %24 = vector.load %arg6[%c1, %c0_18, %c0_19] : memref<2x64x455xf32, #tpu.memory_space<vmem>>, vector<1x64x455xf32>
    %25 = vector.shape_cast %24 : vector<1x64x455xf32> to vector<64x455xf32>
    %26 = vector.shape_cast %23 : vector<64x455xf32> to vector<1x64x455xf32>
    tpu.vector_store %arg6[%c1, %c0_18, %c0_19], %26 {strides = array<i32>} : memref<2x64x455xf32, #tpu.memory_space<vmem>>, vector<1x64x455xf32>,
    %c0_i32 = arith.constant 0 : i32
    %c205_i32 = arith.constant 205 : i32
    %27 = arith.addi %c0_i32, %c205_i32 : i32
    %c1_i32 = arith.constant 1 : i32
    scf.for %arg8 = %c0_i32 to %27 step %c1_i32  : i32 {
      %c3_i32 = arith.constant 3 : i32
      %28 = arith.muli %c3_i32, %arg8 : i32
      %c0_21 = arith.constant 0 : index
      %c0_22 = arith.constant 0 : index
      %c0_23 = arith.constant 0 : index
      %29 = vector.load %arg6[%c0_21, %c0_22, %c0_23] : memref<2x64x455xf32, #tpu.memory_space<vmem>>, vector<1x64x455xf32>
      %30 = vector.shape_cast %29 : vector<1x64x455xf32> to vector<64x455xf32>
      %c1_24 = arith.constant 1 : index
      %c0_25 = arith.constant 0 : index
      %c0_26 = arith.constant 0 : index
      %31 = vector.load %arg6[%c1_24, %c0_25, %c0_26] : memref<2x64x455xf32, #tpu.memory_space<vmem>>, vector<1x64x455xf32>
      %32 = vector.shape_cast %31 : vector<1x64x455xf32> to vector<64x455xf32>
      %33 = arith.addf %30, %32 : vector<64x455xf32>
      %c0_27 = arith.constant 0 : index
      %c0_28 = arith.constant 0 : index
      %34 = vector.load %arg7[%c0_27, %c0_28] : memref<64x455xf32, #tpu.memory_space<vmem>>, vector<64x455xf32>
      tpu.vector_store %arg7[%c0_27, %c0_28], %33 {strides = array<i32>} : memref<64x455xf32, #tpu.memory_space<vmem>>, vector<64x455xf32>,
      %c0_29 = arith.constant 0 : index
      %c0_30 = arith.constant 0 : index
      %35 = vector.load %arg7[%c0_29, %c0_30] : memref<64x455xf32, #tpu.memory_space<vmem>>, vector<64x455xf32>
      %c2_i32 = arith.constant 2 : i32
      %36 = arith.addi %28, %c2_i32 : i32
      %c16_i32 = arith.constant 16 : i32
      %37 = arith.muli %36, %c16_i32 : i32
      %38 = tpu.assume_multiple %37, 16 : i32
      %c0_31 = arith.constant 0 : index
      %39 = arith.index_cast %38 : i32 to index
      %c0_32 = arith.constant 0 : index
      %40 = vector.load %arg1[%c0_31, %39, %c0_32] : memref<1x9904x457xbf16, #tpu.memory_space<vmem>>, vector<1x48x457xbf16>
      %41 = vector.shape_cast %40 : vector<1x48x457xbf16> to vector<48x457xbf16>
      %c0_33 = arith.constant 0 : index
      %c0_34 = arith.constant 0 : index
      %c0_35 = arith.constant 0 : index
      %42 = vector.load %arg2[%c0_33, %c0_34, %c0_35] : memref<1x64x48xbf16, #tpu.memory_space<vmem>>, vector<1x64x48xbf16>
      %43 = vector.shape_cast %42 : vector<1x64x48xbf16> to vector<64x48xbf16>
      %44 = vector.extract_strided_slice %41 {offsets = [0, 0], sizes = [48, 455], strides = [1, 1]} : vector<48x457xbf16> to vector<48x455xbf16>
      %cst_36 = arith.constant dense<0.000000e+00> : vector<64x455xf32>
      %45 = tpu.matmul %43, %44, %cst_36 {dimension_numbers = #tpu.dot_dimension_numbers<[1], [0], [0], [1], [0, 0, 1, 1], [], []>} : vector<64x48xbf16>, vector<48x455xbf16>, vector<64x455xf32> -> vector<64x455xf32>
      %46 = vector.broadcast %0 : vector<64x1xf32> to vector<64x455xf32>
      %47 = arith.addf %45, %46 : vector<64x455xf32>
      %cst_37 = arith.constant 0.000000e+00 : f32
      %48 = vector.broadcast %cst_37 : f32 to vector<64x455xf32>
      %49 = arith.maximumf %47, %48 : vector<64x455xf32>
      %50 = arith.addf %35, %49 : vector<64x455xf32>
      %c0_38 = arith.constant 0 : index
      %c0_39 = arith.constant 0 : index
      %51 = vector.load %arg7[%c0_38, %c0_39] : memref<64x455xf32, #tpu.memory_space<vmem>>, vector<64x455xf32>
      tpu.vector_store %arg7[%c0_38, %c0_39], %50 {strides = array<i32>} : memref<64x455xf32, #tpu.memory_space<vmem>>, vector<64x455xf32>,
      %c3_i32_40 = arith.constant 3 : i32
      %52 = arith.addi %28, %c3_i32_40 : i32
      %c16_i32_41 = arith.constant 16 : i32
      %53 = arith.muli %52, %c16_i32_41 : i32
      %54 = tpu.assume_multiple %53, 16 : i32
      %c0_42 = arith.constant 0 : index
      %55 = arith.index_cast %54 : i32 to index
      %c0_43 = arith.constant 0 : index
      %56 = vector.load %arg1[%c0_42, %55, %c0_43] : memref<1x9904x457xbf16, #tpu.memory_space<vmem>>, vector<1x48x457xbf16>
      %57 = vector.shape_cast %56 : vector<1x48x457xbf16> to vector<48x457xbf16>
      %c0_44 = arith.constant 0 : index
      %c0_45 = arith.constant 0 : index
      %c0_46 = arith.constant 0 : index
      %58 = vector.load %arg2[%c0_44, %c0_45, %c0_46] : memref<1x64x48xbf16, #tpu.memory_space<vmem>>, vector<1x64x48xbf16>
      %59 = vector.shape_cast %58 : vector<1x64x48xbf16> to vector<64x48xbf16>
      %60 = vector.extract_strided_slice %57 {offsets = [0, 0], sizes = [48, 455], strides = [1, 1]} : vector<48x457xbf16> to vector<48x455xbf16>
      %cst_47 = arith.constant dense<0.000000e+00> : vector<64x455xf32>
      %61 = tpu.matmul %59, %60, %cst_47 {dimension_numbers = #tpu.dot_dimension_numbers<[1], [0], [0], [1], [0, 0, 1, 1], [], []>} : vector<64x48xbf16>, vector<48x455xbf16>, vector<64x455xf32> -> vector<64x455xf32>
      %62 = vector.broadcast %0 : vector<64x1xf32> to vector<64x455xf32>
      %63 = arith.addf %61, %62 : vector<64x455xf32>
      %cst_48 = arith.constant 0.000000e+00 : f32
      %64 = vector.broadcast %cst_48 : f32 to vector<64x455xf32>
      %65 = arith.maximumf %63, %64 : vector<64x455xf32>
      %c0_49 = arith.constant 0 : index
      %c0_50 = arith.constant 0 : index
      %66 = vector.load %arg7[%c0_49, %c0_50] : memref<64x455xf32, #tpu.memory_space<vmem>>, vector<64x455xf32>
      %67 = arith.addf %66, %65 : vector<64x455xf32>
      %c0_51 = arith.constant 0 : index
      %c0_52 = arith.constant 0 : index
      %68 = vector.load %arg7[%c0_51, %c0_52] : memref<64x455xf32, #tpu.memory_space<vmem>>, vector<64x455xf32>
      tpu.vector_store %arg7[%c0_51, %c0_52], %67 {strides = array<i32>} : memref<64x455xf32, #tpu.memory_space<vmem>>, vector<64x455xf32>,
      %c0_53 = arith.constant 0 : index
      %c0_54 = arith.constant 0 : index
      %c0_55 = arith.constant 0 : index
      %69 = vector.load %arg6[%c0_53, %c0_54, %c0_55] : memref<2x64x455xf32, #tpu.memory_space<vmem>>, vector<1x64x455xf32>
      %70 = vector.shape_cast %69 : vector<1x64x455xf32> to vector<64x455xf32>
      %71 = vector.shape_cast %65 : vector<64x455xf32> to vector<1x64x455xf32>
      tpu.vector_store %arg6[%c0_53, %c0_54, %c0_55], %71 {strides = array<i32>} : memref<2x64x455xf32, #tpu.memory_space<vmem>>, vector<1x64x455xf32>,
      %c4_i32 = arith.constant 4 : i32
      %72 = arith.addi %28, %c4_i32 : i32
      %c16_i32_56 = arith.constant 16 : i32
      %73 = arith.muli %72, %c16_i32_56 : i32
      %74 = tpu.assume_multiple %73, 16 : i32
      %c0_57 = arith.constant 0 : index
      %75 = arith.index_cast %74 : i32 to index
      %c0_58 = arith.constant 0 : index
      %76 = vector.load %arg1[%c0_57, %75, %c0_58] : memref<1x9904x457xbf16, #tpu.memory_space<vmem>>, vector<1x48x457xbf16>
      %77 = vector.shape_cast %76 : vector<1x48x457xbf16> to vector<48x457xbf16>
      %c0_59 = arith.constant 0 : index
      %c0_60 = arith.constant 0 : index
      %c0_61 = arith.constant 0 : index
      %78 = vector.load %arg2[%c0_59, %c0_60, %c0_61] : memref<1x64x48xbf16, #tpu.memory_space<vmem>>, vector<1x64x48xbf16>
      %79 = vector.shape_cast %78 : vector<1x64x48xbf16> to vector<64x48xbf16>
      %80 = vector.extract_strided_slice %77 {offsets = [0, 0], sizes = [48, 455], strides = [1, 1]} : vector<48x457xbf16> to vector<48x455xbf16>
      %cst_62 = arith.constant dense<0.000000e+00> : vector<64x455xf32>
      %81 = tpu.matmul %79, %80, %cst_62 {dimension_numbers = #tpu.dot_dimension_numbers<[1], [0], [0], [1], [0, 0, 1, 1], [], []>} : vector<64x48xbf16>, vector<48x455xbf16>, vector<64x455xf32> -> vector<64x455xf32>
      %82 = vector.broadcast %0 : vector<64x1xf32> to vector<64x455xf32>
      %83 = arith.addf %81, %82 : vector<64x455xf32>
      %cst_63 = arith.constant 0.000000e+00 : f32
      %84 = vector.broadcast %cst_63 : f32 to vector<64x455xf32>
      %85 = arith.maximumf %83, %84 : vector<64x455xf32>
      %c0_64 = arith.constant 0 : index
      %c0_65 = arith.constant 0 : index
      %86 = vector.load %arg7[%c0_64, %c0_65] : memref<64x455xf32, #tpu.memory_space<vmem>>, vector<64x455xf32>
      %87 = arith.addf %86, %85 : vector<64x455xf32>
      %c0_66 = arith.constant 0 : index
      %c0_67 = arith.constant 0 : index
      %88 = vector.load %arg7[%c0_66, %c0_67] : memref<64x455xf32, #tpu.memory_space<vmem>>, vector<64x455xf32>
      tpu.vector_store %arg7[%c0_66, %c0_67], %87 {strides = array<i32>} : memref<64x455xf32, #tpu.memory_space<vmem>>, vector<64x455xf32>,
      %c1_68 = arith.constant 1 : index
      %c0_69 = arith.constant 0 : index
      %c0_70 = arith.constant 0 : index
      %89 = vector.load %arg6[%c1_68, %c0_69, %c0_70] : memref<2x64x455xf32, #tpu.memory_space<vmem>>, vector<1x64x455xf32>
      %90 = vector.shape_cast %89 : vector<1x64x455xf32> to vector<64x455xf32>
      %91 = vector.shape_cast %85 : vector<64x455xf32> to vector<1x64x455xf32>
      tpu.vector_store %arg6[%c1_68, %c0_69, %c0_70], %91 {strides = array<i32>} : memref<2x64x455xf32, #tpu.memory_space<vmem>>, vector<1x64x455xf32>,
      %c0_71 = arith.constant 0 : index
      %c0_72 = arith.constant 0 : index
      %92 = vector.load %arg7[%c0_71, %c0_72] : memref<64x455xf32, #tpu.memory_space<vmem>>, vector<64x455xf32>
      %93 = arith.truncf %92 : vector<64x455xf32> to vector<64x455xbf16>
      %c0_73 = arith.constant 0 : index
      %c0_74 = arith.constant 0 : index
      %94 = vector.load %arg4[%c0_73, %c0_74] : memref<455x151xbf16, #tpu.memory_space<vmem>>, vector<455x151xbf16>
      %cst_75 = arith.constant dense<0.000000e+00> : vector<64x151xf32>
      %95 = tpu.matmul %93, %94, %cst_75 {dimension_numbers = #tpu.dot_dimension_numbers<[1], [0], [0], [1], [0, 0, 1, 1], [], []>} : vector<64x455xbf16>, vector<455x151xbf16>, vector<64x151xf32> -> vector<64x151xf32>
      %cst_76 = arith.constant 4.000000e-02 : f32
      %96 = vector.broadcast %cst_76 : f32 to vector<64x151xf32>
      %97 = arith.mulf %95, %96 : vector<64x151xf32>
      %98 = arith.truncf %97 : vector<64x151xf32> to vector<64x151xbf16>
      %c0_77 = arith.constant 0 : index
      %99 = arith.index_cast %arg8 : i32 to index
      %c0_78 = arith.constant 0 : index
      %c0_79 = arith.constant 0 : index
      %100 = vector.load %arg5[%c0_77, %99, %c0_78, %c0_79] : memref<1x205x64x151xbf16, #tpu.memory_space<vmem>>, vector<1x1x64x151xbf16>
      %101 = vector.shape_cast %100 : vector<1x1x64x151xbf16> to vector<64x151xbf16>
      %102 = vector.shape_cast %98 : vector<64x151xbf16> to vector<1x1x64x151xbf16>
      tpu.vector_store %arg5[%c0_77, %99, %c0_78, %c0_79], %102 {strides = array<i32>} : memref<1x205x64x151xbf16, #tpu.memory_space<vmem>>, vector<1x1x64x151xbf16>,
    }
    %c205_i32_20 = arith.constant 205 : i32
    return
  }
  func.func @transform_0(%arg0: i32) -> (i32, i32, i32) {
    %c0_i32 = arith.constant 0 : i32
    %c0_i32_0 = arith.constant 0 : i32
    %c0_i32_1 = arith.constant 0 : i32
    return %arg0, %c0_i32, %c0_i32_0 : i32, i32, i32
  }
  func.func @transform_1(%arg0: i32) -> (i32, i32, i32) {
    %c0_i32 = arith.constant 0 : i32
    %c0_i32_0 = arith.constant 0 : i32
    %c0_i32_1 = arith.constant 0 : i32
    %c0_i32_2 = arith.constant 0 : i32
    return %c0_i32, %c0_i32_0, %c0_i32_1 : i32, i32, i32
  }
  func.func @transform_2(%arg0: i32) -> (i32, i32) {
    %c0_i32 = arith.constant 0 : i32
    %c0_i32_0 = arith.constant 0 : i32
    %c0_i32_1 = arith.constant 0 : i32
    return %c0_i32, %c0_i32_0 : i32, i32
  }
  func.func @transform_3(%arg0: i32) -> (i32, i32) {
    %c0_i32 = arith.constant 0 : i32
    %c0_i32_0 = arith.constant 0 : i32
    %c0_i32_1 = arith.constant 0 : i32
    return %c0_i32, %c0_i32_0 : i32, i32
  }
  func.func @transform_4(%arg0: i32) -> (i32, i32, i32, i32) {
    %c0_i32 = arith.constant 0 : i32
    %c0_i32_0 = arith.constant 0 : i32
    %c0_i32_1 = arith.constant 0 : i32
    %c0_i32_2 = arith.constant 0 : i32
    return %arg0, %c0_i32, %c0_i32_0, %c0_i32_1 : i32, i32, i32, i32
  }
}

module attributes {stable_mosaic.version = 11 : i64} {
  func.func @_cnn_block_kernel(%arg0: i32, %arg1: memref<1x13120x151xbf16, #tpu.memory_space<vmem>>, %arg2: memref<3x64x192xbf16, #tpu.memory_space<vmem>>, %arg3: memref<64x1xf32, #tpu.memory_space<vmem>>, %arg4: memref<149x49xbf16, #tpu.memory_space<vmem>>, %arg5: memref<1x67x64x49xbf16, #tpu.memory_space<vmem>>, %arg6: memref<2x64x149xf32, #tpu.memory_space<vmem>>, %arg7: memref<64x149xf32, #tpu.memory_space<vmem>>) attributes {dimension_semantics = [#tpu.dimension_semantics<parallel>], iteration_bounds = array<i64: 2>, scalar_prefetch = 0 : i64, scratch_operands = 2 : i64, tpu.core_type = #tpu.core_type<tc>, window_params = [{transform_indices = @transform_0, window_bounds = array<i64: 1, 13120, 151>}, {pipeline_mode = #tpu.pipeline_mode<synchronous>, transform_indices = @transform_1, window_bounds = array<i64: 3, 64, 192>}, {pipeline_mode = #tpu.pipeline_mode<synchronous>, transform_indices = @transform_2, window_bounds = array<i64: 64, 1>}, {pipeline_mode = #tpu.pipeline_mode<synchronous>, transform_indices = @transform_3, window_bounds = array<i64: 149, 49>}, {transform_indices = @transform_4, window_bounds = array<i64: 1, 67, 64, 49>}]} {
    %c0 = arith.constant 0 : index
    %c0_0 = arith.constant 0 : index
    %0 = vector.load %arg3[%c0, %c0_0] : memref<64x1xf32, #tpu.memory_space<vmem>>, vector<64x1xf32>
    %c0_1 = arith.constant 0 : index
    %c0_2 = arith.constant 0 : index
    %c0_3 = arith.constant 0 : index
    %1 = vector.load %arg1[%c0_1, %c0_2, %c0_3] : memref<1x13120x151xbf16, #tpu.memory_space<vmem>>, vector<1x192x151xbf16>
    %2 = vector.shape_cast %1 : vector<1x192x151xbf16> to vector<192x151xbf16>
    %c0_4 = arith.constant 0 : index
    %c0_5 = arith.constant 0 : index
    %c0_6 = arith.constant 0 : index
    %3 = vector.load %arg2[%c0_4, %c0_5, %c0_6] : memref<3x64x192xbf16, #tpu.memory_space<vmem>>, vector<1x64x192xbf16>
    %4 = vector.shape_cast %3 : vector<1x64x192xbf16> to vector<64x192xbf16>
    %5 = vector.extract_strided_slice %2 {offsets = [0, 0], sizes = [192, 149], strides = [1, 1]} : vector<192x151xbf16> to vector<192x149xbf16>
    %cst = arith.constant dense<0.000000e+00> : vector<64x149xf32>
    %6 = tpu.matmul %4, %5, %cst {dimension_numbers = #tpu.dot_dimension_numbers<[1], [0], [0], [1], [0, 0, 1, 1], [], []>} : vector<64x192xbf16>, vector<192x149xbf16>, vector<64x149xf32> -> vector<64x149xf32>
    %c1 = arith.constant 1 : index
    %c0_7 = arith.constant 0 : index
    %c0_8 = arith.constant 0 : index
    %7 = vector.load %arg2[%c1, %c0_7, %c0_8] : memref<3x64x192xbf16, #tpu.memory_space<vmem>>, vector<1x64x192xbf16>
    %8 = vector.shape_cast %7 : vector<1x64x192xbf16> to vector<64x192xbf16>
    %9 = vector.extract_strided_slice %2 {offsets = [0, 1], sizes = [192, 149], strides = [1, 1]} : vector<192x151xbf16> to vector<192x149xbf16>
    %cst_9 = arith.constant dense<0.000000e+00> : vector<64x149xf32>
    %10 = tpu.matmul %8, %9, %cst_9 {dimension_numbers = #tpu.dot_dimension_numbers<[1], [0], [0], [1], [0, 0, 1, 1], [], []>} : vector<64x192xbf16>, vector<192x149xbf16>, vector<64x149xf32> -> vector<64x149xf32>
    %11 = arith.addf %6, %10 : vector<64x149xf32>
    %c2 = arith.constant 2 : index
    %c0_10 = arith.constant 0 : index
    %c0_11 = arith.constant 0 : index
    %12 = vector.load %arg2[%c2, %c0_10, %c0_11] : memref<3x64x192xbf16, #tpu.memory_space<vmem>>, vector<1x64x192xbf16>
    %13 = vector.shape_cast %12 : vector<1x64x192xbf16> to vector<64x192xbf16>
    %14 = vector.extract_strided_slice %2 {offsets = [0, 2], sizes = [192, 149], strides = [1, 1]} : vector<192x151xbf16> to vector<192x149xbf16>
    %cst_12 = arith.constant dense<0.000000e+00> : vector<64x149xf32>
    %15 = tpu.matmul %13, %14, %cst_12 {dimension_numbers = #tpu.dot_dimension_numbers<[1], [0], [0], [1], [0, 0, 1, 1], [], []>} : vector<64x192xbf16>, vector<192x149xbf16>, vector<64x149xf32> -> vector<64x149xf32>
    %16 = arith.addf %11, %15 : vector<64x149xf32>
    %17 = vector.broadcast %0 : vector<64x1xf32> to vector<64x149xf32>
    %18 = arith.addf %16, %17 : vector<64x149xf32>
    %cst_13 = arith.constant 0.000000e+00 : f32
    %19 = vector.broadcast %cst_13 : f32 to vector<64x149xf32>
    %20 = arith.maximumf %18, %19 : vector<64x149xf32>
    %c0_14 = arith.constant 0 : index
    %c0_15 = arith.constant 0 : index
    %c0_16 = arith.constant 0 : index
    %21 = vector.load %arg6[%c0_14, %c0_15, %c0_16] : memref<2x64x149xf32, #tpu.memory_space<vmem>>, vector<1x64x149xf32>
    %22 = vector.shape_cast %21 : vector<1x64x149xf32> to vector<64x149xf32>
    %23 = vector.shape_cast %20 : vector<64x149xf32> to vector<1x64x149xf32>
    tpu.vector_store %arg6[%c0_14, %c0_15, %c0_16], %23 {strides = array<i32>} : memref<2x64x149xf32, #tpu.memory_space<vmem>>, vector<1x64x149xf32>,
    %c0_17 = arith.constant 0 : index
    %c64 = arith.constant 64 : index
    %c0_18 = arith.constant 0 : index
    %24 = vector.load %arg1[%c0_17, %c64, %c0_18] : memref<1x13120x151xbf16, #tpu.memory_space<vmem>>, vector<1x192x151xbf16>
    %25 = vector.shape_cast %24 : vector<1x192x151xbf16> to vector<192x151xbf16>
    %c0_19 = arith.constant 0 : index
    %c0_20 = arith.constant 0 : index
    %c0_21 = arith.constant 0 : index
    %26 = vector.load %arg2[%c0_19, %c0_20, %c0_21] : memref<3x64x192xbf16, #tpu.memory_space<vmem>>, vector<1x64x192xbf16>
    %27 = vector.shape_cast %26 : vector<1x64x192xbf16> to vector<64x192xbf16>
    %28 = vector.extract_strided_slice %25 {offsets = [0, 0], sizes = [192, 149], strides = [1, 1]} : vector<192x151xbf16> to vector<192x149xbf16>
    %cst_22 = arith.constant dense<0.000000e+00> : vector<64x149xf32>
    %29 = tpu.matmul %27, %28, %cst_22 {dimension_numbers = #tpu.dot_dimension_numbers<[1], [0], [0], [1], [0, 0, 1, 1], [], []>} : vector<64x192xbf16>, vector<192x149xbf16>, vector<64x149xf32> -> vector<64x149xf32>
    %c1_23 = arith.constant 1 : index
    %c0_24 = arith.constant 0 : index
    %c0_25 = arith.constant 0 : index
    %30 = vector.load %arg2[%c1_23, %c0_24, %c0_25] : memref<3x64x192xbf16, #tpu.memory_space<vmem>>, vector<1x64x192xbf16>
    %31 = vector.shape_cast %30 : vector<1x64x192xbf16> to vector<64x192xbf16>
    %32 = vector.extract_strided_slice %25 {offsets = [0, 1], sizes = [192, 149], strides = [1, 1]} : vector<192x151xbf16> to vector<192x149xbf16>
    %cst_26 = arith.constant dense<0.000000e+00> : vector<64x149xf32>
    %33 = tpu.matmul %31, %32, %cst_26 {dimension_numbers = #tpu.dot_dimension_numbers<[1], [0], [0], [1], [0, 0, 1, 1], [], []>} : vector<64x192xbf16>, vector<192x149xbf16>, vector<64x149xf32> -> vector<64x149xf32>
    %34 = arith.addf %29, %33 : vector<64x149xf32>
    %c2_27 = arith.constant 2 : index
    %c0_28 = arith.constant 0 : index
    %c0_29 = arith.constant 0 : index
    %35 = vector.load %arg2[%c2_27, %c0_28, %c0_29] : memref<3x64x192xbf16, #tpu.memory_space<vmem>>, vector<1x64x192xbf16>
    %36 = vector.shape_cast %35 : vector<1x64x192xbf16> to vector<64x192xbf16>
    %37 = vector.extract_strided_slice %25 {offsets = [0, 2], sizes = [192, 149], strides = [1, 1]} : vector<192x151xbf16> to vector<192x149xbf16>
    %cst_30 = arith.constant dense<0.000000e+00> : vector<64x149xf32>
    %38 = tpu.matmul %36, %37, %cst_30 {dimension_numbers = #tpu.dot_dimension_numbers<[1], [0], [0], [1], [0, 0, 1, 1], [], []>} : vector<64x192xbf16>, vector<192x149xbf16>, vector<64x149xf32> -> vector<64x149xf32>
    %39 = arith.addf %34, %38 : vector<64x149xf32>
    %40 = vector.broadcast %0 : vector<64x1xf32> to vector<64x149xf32>
    %41 = arith.addf %39, %40 : vector<64x149xf32>
    %cst_31 = arith.constant 0.000000e+00 : f32
    %42 = vector.broadcast %cst_31 : f32 to vector<64x149xf32>
    %43 = arith.maximumf %41, %42 : vector<64x149xf32>
    %c1_32 = arith.constant 1 : index
    %c0_33 = arith.constant 0 : index
    %c0_34 = arith.constant 0 : index
    %44 = vector.load %arg6[%c1_32, %c0_33, %c0_34] : memref<2x64x149xf32, #tpu.memory_space<vmem>>, vector<1x64x149xf32>
    %45 = vector.shape_cast %44 : vector<1x64x149xf32> to vector<64x149xf32>
    %46 = vector.shape_cast %43 : vector<64x149xf32> to vector<1x64x149xf32>
    tpu.vector_store %arg6[%c1_32, %c0_33, %c0_34], %46 {strides = array<i32>} : memref<2x64x149xf32, #tpu.memory_space<vmem>>, vector<1x64x149xf32>,
    %c0_i32 = arith.constant 0 : i32
    %c67_i32 = arith.constant 67 : i32
    %47 = arith.addi %c0_i32, %c67_i32 : i32
    %c1_i32 = arith.constant 1 : i32
    scf.for %arg8 = %c0_i32 to %47 step %c1_i32  : i32 {
      %c3_i32 = arith.constant 3 : i32
      %48 = arith.muli %c3_i32, %arg8 : i32
      %c0_36 = arith.constant 0 : index
      %c0_37 = arith.constant 0 : index
      %c0_38 = arith.constant 0 : index
      %49 = vector.load %arg6[%c0_36, %c0_37, %c0_38] : memref<2x64x149xf32, #tpu.memory_space<vmem>>, vector<1x64x149xf32>
      %50 = vector.shape_cast %49 : vector<1x64x149xf32> to vector<64x149xf32>
      %c1_39 = arith.constant 1 : index
      %c0_40 = arith.constant 0 : index
      %c0_41 = arith.constant 0 : index
      %51 = vector.load %arg6[%c1_39, %c0_40, %c0_41] : memref<2x64x149xf32, #tpu.memory_space<vmem>>, vector<1x64x149xf32>
      %52 = vector.shape_cast %51 : vector<1x64x149xf32> to vector<64x149xf32>
      %53 = arith.addf %50, %52 : vector<64x149xf32>
      %c0_42 = arith.constant 0 : index
      %c0_43 = arith.constant 0 : index
      %54 = vector.load %arg7[%c0_42, %c0_43] : memref<64x149xf32, #tpu.memory_space<vmem>>, vector<64x149xf32>
      tpu.vector_store %arg7[%c0_42, %c0_43], %53 {strides = array<i32>} : memref<64x149xf32, #tpu.memory_space<vmem>>, vector<64x149xf32>,
      %c0_44 = arith.constant 0 : index
      %c0_45 = arith.constant 0 : index
      %55 = vector.load %arg7[%c0_44, %c0_45] : memref<64x149xf32, #tpu.memory_space<vmem>>, vector<64x149xf32>
      %c2_i32 = arith.constant 2 : i32
      %56 = arith.addi %48, %c2_i32 : i32
      %c64_i32 = arith.constant 64 : i32
      %57 = arith.muli %56, %c64_i32 : i32
      %58 = tpu.assume_multiple %57, 64 : i32
      %c0_46 = arith.constant 0 : index
      %59 = arith.index_cast %58 : i32 to index
      %c0_47 = arith.constant 0 : index
      %60 = vector.load %arg1[%c0_46, %59, %c0_47] : memref<1x13120x151xbf16, #tpu.memory_space<vmem>>, vector<1x192x151xbf16>
      %61 = vector.shape_cast %60 : vector<1x192x151xbf16> to vector<192x151xbf16>
      %c0_48 = arith.constant 0 : index
      %c0_49 = arith.constant 0 : index
      %c0_50 = arith.constant 0 : index
      %62 = vector.load %arg2[%c0_48, %c0_49, %c0_50] : memref<3x64x192xbf16, #tpu.memory_space<vmem>>, vector<1x64x192xbf16>
      %63 = vector.shape_cast %62 : vector<1x64x192xbf16> to vector<64x192xbf16>
      %64 = vector.extract_strided_slice %61 {offsets = [0, 0], sizes = [192, 149], strides = [1, 1]} : vector<192x151xbf16> to vector<192x149xbf16>
      %cst_51 = arith.constant dense<0.000000e+00> : vector<64x149xf32>
      %65 = tpu.matmul %63, %64, %cst_51 {dimension_numbers = #tpu.dot_dimension_numbers<[1], [0], [0], [1], [0, 0, 1, 1], [], []>} : vector<64x192xbf16>, vector<192x149xbf16>, vector<64x149xf32> -> vector<64x149xf32>
      %c1_52 = arith.constant 1 : index
      %c0_53 = arith.constant 0 : index
      %c0_54 = arith.constant 0 : index
      %66 = vector.load %arg2[%c1_52, %c0_53, %c0_54] : memref<3x64x192xbf16, #tpu.memory_space<vmem>>, vector<1x64x192xbf16>
      %67 = vector.shape_cast %66 : vector<1x64x192xbf16> to vector<64x192xbf16>
      %68 = vector.extract_strided_slice %61 {offsets = [0, 1], sizes = [192, 149], strides = [1, 1]} : vector<192x151xbf16> to vector<192x149xbf16>
      %cst_55 = arith.constant dense<0.000000e+00> : vector<64x149xf32>
      %69 = tpu.matmul %67, %68, %cst_55 {dimension_numbers = #tpu.dot_dimension_numbers<[1], [0], [0], [1], [0, 0, 1, 1], [], []>} : vector<64x192xbf16>, vector<192x149xbf16>, vector<64x149xf32> -> vector<64x149xf32>
      %70 = arith.addf %65, %69 : vector<64x149xf32>
      %c2_56 = arith.constant 2 : index
      %c0_57 = arith.constant 0 : index
      %c0_58 = arith.constant 0 : index
      %71 = vector.load %arg2[%c2_56, %c0_57, %c0_58] : memref<3x64x192xbf16, #tpu.memory_space<vmem>>, vector<1x64x192xbf16>
      %72 = vector.shape_cast %71 : vector<1x64x192xbf16> to vector<64x192xbf16>
      %73 = vector.extract_strided_slice %61 {offsets = [0, 2], sizes = [192, 149], strides = [1, 1]} : vector<192x151xbf16> to vector<192x149xbf16>
      %cst_59 = arith.constant dense<0.000000e+00> : vector<64x149xf32>
      %74 = tpu.matmul %72, %73, %cst_59 {dimension_numbers = #tpu.dot_dimension_numbers<[1], [0], [0], [1], [0, 0, 1, 1], [], []>} : vector<64x192xbf16>, vector<192x149xbf16>, vector<64x149xf32> -> vector<64x149xf32>
      %75 = arith.addf %70, %74 : vector<64x149xf32>
      %76 = vector.broadcast %0 : vector<64x1xf32> to vector<64x149xf32>
      %77 = arith.addf %75, %76 : vector<64x149xf32>
      %cst_60 = arith.constant 0.000000e+00 : f32
      %78 = vector.broadcast %cst_60 : f32 to vector<64x149xf32>
      %79 = arith.maximumf %77, %78 : vector<64x149xf32>
      %80 = arith.addf %55, %79 : vector<64x149xf32>
      %c0_61 = arith.constant 0 : index
      %c0_62 = arith.constant 0 : index
      %81 = vector.load %arg7[%c0_61, %c0_62] : memref<64x149xf32, #tpu.memory_space<vmem>>, vector<64x149xf32>
      tpu.vector_store %arg7[%c0_61, %c0_62], %80 {strides = array<i32>} : memref<64x149xf32, #tpu.memory_space<vmem>>, vector<64x149xf32>,
      %c3_i32_63 = arith.constant 3 : i32
      %82 = arith.addi %48, %c3_i32_63 : i32
      %c64_i32_64 = arith.constant 64 : i32
      %83 = arith.muli %82, %c64_i32_64 : i32
      %84 = tpu.assume_multiple %83, 64 : i32
      %c0_65 = arith.constant 0 : index
      %85 = arith.index_cast %84 : i32 to index
      %c0_66 = arith.constant 0 : index
      %86 = vector.load %arg1[%c0_65, %85, %c0_66] : memref<1x13120x151xbf16, #tpu.memory_space<vmem>>, vector<1x192x151xbf16>
      %87 = vector.shape_cast %86 : vector<1x192x151xbf16> to vector<192x151xbf16>
      %c0_67 = arith.constant 0 : index
      %c0_68 = arith.constant 0 : index
      %c0_69 = arith.constant 0 : index
      %88 = vector.load %arg2[%c0_67, %c0_68, %c0_69] : memref<3x64x192xbf16, #tpu.memory_space<vmem>>, vector<1x64x192xbf16>
      %89 = vector.shape_cast %88 : vector<1x64x192xbf16> to vector<64x192xbf16>
      %90 = vector.extract_strided_slice %87 {offsets = [0, 0], sizes = [192, 149], strides = [1, 1]} : vector<192x151xbf16> to vector<192x149xbf16>
      %cst_70 = arith.constant dense<0.000000e+00> : vector<64x149xf32>
      %91 = tpu.matmul %89, %90, %cst_70 {dimension_numbers = #tpu.dot_dimension_numbers<[1], [0], [0], [1], [0, 0, 1, 1], [], []>} : vector<64x192xbf16>, vector<192x149xbf16>, vector<64x149xf32> -> vector<64x149xf32>
      %c1_71 = arith.constant 1 : index
      %c0_72 = arith.constant 0 : index
      %c0_73 = arith.constant 0 : index
      %92 = vector.load %arg2[%c1_71, %c0_72, %c0_73] : memref<3x64x192xbf16, #tpu.memory_space<vmem>>, vector<1x64x192xbf16>
      %93 = vector.shape_cast %92 : vector<1x64x192xbf16> to vector<64x192xbf16>
      %94 = vector.extract_strided_slice %87 {offsets = [0, 1], sizes = [192, 149], strides = [1, 1]} : vector<192x151xbf16> to vector<192x149xbf16>
      %cst_74 = arith.constant dense<0.000000e+00> : vector<64x149xf32>
      %95 = tpu.matmul %93, %94, %cst_74 {dimension_numbers = #tpu.dot_dimension_numbers<[1], [0], [0], [1], [0, 0, 1, 1], [], []>} : vector<64x192xbf16>, vector<192x149xbf16>, vector<64x149xf32> -> vector<64x149xf32>
      %96 = arith.addf %91, %95 : vector<64x149xf32>
      %c2_75 = arith.constant 2 : index
      %c0_76 = arith.constant 0 : index
      %c0_77 = arith.constant 0 : index
      %97 = vector.load %arg2[%c2_75, %c0_76, %c0_77] : memref<3x64x192xbf16, #tpu.memory_space<vmem>>, vector<1x64x192xbf16>
      %98 = vector.shape_cast %97 : vector<1x64x192xbf16> to vector<64x192xbf16>
      %99 = vector.extract_strided_slice %87 {offsets = [0, 2], sizes = [192, 149], strides = [1, 1]} : vector<192x151xbf16> to vector<192x149xbf16>
      %cst_78 = arith.constant dense<0.000000e+00> : vector<64x149xf32>
      %100 = tpu.matmul %98, %99, %cst_78 {dimension_numbers = #tpu.dot_dimension_numbers<[1], [0], [0], [1], [0, 0, 1, 1], [], []>} : vector<64x192xbf16>, vector<192x149xbf16>, vector<64x149xf32> -> vector<64x149xf32>
      %101 = arith.addf %96, %100 : vector<64x149xf32>
      %102 = vector.broadcast %0 : vector<64x1xf32> to vector<64x149xf32>
      %103 = arith.addf %101, %102 : vector<64x149xf32>
      %cst_79 = arith.constant 0.000000e+00 : f32
      %104 = vector.broadcast %cst_79 : f32 to vector<64x149xf32>
      %105 = arith.maximumf %103, %104 : vector<64x149xf32>
      %c0_80 = arith.constant 0 : index
      %c0_81 = arith.constant 0 : index
      %106 = vector.load %arg7[%c0_80, %c0_81] : memref<64x149xf32, #tpu.memory_space<vmem>>, vector<64x149xf32>
      %107 = arith.addf %106, %105 : vector<64x149xf32>
      %c0_82 = arith.constant 0 : index
      %c0_83 = arith.constant 0 : index
      %108 = vector.load %arg7[%c0_82, %c0_83] : memref<64x149xf32, #tpu.memory_space<vmem>>, vector<64x149xf32>
      tpu.vector_store %arg7[%c0_82, %c0_83], %107 {strides = array<i32>} : memref<64x149xf32, #tpu.memory_space<vmem>>, vector<64x149xf32>,
      %c0_84 = arith.constant 0 : index
      %c0_85 = arith.constant 0 : index
      %c0_86 = arith.constant 0 : index
      %109 = vector.load %arg6[%c0_84, %c0_85, %c0_86] : memref<2x64x149xf32, #tpu.memory_space<vmem>>, vector<1x64x149xf32>
      %110 = vector.shape_cast %109 : vector<1x64x149xf32> to vector<64x149xf32>
      %111 = vector.shape_cast %105 : vector<64x149xf32> to vector<1x64x149xf32>
      tpu.vector_store %arg6[%c0_84, %c0_85, %c0_86], %111 {strides = array<i32>} : memref<2x64x149xf32, #tpu.memory_space<vmem>>, vector<1x64x149xf32>,
      %c4_i32 = arith.constant 4 : i32
      %112 = arith.addi %48, %c4_i32 : i32
      %c64_i32_87 = arith.constant 64 : i32
      %113 = arith.muli %112, %c64_i32_87 : i32
      %114 = tpu.assume_multiple %113, 64 : i32
      %c0_88 = arith.constant 0 : index
      %115 = arith.index_cast %114 : i32 to index
      %c0_89 = arith.constant 0 : index
      %116 = vector.load %arg1[%c0_88, %115, %c0_89] : memref<1x13120x151xbf16, #tpu.memory_space<vmem>>, vector<1x192x151xbf16>
      %117 = vector.shape_cast %116 : vector<1x192x151xbf16> to vector<192x151xbf16>
      %c0_90 = arith.constant 0 : index
      %c0_91 = arith.constant 0 : index
      %c0_92 = arith.constant 0 : index
      %118 = vector.load %arg2[%c0_90, %c0_91, %c0_92] : memref<3x64x192xbf16, #tpu.memory_space<vmem>>, vector<1x64x192xbf16>
      %119 = vector.shape_cast %118 : vector<1x64x192xbf16> to vector<64x192xbf16>
      %120 = vector.extract_strided_slice %117 {offsets = [0, 0], sizes = [192, 149], strides = [1, 1]} : vector<192x151xbf16> to vector<192x149xbf16>
      %cst_93 = arith.constant dense<0.000000e+00> : vector<64x149xf32>
      %121 = tpu.matmul %119, %120, %cst_93 {dimension_numbers = #tpu.dot_dimension_numbers<[1], [0], [0], [1], [0, 0, 1, 1], [], []>} : vector<64x192xbf16>, vector<192x149xbf16>, vector<64x149xf32> -> vector<64x149xf32>
      %c1_94 = arith.constant 1 : index
      %c0_95 = arith.constant 0 : index
      %c0_96 = arith.constant 0 : index
      %122 = vector.load %arg2[%c1_94, %c0_95, %c0_96] : memref<3x64x192xbf16, #tpu.memory_space<vmem>>, vector<1x64x192xbf16>
      %123 = vector.shape_cast %122 : vector<1x64x192xbf16> to vector<64x192xbf16>
      %124 = vector.extract_strided_slice %117 {offsets = [0, 1], sizes = [192, 149], strides = [1, 1]} : vector<192x151xbf16> to vector<192x149xbf16>
      %cst_97 = arith.constant dense<0.000000e+00> : vector<64x149xf32>
      %125 = tpu.matmul %123, %124, %cst_97 {dimension_numbers = #tpu.dot_dimension_numbers<[1], [0], [0], [1], [0, 0, 1, 1], [], []>} : vector<64x192xbf16>, vector<192x149xbf16>, vector<64x149xf32> -> vector<64x149xf32>
      %126 = arith.addf %121, %125 : vector<64x149xf32>
      %c2_98 = arith.constant 2 : index
      %c0_99 = arith.constant 0 : index
      %c0_100 = arith.constant 0 : index
      %127 = vector.load %arg2[%c2_98, %c0_99, %c0_100] : memref<3x64x192xbf16, #tpu.memory_space<vmem>>, vector<1x64x192xbf16>
      %128 = vector.shape_cast %127 : vector<1x64x192xbf16> to vector<64x192xbf16>
      %129 = vector.extract_strided_slice %117 {offsets = [0, 2], sizes = [192, 149], strides = [1, 1]} : vector<192x151xbf16> to vector<192x149xbf16>
      %cst_101 = arith.constant dense<0.000000e+00> : vector<64x149xf32>
      %130 = tpu.matmul %128, %129, %cst_101 {dimension_numbers = #tpu.dot_dimension_numbers<[1], [0], [0], [1], [0, 0, 1, 1], [], []>} : vector<64x192xbf16>, vector<192x149xbf16>, vector<64x149xf32> -> vector<64x149xf32>
      %131 = arith.addf %126, %130 : vector<64x149xf32>
      %132 = vector.broadcast %0 : vector<64x1xf32> to vector<64x149xf32>
      %133 = arith.addf %131, %132 : vector<64x149xf32>
      %cst_102 = arith.constant 0.000000e+00 : f32
      %134 = vector.broadcast %cst_102 : f32 to vector<64x149xf32>
      %135 = arith.maximumf %133, %134 : vector<64x149xf32>
      %c0_103 = arith.constant 0 : index
      %c0_104 = arith.constant 0 : index
      %136 = vector.load %arg7[%c0_103, %c0_104] : memref<64x149xf32, #tpu.memory_space<vmem>>, vector<64x149xf32>
      %137 = arith.addf %136, %135 : vector<64x149xf32>
      %c0_105 = arith.constant 0 : index
      %c0_106 = arith.constant 0 : index
      %138 = vector.load %arg7[%c0_105, %c0_106] : memref<64x149xf32, #tpu.memory_space<vmem>>, vector<64x149xf32>
      tpu.vector_store %arg7[%c0_105, %c0_106], %137 {strides = array<i32>} : memref<64x149xf32, #tpu.memory_space<vmem>>, vector<64x149xf32>,
      %c1_107 = arith.constant 1 : index
      %c0_108 = arith.constant 0 : index
      %c0_109 = arith.constant 0 : index
      %139 = vector.load %arg6[%c1_107, %c0_108, %c0_109] : memref<2x64x149xf32, #tpu.memory_space<vmem>>, vector<1x64x149xf32>
      %140 = vector.shape_cast %139 : vector<1x64x149xf32> to vector<64x149xf32>
      %141 = vector.shape_cast %135 : vector<64x149xf32> to vector<1x64x149xf32>
      tpu.vector_store %arg6[%c1_107, %c0_108, %c0_109], %141 {strides = array<i32>} : memref<2x64x149xf32, #tpu.memory_space<vmem>>, vector<1x64x149xf32>,
      %c0_110 = arith.constant 0 : index
      %c0_111 = arith.constant 0 : index
      %142 = vector.load %arg7[%c0_110, %c0_111] : memref<64x149xf32, #tpu.memory_space<vmem>>, vector<64x149xf32>
      %143 = arith.truncf %142 : vector<64x149xf32> to vector<64x149xbf16>
      %c0_112 = arith.constant 0 : index
      %c0_113 = arith.constant 0 : index
      %144 = vector.load %arg4[%c0_112, %c0_113] : memref<149x49xbf16, #tpu.memory_space<vmem>>, vector<149x49xbf16>
      %cst_114 = arith.constant dense<0.000000e+00> : vector<64x49xf32>
      %145 = tpu.matmul %143, %144, %cst_114 {dimension_numbers = #tpu.dot_dimension_numbers<[1], [0], [0], [1], [0, 0, 1, 1], [], []>} : vector<64x149xbf16>, vector<149x49xbf16>, vector<64x49xf32> -> vector<64x49xf32>
      %cst_115 = arith.constant 4.000000e-02 : f32
      %146 = vector.broadcast %cst_115 : f32 to vector<64x49xf32>
      %147 = arith.mulf %145, %146 : vector<64x49xf32>
      %148 = arith.truncf %147 : vector<64x49xf32> to vector<64x49xbf16>
      %c0_116 = arith.constant 0 : index
      %149 = arith.index_cast %arg8 : i32 to index
      %c0_117 = arith.constant 0 : index
      %c0_118 = arith.constant 0 : index
      %150 = vector.load %arg5[%c0_116, %149, %c0_117, %c0_118] : memref<1x67x64x49xbf16, #tpu.memory_space<vmem>>, vector<1x1x64x49xbf16>
      %151 = vector.shape_cast %150 : vector<1x1x64x49xbf16> to vector<64x49xbf16>
      %152 = vector.shape_cast %148 : vector<64x49xbf16> to vector<1x1x64x49xbf16>
      tpu.vector_store %arg5[%c0_116, %149, %c0_117, %c0_118], %152 {strides = array<i32>} : memref<1x67x64x49xbf16, #tpu.memory_space<vmem>>, vector<1x1x64x49xbf16>,
    }
    %c67_i32_35 = arith.constant 67 : i32
    return
  }
  func.func @transform_0(%arg0: i32) -> (i32, i32, i32) {
    %c0_i32 = arith.constant 0 : i32
    %c0_i32_0 = arith.constant 0 : i32
    %c0_i32_1 = arith.constant 0 : i32
    return %arg0, %c0_i32, %c0_i32_0 : i32, i32, i32
  }
  func.func @transform_1(%arg0: i32) -> (i32, i32, i32) {
    %c0_i32 = arith.constant 0 : i32
    %c0_i32_0 = arith.constant 0 : i32
    %c0_i32_1 = arith.constant 0 : i32
    %c0_i32_2 = arith.constant 0 : i32
    return %c0_i32, %c0_i32_0, %c0_i32_1 : i32, i32, i32
  }
  func.func @transform_2(%arg0: i32) -> (i32, i32) {
    %c0_i32 = arith.constant 0 : i32
    %c0_i32_0 = arith.constant 0 : i32
    %c0_i32_1 = arith.constant 0 : i32
    return %c0_i32, %c0_i32_0 : i32, i32
  }
  func.func @transform_3(%arg0: i32) -> (i32, i32) {
    %c0_i32 = arith.constant 0 : i32
    %c0_i32_0 = arith.constant 0 : i32
    %c0_i32_1 = arith.constant 0 : i32
    return %c0_i32, %c0_i32_0 : i32, i32
  }
  func.func @transform_4(%arg0: i32) -> (i32, i32, i32, i32) {
    %c0_i32 = arith.constant 0 : i32
    %c0_i32_0 = arith.constant 0 : i32
    %c0_i32_1 = arith.constant 0 : i32
    %c0_i32_2 = arith.constant 0 : i32
    return %arg0, %c0_i32, %c0_i32_0, %c0_i32_1 : i32, i32, i32, i32
  }
}

module attributes {stable_mosaic.version = 11 : i64} {
  func.func @_cnn_block_kernel(%arg0: i32, %arg1: memref<1x4288x49xbf16, #tpu.memory_space<vmem>>, %arg2: memref<3x64x192xbf16, #tpu.memory_space<vmem>>, %arg3: memref<64x1xf32, #tpu.memory_space<vmem>>, %arg4: memref<47x15xbf16, #tpu.memory_space<vmem>>, %arg5: memref<1x21x64x15xbf16, #tpu.memory_space<vmem>>, %arg6: memref<2x64x47xf32, #tpu.memory_space<vmem>>, %arg7: memref<64x47xf32, #tpu.memory_space<vmem>>) attributes {dimension_semantics = [#tpu.dimension_semantics<parallel>], iteration_bounds = array<i64: 2>, scalar_prefetch = 0 : i64, scratch_operands = 2 : i64, tpu.core_type = #tpu.core_type<tc>, window_params = [{transform_indices = @transform_0, window_bounds = array<i64: 1, 4288, 49>}, {pipeline_mode = #tpu.pipeline_mode<synchronous>, transform_indices = @transform_1, window_bounds = array<i64: 3, 64, 192>}, {pipeline_mode = #tpu.pipeline_mode<synchronous>, transform_indices = @transform_2, window_bounds = array<i64: 64, 1>}, {pipeline_mode = #tpu.pipeline_mode<synchronous>, transform_indices = @transform_3, window_bounds = array<i64: 47, 15>}, {transform_indices = @transform_4, window_bounds = array<i64: 1, 21, 64, 15>}]} {
    %c0 = arith.constant 0 : index
    %c0_0 = arith.constant 0 : index
    %0 = vector.load %arg3[%c0, %c0_0] : memref<64x1xf32, #tpu.memory_space<vmem>>, vector<64x1xf32>
    %c0_1 = arith.constant 0 : index
    %c0_2 = arith.constant 0 : index
    %c0_3 = arith.constant 0 : index
    %1 = vector.load %arg1[%c0_1, %c0_2, %c0_3] : memref<1x4288x49xbf16, #tpu.memory_space<vmem>>, vector<1x192x49xbf16>
    %2 = vector.shape_cast %1 : vector<1x192x49xbf16> to vector<192x49xbf16>
    %c0_4 = arith.constant 0 : index
    %c0_5 = arith.constant 0 : index
    %c0_6 = arith.constant 0 : index
    %3 = vector.load %arg2[%c0_4, %c0_5, %c0_6] : memref<3x64x192xbf16, #tpu.memory_space<vmem>>, vector<1x64x192xbf16>
    %4 = vector.shape_cast %3 : vector<1x64x192xbf16> to vector<64x192xbf16>
    %5 = vector.extract_strided_slice %2 {offsets = [0, 0], sizes = [192, 47], strides = [1, 1]} : vector<192x49xbf16> to vector<192x47xbf16>
    %cst = arith.constant dense<0.000000e+00> : vector<64x47xf32>
    %6 = tpu.matmul %4, %5, %cst {dimension_numbers = #tpu.dot_dimension_numbers<[1], [0], [0], [1], [0, 0, 1, 1], [], []>} : vector<64x192xbf16>, vector<192x47xbf16>, vector<64x47xf32> -> vector<64x47xf32>
    %c1 = arith.constant 1 : index
    %c0_7 = arith.constant 0 : index
    %c0_8 = arith.constant 0 : index
    %7 = vector.load %arg2[%c1, %c0_7, %c0_8] : memref<3x64x192xbf16, #tpu.memory_space<vmem>>, vector<1x64x192xbf16>
    %8 = vector.shape_cast %7 : vector<1x64x192xbf16> to vector<64x192xbf16>
    %9 = vector.extract_strided_slice %2 {offsets = [0, 1], sizes = [192, 47], strides = [1, 1]} : vector<192x49xbf16> to vector<192x47xbf16>
    %cst_9 = arith.constant dense<0.000000e+00> : vector<64x47xf32>
    %10 = tpu.matmul %8, %9, %cst_9 {dimension_numbers = #tpu.dot_dimension_numbers<[1], [0], [0], [1], [0, 0, 1, 1], [], []>} : vector<64x192xbf16>, vector<192x47xbf16>, vector<64x47xf32> -> vector<64x47xf32>
    %11 = arith.addf %6, %10 : vector<64x47xf32>
    %c2 = arith.constant 2 : index
    %c0_10 = arith.constant 0 : index
    %c0_11 = arith.constant 0 : index
    %12 = vector.load %arg2[%c2, %c0_10, %c0_11] : memref<3x64x192xbf16, #tpu.memory_space<vmem>>, vector<1x64x192xbf16>
    %13 = vector.shape_cast %12 : vector<1x64x192xbf16> to vector<64x192xbf16>
    %14 = vector.extract_strided_slice %2 {offsets = [0, 2], sizes = [192, 47], strides = [1, 1]} : vector<192x49xbf16> to vector<192x47xbf16>
    %cst_12 = arith.constant dense<0.000000e+00> : vector<64x47xf32>
    %15 = tpu.matmul %13, %14, %cst_12 {dimension_numbers = #tpu.dot_dimension_numbers<[1], [0], [0], [1], [0, 0, 1, 1], [], []>} : vector<64x192xbf16>, vector<192x47xbf16>, vector<64x47xf32> -> vector<64x47xf32>
    %16 = arith.addf %11, %15 : vector<64x47xf32>
    %17 = vector.broadcast %0 : vector<64x1xf32> to vector<64x47xf32>
    %18 = arith.addf %16, %17 : vector<64x47xf32>
    %cst_13 = arith.constant 0.000000e+00 : f32
    %19 = vector.broadcast %cst_13 : f32 to vector<64x47xf32>
    %20 = arith.maximumf %18, %19 : vector<64x47xf32>
    %c0_14 = arith.constant 0 : index
    %c0_15 = arith.constant 0 : index
    %c0_16 = arith.constant 0 : index
    %21 = vector.load %arg6[%c0_14, %c0_15, %c0_16] : memref<2x64x47xf32, #tpu.memory_space<vmem>>, vector<1x64x47xf32>
    %22 = vector.shape_cast %21 : vector<1x64x47xf32> to vector<64x47xf32>
    %23 = vector.shape_cast %20 : vector<64x47xf32> to vector<1x64x47xf32>
    tpu.vector_store %arg6[%c0_14, %c0_15, %c0_16], %23 {strides = array<i32>} : memref<2x64x47xf32, #tpu.memory_space<vmem>>, vector<1x64x47xf32>,
    %c0_17 = arith.constant 0 : index
    %c64 = arith.constant 64 : index
    %c0_18 = arith.constant 0 : index
    %24 = vector.load %arg1[%c0_17, %c64, %c0_18] : memref<1x4288x49xbf16, #tpu.memory_space<vmem>>, vector<1x192x49xbf16>
    %25 = vector.shape_cast %24 : vector<1x192x49xbf16> to vector<192x49xbf16>
    %c0_19 = arith.constant 0 : index
    %c0_20 = arith.constant 0 : index
    %c0_21 = arith.constant 0 : index
    %26 = vector.load %arg2[%c0_19, %c0_20, %c0_21] : memref<3x64x192xbf16, #tpu.memory_space<vmem>>, vector<1x64x192xbf16>
    %27 = vector.shape_cast %26 : vector<1x64x192xbf16> to vector<64x192xbf16>
    %28 = vector.extract_strided_slice %25 {offsets = [0, 0], sizes = [192, 47], strides = [1, 1]} : vector<192x49xbf16> to vector<192x47xbf16>
    %cst_22 = arith.constant dense<0.000000e+00> : vector<64x47xf32>
    %29 = tpu.matmul %27, %28, %cst_22 {dimension_numbers = #tpu.dot_dimension_numbers<[1], [0], [0], [1], [0, 0, 1, 1], [], []>} : vector<64x192xbf16>, vector<192x47xbf16>, vector<64x47xf32> -> vector<64x47xf32>
    %c1_23 = arith.constant 1 : index
    %c0_24 = arith.constant 0 : index
    %c0_25 = arith.constant 0 : index
    %30 = vector.load %arg2[%c1_23, %c0_24, %c0_25] : memref<3x64x192xbf16, #tpu.memory_space<vmem>>, vector<1x64x192xbf16>
    %31 = vector.shape_cast %30 : vector<1x64x192xbf16> to vector<64x192xbf16>
    %32 = vector.extract_strided_slice %25 {offsets = [0, 1], sizes = [192, 47], strides = [1, 1]} : vector<192x49xbf16> to vector<192x47xbf16>
    %cst_26 = arith.constant dense<0.000000e+00> : vector<64x47xf32>
    %33 = tpu.matmul %31, %32, %cst_26 {dimension_numbers = #tpu.dot_dimension_numbers<[1], [0], [0], [1], [0, 0, 1, 1], [], []>} : vector<64x192xbf16>, vector<192x47xbf16>, vector<64x47xf32> -> vector<64x47xf32>
    %34 = arith.addf %29, %33 : vector<64x47xf32>
    %c2_27 = arith.constant 2 : index
    %c0_28 = arith.constant 0 : index
    %c0_29 = arith.constant 0 : index
    %35 = vector.load %arg2[%c2_27, %c0_28, %c0_29] : memref<3x64x192xbf16, #tpu.memory_space<vmem>>, vector<1x64x192xbf16>
    %36 = vector.shape_cast %35 : vector<1x64x192xbf16> to vector<64x192xbf16>
    %37 = vector.extract_strided_slice %25 {offsets = [0, 2], sizes = [192, 47], strides = [1, 1]} : vector<192x49xbf16> to vector<192x47xbf16>
    %cst_30 = arith.constant dense<0.000000e+00> : vector<64x47xf32>
    %38 = tpu.matmul %36, %37, %cst_30 {dimension_numbers = #tpu.dot_dimension_numbers<[1], [0], [0], [1], [0, 0, 1, 1], [], []>} : vector<64x192xbf16>, vector<192x47xbf16>, vector<64x47xf32> -> vector<64x47xf32>
    %39 = arith.addf %34, %38 : vector<64x47xf32>
    %40 = vector.broadcast %0 : vector<64x1xf32> to vector<64x47xf32>
    %41 = arith.addf %39, %40 : vector<64x47xf32>
    %cst_31 = arith.constant 0.000000e+00 : f32
    %42 = vector.broadcast %cst_31 : f32 to vector<64x47xf32>
    %43 = arith.maximumf %41, %42 : vector<64x47xf32>
    %c1_32 = arith.constant 1 : index
    %c0_33 = arith.constant 0 : index
    %c0_34 = arith.constant 0 : index
    %44 = vector.load %arg6[%c1_32, %c0_33, %c0_34] : memref<2x64x47xf32, #tpu.memory_space<vmem>>, vector<1x64x47xf32>
    %45 = vector.shape_cast %44 : vector<1x64x47xf32> to vector<64x47xf32>
    %46 = vector.shape_cast %43 : vector<64x47xf32> to vector<1x64x47xf32>
    tpu.vector_store %arg6[%c1_32, %c0_33, %c0_34], %46 {strides = array<i32>} : memref<2x64x47xf32, #tpu.memory_space<vmem>>, vector<1x64x47xf32>,
    %c0_i32 = arith.constant 0 : i32
    %c21_i32 = arith.constant 21 : i32
    %47 = arith.addi %c0_i32, %c21_i32 : i32
    %c1_i32 = arith.constant 1 : i32
    scf.for %arg8 = %c0_i32 to %47 step %c1_i32  : i32 {
      %c3_i32 = arith.constant 3 : i32
      %48 = arith.muli %c3_i32, %arg8 : i32
      %c0_36 = arith.constant 0 : index
      %c0_37 = arith.constant 0 : index
      %c0_38 = arith.constant 0 : index
      %49 = vector.load %arg6[%c0_36, %c0_37, %c0_38] : memref<2x64x47xf32, #tpu.memory_space<vmem>>, vector<1x64x47xf32>
      %50 = vector.shape_cast %49 : vector<1x64x47xf32> to vector<64x47xf32>
      %c1_39 = arith.constant 1 : index
      %c0_40 = arith.constant 0 : index
      %c0_41 = arith.constant 0 : index
      %51 = vector.load %arg6[%c1_39, %c0_40, %c0_41] : memref<2x64x47xf32, #tpu.memory_space<vmem>>, vector<1x64x47xf32>
      %52 = vector.shape_cast %51 : vector<1x64x47xf32> to vector<64x47xf32>
      %53 = arith.addf %50, %52 : vector<64x47xf32>
      %c0_42 = arith.constant 0 : index
      %c0_43 = arith.constant 0 : index
      %54 = vector.load %arg7[%c0_42, %c0_43] : memref<64x47xf32, #tpu.memory_space<vmem>>, vector<64x47xf32>
      tpu.vector_store %arg7[%c0_42, %c0_43], %53 {strides = array<i32>} : memref<64x47xf32, #tpu.memory_space<vmem>>, vector<64x47xf32>,
      %c0_44 = arith.constant 0 : index
      %c0_45 = arith.constant 0 : index
      %55 = vector.load %arg7[%c0_44, %c0_45] : memref<64x47xf32, #tpu.memory_space<vmem>>, vector<64x47xf32>
      %c2_i32 = arith.constant 2 : i32
      %56 = arith.addi %48, %c2_i32 : i32
      %c64_i32 = arith.constant 64 : i32
      %57 = arith.muli %56, %c64_i32 : i32
      %58 = tpu.assume_multiple %57, 64 : i32
      %c0_46 = arith.constant 0 : index
      %59 = arith.index_cast %58 : i32 to index
      %c0_47 = arith.constant 0 : index
      %60 = vector.load %arg1[%c0_46, %59, %c0_47] : memref<1x4288x49xbf16, #tpu.memory_space<vmem>>, vector<1x192x49xbf16>
      %61 = vector.shape_cast %60 : vector<1x192x49xbf16> to vector<192x49xbf16>
      %c0_48 = arith.constant 0 : index
      %c0_49 = arith.constant 0 : index
      %c0_50 = arith.constant 0 : index
      %62 = vector.load %arg2[%c0_48, %c0_49, %c0_50] : memref<3x64x192xbf16, #tpu.memory_space<vmem>>, vector<1x64x192xbf16>
      %63 = vector.shape_cast %62 : vector<1x64x192xbf16> to vector<64x192xbf16>
      %64 = vector.extract_strided_slice %61 {offsets = [0, 0], sizes = [192, 47], strides = [1, 1]} : vector<192x49xbf16> to vector<192x47xbf16>
      %cst_51 = arith.constant dense<0.000000e+00> : vector<64x47xf32>
      %65 = tpu.matmul %63, %64, %cst_51 {dimension_numbers = #tpu.dot_dimension_numbers<[1], [0], [0], [1], [0, 0, 1, 1], [], []>} : vector<64x192xbf16>, vector<192x47xbf16>, vector<64x47xf32> -> vector<64x47xf32>
      %c1_52 = arith.constant 1 : index
      %c0_53 = arith.constant 0 : index
      %c0_54 = arith.constant 0 : index
      %66 = vector.load %arg2[%c1_52, %c0_53, %c0_54] : memref<3x64x192xbf16, #tpu.memory_space<vmem>>, vector<1x64x192xbf16>
      %67 = vector.shape_cast %66 : vector<1x64x192xbf16> to vector<64x192xbf16>
      %68 = vector.extract_strided_slice %61 {offsets = [0, 1], sizes = [192, 47], strides = [1, 1]} : vector<192x49xbf16> to vector<192x47xbf16>
      %cst_55 = arith.constant dense<0.000000e+00> : vector<64x47xf32>
      %69 = tpu.matmul %67, %68, %cst_55 {dimension_numbers = #tpu.dot_dimension_numbers<[1], [0], [0], [1], [0, 0, 1, 1], [], []>} : vector<64x192xbf16>, vector<192x47xbf16>, vector<64x47xf32> -> vector<64x47xf32>
      %70 = arith.addf %65, %69 : vector<64x47xf32>
      %c2_56 = arith.constant 2 : index
      %c0_57 = arith.constant 0 : index
      %c0_58 = arith.constant 0 : index
      %71 = vector.load %arg2[%c2_56, %c0_57, %c0_58] : memref<3x64x192xbf16, #tpu.memory_space<vmem>>, vector<1x64x192xbf16>
      %72 = vector.shape_cast %71 : vector<1x64x192xbf16> to vector<64x192xbf16>
      %73 = vector.extract_strided_slice %61 {offsets = [0, 2], sizes = [192, 47], strides = [1, 1]} : vector<192x49xbf16> to vector<192x47xbf16>
      %cst_59 = arith.constant dense<0.000000e+00> : vector<64x47xf32>
      %74 = tpu.matmul %72, %73, %cst_59 {dimension_numbers = #tpu.dot_dimension_numbers<[1], [0], [0], [1], [0, 0, 1, 1], [], []>} : vector<64x192xbf16>, vector<192x47xbf16>, vector<64x47xf32> -> vector<64x47xf32>
      %75 = arith.addf %70, %74 : vector<64x47xf32>
      %76 = vector.broadcast %0 : vector<64x1xf32> to vector<64x47xf32>
      %77 = arith.addf %75, %76 : vector<64x47xf32>
      %cst_60 = arith.constant 0.000000e+00 : f32
      %78 = vector.broadcast %cst_60 : f32 to vector<64x47xf32>
      %79 = arith.maximumf %77, %78 : vector<64x47xf32>
      %80 = arith.addf %55, %79 : vector<64x47xf32>
      %c0_61 = arith.constant 0 : index
      %c0_62 = arith.constant 0 : index
      %81 = vector.load %arg7[%c0_61, %c0_62] : memref<64x47xf32, #tpu.memory_space<vmem>>, vector<64x47xf32>
      tpu.vector_store %arg7[%c0_61, %c0_62], %80 {strides = array<i32>} : memref<64x47xf32, #tpu.memory_space<vmem>>, vector<64x47xf32>,
      %c3_i32_63 = arith.constant 3 : i32
      %82 = arith.addi %48, %c3_i32_63 : i32
      %c64_i32_64 = arith.constant 64 : i32
      %83 = arith.muli %82, %c64_i32_64 : i32
      %84 = tpu.assume_multiple %83, 64 : i32
      %c0_65 = arith.constant 0 : index
      %85 = arith.index_cast %84 : i32 to index
      %c0_66 = arith.constant 0 : index
      %86 = vector.load %arg1[%c0_65, %85, %c0_66] : memref<1x4288x49xbf16, #tpu.memory_space<vmem>>, vector<1x192x49xbf16>
      %87 = vector.shape_cast %86 : vector<1x192x49xbf16> to vector<192x49xbf16>
      %c0_67 = arith.constant 0 : index
      %c0_68 = arith.constant 0 : index
      %c0_69 = arith.constant 0 : index
      %88 = vector.load %arg2[%c0_67, %c0_68, %c0_69] : memref<3x64x192xbf16, #tpu.memory_space<vmem>>, vector<1x64x192xbf16>
      %89 = vector.shape_cast %88 : vector<1x64x192xbf16> to vector<64x192xbf16>
      %90 = vector.extract_strided_slice %87 {offsets = [0, 0], sizes = [192, 47], strides = [1, 1]} : vector<192x49xbf16> to vector<192x47xbf16>
      %cst_70 = arith.constant dense<0.000000e+00> : vector<64x47xf32>
      %91 = tpu.matmul %89, %90, %cst_70 {dimension_numbers = #tpu.dot_dimension_numbers<[1], [0], [0], [1], [0, 0, 1, 1], [], []>} : vector<64x192xbf16>, vector<192x47xbf16>, vector<64x47xf32> -> vector<64x47xf32>
      %c1_71 = arith.constant 1 : index
      %c0_72 = arith.constant 0 : index
      %c0_73 = arith.constant 0 : index
      %92 = vector.load %arg2[%c1_71, %c0_72, %c0_73] : memref<3x64x192xbf16, #tpu.memory_space<vmem>>, vector<1x64x192xbf16>
      %93 = vector.shape_cast %92 : vector<1x64x192xbf16> to vector<64x192xbf16>
      %94 = vector.extract_strided_slice %87 {offsets = [0, 1], sizes = [192, 47], strides = [1, 1]} : vector<192x49xbf16> to vector<192x47xbf16>
      %cst_74 = arith.constant dense<0.000000e+00> : vector<64x47xf32>
      %95 = tpu.matmul %93, %94, %cst_74 {dimension_numbers = #tpu.dot_dimension_numbers<[1], [0], [0], [1], [0, 0, 1, 1], [], []>} : vector<64x192xbf16>, vector<192x47xbf16>, vector<64x47xf32> -> vector<64x47xf32>
      %96 = arith.addf %91, %95 : vector<64x47xf32>
      %c2_75 = arith.constant 2 : index
      %c0_76 = arith.constant 0 : index
      %c0_77 = arith.constant 0 : index
      %97 = vector.load %arg2[%c2_75, %c0_76, %c0_77] : memref<3x64x192xbf16, #tpu.memory_space<vmem>>, vector<1x64x192xbf16>
      %98 = vector.shape_cast %97 : vector<1x64x192xbf16> to vector<64x192xbf16>
      %99 = vector.extract_strided_slice %87 {offsets = [0, 2], sizes = [192, 47], strides = [1, 1]} : vector<192x49xbf16> to vector<192x47xbf16>
      %cst_78 = arith.constant dense<0.000000e+00> : vector<64x47xf32>
      %100 = tpu.matmul %98, %99, %cst_78 {dimension_numbers = #tpu.dot_dimension_numbers<[1], [0], [0], [1], [0, 0, 1, 1], [], []>} : vector<64x192xbf16>, vector<192x47xbf16>, vector<64x47xf32> -> vector<64x47xf32>
      %101 = arith.addf %96, %100 : vector<64x47xf32>
      %102 = vector.broadcast %0 : vector<64x1xf32> to vector<64x47xf32>
      %103 = arith.addf %101, %102 : vector<64x47xf32>
      %cst_79 = arith.constant 0.000000e+00 : f32
      %104 = vector.broadcast %cst_79 : f32 to vector<64x47xf32>
      %105 = arith.maximumf %103, %104 : vector<64x47xf32>
      %c0_80 = arith.constant 0 : index
      %c0_81 = arith.constant 0 : index
      %106 = vector.load %arg7[%c0_80, %c0_81] : memref<64x47xf32, #tpu.memory_space<vmem>>, vector<64x47xf32>
      %107 = arith.addf %106, %105 : vector<64x47xf32>
      %c0_82 = arith.constant 0 : index
      %c0_83 = arith.constant 0 : index
      %108 = vector.load %arg7[%c0_82, %c0_83] : memref<64x47xf32, #tpu.memory_space<vmem>>, vector<64x47xf32>
      tpu.vector_store %arg7[%c0_82, %c0_83], %107 {strides = array<i32>} : memref<64x47xf32, #tpu.memory_space<vmem>>, vector<64x47xf32>,
      %c0_84 = arith.constant 0 : index
      %c0_85 = arith.constant 0 : index
      %c0_86 = arith.constant 0 : index
      %109 = vector.load %arg6[%c0_84, %c0_85, %c0_86] : memref<2x64x47xf32, #tpu.memory_space<vmem>>, vector<1x64x47xf32>
      %110 = vector.shape_cast %109 : vector<1x64x47xf32> to vector<64x47xf32>
      %111 = vector.shape_cast %105 : vector<64x47xf32> to vector<1x64x47xf32>
      tpu.vector_store %arg6[%c0_84, %c0_85, %c0_86], %111 {strides = array<i32>} : memref<2x64x47xf32, #tpu.memory_space<vmem>>, vector<1x64x47xf32>,
      %c4_i32 = arith.constant 4 : i32
      %112 = arith.addi %48, %c4_i32 : i32
      %c64_i32_87 = arith.constant 64 : i32
      %113 = arith.muli %112, %c64_i32_87 : i32
      %114 = tpu.assume_multiple %113, 64 : i32
      %c0_88 = arith.constant 0 : index
      %115 = arith.index_cast %114 : i32 to index
      %c0_89 = arith.constant 0 : index
      %116 = vector.load %arg1[%c0_88, %115, %c0_89] : memref<1x4288x49xbf16, #tpu.memory_space<vmem>>, vector<1x192x49xbf16>
      %117 = vector.shape_cast %116 : vector<1x192x49xbf16> to vector<192x49xbf16>
      %c0_90 = arith.constant 0 : index
      %c0_91 = arith.constant 0 : index
      %c0_92 = arith.constant 0 : index
      %118 = vector.load %arg2[%c0_90, %c0_91, %c0_92] : memref<3x64x192xbf16, #tpu.memory_space<vmem>>, vector<1x64x192xbf16>
      %119 = vector.shape_cast %118 : vector<1x64x192xbf16> to vector<64x192xbf16>
      %120 = vector.extract_strided_slice %117 {offsets = [0, 0], sizes = [192, 47], strides = [1, 1]} : vector<192x49xbf16> to vector<192x47xbf16>
      %cst_93 = arith.constant dense<0.000000e+00> : vector<64x47xf32>
      %121 = tpu.matmul %119, %120, %cst_93 {dimension_numbers = #tpu.dot_dimension_numbers<[1], [0], [0], [1], [0, 0, 1, 1], [], []>} : vector<64x192xbf16>, vector<192x47xbf16>, vector<64x47xf32> -> vector<64x47xf32>
      %c1_94 = arith.constant 1 : index
      %c0_95 = arith.constant 0 : index
      %c0_96 = arith.constant 0 : index
      %122 = vector.load %arg2[%c1_94, %c0_95, %c0_96] : memref<3x64x192xbf16, #tpu.memory_space<vmem>>, vector<1x64x192xbf16>
      %123 = vector.shape_cast %122 : vector<1x64x192xbf16> to vector<64x192xbf16>
      %124 = vector.extract_strided_slice %117 {offsets = [0, 1], sizes = [192, 47], strides = [1, 1]} : vector<192x49xbf16> to vector<192x47xbf16>
      %cst_97 = arith.constant dense<0.000000e+00> : vector<64x47xf32>
      %125 = tpu.matmul %123, %124, %cst_97 {dimension_numbers = #tpu.dot_dimension_numbers<[1], [0], [0], [1], [0, 0, 1, 1], [], []>} : vector<64x192xbf16>, vector<192x47xbf16>, vector<64x47xf32> -> vector<64x47xf32>
      %126 = arith.addf %121, %125 : vector<64x47xf32>
      %c2_98 = arith.constant 2 : index
      %c0_99 = arith.constant 0 : index
      %c0_100 = arith.constant 0 : index
      %127 = vector.load %arg2[%c2_98, %c0_99, %c0_100] : memref<3x64x192xbf16, #tpu.memory_space<vmem>>, vector<1x64x192xbf16>
      %128 = vector.shape_cast %127 : vector<1x64x192xbf16> to vector<64x192xbf16>
      %129 = vector.extract_strided_slice %117 {offsets = [0, 2], sizes = [192, 47], strides = [1, 1]} : vector<192x49xbf16> to vector<192x47xbf16>
      %cst_101 = arith.constant dense<0.000000e+00> : vector<64x47xf32>
      %130 = tpu.matmul %128, %129, %cst_101 {dimension_numbers = #tpu.dot_dimension_numbers<[1], [0], [0], [1], [0, 0, 1, 1], [], []>} : vector<64x192xbf16>, vector<192x47xbf16>, vector<64x47xf32> -> vector<64x47xf32>
      %131 = arith.addf %126, %130 : vector<64x47xf32>
      %132 = vector.broadcast %0 : vector<64x1xf32> to vector<64x47xf32>
      %133 = arith.addf %131, %132 : vector<64x47xf32>
      %cst_102 = arith.constant 0.000000e+00 : f32
      %134 = vector.broadcast %cst_102 : f32 to vector<64x47xf32>
      %135 = arith.maximumf %133, %134 : vector<64x47xf32>
      %c0_103 = arith.constant 0 : index
      %c0_104 = arith.constant 0 : index
      %136 = vector.load %arg7[%c0_103, %c0_104] : memref<64x47xf32, #tpu.memory_space<vmem>>, vector<64x47xf32>
      %137 = arith.addf %136, %135 : vector<64x47xf32>
      %c0_105 = arith.constant 0 : index
      %c0_106 = arith.constant 0 : index
      %138 = vector.load %arg7[%c0_105, %c0_106] : memref<64x47xf32, #tpu.memory_space<vmem>>, vector<64x47xf32>
      tpu.vector_store %arg7[%c0_105, %c0_106], %137 {strides = array<i32>} : memref<64x47xf32, #tpu.memory_space<vmem>>, vector<64x47xf32>,
      %c1_107 = arith.constant 1 : index
      %c0_108 = arith.constant 0 : index
      %c0_109 = arith.constant 0 : index
      %139 = vector.load %arg6[%c1_107, %c0_108, %c0_109] : memref<2x64x47xf32, #tpu.memory_space<vmem>>, vector<1x64x47xf32>
      %140 = vector.shape_cast %139 : vector<1x64x47xf32> to vector<64x47xf32>
      %141 = vector.shape_cast %135 : vector<64x47xf32> to vector<1x64x47xf32>
      tpu.vector_store %arg6[%c1_107, %c0_108, %c0_109], %141 {strides = array<i32>} : memref<2x64x47xf32, #tpu.memory_space<vmem>>, vector<1x64x47xf32>,
      %c0_110 = arith.constant 0 : index
      %c0_111 = arith.constant 0 : index
      %142 = vector.load %arg7[%c0_110, %c0_111] : memref<64x47xf32, #tpu.memory_space<vmem>>, vector<64x47xf32>
      %143 = arith.truncf %142 : vector<64x47xf32> to vector<64x47xbf16>
      %c0_112 = arith.constant 0 : index
      %c0_113 = arith.constant 0 : index
      %144 = vector.load %arg4[%c0_112, %c0_113] : memref<47x15xbf16, #tpu.memory_space<vmem>>, vector<47x15xbf16>
      %cst_114 = arith.constant dense<0.000000e+00> : vector<64x15xf32>
      %145 = tpu.matmul %143, %144, %cst_114 {dimension_numbers = #tpu.dot_dimension_numbers<[1], [0], [0], [1], [0, 0, 1, 1], [], []>} : vector<64x47xbf16>, vector<47x15xbf16>, vector<64x15xf32> -> vector<64x15xf32>
      %cst_115 = arith.constant 4.000000e-02 : f32
      %146 = vector.broadcast %cst_115 : f32 to vector<64x15xf32>
      %147 = arith.mulf %145, %146 : vector<64x15xf32>
      %148 = arith.truncf %147 : vector<64x15xf32> to vector<64x15xbf16>
      %c0_116 = arith.constant 0 : index
      %149 = arith.index_cast %arg8 : i32 to index
      %c0_117 = arith.constant 0 : index
      %c0_118 = arith.constant 0 : index
      %150 = vector.load %arg5[%c0_116, %149, %c0_117, %c0_118] : memref<1x21x64x15xbf16, #tpu.memory_space<vmem>>, vector<1x1x64x15xbf16>
      %151 = vector.shape_cast %150 : vector<1x1x64x15xbf16> to vector<64x15xbf16>
      %152 = vector.shape_cast %148 : vector<64x15xbf16> to vector<1x1x64x15xbf16>
      tpu.vector_store %arg5[%c0_116, %149, %c0_117, %c0_118], %152 {strides = array<i32>} : memref<1x21x64x15xbf16, #tpu.memory_space<vmem>>, vector<1x1x64x15xbf16>,
    }
    %c21_i32_35 = arith.constant 21 : i32
    return
  }
  func.func @transform_0(%arg0: i32) -> (i32, i32, i32) {
    %c0_i32 = arith.constant 0 : i32
    %c0_i32_0 = arith.constant 0 : i32
    %c0_i32_1 = arith.constant 0 : i32
    return %arg0, %c0_i32, %c0_i32_0 : i32, i32, i32
  }
  func.func @transform_1(%arg0: i32) -> (i32, i32, i32) {
    %c0_i32 = arith.constant 0 : i32
    %c0_i32_0 = arith.constant 0 : i32
    %c0_i32_1 = arith.constant 0 : i32
    %c0_i32_2 = arith.constant 0 : i32
    return %c0_i32, %c0_i32_0, %c0_i32_1 : i32, i32, i32
  }
  func.func @transform_2(%arg0: i32) -> (i32, i32) {
    %c0_i32 = arith.constant 0 : i32
    %c0_i32_0 = arith.constant 0 : i32
    %c0_i32_1 = arith.constant 0 : i32
    return %c0_i32, %c0_i32_0 : i32, i32
  }
  func.func @transform_3(%arg0: i32) -> (i32, i32) {
    %c0_i32 = arith.constant 0 : i32
    %c0_i32_0 = arith.constant 0 : i32
    %c0_i32_1 = arith.constant 0 : i32
    return %c0_i32, %c0_i32_0 : i32, i32
  }
  func.func @transform_4(%arg0: i32) -> (i32, i32, i32, i32) {
    %c0_i32 = arith.constant 0 : i32
    %c0_i32_0 = arith.constant 0 : i32
    %c0_i32_1 = arith.constant 0 : i32
    %c0_i32_2 = arith.constant 0 : i32
    return %arg0, %c0_i32, %c0_i32_0, %c0_i32_1 : i32, i32, i32, i32
  }
}

module attributes {stable_mosaic.version = 11 : i64} {
  func.func @_fc_kernel(%arg0: i32, %arg1: memref<2x20160xbf16, #tpu.memory_space<vmem>>, %arg2: memref<6x20160xbf16, #tpu.memory_space<vmem>>, %arg3: memref<1x6xf32, #tpu.memory_space<vmem>>, %arg4: memref<2x6xf32, #tpu.memory_space<vmem>>) attributes {dimension_semantics = [#tpu.dimension_semantics<arbitrary>], iteration_bounds = array<i64: 1>, scalar_prefetch = 0 : i64, scratch_operands = 0 : i64, tpu.core_type = #tpu.core_type<tc>, window_params = [{pipeline_mode = #tpu.pipeline_mode<synchronous>, transform_indices = @transform_0, window_bounds = array<i64: 2, 20160>}, {pipeline_mode = #tpu.pipeline_mode<synchronous>, transform_indices = @transform_1, window_bounds = array<i64: 6, 20160>}, {pipeline_mode = #tpu.pipeline_mode<synchronous>, transform_indices = @transform_2, window_bounds = array<i64: 1, 6>}, {pipeline_mode = #tpu.pipeline_mode<synchronous>, transform_indices = @transform_3, window_bounds = array<i64: 2, 6>}]} {
    %c0 = arith.constant 0 : index
    %c0_0 = arith.constant 0 : index
    %0 = vector.load %arg1[%c0, %c0_0] : memref<2x20160xbf16, #tpu.memory_space<vmem>>, vector<2x20160xbf16>
    %c0_1 = arith.constant 0 : index
    %c0_2 = arith.constant 0 : index
    %1 = vector.load %arg2[%c0_1, %c0_2] : memref<6x20160xbf16, #tpu.memory_space<vmem>>, vector<6x20160xbf16>
    %cst = arith.constant dense<0.000000e+00> : vector<2x6xf32>
    %2 = tpu.matmul %0, %1, %cst {dimension_numbers = #tpu.dot_dimension_numbers<[1], [1], [0], [0], [0, 0, 1, 0], [], []>} : vector<2x20160xbf16>, vector<6x20160xbf16>, vector<2x6xf32> -> vector<2x6xf32>
    %c0_3 = arith.constant 0 : index
    %c0_4 = arith.constant 0 : index
    %3 = vector.load %arg3[%c0_3, %c0_4] : memref<1x6xf32, #tpu.memory_space<vmem>>, vector<1x6xf32>
    %4 = vector.broadcast %3 : vector<1x6xf32> to vector<2x6xf32>
    %5 = arith.addf %2, %4 : vector<2x6xf32>
    %c0_5 = arith.constant 0 : index
    %c0_6 = arith.constant 0 : index
    %6 = vector.load %arg4[%c0_5, %c0_6] : memref<2x6xf32, #tpu.memory_space<vmem>>, vector<2x6xf32>
    tpu.vector_store %arg4[%c0_5, %c0_6], %5 {strides = array<i32>} : memref<2x6xf32, #tpu.memory_space<vmem>>, vector<2x6xf32>,
    return
  }
  func.func @transform_0(%arg0: i32) -> (i32, i32) {
    %c0_i32 = arith.constant 0 : i32
    %c0_i32_0 = arith.constant 0 : i32
    %c0_i32_1 = arith.constant 0 : i32
    return %c0_i32, %c0_i32_0 : i32, i32
  }
  func.func @transform_1(%arg0: i32) -> (i32, i32) {
    %c0_i32 = arith.constant 0 : i32
    %c0_i32_0 = arith.constant 0 : i32
    %c0_i32_1 = arith.constant 0 : i32
    return %c0_i32, %c0_i32_0 : i32, i32
  }
  func.func @transform_2(%arg0: i32) -> (i32, i32) {
    %c0_i32 = arith.constant 0 : i32
    %c0_i32_0 = arith.constant 0 : i32
    %c0_i32_1 = arith.constant 0 : i32
    return %c0_i32, %c0_i32_0 : i32, i32
  }
  func.func @transform_3(%arg0: i32) -> (i32, i32) {
    %c0_i32 = arith.constant 0 : i32
    %c0_i32_0 = arith.constant 0 : i32
    %c0_i32_1 = arith.constant 0 : i32
    return %c0_i32, %c0_i32_0 : i32, i32
  }
}

</mosaic_0001>

<bundles_post_ra>
// kernel: deep_q_forward.4
= control target key start
LH: loop header
LB: loop body
LE: loop exit
PB: predicated region body
PF: predicated region fallthrough
CT: control target
= control target key end

     0   :  { %9 = vsyncpa [#allocation5], 0  ;;  %s4690_s0 = inlined_call_operand.hbm [shape: bf16[2,9904,457], index: 0, kind: input, shape index: {}]   ;;  %s4691_s1 = inlined_call_operand.vmem [shape: bf16[1,64,48], index: 1, kind: input, shape index: {}]   ;;  %s4692_s2 = inlined_call_operand.vmem [shape: f32[64,1], index: 2, kind: input, shape index: {}]   ;;  %s4693_s3 = inlined_call_operand.vmem [shape: bf16[455,151], index: 3, kind: input, shape index: {}]   ;;  %s4694_s4 = inlined_call_operand.vmem [shape: bf16[2,205,64,151], index: 4, kind: output, shape index: {}]  }
   0x1   :  { %11 = vsyncpa [#allocation5 + $0x1], 0  ;;  %s3600_s15 = smov 0   ;;  %s3602_s16 = smov 0  }
   0x2   :  { %s3604_s17 = smov 0   ;;  %s3606_s18 = smov 0  }
   0x3 LB: > { %s3619_s19 = sadd.s32 4294967295, %s3563_s18   ;;  %s3622_s20 = sadd.s32 1, %s3563_s18   ;;  %s3563_s18 = sphi %s3606_s18, %s4717_s18   ;;  %s3559_s17 = sphi %s3604_s17, %s4716_s17   ;;  %s3555_s16 = sphi %s3602_s16, %s4715_s16   ;;  %s3551_s15 = sphi %s3600_s15, %s4714_s15  }
   0x4   : > { %s21_s21 = ssub.s32 %s3563_s18, %s3622_s20  ;;  %s24_s22 = sadd.s32 1, %s3559_s17 }
   0x5   : > { %p22_p0 = scmp.eq.s32.totalorder %s21_s21, 0  ;;  %p31_p1 = scmp.ne.s32.totalorder %s3559_s17, %s3555_s16 }
   0x6   : > { %p32_p2 = scmp.eq.s32.totalorder %s3563_s18, 0  ;;  %p37_p3 = scmp.ne.s32.totalorder %s3555_s16, %s3551_s15 }
   0x7   : > { %s3632_s23 = scalar_select %p22_p0, %s3559_s17, %s24_s22  }
   0x8   : > { %p33_p4 = por %p32_p2, %p31_p1  ;;  %p38_p5 = scmp.eq.s32.totalorder %s3619_s19, 0 }
   0x9   : > { %p3263_p6 = scmp.lt.s32.totalorder %s3563_s18, 2  ;;  %s159_s25 = sand.u32 1, %s3559_s17  }
   0xa   : > { %p3636_p7 = por %p38_p5, %p37_p3  ;;  %s3253_s26 = smul.u32 19808, %s159_s25 }
   0xb   : > { %s3254_s27 = smul.u32 316928, %s3563_s18  ;;  %p3642_p8 = pnand %p3263_p6, %p33_p4 }
   0xc   : > { %s163_s6 = scalar_lea.vmem [#allocation4], %s3253_s26  ;;  %s3654_s8 = scalar_lea.sflag [#allocation5], %s159_s25 }
   0xd   : > { %s3649_s5 = scalar_lea.hbm %s4690_s0, %s3254_s27  ;;  %s170_s7 = sshll.u32 %s163_s6, 4  ;;  %s3651_s7 = int_to_ptr.vmem [resolvable:$true] %s170_s7 }
   0xe   : > { %s3495_s9 = scalar_lea.hbm %s3649_s5, 316928  ;;  %p3497_p11 = pneg %p3642_p8 }
   0xf   : > { %p3496_p10 = scmp.ne.s32.totalorder %s3649_s5, %s3495_s9  ;;  %s3500_s12 = scalar_lea.hbm %s4690_s0, 633856 }
  0x10   : > { %p3501_p0 = scmp.lt.u32.totalorder %s3649_s5, %s4690_s0  ;;  %p3502_p1 = scmp.lt.u32.totalorder %s3500_s12, %s3495_s9 }
  0x11   : > { %p3498_p12 = pnand %p3497_p11, %p3496_p10  ;;  %p3504_p3 = scmp.lt.u32.totalorder %s3495_s9, %s3649_s5 }
  0x12   : > { %p3503_p2 = por %p3502_p1, %p3501_p0 }
  0x13   : > { %p3499_p13 = pneg %p3498_p12 }
  0x14   : > { %p3505_p4 = por %p3504_p3, %p3503_p2 }
  0x16   : > { %p3506_p5 = pnand %p3505_p4, %p3499_p13 }
  0x18   : > { %3509 = shalt.err (!%p3506_p5)
}
  0x19   : > { %s3510_s15 = scalar_lea.vmem %s3651_s7, 316928  ;;  %s3569_s21 = smov [#allocation4]  }
  0x1a   : > { %p3511_p6 = scmp.ne.s32.totalorder %s3651_s7, %s3510_s15  ;;  %s3515_s22 = sshll.u32 %s3569_s21, 4  ;;  %s3516_s22 = int_to_ptr.vmem [resolvable:$false] %s3515_s22 }
  0x1b   : > { %s3517_s25 = scalar_lea.vmem %s3516_s22, 633856  ;;  %p3518_p9 = scmp.lt.s32.totalorder %s3651_s7, %s3516_s22 }
  0x1c   : > { %p3513_p10 = pnand %p3511_p6, %p3497_p11  ;;  %p3519_p0 = scmp.lt.s32.totalorder %s3517_s25, %s3510_s15 }
  0x1e   : > { %p3514_p12 = pneg %p3513_p10  ;;  %p3520_p1 = por %p3519_p0, %p3518_p9 }
  0x20   : > { %p3521_p2 = pnand %p3520_p1, %p3514_p12 }
  0x22   : > { %3524 = shalt.err (!%p3521_p2)
}
  0x23   : > { %s3570_s26 = smov 256   ;;  %s3571_s27 = smov 16  }
  0x24   : > { %3262 = dma.hbm_to_vmem [thread:$0]  (!%p3642_p8), %s3649_s5, 316928, %s3651_s7, %s3654_s8, %s3570_s26, %s3570_s26, %s3571_s27  }
  0x25   : > { %p178_p11 = scmp.lt.s32.totalorder %s3563_s18, 3  ;;  %p4701_p13 = scmp.ge.s32.totalorder %s3563_s18, 1 }
  0x27   : > { %p179_p3 = pnand %p4701_p13, %p178_p11 }
  0x28   : > { %s184_s29 = sand.u32 (!%p179_p3), 1, %s3555_s16  }
  0x29   : > { %182 = sbr.rel (%p179_p3) target bundleno = 901 (0x385), region = 36  ;;  %s185_s6 = scalar_lea.sflag (!%p179_p3), [#allocation5], %s184_s29 }
  0x2a   : > { %s3255_s30 = smul.u32 (!%p179_p3), 19808, %s184_s29 }
  0x2c   : > { %s3686_s9 = scalar_lea.vmem (!%p179_p3), [#allocation4], %s3255_s30 }
  0x30   : > { %3546 = dma.done.wait (%p3636_p7), %s185_s6, 316928  }
  0x31   : > { %3548 = vsyncadd (%p3636_p7), %s185_s6, 4294650368  ;;  %p213_p8 = scmp.lt.s32.totalorder %s3619_s19, 1  ;;  %v3572_v0 = vmov 0   ;;  %v3311_v1 = vld [vmem:[%s3686_s9 + $0x4] ss:$16 sps:$4 sm:$0xff]   ;;  %vm367_vm0 = vcmask 392192  }
  0x32   : > { %412 = vmatprep.mubr.bf16.mxu0 %v3572_v0  ;;  %485 = vmatprep.mubr.bf16.mxu1 %v3572_v0  ;;  %v3313_v2 = vld [vmem:[%s3686_s9 + $0xc] ss:$16 sps:$4 sm:$0xff]   ;;  %v3315_v3 = vld [vmem:[%s3686_s9] ss:$16 sps:$4 sm:$0xff]   ;;  %v3316_v4 = vld [vmem:[%s3686_s9 + $0x8] ss:$16 sps:$4 sm:$0xff]  }
  0x33   : > { %s4719_s19 = smov (!%p213_p8, %s3619_s19), 1  ;;  %3309 = vset.pattern.permute.xlu0 %v3572_v0  ;;  %3310 = vset.pattern.permute.xlu1 %v3572_v0  ;;  %v3317_v5 = vld [vmem:[%s3686_s9 + $0x24] ss:$16 sps:$4 sm:$0xff]   ;;  %v3319_v6 = vld [vmem:[%s3686_s9 + $0x2c] ss:$16 sps:$4 sm:$0xff]   ;;  %vm561_vm1 = vcmask 580608  }
  0x34   : > { %s3256_s18 = smul.u32 13120, %s4719_s19  ;;  %380 = vmatprep.subr.bf16.mxu0 %v3311_v1  ;;  %453 = vmatprep.subr.bf16.mxu1 %v3313_v2  ;;  %v3321_v7 = vld [vmem:[%s3686_s9 + $0x20] ss:$16 sps:$4 sm:$0xff]   ;;  %v3322_v8 = vld [vmem:[%s3686_s9 + $0x28] ss:$16 sps:$4 sm:$0xff]   ;;  %s3893_s26 = smov 0  }
  0x35   : > { %381 = vmatpush1.bf16.msra.mxu0 %v3315_v3  ;;  %454 = vmatpush1.bf16.msra.mxu1 %v3316_v4  ;;  %v3323_v9 = vld [vmem:[%s3686_s9 + $0x44] ss:$16 sps:$4 sm:$0xff]   ;;  %v3325_v10 = vld [vmem:[%s3686_s9 + $0x4c] ss:$16 sps:$4 sm:$0xff]   ;;  %v3327_v11 = vld [vmem:[%s3686_s9 + $0x40] ss:$16 sps:$4 sm:$0xff]  }
  0x36   : > { %s3701_s5 = scalar_lea.vmem %s4694_s4, %s3256_s18  ;;  %382 = vmatprep.subr.bf16.mxu0 %v3317_v5  ;;  %455 = vmatprep.subr.bf16.mxu1 %v3319_v6  ;;  %v3328_v12 = vld [vmem:[%s3686_s9 + $0x48] ss:$16 sps:$4 sm:$0xff]   ;;  %v3329_v13 = vld [vmem:[%s4691_s1] sm:$0xff]   ;;  %v3337_v15 = vld [vmem:[%s3686_s9 + $0x6c] ss:$16 sps:$4 sm:$0xff]  }
  0x37   : > { %v3334_v14 = vld [vmem:[%s3686_s9 + $0x64] ss:$16 sps:$4 sm:$0xff]   ;;  %v3330_v17 = vld [vmem:[%s4691_s1 + $0x8] sm:$0xff]   ;;  %v3332_v19 = vld [vmem:[%s3686_s9 + $0x60] ss:$16 sps:$4 sm:$0xff]  }
  0x38   : > { %v219_v16 = vld [vmem:[%s4692_s2] sm:$0xff]  ;;  %v221_v18 = vld [vmem:[%s4692_s2 + $0x10] sm:$0xff]  ;;  %v3335_v20 = vld [vmem:[%s3686_s9 + $0x68] ss:$16 sps:$4 sm:$0xff]  }
  0x39   : > { %383 = vmatpush1.bf16.msra.mxu0 %v3321_v7  ;;  %456 = vmatpush1.bf16.msra.mxu1 %v3322_v8  ;;  %v220_v21 = vld [vmem:[%s4692_s2 + $0x8] sm:$0xff]  ;;  %v222_v22 = vld [vmem:[%s4692_s2 + $0x18] sm:$0xff]  ;;  %v3331_v23 = vld [vmem:[%s4691_s1 + $0x10] sm:$0xff]  }
  0x3a   : > { %384 = vmatprep.subr.bf16.mxu0 %v3323_v9  ;;  %457 = vmatprep.subr.bf16.mxu1 %v3325_v10  ;;  %v223_v24 = vld [vmem:[%s4692_s2 + $0x20] sm:$0xff]  ;;  %v224_v25 = vld [vmem:[%s4692_s2 + $0x28] sm:$0xff]  ;;  %v225_v26 = vld [vmem:[%s4692_s2 + $0x30] sm:$0xff] }
  0x3b   : > { %249 = vperm.xlu0 %3309, %v219_v16   ;;  %259 = vperm.xlu1 %3310, %v221_v18   ;;  %v226_v27 = vld [vmem:[%s4692_s2 + $0x38] sm:$0xff]  ;;  %v3339_v29 = vld [vmem:[%s4691_s1] sm:$0xff]   ;;  %v3340_v30 = vld [vmem:[%s4691_s1 + $0x8] sm:$0xff]  }
  0x3c   : > { %v3338_v28 = vld [vmem:[%s4691_s1 + $0x18] sm:$0xff]   ;;  %v3341_v31 = vld [vmem:[%s4691_s1 + $0x10] sm:$0xff]  }
  0x3d   : > { %385 = vmatpush1.bf16.msra.mxu0 %v3327_v11  ;;  %458 = vmatpush1.bf16.msra.mxu1 %v3328_v12  ;;  %v3342_v32 = vld [vmem:[%s4691_s1 + $0x18] sm:$0xff]  }
  0x3e   : > { %703 = vmatprep.subr.bf16.mxu0 %v3317_v5  ;;  %776 = vmatprep.subr.bf16.mxu1 %v3319_v6 }
  0x3f   : > { %254 = vperm.xlu0 %3309, %v220_v21   ;;  %264 = vperm.xlu1 %3310, %v222_v22  }
  0x40   : > { %3029 = vmatmul.mubr.msk.bf16.vlgmr.msra.gmra.mrb[0].mxu0 %vm367_vm0, %v3329_v13  ;;  %3033 = vmatmul.mubr.msk.bf16.vlgmr.msra.gmra.mrb[0].mxu1 %vm367_vm0, %v3329_v13 }
  0x41   : > { %704 = vmatpush1.bf16.msra.mxu0 %v3321_v7  ;;  %777 = vmatpush1.bf16.msra.mxu1 %v3322_v8 }
  0x42   : > { %422 = vmatprep.mubr.bf16.mxu0 %v3572_v0  ;;  %495 = vmatprep.mubr.bf16.mxu1 %v3572_v0 }
  0x43   : > { %705 = vmatprep.subr.bf16.mxu0 %v3323_v9  ;;  %778 = vmatprep.subr.bf16.mxu1 %v3325_v10 }
  0x44   : > { %269 = vperm.xlu0 %3309, %v223_v24   ;;  %274 = vperm.xlu1 %3310, %v224_v25  }
  0x45   : > { %706 = vmatpush1.bf16.msra.mxu0 %v3327_v11  ;;  %779 = vmatpush1.bf16.msra.mxu1 %v3328_v12 }
  0x46   : > { %707 = vmatprep.subr.bf16.mxu0 %v3334_v14  ;;  %780 = vmatprep.subr.bf16.mxu1 %v3337_v15 }
  0x48   : > { %3030 = vmatmul.mubr.msk.bf16.gmra.mrb[4].mxu0 %vm367_vm0, %v3330_v17  ;;  %3034 = vmatmul.mubr.msk.bf16.gmra.mrb[4].mxu1 %vm367_vm0, %v3330_v17 }
  0x49   : > { %432 = vmatprep.mubr.bf16.mxu0 %v3572_v0  ;;  %505 = vmatprep.mubr.bf16.mxu1 %v3572_v0 }
  0x4a   : > { %708 = vmatpush1.bf16.msra.mxu0 %v3332_v19  ;;  %781 = vmatpush1.bf16.msra.mxu1 %v3335_v20 }
  0x4b   : > { %279 = vperm.xlu0 %3309, %v225_v26   ;;  %284 = vperm.xlu1 %3310, %v226_v27  }
  0x50   : > { %3031 = vmatmul.mubr.msk.bf16.gmra.mrb[8].mxu0 %vm367_vm0, %v3331_v23  ;;  %3035 = vmatmul.mubr.msk.bf16.gmra.mrb[8].mxu1 %vm367_vm0, %v3331_v23 }
  0x51   : > { %442 = vmatprep.mubr.bf16.mxu0 %v3572_v0  ;;  %515 = vmatprep.mubr.bf16.mxu1 %v3572_v0 }
  0x58   : > { %3032 = vmatmul.mubr.msk.bf16.gmra.mrb[12].mxu0 %vm367_vm0, %v3338_v28  ;;  %3036 = vmatmul.mubr.msk.bf16.gmra.mrb[12].mxu1 %vm367_vm0, %v3338_v28 }
  0x59   : > { %735 = vmatprep.mubr.bf16.mxu0 %v3572_v0  ;;  %808 = vmatprep.mubr.bf16.mxu1 %v3572_v0 }
  0x60   : > { %3053 = vmatmul.mubr.msk.bf16.vlgmr.msra.gmra.mrb[16].mxu0 %vm367_vm0, %v3339_v29  ;;  %3057 = vmatmul.mubr.msk.bf16.vlgmr.msra.gmra.mrb[16].mxu1 %vm367_vm0, %v3339_v29 }
  0x61   : > { %745 = vmatprep.mubr.bf16.mxu0 %v3572_v0  ;;  %818 = vmatprep.mubr.bf16.mxu1 %v3572_v0 }
  0x68   : > { %3054 = vmatmul.mubr.msk.bf16.gmra.mrb[20].mxu0 %vm367_vm0, %v3340_v30  ;;  %3058 = vmatmul.mubr.msk.bf16.gmra.mrb[20].mxu1 %vm367_vm0, %v3340_v30 }
  0x69   : > { %755 = vmatprep.mubr.bf16.mxu0 %v3572_v0  ;;  %828 = vmatprep.mubr.bf16.mxu1 %v3572_v0 }
  0x70   : > { %3055 = vmatmul.mubr.msk.bf16.gmra.mrb[24].mxu0 %vm367_vm0, %v3341_v31  ;;  %3059 = vmatmul.mubr.msk.bf16.gmra.mrb[24].mxu1 %vm367_vm0, %v3341_v31 }
  0x71   : > { %765 = vmatprep.mubr.bf16.mxu0 %v3572_v0  ;;  %838 = vmatprep.mubr.bf16.mxu1 %v3572_v0 }
  0x78   : > { %3056 = vmatmul.mubr.msk.bf16.gmra.mrb[28].mxu0 %vm367_vm0, %v3342_v32  ;;  %3060 = vmatmul.mubr.msk.bf16.gmra.mrb[28].mxu1 %vm367_vm0, %v3342_v32 }
  0xba   : > { %v3797_v33 = vpop.permute.xlu0 %249  ;;  %v3801_v35 = vpop.permute.xlu1 %259 }
  0xbe   : > { %v3799_v34 = vpop.permute.xlu0 %254  ;;  %v3812_v60 = vpop.permute.xlu1 %264 }
  0xc3   : > { %v3824_v21 = vpop.permute.xlu0 %269  ;;  %v3826_v22 = vpop.permute.xlu1 %274 }
 0x113   : > { %v414_v36 = vpop.f32.mrb[0].mxu0  ;;  %v487_v37 = vpop.f32.mrb[0].mxu1 }
 0x114   : > { %v415_v38 = vadd.f32 %v414_v36, %v3797_v33  ;;  %v488_v39 = vadd.f32 %v487_v37, %v3797_v33  ;;  %v416_v40 = vpop.f32.mrb[1].mxu0  ;;  %v489_v41 = vpop.f32.mrb[1].mxu1 }
 0x115   : > { %v417_v42 = vadd.f32 %v416_v40, %v3797_v33  ;;  %v490_v43 = vadd.f32 %v489_v41, %v3797_v33  ;;  %v418_v44 = vpop.f32.mrb[2].mxu0  ;;  %v491_v45 = vpop.f32.mrb[2].mxu1 }
 0x116   : > { %v526_v46 = vmax.f32 %v415_v38, 0.0  ;;  %v528_v47 = vmax.f32 %v488_v39, 0.0  ;;  %v419_v48 = vadd.f32 %v418_v44, %v3799_v34  ;;  %v492_v49 = vadd.f32 %v491_v45, %v3799_v34  ;;  %v420_v50 = vpop.f32.mrb[3].mxu0  ;;  %v493_v51 = vpop.f32.mrb[3].mxu1 }
 0x117   : > { %v527_v52 = vmax.f32 %v417_v42, 0.0  ;;  %v529_v53 = vmax.f32 %v490_v43, 0.0  ;;  %v421_v54 = vadd.f32 %v420_v50, %v3799_v34  ;;  %v494_v55 = vadd.f32 %v493_v51, %v3799_v34  ;;  %v3838_v50 = vpop.permute.xlu0 %279  ;;  %v3840_v51 = vpop.permute.xlu1 %284 }
 0x118   : > { %558 = vst [vmem:[#allocation2] sm:$0xff] %v526_v46  ;;  %560 = vst [vmem:[#allocation2 + $0x10] sm:$0xff] %v528_v47  ;;  %v530_v56 = vmax.f32 %v419_v48, 0.0  ;;  %v532_v57 = vmax.f32 %v492_v49, 0.0 }
 0x119   : > { %559 = vst [vmem:[#allocation2 + $0x8] sm:$0xff] %v527_v52  ;;  %562 = vst.msk [vmem:[#allocation2 + $0x18] sm:$0xff] %vm561_vm1, %v529_v53  ;;  %v531_v58 = vmax.f32 %v421_v54, 0.0  ;;  %v533_v59 = vmax.f32 %v494_v55, 0.0 }
 0x11a   : > { %563 = vst [vmem:[#allocation2 + $0x20] sm:$0xff] %v530_v56  ;;  %565 = vst [vmem:[#allocation2 + $0x30] sm:$0xff] %v532_v57 }
 0x11b   : > { %564 = vst [vmem:[#allocation2 + $0x28] sm:$0xff] %v531_v58  ;;  %566 = vst.msk [vmem:[#allocation2 + $0x38] sm:$0xff] %vm561_vm1, %v533_v59  ;;  %v424_v61 = vpop.f32.mrb[4].mxu0  ;;  %v497_v62 = vpop.f32.mrb[4].mxu1 }
 0x11c   : > { %v425_v63 = vadd.f32 %v424_v61, %v3801_v35  ;;  %v498_v0 = vadd.f32 %v497_v62, %v3801_v35  ;;  %v426_v1 = vpop.f32.mrb[5].mxu0  ;;  %v499_v2 = vpop.f32.mrb[5].mxu1  ;;  %4702 = vst [vmem:[#allocation7_spill] sm:$0xff] %v3838_v50  ;;  %4703 = vst [vmem:[#allocation8_spill] sm:$0xff] %v3840_v51 }
 0x11d   : > { %v427_v3 = vadd.f32 %v426_v1, %v3801_v35  ;;  %v500_v4 = vadd.f32 %v499_v2, %v3801_v35  ;;  %v428_v5 = vpop.f32.mrb[6].mxu0  ;;  %v501_v6 = vpop.f32.mrb[6].mxu1 }
 0x11e   : > { %v534_v7 = vmax.f32 %v425_v63, 0.0  ;;  %v536_v8 = vmax.f32 %v498_v0, 0.0  ;;  %v429_v9 = vadd.f32 %v428_v5, %v3812_v60  ;;  %v502_v10 = vadd.f32 %v501_v6, %v3812_v60  ;;  %v430_v11 = vpop.f32.mrb[7].mxu0  ;;  %v503_v12 = vpop.f32.mrb[7].mxu1 }
 0x11f   : > { %v535_v13 = vmax.f32 %v427_v3, 0.0  ;;  %v537_v14 = vmax.f32 %v500_v4, 0.0  ;;  %v431_v15 = vadd.f32 %v430_v11, %v3812_v60  ;;  %v504_v16 = vadd.f32 %v503_v12, %v3812_v60 }
 0x120   : > { %567 = vst [vmem:[#allocation2 + $0x40] sm:$0xff] %v534_v7  ;;  %569 = vst [vmem:[#allocation2 + $0x50] sm:$0xff] %v536_v8  ;;  %v538_v17 = vmax.f32 %v429_v9, 0.0  ;;  %v540_v18 = vmax.f32 %v502_v10, 0.0 }
 0x121   : > { %568 = vst [vmem:[#allocation2 + $0x48] sm:$0xff] %v535_v13  ;;  %570 = vst.msk [vmem:[#allocation2 + $0x58] sm:$0xff] %vm561_vm1, %v537_v14  ;;  %v539_v19 = vmax.f32 %v431_v15, 0.0  ;;  %v541_v20 = vmax.f32 %v504_v16, 0.0 }
 0x122   : > { %571 = vst [vmem:[#allocation2 + $0x60] sm:$0xff] %v538_v17  ;;  %573 = vst [vmem:[#allocation2 + $0x70] sm:$0xff] %v540_v18 }
 0x123   : > { %572 = vst [vmem:[#allocation2 + $0x68] sm:$0xff] %v539_v19  ;;  %574 = vst.msk [vmem:[#allocation2 + $0x78] sm:$0xff] %vm561_vm1, %v541_v20  ;;  %v434_v23 = vpop.f32.mrb[8].mxu0  ;;  %v507_v24 = vpop.f32.mrb[8].mxu1 }
 0x124   : > { %v436_v25 = vpop.f32.mrb[9].mxu0  ;;  %v509_v26 = vpop.f32.mrb[9].mxu1  ;;  %v435_v27 = vadd.f32 %v434_v23, %v3824_v21  ;;  %v508_v28 = vadd.f32 %v507_v24, %v3824_v21 }
 0x125   : > { %v437_v29 = vadd.f32 %v436_v25, %v3824_v21  ;;  %v510_v30 = vadd.f32 %v509_v26, %v3824_v21  ;;  %v438_v31 = vpop.f32.mrb[10].mxu0  ;;  %v511_v32 = vpop.f32.mrb[10].mxu1 }
 0x126   : > { %v542_v36 = vmax.f32 %v435_v27, 0.0  ;;  %v544_v37 = vmax.f32 %v508_v28, 0.0  ;;  %v439_v38 = vadd.f32 %v438_v31, %v3826_v22  ;;  %v512_v39 = vadd.f32 %v511_v32, %v3826_v22  ;;  %v440_v40 = vpop.f32.mrb[11].mxu0  ;;  %v513_v41 = vpop.f32.mrb[11].mxu1 }
 0x127   : > { %v543_v42 = vmax.f32 %v437_v29, 0.0  ;;  %v545_v43 = vmax.f32 %v510_v30, 0.0  ;;  %v441_v44 = vadd.f32 %v440_v40, %v3826_v22  ;;  %v514_v45 = vadd.f32 %v513_v41, %v3826_v22 }
 0x128   : > { %575 = vst [vmem:[#allocation2 + $0x80] sm:$0xff] %v542_v36  ;;  %577 = vst [vmem:[#allocation2 + $0x90] sm:$0xff] %v544_v37  ;;  %v546_v46 = vmax.f32 %v439_v38, 0.0  ;;  %v548_v47 = vmax.f32 %v512_v39, 0.0 }
 0x129   : > { %576 = vst [vmem:[#allocation2 + $0x88] sm:$0xff] %v543_v42  ;;  %578 = vst.msk [vmem:[#allocation2 + $0x98] sm:$0xff] %vm561_vm1, %v545_v43  ;;  %v547_v48 = vmax.f32 %v441_v44, 0.0  ;;  %v549_v49 = vmax.f32 %v514_v45, 0.0 }
 0x12a   : > { %579 = vst [vmem:[#allocation2 + $0xa0] sm:$0xff] %v546_v46  ;;  %581 = vst [vmem:[#allocation2 + $0xb0] sm:$0xff] %v548_v47 }
 0x12b   : > { %580 = vst [vmem:[#allocation2 + $0xa8] sm:$0xff] %v547_v48  ;;  %582 = vst.msk [vmem:[#allocation2 + $0xb8] sm:$0xff] %vm561_vm1, %v549_v49  ;;  %v444_v52 = vpop.f32.mrb[12].mxu0  ;;  %v517_v53 = vpop.f32.mrb[12].mxu1 }
 0x12c   : > { %v446_v54 = vpop.f32.mrb[13].mxu0  ;;  %v519_v55 = vpop.f32.mrb[13].mxu1  ;;  %v445_v56 = vadd.f32 %v444_v52, %v3838_v50  ;;  %v518_v57 = vadd.f32 %v517_v53, %v3838_v50 }
 0x12d   : > { %v447_v58 = vadd.f32 %v446_v54, %v3838_v50  ;;  %v520_v59 = vadd.f32 %v519_v55, %v3838_v50  ;;  %v448_v61 = vpop.f32.mrb[14].mxu0  ;;  %v521_v62 = vpop.f32.mrb[14].mxu1 }
 0x12e   : > { %v550_v63 = vmax.f32 %v445_v56, 0.0  ;;  %v552_v0 = vmax.f32 %v518_v57, 0.0  ;;  %v449_v1 = vadd.f32 %v448_v61, %v3840_v51  ;;  %v522_v2 = vadd.f32 %v521_v62, %v3840_v51  ;;  %v450_v3 = vpop.f32.mrb[15].mxu0  ;;  %v523_v4 = vpop.f32.mrb[15].mxu1 }
 0x12f   : > { %v551_v5 = vmax.f32 %v447_v58, 0.0  ;;  %v553_v6 = vmax.f32 %v520_v59, 0.0  ;;  %v451_v7 = vadd.f32 %v450_v3, %v3840_v51  ;;  %v524_v8 = vadd.f32 %v523_v4, %v3840_v51 }
 0x130   : > { %583 = vst [vmem:[#allocation2 + $0xc0] sm:$0xff] %v550_v63  ;;  %585 = vst [vmem:[#allocation2 + $0xd0] sm:$0xff] %v552_v0  ;;  %v554_v9 = vmax.f32 %v449_v1, 0.0  ;;  %v556_v10 = vmax.f32 %v522_v2, 0.0 }
 0x131   : > { %584 = vst [vmem:[#allocation2 + $0xc8] sm:$0xff] %v551_v5  ;;  %586 = vst.msk [vmem:[#allocation2 + $0xd8] sm:$0xff] %vm561_vm1, %v553_v6  ;;  %v555_v11 = vmax.f32 %v451_v7, 0.0  ;;  %v557_v12 = vmax.f32 %v524_v8, 0.0 }
 0x132   : > { %587 = vst [vmem:[#allocation2 + $0xe0] sm:$0xff] %v554_v9  ;;  %589 = vst [vmem:[#allocation2 + $0xf0] sm:$0xff] %v556_v10 }
 0x133   : > { %588 = vst [vmem:[#allocation2 + $0xe8] sm:$0xff] %v555_v11  ;;  %590 = vst.msk [vmem:[#allocation2 + $0xf8] sm:$0xff] %vm561_vm1, %v557_v12  ;;  %v737_v13 = vpop.f32.mrb[16].mxu0  ;;  %v810_v14 = vpop.f32.mrb[16].mxu1 }
 0x134   : > { %v738_v15 = vadd.f32 %v737_v13, %v3797_v33  ;;  %v811_v16 = vadd.f32 %v810_v14, %v3797_v33  ;;  %v739_v17 = vpop.f32.mrb[17].mxu0  ;;  %v812_v18 = vpop.f32.mrb[17].mxu1 }
 0x135   : > { %v740_v19 = vadd.f32 %v739_v17, %v3797_v33  ;;  %v813_v20 = vadd.f32 %v812_v18, %v3797_v33  ;;  %v741_v23 = vpop.f32.mrb[18].mxu0  ;;  %v814_v24 = vpop.f32.mrb[18].mxu1 }
 0x136   : > { %v849_v25 = vmax.f32 %v738_v15, 0.0  ;;  %v851_v26 = vmax.f32 %v811_v16, 0.0  ;;  %v742_v27 = vadd.f32 %v741_v23, %v3799_v34  ;;  %v815_v28 = vadd.f32 %v814_v24, %v3799_v34  ;;  %v743_v29 = vpop.f32.mrb[19].mxu0  ;;  %v816_v30 = vpop.f32.mrb[19].mxu1 }
 0x137   : > { %v850_v31 = vmax.f32 %v740_v19, 0.0  ;;  %v852_v32 = vmax.f32 %v813_v20, 0.0  ;;  %v744_v36 = vadd.f32 %v743_v29, %v3799_v34  ;;  %v817_v37 = vadd.f32 %v816_v30, %v3799_v34 }
 0x138   : > { %882 = vst [vmem:[#allocation2 + $0x100] sm:$0xff] %v849_v25  ;;  %884 = vst [vmem:[#allocation2 + $0x110] sm:$0xff] %v851_v26  ;;  %v853_v38 = vmax.f32 %v742_v27, 0.0  ;;  %v855_v39 = vmax.f32 %v815_v28, 0.0 }
 0x139   : > { %883 = vst [vmem:[#allocation2 + $0x108] sm:$0xff] %v850_v31  ;;  %885 = vst.msk [vmem:[#allocation2 + $0x118] sm:$0xff] %vm561_vm1, %v852_v32  ;;  %v854_v40 = vmax.f32 %v744_v36, 0.0  ;;  %v856_v41 = vmax.f32 %v817_v37, 0.0 }
 0x13a   : > { %886 = vst [vmem:[#allocation2 + $0x120] sm:$0xff] %v853_v38  ;;  %888 = vst [vmem:[#allocation2 + $0x130] sm:$0xff] %v855_v39 }
 0x13b   : > { %887 = vst [vmem:[#allocation2 + $0x128] sm:$0xff] %v854_v40  ;;  %889 = vst.msk [vmem:[#allocation2 + $0x138] sm:$0xff] %vm561_vm1, %v856_v41  ;;  %v747_v42 = vpop.f32.mrb[20].mxu0  ;;  %v820_v43 = vpop.f32.mrb[20].mxu1 }
 0x13c   : > { %v748_v44 = vadd.f32 %v747_v42, %v3801_v35  ;;  %v821_v45 = vadd.f32 %v820_v43, %v3801_v35  ;;  %v749_v46 = vpop.f32.mrb[21].mxu0  ;;  %v822_v47 = vpop.f32.mrb[21].mxu1 }
 0x13d   : > { %v750_v48 = vadd.f32 %v749_v46, %v3801_v35  ;;  %v823_v49 = vadd.f32 %v822_v47, %v3801_v35  ;;  %v751_v52 = vpop.f32.mrb[22].mxu0  ;;  %v824_v53 = vpop.f32.mrb[22].mxu1 }
 0x13e   : > { %v857_v54 = vmax.f32 %v748_v44, 0.0  ;;  %v859_v55 = vmax.f32 %v821_v45, 0.0  ;;  %v752_v56 = vadd.f32 %v751_v52, %v3812_v60  ;;  %v825_v57 = vadd.f32 %v824_v53, %v3812_v60  ;;  %v753_v58 = vpop.f32.mrb[23].mxu0  ;;  %v826_v59 = vpop.f32.mrb[23].mxu1 }
 0x13f   : > { %v858_v61 = vmax.f32 %v750_v48, 0.0  ;;  %v860_v62 = vmax.f32 %v823_v49, 0.0  ;;  %v754_v63 = vadd.f32 %v753_v58, %v3812_v60  ;;  %v827_v0 = vadd.f32 %v826_v59, %v3812_v60 }
 0x140   : > { %890 = vst [vmem:[#allocation2 + $0x140] sm:$0xff] %v857_v54  ;;  %892 = vst [vmem:[#allocation2 + $0x150] sm:$0xff] %v859_v55  ;;  %v861_v1 = vmax.f32 %v752_v56, 0.0  ;;  %v863_v2 = vmax.f32 %v825_v57, 0.0 }
 0x141   : > { %891 = vst [vmem:[#allocation2 + $0x148] sm:$0xff] %v858_v61  ;;  %893 = vst.msk [vmem:[#allocation2 + $0x158] sm:$0xff] %vm561_vm1, %v860_v62  ;;  %v862_v3 = vmax.f32 %v754_v63, 0.0  ;;  %v864_v4 = vmax.f32 %v827_v0, 0.0 }
 0x142   : > { %894 = vst [vmem:[#allocation2 + $0x160] sm:$0xff] %v861_v1  ;;  %896 = vst [vmem:[#allocation2 + $0x170] sm:$0xff] %v863_v2 }
 0x143   : > { %895 = vst [vmem:[#allocation2 + $0x168] sm:$0xff] %v862_v3  ;;  %897 = vst.msk [vmem:[#allocation2 + $0x178] sm:$0xff] %vm561_vm1, %v864_v4  ;;  %v757_v5 = vpop.f32.mrb[24].mxu0  ;;  %v830_v6 = vpop.f32.mrb[24].mxu1 }
 0x144   : > { %v758_v7 = vadd.f32 %v757_v5, %v3824_v21  ;;  %v831_v8 = vadd.f32 %v830_v6, %v3824_v21  ;;  %v759_v9 = vpop.f32.mrb[25].mxu0  ;;  %v832_v10 = vpop.f32.mrb[25].mxu1 }
 0x145   : > { %v760_v11 = vadd.f32 %v759_v9, %v3824_v21  ;;  %v833_v12 = vadd.f32 %v832_v10, %v3824_v21  ;;  %v761_v13 = vpop.f32.mrb[26].mxu0  ;;  %v834_v14 = vpop.f32.mrb[26].mxu1 }
 0x146   : > { %v865_v15 = vmax.f32 %v758_v7, 0.0  ;;  %v867_v16 = vmax.f32 %v831_v8, 0.0  ;;  %v762_v17 = vadd.f32 %v761_v13, %v3826_v22  ;;  %v835_v18 = vadd.f32 %v834_v14, %v3826_v22  ;;  %v763_v19 = vpop.f32.mrb[27].mxu0  ;;  %v836_v20 = vpop.f32.mrb[27].mxu1 }
 0x147   : > { %v866_v23 = vmax.f32 %v760_v11, 0.0  ;;  %v868_v24 = vmax.f32 %v833_v12, 0.0  ;;  %v764_v25 = vadd.f32 %v763_v19, %v3826_v22  ;;  %v837_v26 = vadd.f32 %v836_v20, %v3826_v22 }
 0x148   : > { %898 = vst [vmem:[#allocation2 + $0x180] sm:$0xff] %v865_v15  ;;  %900 = vst [vmem:[#allocation2 + $0x190] sm:$0xff] %v867_v16  ;;  %v869_v27 = vmax.f32 %v762_v17, 0.0  ;;  %v871_v28 = vmax.f32 %v835_v18, 0.0 }
 0x149   : > { %899 = vst [vmem:[#allocation2 + $0x188] sm:$0xff] %v866_v23  ;;  %901 = vst.msk [vmem:[#allocation2 + $0x198] sm:$0xff] %vm561_vm1, %v868_v24  ;;  %v870_v29 = vmax.f32 %v764_v25, 0.0  ;;  %v872_v30 = vmax.f32 %v837_v26, 0.0 }
 0x14a   : > { %902 = vst [vmem:[#allocation2 + $0x1a0] sm:$0xff] %v869_v27  ;;  %904 = vst [vmem:[#allocation2 + $0x1b0] sm:$0xff] %v871_v28 }
 0x14b   : > { %903 = vst [vmem:[#allocation2 + $0x1a8] sm:$0xff] %v870_v29  ;;  %905 = vst.msk [vmem:[#allocation2 + $0x1b8] sm:$0xff] %vm561_vm1, %v872_v30  ;;  %v767_v31 = vpop.f32.mrb[28].mxu0  ;;  %v840_v32 = vpop.f32.mrb[28].mxu1 }
 0x14c   : > { %v768_v36 = vadd.f32 %v767_v31, %v3838_v50  ;;  %v841_v37 = vadd.f32 %v840_v32, %v3838_v50  ;;  %v769_v38 = vpop.f32.mrb[29].mxu0  ;;  %v842_v39 = vpop.f32.mrb[29].mxu1 }
 0x14d   : > { %v770_v40 = vadd.f32 %v769_v38, %v3838_v50  ;;  %v843_v41 = vadd.f32 %v842_v39, %v3838_v50  ;;  %v771_v42 = vpop.f32.mrb[30].mxu0  ;;  %v844_v43 = vpop.f32.mrb[30].mxu1 }
 0x14e   : > { %v873_v44 = vmax.f32 %v768_v36, 0.0  ;;  %v875_v45 = vmax.f32 %v841_v37, 0.0  ;;  %v772_v46 = vadd.f32 %v771_v42, %v3840_v51  ;;  %v845_v47 = vadd.f32 %v844_v43, %v3840_v51  ;;  %v773_v48 = vpop.f32.mrb[31].mxu0  ;;  %v846_v49 = vpop.f32.mrb[31].mxu1 }
 0x14f   : > { %v874_v52 = vmax.f32 %v770_v40, 0.0  ;;  %v876_v53 = vmax.f32 %v843_v41, 0.0  ;;  %v774_v54 = vadd.f32 %v773_v48, %v3840_v51  ;;  %v847_v55 = vadd.f32 %v846_v49, %v3840_v51 }
 0x150   : > { %906 = vst [vmem:[#allocation2 + $0x1c0] sm:$0xff] %v873_v44  ;;  %908 = vst [vmem:[#allocation2 + $0x1d0] sm:$0xff] %v875_v45  ;;  %v877_v56 = vmax.f32 %v772_v46, 0.0  ;;  %v879_v57 = vmax.f32 %v845_v47, 0.0 }
 0x151   : > { %907 = vst [vmem:[#allocation2 + $0x1c8] sm:$0xff] %v874_v52  ;;  %909 = vst.msk [vmem:[#allocation2 + $0x1d8] sm:$0xff] %vm561_vm1, %v876_v53  ;;  %v878_v58 = vmax.f32 %v774_v54, 0.0  ;;  %v880_v59 = vmax.f32 %v847_v55, 0.0 }
 0x152   : > { %910 = vst [vmem:[#allocation2 + $0x1e0] sm:$0xff] %v877_v56  ;;  %912 = vst [vmem:[#allocation2 + $0x1f0] sm:$0xff] %v879_v57 }
 0x153   : > { %911 = vst [vmem:[#allocation2 + $0x1e8] sm:$0xff] %v878_v58  ;;  %913 = vst.msk [vmem:[#allocation2 + $0x1f8] sm:$0xff] %vm561_vm1, %v880_v59 }
 0x154 LB: >> { %v3573_v61 = vmov 0   ;;  %s3901_s27 = smul.u32 48, %s3567_s26  ;;  %v3361_v12 = vld [vmem:[%s4691_s1] sm:$0xff]   ;;  %v3368_v23 = vld [vmem:[%s4691_s1 + $0x8] sm:$0xff]   ;;  %v3375_v28 = vld [vmem:[%s4691_s1 + $0x10] sm:$0xff]   ;;  %vm2694_vm2 = vcmask 1042432   ;;  %s3567_s26 = sphi %s3893_s26, %s919_s26  }
 0x155   : >> { %1232 = vmatprep.mubr.bf16.mxu0 %v3573_v61  ;;  %1305 = vmatprep.mubr.bf16.mxu1 %v3573_v61  ;;  %v3382_v29 = vld [vmem:[%s4691_s1 + $0x18] sm:$0xff]   ;;  %v3383_v30 = vld [vmem:[%s4691_s1] sm:$0xff]   ;;  %v3390_v42 = vld [vmem:[%s4691_s1 + $0x8] sm:$0xff]   ;;  %vm2695_vm3 = vcmask 1043456   ;;  %vm2917_vm4 = vcmask 187396   ;;  %s3233_s25 = sshll.u32 %s3567_s26, 6 }
 0x156   : >> { %s3217_s29 = sadd.s32 32, %s3901_s27  ;;  %s3220_s6 = sadd.s32 48, %s3901_s27  ;;  %v3397_v45 = vld [vmem:[%s4691_s1 + $0x10] sm:$0xff]   ;;  %v3404_v46 = vld [vmem:[%s4691_s1 + $0x18] sm:$0xff]   ;;  %v3405_v47 = vld [vmem:[%s4691_s1] sm:$0xff]  }
 0x157   : >> { %s1083_s30 = sshra.s32 %s3217_s29, 3  ;;  %s1444_s28 = sshra.s32 %s3220_s6, 3  ;;  %v3406_v48 = vld [vmem:[%s4691_s1 + $0x8] sm:$0xff]   ;;  %v3407_v49 = vld [vmem:[%s4691_s1 + $0x10] sm:$0xff]   ;;  %v924_v52 = vld [vmem:[#allocation2 + $0x18] sm:$0xff] }
 0x158   : >> { %s3218_s18 = sshll.u32 %s1083_s30, 4  ;;  %s3221_s19 = sshll.u32 %s1444_s28, 4  ;;  %v956_v53 = vld [vmem:[#allocation2 + $0x118] sm:$0xff]  ;;  %v977_v51 = vld [vmem:[#allocation2 + $0x1c0] sm:$0xff]  ;;  %v947_v50 = vld [vmem:[#allocation2 + $0xd0] sm:$0xff] }
 0x159   : >> { %s1087_s24 = scalar_lea.vmem %s3686_s9, %s3218_s18 [#allocation4]  ;;  %s3907_s7 = scalar_lea.vmem %s3686_s9, %s3221_s19 [#allocation4]  ;;  %v988_v54 = vadd.f32 %v956_v53, %v924_v52  ;;  %v928_v55 = vld [vmem:[#allocation2 + $0x38] sm:$0xff]  ;;  %v3462_v52 = vld [vmem:[%s4693_s3 + $0xa4] ss:$8 sps:$4 sm:$0xff]   ;;  %vm4643_vm5 = vmor %vm2917_vm4, %vm2695_vm3 }
 0x15a   : >> { %v3343_v62 = vld [vmem:[%s1087_s24 + $0x4] ss:$16 sps:$4 sm:$0xff]   ;;  %v3345_v63 = vld [vmem:[%s1087_s24 + $0xc] ss:$16 sps:$4 sm:$0xff]   ;;  %v3347_v0 = vld [vmem:[%s1087_s24] ss:$16 sps:$4 sm:$0xff]  }
 0x15b   : >> { %1200 = vmatprep.subr.bf16.mxu0 %v3343_v62  ;;  %v3348_v1 = vld [vmem:[%s1087_s24 + $0x8] ss:$16 sps:$4 sm:$0xff]   ;;  %1273 = vmatprep.subr.bf16.mxu1 %v3345_v63  ;;  %v3349_v2 = vld [vmem:[%s1087_s24 + $0x24] ss:$16 sps:$4 sm:$0xff]   ;;  %v3351_v3 = vld [vmem:[%s1087_s24 + $0x2c] ss:$16 sps:$4 sm:$0xff]  }
 0x15c   : >> { %1201 = vmatpush1.bf16.msra.mxu0 %v3347_v0  ;;  %1274 = vmatpush1.bf16.msra.mxu1 %v3348_v1  ;;  %v3353_v4 = vld [vmem:[%s1087_s24 + $0x20] ss:$16 sps:$4 sm:$0xff]   ;;  %v3354_v5 = vld [vmem:[%s1087_s24 + $0x28] ss:$16 sps:$4 sm:$0xff]   ;;  %v3355_v6 = vld [vmem:[%s1087_s24 + $0x44] ss:$16 sps:$4 sm:$0xff]  }
 0x15d   : >> { %1202 = vmatprep.subr.bf16.mxu0 %v3349_v2  ;;  %1275 = vmatprep.subr.bf16.mxu1 %v3351_v3  ;;  %s3223_s8 = sadd.s32 64, %s3901_s27  ;;  %v3357_v7 = vld [vmem:[%s1087_s24 + $0x4c] ss:$16 sps:$4 sm:$0xff]   ;;  %v3359_v8 = vld [vmem:[%s1087_s24 + $0x40] ss:$16 sps:$4 sm:$0xff]   ;;  %1020 = vst.msk [vmem:[#allocation3 + $0x18] sm:$0xff] %vm561_vm1, %v988_v54  ;;  %s4648_s27 = scalar_lea.vmem %s3701_s5, %s3233_s25 }
 0x15e   : >> { %v3360_v9 = vld [vmem:[%s1087_s24 + $0x48] ss:$16 sps:$4 sm:$0xff]   ;;  %v3364_v10 = vld [vmem:[%s3907_s7 + $0x4] ss:$16 sps:$4 sm:$0xff]   ;;  %s1869_s10 = sshra.s32 %s3223_s8, 3  ;;  %s919_s26 = sadd.s32 1, %s3567_s26  }
 0x15f   : >> { %v3367_v11 = vld [vmem:[%s3907_s7 + $0xc] ss:$16 sps:$4 sm:$0xff]   ;;  %v3362_v13 = vld [vmem:[%s3907_s7] ss:$16 sps:$4 sm:$0xff]   ;;  %v3365_v14 = vld [vmem:[%s3907_s7 + $0x8] ss:$16 sps:$4 sm:$0xff]  }
 0x160   : >> { %1203 = vmatpush1.bf16.msra.mxu0 %v3353_v4  ;;  %1276 = vmatpush1.bf16.msra.mxu1 %v3354_v5  ;;  %s3224_s13 = sshll.u32 %s1869_s10, 4  ;;  %v3371_v15 = vld [vmem:[%s3907_s7 + $0x24] ss:$16 sps:$4 sm:$0xff]   ;;  %v3374_v16 = vld [vmem:[%s3907_s7 + $0x2c] ss:$16 sps:$4 sm:$0xff]   ;;  %p916_p7 = scmp.ge.s32.totalorder %s919_s26, 205  }
 0x161   : >> { %1204 = vmatprep.subr.bf16.mxu0 %v3355_v6  ;;  %1277 = vmatprep.subr.bf16.mxu1 %v3357_v7  ;;  %v3369_v17 = vld [vmem:[%s3907_s7 + $0x20] ss:$16 sps:$4 sm:$0xff]   ;;  %v3372_v18 = vld [vmem:[%s3907_s7 + $0x28] ss:$16 sps:$4 sm:$0xff]   ;;  %s3924_s14 = scalar_lea.vmem %s3686_s9, %s3224_s13 [#allocation4]  ;;  %v3378_v19 = vld [vmem:[%s3907_s7 + $0x44] ss:$16 sps:$4 sm:$0xff]  }
 0x162   : >> { %v3381_v20 = vld [vmem:[%s3907_s7 + $0x4c] ss:$16 sps:$4 sm:$0xff]   ;;  %v3376_v24 = vld [vmem:[%s3907_s7 + $0x40] ss:$16 sps:$4 sm:$0xff]   ;;  %v3379_v25 = vld [vmem:[%s3907_s7 + $0x48] ss:$16 sps:$4 sm:$0xff]  }
 0x163   : >> { %v3386_v26 = vld [vmem:[%s3924_s14 + $0x4] ss:$16 sps:$4 sm:$0xff]   ;;  %v3389_v27 = vld [vmem:[%s3924_s14 + $0xc] ss:$16 sps:$4 sm:$0xff]   ;;  %v3384_v31 = vld [vmem:[%s3924_s14] ss:$16 sps:$4 sm:$0xff]  }
 0x164   : >> { %1205 = vmatpush1.bf16.msra.mxu0 %v3359_v8  ;;  %1278 = vmatpush1.bf16.msra.mxu1 %v3360_v9  ;;  %v3387_v32 = vld [vmem:[%s3924_s14 + $0x8] ss:$16 sps:$4 sm:$0xff]   ;;  %v3393_v36 = vld [vmem:[%s3924_s14 + $0x24] ss:$16 sps:$4 sm:$0xff]   ;;  %v3396_v37 = vld [vmem:[%s3924_s14 + $0x2c] ss:$16 sps:$4 sm:$0xff]  }
 0x165   : >> { %1561 = vmatprep.subr.bf16.mxu0 %v3364_v10  ;;  %1634 = vmatprep.subr.bf16.mxu1 %v3367_v11  ;;  %v3391_v38 = vld [vmem:[%s3924_s14 + $0x20] ss:$16 sps:$4 sm:$0xff]   ;;  %v3394_v39 = vld [vmem:[%s3924_s14 + $0x28] ss:$16 sps:$4 sm:$0xff]   ;;  %v3400_v40 = vld [vmem:[%s3924_s14 + $0x44] ss:$16 sps:$4 sm:$0xff]  }
 0x166   : >> { %v3403_v41 = vld [vmem:[%s3924_s14 + $0x4c] ss:$16 sps:$4 sm:$0xff]   ;;  %v3398_v43 = vld [vmem:[%s3924_s14 + $0x40] ss:$16 sps:$4 sm:$0xff]   ;;  %v3401_v44 = vld [vmem:[%s3924_s14 + $0x48] ss:$16 sps:$4 sm:$0xff]  }
 0x167   : >> { %3080 = vmatmul.mubr.msk.bf16.vlgmr.msra.gmra.mrb[0].mxu0 %vm367_vm0, %v3361_v12  ;;  %3084 = vmatmul.mubr.msk.bf16.vlgmr.msra.gmra.mrb[0].mxu1 %vm367_vm0, %v3361_v12  ;;  %v960_v56 = vld [vmem:[#allocation2 + $0x138] sm:$0xff]  ;;  %v3409_v5 = vld [vmem:[%s4693_s3] ss:$8 sps:$4 sm:$0xff]   ;;  %v3411_v8 = vld [vmem:[%s4693_s3 + $0x4] ss:$8 sps:$4 sm:$0xff]  }
 0x168   : >> { %1562 = vmatpush1.bf16.msra.mxu0 %v3362_v13  ;;  %1635 = vmatpush1.bf16.msra.mxu1 %v3365_v14  ;;  %v992_v57 = vadd.f32 %v960_v56, %v928_v55  ;;  %v3408_v58 = vld [vmem:[%s4691_s1 + $0x18] sm:$0xff]   ;;  %v3460_v54 = vld [vmem:[%s4693_s3 + $0xa0] ss:$8 sps:$4 sm:$0xff]   ;;  %v3459_v55 = vld [vmem:[%s4693_s3 + $0x164] ss:$8 sps:$4 sm:$0xff]  }
 0x169   : >> { %1242 = vmatprep.mubr.bf16.mxu0 %v3573_v61  ;;  %1315 = vmatprep.mubr.bf16.mxu1 %v3573_v61  ;;  %v932_v59 = vld [vmem:[#allocation2 + $0x58] sm:$0xff] }
 0x16a   : >> { %1563 = vmatprep.subr.bf16.mxu0 %v3371_v15  ;;  %1636 = vmatprep.subr.bf16.mxu1 %v3374_v16  ;;  %1024 = vst.msk [vmem:[#allocation3 + $0x38] sm:$0xff] %vm561_vm1, %v992_v57  ;;  %v964_v62 = vld [vmem:[#allocation2 + $0x158] sm:$0xff]  ;;  %v3415_v15 = vld [vmem:[%s4693_s3 + $0x20] ss:$8 sps:$4 sm:$0xff]  }
 0x16b   : >> { %v996_v63 = vadd.f32 %v964_v62, %v932_v59  ;;  %v936_v0 = vld [vmem:[#allocation2 + $0x78] sm:$0xff]  ;;  %v3457_v57 = vld [vmem:[%s4693_s3 + $0x160] ss:$8 sps:$4 sm:$0xff]   ;;  %v3474_v62 = vld [vmem:[%s4693_s3 + $0xc4] ss:$8 sps:$4 sm:$0xff]  }
 0x16c   : >> { %1564 = vmatpush1.bf16.msra.mxu0 %v3369_v17  ;;  %1637 = vmatpush1.bf16.msra.mxu1 %v3372_v18  ;;  %v940_v2 = vld [vmem:[#allocation2 + $0x98] sm:$0xff]  ;;  %v3417_v18 = vld [vmem:[%s4693_s3 + $0x24] ss:$8 sps:$4 sm:$0xff]  }
 0x16d   : >> { %1565 = vmatprep.subr.bf16.mxu0 %v3378_v19  ;;  %1638 = vmatprep.subr.bf16.mxu1 %v3381_v20  ;;  %1028 = vst.msk [vmem:[#allocation3 + $0x58] sm:$0xff] %vm561_vm1, %v996_v63  ;;  %v972_v3 = vld [vmem:[#allocation2 + $0x198] sm:$0xff] }
 0x16e   : >> { %v1004_v4 = vadd.f32 %v972_v3, %v940_v2  ;;  %v944_v6 = vld [vmem:[#allocation2 + $0xb8] sm:$0xff]  ;;  %v3469_v2 = vld [vmem:[%s4693_s3 + $0x180] ss:$8 sps:$4 sm:$0xff]  }
 0x16f   : >> { %3081 = vmatmul.mubr.msk.bf16.gmra.mrb[4].mxu0 %vm367_vm0, %v3368_v23  ;;  %3085 = vmatmul.mubr.msk.bf16.gmra.mrb[4].mxu1 %vm367_vm0, %v3368_v23  ;;  %v976_v7 = vld [vmem:[#allocation2 + $0x1b8] sm:$0xff] }
 0x170   : >> { %1252 = vmatprep.mubr.bf16.mxu0 %v3573_v61  ;;  %1325 = vmatprep.mubr.bf16.mxu1 %v3573_v61  ;;  %1036 = vst.msk [vmem:[#allocation3 + $0x98] sm:$0xff] %vm561_vm1, %v1004_v4  ;;  %v1008_v9 = vadd.f32 %v976_v7, %v944_v6  ;;  %v3414_v10 = vld [vmem:[%s4693_s3 + $0x14] ss:$8 sps:$4 sm:$0xff]   ;;  %v3412_v11 = vld [vmem:[%s4693_s3 + $0x10] ss:$8 sps:$4 sm:$0xff]  }
 0x171   : >> { %1566 = vmatpush1.bf16.msra.mxu0 %v3376_v24  ;;  %1639 = vmatpush1.bf16.msra.mxu1 %v3379_v25  ;;  %v948_v12 = vld [vmem:[#allocation2 + $0xd8] sm:$0xff]  ;;  %v3426_v24 = vld [vmem:[%s4693_s3 + $0x44] ss:$8 sps:$4 sm:$0xff]   ;;  %v3424_v25 = vld [vmem:[%s4693_s3 + $0x40] ss:$8 sps:$4 sm:$0xff]  }
 0x172   : >> { %1986 = vmatprep.subr.bf16.mxu0 %v3386_v26  ;;  %2059 = vmatprep.subr.bf16.mxu1 %v3389_v27  ;;  %1040 = vst.msk [vmem:[#allocation3 + $0xb8] sm:$0xff] %vm561_vm1, %v1008_v9  ;;  %v980_v13 = vld [vmem:[#allocation2 + $0x1d8] sm:$0xff]  ;;  %v3423_v26 = vld [vmem:[%s4693_s3 + $0x104] ss:$8 sps:$4 sm:$0xff]   ;;  %v3484_v7 = vld [vmem:[%s4693_s3 + $0xe0] ss:$8 sps:$4 sm:$0xff]  }
 0x173   : >> { %v1012_v14 = vadd.f32 %v980_v13, %v948_v12  ;;  %v952_v16 = vld [vmem:[#allocation2 + $0xf8] sm:$0xff] }
 0x174   : >> { %v984_v17 = vld [vmem:[#allocation2 + $0x1f8] sm:$0xff] }
 0x175   : >> { %1044 = vst.msk [vmem:[#allocation3 + $0xd8] sm:$0xff] %vm561_vm1, %v1012_v14  ;;  %v1016_v19 = vadd.f32 %v984_v17, %v952_v16  ;;  %v3420_v20 = vld [vmem:[%s4693_s3 + $0x34] ss:$8 sps:$4 sm:$0xff]   ;;  %v3418_v23 = vld [vmem:[%s4693_s3 + $0x30] ss:$8 sps:$4 sm:$0xff]   ;;  %v2396_v14 = vld [vmem:[%s4693_s3 + $0x1c0] sm:$0xff] }
 0x176   : >> { %v3432_v27 = vld [vmem:[%s4693_s3 + $0x54] ss:$8 sps:$4 sm:$0xff]   ;;  %v3451_v53 = vld [vmem:[%s4693_s3 + $0x150] ss:$8 sps:$4 sm:$0xff]   ;;  %v3574_v16 = vmov 65535  }
 0x177   : >> { %3082 = vmatmul.mubr.msk.bf16.gmra.mrb[8].mxu0 %vm367_vm0, %v3375_v28  ;;  %3086 = vmatmul.mubr.msk.bf16.gmra.mrb[8].mxu1 %vm367_vm0, %v3375_v28  ;;  %1048 = vst.msk [vmem:[#allocation3 + $0xf8] sm:$0xff] %vm561_vm1, %v1016_v19  ;;  %v3421_v28 = vld [vmem:[%s4693_s3 + $0x100] ss:$8 sps:$4 sm:$0xff]   ;;  %v3468_v56 = vld [vmem:[%s4693_s3 + $0xb4] ss:$8 sps:$4 sm:$0xff]   ;;  %v2696_v17 = vsel %vm2694_vm2, 4294967295, %v3574_v16 }
 0x178   : >> { %1262 = vmatprep.mubr.bf16.mxu0 %v3573_v61  ;;  %1335 = vmatprep.mubr.bf16.mxu1 %v3573_v61  ;;  %v3465_v59 = vld [vmem:[%s4693_s3 + $0x174] ss:$8 sps:$4 sm:$0xff]   ;;  %v3463_v63 = vld [vmem:[%s4693_s3 + $0x170] ss:$8 sps:$4 sm:$0xff]   ;;  %v2697_v19 = vsel %vm2695_vm3, %v2696_v17, 0 }
 0x179   : >> { %v3478_v3 = vld [vmem:[%s4693_s3 + $0xd0] ss:$8 sps:$4 sm:$0xff]   ;;  %v3477_v4 = vld [vmem:[%s4693_s3 + $0x194] ss:$8 sps:$4 sm:$0xff]  }
 0x17a   : >> { %v3475_v6 = vld [vmem:[%s4693_s3 + $0x190] ss:$8 sps:$4 sm:$0xff]   ;;  %v3492_v9 = vld [vmem:[%s4693_s3 + $0xf4] ss:$8 sps:$4 sm:$0xff]  }
 0x17b   : >> { %v3489_v12 = vld [vmem:[%s4693_s3 + $0x1b4] ss:$8 sps:$4 sm:$0xff]   ;;  %v3487_v13 = vld [vmem:[%s4693_s3 + $0x1b0] ss:$8 sps:$4 sm:$0xff]  }
 0x17c   : >> { %v939_v16 = vld [vmem:[#allocation2 + $0x90] sm:$0xff] }
 0x17d   : >> { %v971_v17 = vld [vmem:[#allocation2 + $0x190] sm:$0xff] }
 0x17f   : >> { %3083 = vmatmul.mubr.msk.bf16.gmra.mrb[12].mxu0 %vm367_vm0, %v3382_v29  ;;  %3087 = vmatmul.mubr.msk.bf16.gmra.mrb[12].mxu1 %vm367_vm0, %v3382_v29  ;;  %v3430_v29 = vld [vmem:[%s4693_s3 + $0x50] ss:$8 sps:$4 sm:$0xff]  }
 0x180   : >> { %1593 = vmatprep.mubr.bf16.mxu0 %v3573_v61  ;;  %1666 = vmatprep.mubr.bf16.mxu1 %v3573_v61 }
 0x187   : >> { %3107 = vmatmul.mubr.msk.bf16.vlgmr.msra.gmra.mrb[16].mxu0 %vm367_vm0, %v3383_v30  ;;  %3111 = vmatmul.mubr.msk.bf16.vlgmr.msra.gmra.mrb[16].mxu1 %vm367_vm0, %v3383_v30  ;;  %v3429_v30 = vld [vmem:[%s4693_s3 + $0x114] ss:$8 sps:$4 sm:$0xff]  }
 0x188   : >> { %1987 = vmatpush1.bf16.msra.mxu0 %v3384_v31  ;;  %2060 = vmatpush1.bf16.msra.mxu1 %v3387_v32  ;;  %v3438_v31 = vld [vmem:[%s4693_s3 + $0x64] ss:$8 sps:$4 sm:$0xff]   ;;  %v3427_v32 = vld [vmem:[%s4693_s3 + $0x110] ss:$8 sps:$4 sm:$0xff]  }
 0x189   : >> { %1603 = vmatprep.mubr.bf16.mxu0 %v3573_v61  ;;  %1676 = vmatprep.mubr.bf16.mxu1 %v3573_v61 }
 0x18a   : >> { %1988 = vmatprep.subr.bf16.mxu0 %v3393_v36  ;;  %2061 = vmatprep.subr.bf16.mxu1 %v3396_v37  ;;  %v3436_v36 = vld [vmem:[%s4693_s3 + $0x60] ss:$8 sps:$4 sm:$0xff]   ;;  %v3435_v37 = vld [vmem:[%s4693_s3 + $0x124] ss:$8 sps:$4 sm:$0xff]  }
 0x18c   : >> { %1989 = vmatpush1.bf16.msra.mxu0 %v3391_v38  ;;  %2062 = vmatpush1.bf16.msra.mxu1 %v3394_v39  ;;  %v3444_v38 = vld [vmem:[%s4693_s3 + $0x74] ss:$8 sps:$4 sm:$0xff]   ;;  %v3433_v39 = vld [vmem:[%s4693_s3 + $0x120] ss:$8 sps:$4 sm:$0xff]  }
 0x18d   : >> { %1990 = vmatprep.subr.bf16.mxu0 %v3400_v40  ;;  %2063 = vmatprep.subr.bf16.mxu1 %v3403_v41  ;;  %v3442_v40 = vld [vmem:[%s4693_s3 + $0x70] ss:$8 sps:$4 sm:$0xff]   ;;  %v3441_v41 = vld [vmem:[%s4693_s3 + $0x134] ss:$8 sps:$4 sm:$0xff]  }
 0x18f   : >> { %3108 = vmatmul.mubr.msk.bf16.gmra.mrb[20].mxu0 %vm367_vm0, %v3390_v42  ;;  %3112 = vmatmul.mubr.msk.bf16.gmra.mrb[20].mxu1 %vm367_vm0, %v3390_v42  ;;  %v3450_v42 = vld [vmem:[%s4693_s3 + $0x84] ss:$8 sps:$4 sm:$0xff]  }
 0x190   : >> { %1613 = vmatprep.mubr.bf16.mxu0 %v3573_v61  ;;  %1686 = vmatprep.mubr.bf16.mxu1 %v3573_v61 }
 0x191   : >> { %1991 = vmatpush1.bf16.msra.mxu0 %v3398_v43  ;;  %2064 = vmatpush1.bf16.msra.mxu1 %v3401_v44  ;;  %v3439_v43 = vld [vmem:[%s4693_s3 + $0x130] ss:$8 sps:$4 sm:$0xff]   ;;  %v3448_v44 = vld [vmem:[%s4693_s3 + $0x80] ss:$8 sps:$4 sm:$0xff]  }
 0x192   : >> { %2704 = vmatprep.subr.bf16.mxu1 %v3411_v8  ;;  %2777 = vmatprep.subr.bf16.mxu0 %v3423_v26  ;;  %v3483_v8 = vld [vmem:[%s4693_s3 + $0x1a4] ss:$8 sps:$4 sm:$0xff]  }
 0x197   : >> { %3109 = vmatmul.mubr.msk.bf16.gmra.mrb[24].mxu0 %vm367_vm0, %v3397_v45  ;;  %3113 = vmatmul.mubr.msk.bf16.gmra.mrb[24].mxu1 %vm367_vm0, %v3397_v45  ;;  %v3447_v45 = vld [vmem:[%s4693_s3 + $0x144] ss:$8 sps:$4 sm:$0xff]  }
 0x198   : >> { %1623 = vmatprep.mubr.bf16.mxu0 %v3573_v61  ;;  %1696 = vmatprep.mubr.bf16.mxu1 %v3573_v61 }
 0x19f   : >> { %3110 = vmatmul.mubr.msk.bf16.gmra.mrb[28].mxu0 %vm367_vm0, %v3404_v46  ;;  %3114 = vmatmul.mubr.msk.bf16.gmra.mrb[28].mxu1 %vm367_vm0, %v3404_v46  ;;  %v3456_v46 = vld [vmem:[%s4693_s3 + $0x94] ss:$8 sps:$4 sm:$0xff]  }
 0x1a0   : >> { %2018 = vmatprep.mubr.bf16.mxu0 %v3573_v61  ;;  %2091 = vmatprep.mubr.bf16.mxu1 %v3573_v61 }
 0x1a7   : >> { %3134 = vmatmul.mubr.msk.bf16.vlgmr.msra.gmra.mrb[32].mxu0 %vm367_vm0, %v3405_v47  ;;  %3138 = vmatmul.mubr.msk.bf16.vlgmr.msra.gmra.mrb[32].mxu1 %vm367_vm0, %v3405_v47  ;;  %v3445_v47 = vld [vmem:[%s4693_s3 + $0x140] ss:$8 sps:$4 sm:$0xff]  }
 0x1a8   : >> { %2028 = vmatprep.mubr.bf16.mxu0 %v3573_v61  ;;  %2101 = vmatprep.mubr.bf16.mxu1 %v3573_v61 }
 0x1a9   : >> { %2705 = vmatpush1.bf16.msra.mxu1 %v3409_v5  ;;  %2778 = vmatpush1.bf16.msra.mxu0 %v3421_v28  ;;  %v3486_v5 = vld [vmem:[%s4693_s3 + $0xe4] ss:$8 sps:$4 sm:$0xff]  }
 0x1aa   : >> { %2706 = vmatprep.subr.bf16.mxu1 %v3414_v10  ;;  %2779 = vmatprep.subr.bf16.mxu0 %v3429_v30  ;;  %v3481_v10 = vld [vmem:[%s4693_s3 + $0x1a0] ss:$8 sps:$4 sm:$0xff]  }
 0x1ad   : >> { %2707 = vmatpush1.bf16.msra.mxu1 %v3412_v11  ;;  %2780 = vmatpush1.bf16.msra.mxu0 %v3427_v32  ;;  %v3490_v11 = vld [vmem:[%s4693_s3 + $0xf0] ss:$8 sps:$4 sm:$0xff]  }
 0x1ae   : >> { %2708 = vmatprep.subr.bf16.mxu1 %v3417_v18  ;;  %2781 = vmatprep.subr.bf16.mxu0 %v3435_v37  ;;  %v3198_v18 = vcombine.low %v2396_v14, %v2396_v14 }
 0x1af   : >> { %3135 = vmatmul.mubr.msk.bf16.gmra.mrb[36].mxu0 %vm367_vm0, %v3406_v48  ;;  %3139 = vmatmul.mubr.msk.bf16.gmra.mrb[36].mxu1 %vm367_vm0, %v3406_v48  ;;  %v3454_v48 = vld [vmem:[%s4693_s3 + $0x90] ss:$8 sps:$4 sm:$0xff]  }
 0x1b0   : >> { %2038 = vmatprep.mubr.bf16.mxu0 %v3573_v61  ;;  %2111 = vmatprep.mubr.bf16.mxu1 %v3573_v61 }
 0x1b1   : >> { %2709 = vmatpush1.bf16.msra.mxu1 %v3415_v15  ;;  %2782 = vmatpush1.bf16.msra.mxu0 %v3433_v39  ;;  %v3199_v15 = vcombine.high %v2396_v14, %v2396_v14  ;;  %v1056_v39 = vld [vmem:[#allocation3 + $0x38] sm:$0xff]  ;;  %v937_v14 = vld [vmem:[#allocation2 + $0x80] sm:$0xff] }
 0x1b2   : >> { %2710 = vmatprep.subr.bf16.mxu1 %v3420_v20  ;;  %2783 = vmatprep.subr.bf16.mxu0 %v3441_v41  ;;  %v953_v41 = vld [vmem:[#allocation2 + $0x100] sm:$0xff] }
 0x1b3   : >> { %v2702_v20 = vand.u32 %v3199_v15, %v2697_v19  ;;  %v969_v15 = vld [vmem:[#allocation2 + $0x180] sm:$0xff] }
 0x1b5   : >> { %2711 = vmatpush1.bf16.msra.mxu1 %v3418_v23  ;;  %2784 = vmatpush1.bf16.msra.mxu0 %v3439_v43  ;;  %v2699_v23 = vand.u32 %v3198_v18, %v2697_v19  ;;  %v955_v43 = vld [vmem:[#allocation2 + $0x110] sm:$0xff] }
 0x1b6   : >> { %2712 = vmatprep.subr.bf16.mxu1 %v3426_v24  ;;  %2785 = vmatprep.subr.bf16.mxu0 %v3447_v45  ;;  %v927_v45 = vld [vmem:[#allocation2 + $0x30] sm:$0xff] }
 0x1b7   : >> { %3136 = vmatmul.mubr.msk.bf16.gmra.mrb[40].mxu0 %vm367_vm0, %v3407_v49  ;;  %3140 = vmatmul.mubr.msk.bf16.gmra.mrb[40].mxu1 %vm367_vm0, %v3407_v49  ;;  %v3453_v49 = vld [vmem:[%s4693_s3 + $0x154] ss:$8 sps:$4 sm:$0xff]  }
 0x1b8   : >> { %2048 = vmatprep.mubr.bf16.mxu0 %v3573_v61  ;;  %2121 = vmatprep.mubr.bf16.mxu1 %v3573_v61  ;;  %v968_v61 = vld [vmem:[#allocation2 + $0x178] sm:$0xff] }
 0x1b9   : >> { %v1000_v1 = vadd.f32 %v968_v61, %v936_v0  ;;  %2713 = vmatpush1.bf16.msra.mxu1 %v3424_v25  ;;  %2786 = vmatpush1.bf16.msra.mxu0 %v3445_v47  ;;  %v3472_v0 = vld [vmem:[%s4693_s3 + $0xc0] ss:$8 sps:$4 sm:$0xff]   ;;  %v3471_v61 = vld [vmem:[%s4693_s3 + $0x184] ss:$8 sps:$4 sm:$0xff]  }
 0x1ba   : >> { %2714 = vmatprep.subr.bf16.mxu1 %v3432_v27  ;;  %2787 = vmatprep.subr.bf16.mxu0 %v3453_v49  ;;  %v954_v49 = vld [vmem:[#allocation2 + $0x108] sm:$0xff] }
 0x1bb   : >> { %1032 = vst.msk [vmem:[#allocation3 + $0x78] sm:$0xff] %vm561_vm1, %v1000_v1  ;;  %v3480_v1 = vld [vmem:[%s4693_s3 + $0xd4] ss:$8 sps:$4 sm:$0xff]  }
 0x1bd   : >> { %2715 = vmatpush1.bf16.msra.mxu1 %v3430_v29  ;;  %2788 = vmatpush1.bf16.msra.mxu0 %v3451_v53  ;;  %v957_v53 = vld [vmem:[#allocation2 + $0x120] sm:$0xff] }
 0x1be   : >> { %2716 = vmatprep.subr.bf16.mxu1 %v3438_v31  ;;  %2789 = vmatprep.subr.bf16.mxu0 %v3459_v55  ;;  %v1052_v31 = vld [vmem:[#allocation3 + $0x18] sm:$0xff]  ;;  %v958_v55 = vld [vmem:[#allocation2 + $0x128] sm:$0xff] }
 0x1bf   : >> { %3137 = vmatmul.mubr.msk.bf16.gmra.mrb[44].mxu0 %vm367_vm0, %v3408_v58  ;;  %3141 = vmatmul.mubr.msk.bf16.gmra.mrb[44].mxu1 %vm367_vm0, %v3408_v58  ;;  %v3466_v58 = vld [vmem:[%s4693_s3 + $0xb0] ss:$8 sps:$4 sm:$0xff]  }
 0x1c1   : >> { %2717 = vmatpush1.bf16.msra.mxu1 %v3436_v36  ;;  %2790 = vmatpush1.bf16.msra.mxu0 %v3457_v57  ;;  %v929_v57 = vld [vmem:[#allocation2 + $0x40] sm:$0xff] }
 0x1c2   : >> { %2718 = vmatprep.subr.bf16.mxu1 %v3444_v38  ;;  %2791 = vmatprep.subr.bf16.mxu0 %v3465_v59 }
 0x1c5   : >> { %2719 = vmatpush1.bf16.msra.mxu1 %v3442_v40  ;;  %2792 = vmatpush1.bf16.msra.mxu0 %v3463_v63  ;;  %v921_v40 = vld [vmem:[#allocation2] sm:$0xff]  ;;  %v963_v63 = vld [vmem:[#allocation2 + $0x150] sm:$0xff] }
 0x1c6   : >> { %2720 = vmatprep.subr.bf16.mxu1 %v3450_v42  ;;  %2793 = vmatprep.subr.bf16.mxu0 %v3471_v61  ;;  %v923_v42 = vld [vmem:[#allocation2 + $0x10] sm:$0xff]  ;;  %v930_v61 = vld [vmem:[#allocation2 + $0x48] sm:$0xff]  ;;  %v4226_v18 = vadd.f32 %v953_v41, %v921_v40  ;;  %v941_v41 = vld [vmem:[#allocation2 + $0xa0] sm:$0xff] }
 0x1c7   : >> { %v4228_v19 = vadd.f32 %v955_v43, %v923_v42  ;;  %v970_v40 = vld [vmem:[#allocation2 + $0x188] sm:$0xff]  ;;  %v973_v42 = vld [vmem:[#allocation2 + $0x1a0] sm:$0xff] }
 0x1c9   : >> { %2721 = vmatpush1.bf16.msra.mxu1 %v3448_v44  ;;  %2794 = vmatpush1.bf16.msra.mxu0 %v3469_v2 }
 0x1ca   : >> { %2722 = vmatprep.subr.bf16.mxu1 %v3456_v46  ;;  %2795 = vmatprep.subr.bf16.mxu0 %v3477_v4  ;;  %v959_v46 = vld [vmem:[#allocation2 + $0x130] sm:$0xff] }
 0x1cd   : >> { %2723 = vmatpush1.bf16.msra.mxu1 %v3454_v48  ;;  %2796 = vmatpush1.bf16.msra.mxu0 %v3475_v6  ;;  %v922_v48 = vld [vmem:[#allocation2 + $0x8] sm:$0xff]  ;;  %v967_v6 = vld [vmem:[#allocation2 + $0x170] sm:$0xff] }
 0x1ce   : >> { %2724 = vmatprep.subr.bf16.mxu1 %v3462_v52  ;;  %2797 = vmatprep.subr.bf16.mxu0 %v3483_v8  ;;  %v925_v52 = vld [vmem:[#allocation2 + $0x20] sm:$0xff] }
 0x1cf   : >> { %v933_v8 = vld [vmem:[#allocation2 + $0x60] sm:$0xff] }
 0x1d1   : >> { %2725 = vmatpush1.bf16.msra.mxu1 %v3460_v54  ;;  %2798 = vmatpush1.bf16.msra.mxu0 %v3481_v10  ;;  %v926_v54 = vld [vmem:[#allocation2 + $0x28] sm:$0xff] }
 0x1d2   : >> { %2726 = vmatprep.subr.bf16.mxu1 %v3468_v56  ;;  %2799 = vmatprep.subr.bf16.mxu0 %v3489_v12  ;;  %v934_v12 = vld [vmem:[#allocation2 + $0x68] sm:$0xff] }
 0x1d5   : >> { %2727 = vmatpush1.bf16.msra.mxu1 %v3466_v58  ;;  %2800 = vmatpush1.bf16.msra.mxu0 %v3487_v13  ;;  %v961_v58 = vld [vmem:[#allocation2 + $0x140] sm:$0xff]  ;;  %v966_v13 = vld [vmem:[#allocation2 + $0x168] sm:$0xff] }
 0x1d6   : >> { %2728 = vmatprep.subr.bf16.mxu1 %v3474_v62  ;;  %2801 = vmatprep.subr.bf16.mxu0 %v2702_v20  ;;  %v931_v62 = vld [vmem:[#allocation2 + $0x50] sm:$0xff]  ;;  %v4230_v20 = vadd.f32 %v959_v46, %v927_v45  ;;  %v4241_v45 = vadd.f32 %v958_v55, %v926_v54  ;;  %v4243_v46 = vadd.f32 %v961_v58, %v929_v57  ;;  %v946_v57 = vld [vmem:[#allocation2 + $0xc8] sm:$0xff] }
 0x1d7   : >> { %v4255_v54 = vadd.f32 %v969_v15, %v937_v14  ;;  %v4257_v55 = vadd.f32 %v971_v17, %v939_v16  ;;  %v951_v58 = vld [vmem:[#allocation2 + $0xf0] sm:$0xff]  ;;  %v4268_v17 = vadd.f32 %v973_v42, %v941_v41  ;;  %v1068_v41 = vld [vmem:[#allocation3 + $0x98] sm:$0xff] }
 0x1d8   : >> { %4704 = vst [vmem:[#allocation9_spill] sm:$0xff] %v4230_v20  ;;  %v979_v20 = vld [vmem:[#allocation2 + $0x1d0] sm:$0xff] }
 0x1d9   : >> { %2729 = vmatpush1.bf16.msra.mxu1 %v3472_v0  ;;  %2802 = vmatpush1.bf16.msra.mxu0 %v2699_v23 }
 0x1da   : >> { %2730 = vmatprep.subr.bf16.mxu1 %v3480_v1  ;;  %v962_v1 = vld [vmem:[#allocation2 + $0x148] sm:$0xff] }
 0x1dd   : >> { %2731 = vmatpush1.bf16.msra.mxu1 %v3478_v3  ;;  %v1060_v3 = vld [vmem:[#allocation3 + $0x58] sm:$0xff] }
 0x1de   : >> { %2732 = vmatprep.subr.bf16.mxu1 %v3486_v5  ;;  %v935_v5 = vld [vmem:[#allocation2 + $0x70] sm:$0xff] }
 0x1e1   : >> { %2733 = vmatpush1.bf16.msra.mxu1 %v3484_v7 }
 0x1e2   : >> { %2734 = vmatprep.subr.bf16.mxu1 %v3492_v9  ;;  %v965_v9 = vld [vmem:[#allocation2 + $0x160] sm:$0xff] }
 0x1e5   : >> { %2735 = vmatpush1.bf16.msra.mxu1 %v3490_v11 }
 0x23a   : >> { %v4199_v24 = vpop.f32.mrb[0].mxu0  ;;  %v4201_v25 = vpop.f32.mrb[0].mxu1 }
 0x23b   : >> { %v4203_v26 = vpop.f32.mrb[1].mxu0  ;;  %v1309_v27 = vpop.f32.mrb[1].mxu1  ;;  %v1235_v43 = vadd.f32 %v4199_v24, %v3797_v33  ;;  %v4253_v24 = vadd.f32 %v966_v13, %v934_v12  ;;  %v981_v12 = vld [vmem:[#allocation2 + $0x1e0] sm:$0xff] }
 0x23c   : >> { %v1310_v28 = vadd.f32 %v1309_v27, %v3797_v33  ;;  %v4206_v29 = vpop.f32.mrb[2].mxu0  ;;  %v4208_v30 = vpop.f32.mrb[2].mxu1  ;;  %v1064_v27 = vld [vmem:[#allocation3 + $0x78] sm:$0xff]  ;;  %v1237_v14 = vadd.f32 %v4203_v26, %v3797_v33 }
 0x23d   : >> { %v4210_v32 = vpop.f32.mrb[3].mxu0  ;;  %v1313_v36 = vpop.f32.mrb[3].mxu1  ;;  %v1346_v13 = vmax.f32 %v1235_v43, 0.0 }
 0x23e   : >> { %v1349_v37 = vmax.f32 %v1310_v28, 0.0  ;;  %v1314_v38 = vadd.f32 %v1313_v36, %v3799_v34  ;;  %v943_v36 = vld [vmem:[#allocation2 + $0xb0] sm:$0xff] }
 0x240   : >> { %v1381_v44 = vadd.f32 %v1349_v37, %v1052_v31  ;;  %v1353_v47 = vmax.f32 %v1314_v38, 0.0  ;;  %v938_v31 = vld [vmem:[#allocation2 + $0x88] sm:$0xff]  ;;  %v975_v37 = vld [vmem:[#allocation2 + $0x1b0] sm:$0xff]  ;;  %v4234_v38 = vadd.f32 %v954_v49, %v922_v48  ;;  %v945_v49 = vld [vmem:[#allocation2 + $0xc0] sm:$0xff] }
 0x241   : >> { %v974_v48 = vld [vmem:[#allocation2 + $0x1a8] sm:$0xff] }
 0x242   : >> { %1413 = vst.msk [vmem:[#allocation3 + $0x18] sm:$0xff] %vm561_vm1, %v1381_v44  ;;  %v1385_v56 = vadd.f32 %v1353_v47, %v1056_v39  ;;  %v4214_v59 = vpop.f32.mrb[4].mxu0  ;;  %v4216_v0 = vpop.f32.mrb[4].mxu1  ;;  %v4236_v39 = vadd.f32 %v957_v53, %v925_v52  ;;  %v4247_v52 = vadd.f32 %v962_v1, %v930_v61 }
 0x243   : >> { %v4218_v2 = vpop.f32.mrb[5].mxu0  ;;  %v1319_v4 = vpop.f32.mrb[5].mxu1 }
 0x244   : >> { %1417 = vst.msk [vmem:[#allocation3 + $0x38] sm:$0xff] %vm561_vm1, %v1385_v56  ;;  %v1320_v7 = vadd.f32 %v1319_v4, %v3801_v35  ;;  %v4222_v10 = vpop.f32.mrb[6].mxu0  ;;  %v4224_v11 = vpop.f32.mrb[6].mxu1  ;;  %4705 = vst [vmem:[#allocation10_spill] sm:$0xff] %v4236_v39  ;;  %v4245_v56 = vadd.f32 %v963_v63, %v931_v62  ;;  %v942_v4 = vld [vmem:[#allocation2 + $0xa8] sm:$0xff]  ;;  %v4251_v39 = vadd.f32 %v965_v9, %v933_v8  ;;  %v983_v62 = vld [vmem:[#allocation2 + $0x1f0] sm:$0xff] }
 0x245   : >> { %v4232_v23 = vpop.f32.mrb[7].mxu0  ;;  %v1323_v28 = vpop.f32.mrb[7].mxu1  ;;  %v1308_v63 = vadd.f32 %v4201_v25, %v3797_v33  ;;  %v978_v8 = vld [vmem:[#allocation2 + $0x1c8] sm:$0xff]  ;;  %v949_v9 = vld [vmem:[#allocation2 + $0xe0] sm:$0xff]  ;;  %v4270_v25 = vadd.f32 %v974_v48, %v942_v4  ;;  %v4284_v4 = vadd.f32 %v979_v20, %v947_v50  ;;  %v1241_v50 = vadd.f32 %v4210_v32, %v3799_v34 }
 0x246   : >> { %v1357_v44 = vmax.f32 %v1320_v7, 0.0  ;;  %v1324_v47 = vadd.f32 %v1323_v28, %v3812_v60  ;;  %v4249_v7 = vadd.f32 %v967_v6, %v935_v5  ;;  %v4262_v5 = vadd.f32 %v970_v40, %v938_v31 }
 0x247   : >> { %v4264_v6 = vadd.f32 %v975_v37, %v943_v36  ;;  %v1239_v31 = vadd.f32 %v4206_v29, %v3799_v34  ;;  %v1312_v36 = vadd.f32 %v4208_v30, %v3799_v34  ;;  %v4280_v40 = vadd.f32 %v977_v51, %v945_v49 }
 0x248   : >> { %v1389_v53 = vadd.f32 %v1357_v44, %v1060_v3  ;;  %v1361_v28 = vmax.f32 %v1324_v47, 0.0  ;;  %v982_v44 = vld [vmem:[#allocation2 + $0x1e8] sm:$0xff]  ;;  %v4286_v48 = vadd.f32 %v978_v8, %v946_v57  ;;  %v4288_v29 = vadd.f32 %v981_v12, %v949_v9  ;;  %v1072_v57 = vld [vmem:[#allocation3 + $0xb8] sm:$0xff] }
 0x249   : >> { %v4290_v30 = vadd.f32 %v983_v62, %v951_v58  ;;  %v4296_v51 = vadd.f32 %v1346_v13, %v4226_v18  ;;  %v1347_v49 = vmax.f32 %v1237_v14, 0.0  ;;  %v1245_v20 = vadd.f32 %v4214_v59, %v3801_v35 }
 0x24a   : >> { %1421 = vst.msk [vmem:[#allocation3 + $0x58] sm:$0xff] %vm561_vm1, %v1389_v53  ;;  %v1393_v61 = vadd.f32 %v1361_v28, %v1064_v27  ;;  %v1254_v1 = vpop.f32.mrb[8].mxu0  ;;  %v1327_v3 = vpop.f32.mrb[8].mxu1  ;;  %v950_v27 = vld [vmem:[#allocation2 + $0xe8] sm:$0xff]  ;;  %v1348_v53 = vmax.f32 %v1308_v63, 0.0  ;;  %v1350_v8 = vmax.f32 %v1239_v31, 0.0  ;;  %v1318_v9 = vadd.f32 %v4216_v0, %v3801_v35 }
 0x24b   : >> { %v1256_v15 = vpop.f32.mrb[9].mxu0  ;;  %v1329_v16 = vpop.f32.mrb[9].mxu1  ;;  %v1352_v58 = vmax.f32 %v1312_v36, 0.0  ;;  %v1247_v12 = vadd.f32 %v4218_v2, %v3801_v35  ;;  %v1249_v18 = vadd.f32 %v4222_v10, %v3812_v60  ;;  %v1322_v32 = vadd.f32 %v4224_v11, %v3812_v60 }
 0x24c   : >> { %1425 = vst.msk [vmem:[#allocation3 + $0x78] sm:$0xff] %vm561_vm1, %v1393_v61  ;;  %v1330_v37 = vadd.f32 %v1329_v16, %v3824_v21  ;;  %v1258_v47 = vpop.f32.mrb[10].mxu0  ;;  %v4278_v26 = vpop.f32.mrb[10].mxu1  ;;  %v4293_v16 = vadd.f32 %v982_v44, %v950_v27  ;;  %v4311_v13 = vadd.f32 %v1348_v53, %v4228_v19  ;;  %v1251_v59 = vadd.f32 %v4232_v23, %v3812_v60  ;;  %v4707_v23 = vld [vmem:[#allocation10_spill] sm:$0xff] }
 0x24d   : >> { %v4282_v42 = vpop.f32.mrb[11].mxu0  ;;  %v1333_v43 = vpop.f32.mrb[11].mxu1  ;;  %v1255_v14 = vadd.f32 %v1254_v1, %v3824_v21  ;;  %v4322_v10 = vadd.f32 %v1347_v49, %v4234_v38  ;;  %v1351_v44 = vmax.f32 %v1241_v50, 0.0  ;;  %v1354_v11 = vmax.f32 %v1245_v20, 0.0  ;;  %v4708_v1 = vld [vmem:[#allocation9_spill] sm:$0xff]  ;;  %v1076_v53 = vld [vmem:[#allocation3 + $0xd8] sm:$0xff] }
 0x24e   : >> { %v1365_v28 = vmax.f32 %v1330_v37, 0.0  ;;  %v1334_v61 = vadd.f32 %v1333_v43, %v3826_v22  ;;  %4706 = vst [vmem:[#allocation11_spill] sm:$0xff] %v4293_v16  ;;  %v1328_v19 = vadd.f32 %v1327_v3, %v3824_v21  ;;  %v4328_v37 = vadd.f32 %v1350_v8, %v4707_v23  ;;  %v4709_v38 = vld [vmem:[#allocation7_spill] sm:$0xff] }
 0x24f   : >> { %v1257_v43 = vadd.f32 %v1256_v15, %v3824_v21  ;;  %v1356_v3 = vmax.f32 %v1318_v9, 0.0  ;;  %v1355_v50 = vmax.f32 %v1247_v12, 0.0  ;;  %v1358_v20 = vmax.f32 %v1249_v18, 0.0  ;;  %v4710_v15 = vld [vmem:[#allocation8_spill] sm:$0xff]  ;;  %v1080_v12 = vld [vmem:[#allocation3 + $0xf8] sm:$0xff] }
 0x250   : >> { %v1397_v62 = vadd.f32 %v1365_v28, %v1068_v41  ;;  %v1369_v63 = vmax.f32 %v1334_v61, 0.0  ;;  %v4331_v41 = vadd.f32 %v1352_v58, %v4708_v1  ;;  %v1359_v58 = vmax.f32 %v1251_v59, 0.0 }
 0x251   : >> { %v1364_v16 = vmax.f32 %v1328_v19, 0.0  ;;  %v1259_v9 = vadd.f32 %v1258_v47, %v3826_v22  ;;  %v1363_v18 = vmax.f32 %v1257_v43, 0.0 }
 0x252   : >> { %1429 = vst.msk [vmem:[#allocation3 + $0x98] sm:$0xff] %vm561_vm1, %v1397_v62  ;;  %v1401_v0 = vadd.f32 %v1369_v63, %v1072_v57  ;;  %v4317_v27 = vpop.f32.mrb[12].mxu0  ;;  %v4319_v2 = vpop.f32.mrb[12].mxu1  ;;  %v1360_v57 = vmax.f32 %v1322_v32, 0.0  ;;  %v1362_v63 = vmax.f32 %v1255_v14, 0.0  ;;  %v4352_v32 = vadd.f32 %v4278_v26, %v3826_v22 }
 0x253   : >> { %v4325_v31 = vpop.f32.mrb[13].mxu0  ;;  %v1339_v36 = vpop.f32.mrb[13].mxu1  ;;  %v4367_v47 = vadd.f32 %v1359_v58, %v4253_v24 }
 0x254   : >> { %1433 = vst.msk [vmem:[#allocation3 + $0xb8] sm:$0xff] %vm561_vm1, %v1401_v0  ;;  %v1340_v28 = vadd.f32 %v1339_v36, %v4709_v38  ;;  %v4336_v61 = vpop.f32.mrb[14].mxu0  ;;  %v4338_v49 = vpop.f32.mrb[14].mxu1  ;;  %v4344_v0 = vadd.f32 %v1351_v44, %v4241_v45  ;;  %v4347_v36 = vadd.f32 %v1354_v11, %v4243_v46  ;;  %v4358_v45 = vadd.f32 %v1355_v50, %v4247_v52 }
 0x255   : >> { %v4340_v8 = vpop.f32.mrb[15].mxu0  ;;  %v1343_v62 = vpop.f32.mrb[15].mxu1  ;;  %v4361_v46 = vadd.f32 %v1358_v20, %v4251_v39  ;;  %v4364_v44 = vadd.f32 %v1360_v57, %v4249_v7  ;;  %v4370_v26 = vadd.f32 %v1362_v63, %v4255_v54  ;;  %v4374_v11 = vadd.f32 %v4282_v42, %v3826_v22 }
 0x256   : >> { %v1373_v23 = vmax.f32 %v1340_v28, 0.0  ;;  %v1344_v1 = vadd.f32 %v1343_v62, %v4710_v15  ;;  %v4355_v28 = vadd.f32 %v1356_v3, %v4245_v56  ;;  %v4378_v39 = vadd.f32 %v1364_v16, %v4257_v55 }
 0x257   : >> { %v1366_v7 = vmax.f32 %v1259_v9, 0.0  ;;  %v4383_v3 = vadd.f32 %v1363_v18, %v4262_v5  ;;  %v1368_v42 = vmax.f32 %v4352_v32, 0.0 }
 0x258   : >> { %v1405_v59 = vadd.f32 %v1373_v23, %v1076_v53  ;;  %v1377_v14 = vmax.f32 %v1344_v1, 0.0 }
 0x25a   : >> { %1437 = vst.msk [vmem:[#allocation3 + $0xd8] sm:$0xff] %vm561_vm1, %v1405_v59  ;;  %v1409_v56 = vadd.f32 %v1377_v14, %v1080_v12  ;;  %v1595_v52 = vpop.f32.mrb[16].mxu0  ;;  %v1668_v19 = vpop.f32.mrb[16].mxu1 }
 0x25b   : >> { %v1596_v43 = vadd.f32 %v1595_v52, %v3797_v33  ;;  %v1669_v24 = vadd.f32 %v1668_v19, %v3797_v33  ;;  %v1597_v53 = vpop.f32.mrb[17].mxu0  ;;  %v1670_v54 = vpop.f32.mrb[17].mxu1 }
 0x25c   : >> { %1441 = vst.msk [vmem:[#allocation3 + $0xf8] sm:$0xff] %vm561_vm1, %v1409_v56  ;;  %v1598_v50 = vadd.f32 %v1597_v53, %v3797_v33  ;;  %v1671_v20 = vadd.f32 %v1670_v54, %v3797_v33  ;;  %v1599_v55 = vpop.f32.mrb[18].mxu0  ;;  %v1672_v16 = vpop.f32.mrb[18].mxu1  ;;  %v1742_v56 = vld [vmem:[#allocation3 + $0x18] sm:$0xff] }
 0x25d   : >> { %v1707_v57 = vmax.f32 %v1596_v43, 0.0  ;;  %v1709_v62 = vmax.f32 %v1669_v24, 0.0  ;;  %v1600_v58 = vadd.f32 %v1599_v55, %v3799_v34  ;;  %v1673_v63 = vadd.f32 %v1672_v16, %v3799_v34  ;;  %v1601_v23 = vpop.f32.mrb[19].mxu0  ;;  %v1674_v1 = vpop.f32.mrb[19].mxu1 }
 0x25e   : >> { %v1708_v5 = vmax.f32 %v1598_v50, 0.0  ;;  %v1710_v9 = vmax.f32 %v1671_v20, 0.0  ;;  %v1602_v12 = vadd.f32 %v1601_v23, %v3799_v34  ;;  %v1675_v18 = vadd.f32 %v1674_v1, %v3799_v34 }
 0x25f   : >> { %v4394_v59 = vadd.f32 %v1707_v57, %v4296_v51  ;;  %1835 = vst [vmem:[#allocation2] sm:$0xff] %v1707_v57  ;;  %v4397_v14 = vadd.f32 %v1709_v62, %v4311_v13  ;;  %1837 = vst [vmem:[#allocation2 + $0x10] sm:$0xff] %v1709_v62  ;;  %v1711_v52 = vmax.f32 %v1600_v58, 0.0  ;;  %v1713_v19 = vmax.f32 %v1673_v63, 0.0 }
 0x260   : >> { %v4400_v43 = vadd.f32 %v1708_v5, %v4322_v10  ;;  %1836 = vst [vmem:[#allocation2 + $0x8] sm:$0xff] %v1708_v5  ;;  %v1774_v24 = vadd.f32 %v1742_v56, %v1710_v9  ;;  %1838 = vst.msk [vmem:[#allocation2 + $0x18] sm:$0xff] %vm561_vm1, %v1710_v9  ;;  %v1712_v53 = vmax.f32 %v1602_v12, 0.0  ;;  %v1714_v54 = vmax.f32 %v1675_v18, 0.0  ;;  %v1746_v10 = vld [vmem:[#allocation3 + $0x38] sm:$0xff] }
 0x261   : >> { %v4404_v51 = vadd.f32 %v1366_v7, %v4268_v17  ;;  %v1367_v50 = vmax.f32 %v4374_v11, 0.0  ;;  %v4408_v13 = vadd.f32 %v1711_v52, %v4328_v37  ;;  %1839 = vst [vmem:[#allocation2 + $0x20] sm:$0xff] %v1711_v52  ;;  %v4411_v20 = vadd.f32 %v1713_v19, %v4331_v41  ;;  %1841 = vst [vmem:[#allocation2 + $0x30] sm:$0xff] %v1713_v19 }
 0x262   : >> { %v4415_v55 = vadd.f32 %v4317_v27, %v4709_v38  ;;  %v4419_v16 = vadd.f32 %v4319_v2, %v4709_v38  ;;  %1806 = vst.msk [vmem:[#allocation3 + $0x18] sm:$0xff] %vm561_vm1, %v1774_v24  ;;  %v4423_v17 = vadd.f32 %v1712_v53, %v4344_v0  ;;  %1840 = vst [vmem:[#allocation2 + $0x28] sm:$0xff] %v1712_v53  ;;  %v1605_v41 = vpop.f32.mrb[20].mxu0  ;;  %v1678_v11 = vpop.f32.mrb[20].mxu1 }
 0x263   : >> { %v1778_v37 = vadd.f32 %v1746_v10, %v1714_v54  ;;  %1842 = vst.msk [vmem:[#allocation2 + $0x38] sm:$0xff] %vm561_vm1, %v1714_v54  ;;  %v4428_v7 = vadd.f32 %v4325_v31, %v4709_v38  ;;  %v4432_v27 = vadd.f32 %v4336_v61, %v4710_v15  ;;  %v1606_v2 = vadd.f32 %v1605_v41, %v3801_v35  ;;  %v1607_v0 = vpop.f32.mrb[21].mxu0  ;;  %v1680_v62 = vpop.f32.mrb[21].mxu1  ;;  %v1750_v10 = vld [vmem:[#allocation3 + $0x58] sm:$0xff] }
 0x264   : >> { %v1679_v57 = vadd.f32 %v1678_v11, %v3801_v35  ;;  %v4438_v58 = vadd.f32 %v4338_v49, %v4710_v15  ;;  %v4442_v63 = vadd.f32 %v4340_v8, %v4710_v15  ;;  %v1608_v31 = vadd.f32 %v1607_v0, %v3801_v35  ;;  %v1609_v23 = vpop.f32.mrb[22].mxu0  ;;  %v1682_v1 = vpop.f32.mrb[22].mxu1 }
 0x265   : >> { %1810 = vst.msk [vmem:[#allocation3 + $0x38] sm:$0xff] %vm561_vm1, %v1778_v37  ;;  %v1681_v61 = vadd.f32 %v1680_v62, %v3801_v35  ;;  %v1715_v5 = vmax.f32 %v1606_v2, 0.0  ;;  %v1610_v12 = vadd.f32 %v1609_v23, %v3812_v60  ;;  %v1683_v18 = vadd.f32 %v1682_v1, %v3812_v60  ;;  %v1611_v49 = vpop.f32.mrb[23].mxu0  ;;  %v1684_v56 = vpop.f32.mrb[23].mxu1 }
 0x266   : >> { %v1717_v9 = vmax.f32 %v1679_v57, 0.0  ;;  %v1716_v52 = vmax.f32 %v1608_v31, 0.0  ;;  %v1612_v8 = vadd.f32 %v1611_v49, %v3812_v60  ;;  %v1685_v24 = vadd.f32 %v1684_v56, %v3812_v60 }
 0x267   : >> { %v1718_v19 = vmax.f32 %v1681_v61, 0.0  ;;  %v4452_v53 = vadd.f32 %v1715_v5, %v4347_v36  ;;  %1843 = vst [vmem:[#allocation2 + $0x40] sm:$0xff] %v1715_v5  ;;  %v1719_v37 = vmax.f32 %v1610_v12, 0.0  ;;  %v1721_v41 = vmax.f32 %v1683_v18, 0.0 }
 0x268   : >> { %v4455_v54 = vadd.f32 %v1717_v9, %v4355_v28  ;;  %1845 = vst [vmem:[#allocation2 + $0x50] sm:$0xff] %v1717_v9  ;;  %v4458_v11 = vadd.f32 %v1716_v52, %v4358_v45  ;;  %1844 = vst [vmem:[#allocation2 + $0x48] sm:$0xff] %v1716_v52  ;;  %v1720_v57 = vmax.f32 %v1612_v8, 0.0  ;;  %v1722_v0 = vmax.f32 %v1685_v24, 0.0  ;;  %v1754_v45 = vld [vmem:[#allocation3 + $0x78] sm:$0xff] }
 0x269   : >> { %v1782_v2 = vadd.f32 %v1750_v10, %v1718_v19  ;;  %1846 = vst.msk [vmem:[#allocation2 + $0x58] sm:$0xff] %vm561_vm1, %v1718_v19  ;;  %v1400_v36 = vadd.f32 %v1368_v42, %v4264_v6  ;;  %v1399_v28 = vadd.f32 %v1367_v50, %v4270_v25  ;;  %v4466_v62 = vadd.f32 %v1719_v37, %v4361_v46 }
 0x26a   : >> { %1847 = vst [vmem:[#allocation2 + $0x60] sm:$0xff] %v1719_v37  ;;  %v4469_v31 = vadd.f32 %v1721_v41, %v4364_v44  ;;  %1849 = vst [vmem:[#allocation2 + $0x70] sm:$0xff] %v1721_v41  ;;  %v1370_v61 = vmax.f32 %v4415_v55, 0.0  ;;  %v1372_v23 = vmax.f32 %v4419_v16, 0.0  ;;  %v4475_v32 = vadd.f32 %v1720_v57, %v4367_v47  ;;  %v1615_v25 = vpop.f32.mrb[24].mxu0  ;;  %v1688_v46 = vpop.f32.mrb[24].mxu1 }
 0x26b   : >> { %1814 = vst.msk [vmem:[#allocation3 + $0x58] sm:$0xff] %vm561_vm1, %v1782_v2  ;;  %1848 = vst [vmem:[#allocation2 + $0x68] sm:$0xff] %v1720_v57  ;;  %v1786_v6 = vadd.f32 %v1754_v45, %v1722_v0  ;;  %v1371_v44 = vmax.f32 %v4428_v7, 0.0  ;;  %v1374_v42 = vmax.f32 %v4432_v27, 0.0  ;;  %v1616_v50 = vadd.f32 %v1615_v25, %v3824_v21  ;;  %v1617_v16 = vpop.f32.mrb[25].mxu0  ;;  %v1690_v1 = vpop.f32.mrb[25].mxu1 }
 0x26c   : >> { %1850 = vst.msk [vmem:[#allocation2 + $0x78] sm:$0xff] %vm561_vm1, %v1722_v0  ;;  %v1689_v55 = vadd.f32 %v1688_v46, %v3824_v21  ;;  %v1376_v5 = vmax.f32 %v4438_v58, 0.0  ;;  %v1375_v47 = vmax.f32 %v4442_v63, 0.0  ;;  %v1618_v9 = vadd.f32 %v1617_v16, %v3824_v21  ;;  %v1619_v18 = vpop.f32.mrb[26].mxu0  ;;  %v1692_v7 = vpop.f32.mrb[26].mxu1  ;;  %v1758_v2 = vld [vmem:[#allocation3 + $0x98] sm:$0xff] }
 0x26d   : >> { %1818 = vst.msk [vmem:[#allocation3 + $0x78] sm:$0xff] %vm561_vm1, %v1786_v6  ;;  %v1691_v12 = vadd.f32 %v1690_v1, %v3824_v21  ;;  %v1723_v49 = vmax.f32 %v1616_v50, 0.0  ;;  %v1620_v56 = vadd.f32 %v1619_v18, %v3826_v22  ;;  %v1693_v52 = vadd.f32 %v1692_v7, %v3826_v22  ;;  %v1621_v19 = vpop.f32.mrb[27].mxu0  ;;  %v1694_v8 = vpop.f32.mrb[27].mxu1 }
 0x26e   : >> { %v1725_v27 = vmax.f32 %v1689_v55, 0.0  ;;  %v1724_v24 = vmax.f32 %v1618_v9, 0.0  ;;  %v1622_v63 = vadd.f32 %v1621_v19, %v3826_v22  ;;  %v1695_v10 = vadd.f32 %v1694_v8, %v3826_v22 }
 0x26f   : >> { %v1726_v58 = vmax.f32 %v1691_v12, 0.0  ;;  %v4492_v37 = vadd.f32 %v1723_v49, %v4370_v26  ;;  %1851 = vst [vmem:[#allocation2 + $0x80] sm:$0xff] %v1723_v49  ;;  %v1727_v57 = vmax.f32 %v1620_v56, 0.0  ;;  %v1729_v0 = vmax.f32 %v1693_v52, 0.0 }
 0x270   : >> { %v4495_v41 = vadd.f32 %v1725_v27, %v4378_v39  ;;  %1853 = vst [vmem:[#allocation2 + $0x90] sm:$0xff] %v1725_v27  ;;  %v4498_v45 = vadd.f32 %v1724_v24, %v4383_v3  ;;  %1852 = vst [vmem:[#allocation2 + $0x88] sm:$0xff] %v1724_v24  ;;  %v1728_v25 = vmax.f32 %v1622_v63, 0.0  ;;  %v1730_v46 = vmax.f32 %v1695_v10, 0.0  ;;  %v1762_v39 = vld [vmem:[#allocation3 + $0xb8] sm:$0xff] }
 0x271   : >> { %v1790_v6 = vadd.f32 %v1758_v2, %v1726_v58  ;;  %1854 = vst.msk [vmem:[#allocation2 + $0x98] sm:$0xff] %vm561_vm1, %v1726_v58  ;;  %v4502_v26 = vadd.f32 %v1727_v57, %v4404_v51  ;;  %1855 = vst [vmem:[#allocation2 + $0xa0] sm:$0xff] %v1727_v57  ;;  %v4504_v50 = vadd.f32 %v1729_v0, %v1400_v36  ;;  %v1766_v10 = vld [vmem:[#allocation3 + $0xd8] sm:$0xff] }
 0x272   : >> { %1857 = vst [vmem:[#allocation2 + $0xb0] sm:$0xff] %v1729_v0  ;;  %v1402_v55 = vadd.f32 %v1370_v61, %v4280_v40  ;;  %v1404_v16 = vadd.f32 %v1372_v23, %v4284_v4  ;;  %v4509_v3 = vadd.f32 %v1728_v25, %v1399_v28  ;;  %1856 = vst [vmem:[#allocation2 + $0xa8] sm:$0xff] %v1728_v25  ;;  %v1625_v9 = vpop.f32.mrb[28].mxu0  ;;  %v1698_v51 = vpop.f32.mrb[28].mxu1  ;;  %v4711_v28 = vld [vmem:[#allocation11_spill] sm:$0xff] }
 0x273   : >> { %1822 = vst.msk [vmem:[#allocation3 + $0x98] sm:$0xff] %vm561_vm1, %v1790_v6  ;;  %v1794_v1 = vadd.f32 %v1762_v39, %v1730_v46  ;;  %1858 = vst.msk [vmem:[#allocation2 + $0xb8] sm:$0xff] %vm561_vm1, %v1730_v46  ;;  %v1403_v12 = vadd.f32 %v1371_v44, %v4286_v48  ;;  %v1406_v36 = vadd.f32 %v1374_v42, %v4288_v29  ;;  %v1627_v61 = vpop.f32.mrb[29].mxu0  ;;  %v1700_v4 = vpop.f32.mrb[29].mxu1 }
 0x274   : >> { %v1626_v18 = vadd.f32 %v1625_v9, %v4709_v38  ;;  %v1699_v40 = vadd.f32 %v1698_v51, %v4709_v38  ;;  %v1408_v23 = vadd.f32 %v1376_v5, %v4290_v30  ;;  %v1407_v7 = vadd.f32 %v1375_v47, %v4711_v28  ;;  %v1629_v56 = vpop.f32.mrb[30].mxu0  ;;  %v1702_v48 = vpop.f32.mrb[30].mxu1 }
 0x275   : >> { %1826 = vst.msk [vmem:[#allocation3 + $0xb8] sm:$0xff] %vm561_vm1, %v1794_v1  ;;  %v1628_v49 = vadd.f32 %v1627_v61, %v4709_v38  ;;  %v1701_v27 = vadd.f32 %v1700_v4, %v4709_v38  ;;  %v1630_v42 = vadd.f32 %v1629_v56, %v4710_v15  ;;  %v1703_v52 = vadd.f32 %v1702_v48, %v4710_v15  ;;  %v1631_v19 = vpop.f32.mrb[31].mxu0  ;;  %v1704_v8 = vpop.f32.mrb[31].mxu1 }
 0x276   : >> { %v1731_v44 = vmax.f32 %v1626_v18, 0.0  ;;  %v1733_v29 = vmax.f32 %v1699_v40, 0.0  ;;  %v1632_v5 = vadd.f32 %v1631_v19, %v4710_v15  ;;  %v1705_v47 = vadd.f32 %v1704_v8, %v4710_v15 }
 0x277   : >> { %v1732_v24 = vmax.f32 %v1628_v49, 0.0  ;;  %v1734_v30 = vmax.f32 %v1701_v27, 0.0  ;;  %v1735_v2 = vmax.f32 %v1630_v42, 0.0  ;;  %v1737_v57 = vmax.f32 %v1703_v52, 0.0 }
 0x278   : >> { %v4525_v58 = vadd.f32 %v1731_v44, %v1402_v55  ;;  %1859 = vst [vmem:[#allocation2 + $0xc0] sm:$0xff] %v1731_v44  ;;  %v4527_v63 = vadd.f32 %v1733_v29, %v1404_v16  ;;  %1861 = vst [vmem:[#allocation2 + $0xd0] sm:$0xff] %v1733_v29  ;;  %v1736_v25 = vmax.f32 %v1632_v5, 0.0  ;;  %v1738_v46 = vmax.f32 %v1705_v47, 0.0  ;;  %v1770_v16 = vld [vmem:[#allocation3 + $0xf8] sm:$0xff] }
 0x279   : >> { %v4529_v0 = vadd.f32 %v1732_v24, %v1403_v12  ;;  %1860 = vst [vmem:[#allocation2 + $0xc8] sm:$0xff] %v1732_v24  ;;  %v1798_v6 = vadd.f32 %v1766_v10, %v1734_v30  ;;  %1862 = vst.msk [vmem:[#allocation2 + $0xd8] sm:$0xff] %vm561_vm1, %v1734_v30  ;;  %v4532_v39 = vadd.f32 %v1735_v2, %v1406_v36  ;;  %v2167_v5 = vld [vmem:[#allocation3 + $0x18] sm:$0xff] }
 0x27a   : >> { %1863 = vst [vmem:[#allocation2 + $0xe0] sm:$0xff] %v1735_v2  ;;  %v4534_v55 = vadd.f32 %v1737_v57, %v1408_v23  ;;  %1865 = vst [vmem:[#allocation2 + $0xf0] sm:$0xff] %v1737_v57  ;;  %v4537_v1 = vadd.f32 %v1736_v25, %v1407_v7  ;;  %v1802_v9 = vadd.f32 %v1770_v16, %v1738_v46  ;;  %v2020_v51 = vpop.f32.mrb[32].mxu0  ;;  %v2093_v12 = vpop.f32.mrb[32].mxu1 }
 0x27b   : >> { %1830 = vst.msk [vmem:[#allocation3 + $0xd8] sm:$0xff] %vm561_vm1, %v1798_v6  ;;  %1864 = vst [vmem:[#allocation2 + $0xe8] sm:$0xff] %v1736_v25  ;;  %v2021_v18 = vadd.f32 %v2020_v51, %v3797_v33  ;;  %v2094_v36 = vadd.f32 %v2093_v12, %v3797_v33  ;;  %v2022_v40 = vpop.f32.mrb[33].mxu0  ;;  %v2095_v61 = vpop.f32.mrb[33].mxu1 }
 0x27c   : >> { %1866 = vst.msk [vmem:[#allocation2 + $0xf8] sm:$0xff] %vm561_vm1, %v1738_v46  ;;  %1834 = vst.msk [vmem:[#allocation3 + $0xf8] sm:$0xff] %vm561_vm1, %v1802_v9  ;;  %v2023_v4 = vadd.f32 %v2022_v40, %v3797_v33  ;;  %v2096_v23 = vadd.f32 %v2095_v61, %v3797_v33  ;;  %v2024_v28 = vpop.f32.mrb[34].mxu0  ;;  %v2097_v7 = vpop.f32.mrb[34].mxu1 }
 0x27d   : >> { %v2132_v49 = vmax.f32 %v2021_v18, 0.0  ;;  %v2134_v27 = vmax.f32 %v2094_v36, 0.0  ;;  %v2025_v56 = vadd.f32 %v2024_v28, %v3799_v34  ;;  %v2098_v48 = vadd.f32 %v2097_v7, %v3799_v34  ;;  %v2026_v44 = vpop.f32.mrb[35].mxu0  ;;  %v2099_v29 = vpop.f32.mrb[35].mxu1 }
 0x27e   : >> { %v2133_v42 = vmax.f32 %v2023_v4, 0.0  ;;  %v2135_v52 = vmax.f32 %v2096_v23, 0.0  ;;  %v2027_v19 = vadd.f32 %v2026_v44, %v3799_v34  ;;  %v2100_v8 = vadd.f32 %v2099_v29, %v3799_v34 }
 0x27f   : >> { %v2196_v24 = vadd.f32 %v2132_v49, %v4394_v59  ;;  %2260 = vst [vmem:[#allocation2 + $0x100] sm:$0xff] %v2132_v49  ;;  %v4551_v30 = vadd.f32 %v2134_v27, %v4397_v14  ;;  %2262 = vst [vmem:[#allocation2 + $0x110] sm:$0xff] %v2134_v27  ;;  %v2136_v47 = vmax.f32 %v2025_v56, 0.0  ;;  %v2138_v10 = vmax.f32 %v2098_v48, 0.0  ;;  %v2171_v14 = vld [vmem:[#allocation3 + $0x38] sm:$0xff] }
 0x280   : >> { %v2197_v2 = vadd.f32 %v2133_v42, %v4400_v43  ;;  %2261 = vst [vmem:[#allocation2 + $0x108] sm:$0xff] %v2133_v42  ;;  %v2199_v57 = vadd.f32 %v2167_v5, %v2135_v52  ;;  %2263 = vst.msk [vmem:[#allocation2 + $0x118] sm:$0xff] %vm561_vm1, %v2135_v52  ;;  %v2137_v6 = vmax.f32 %v2027_v19, 0.0  ;;  %v2139_v25 = vmax.f32 %v2100_v8, 0.0  ;;  %v2175_v5 = vld [vmem:[#allocation3 + $0x58] sm:$0xff] }
 0x281   : >> { %v2200_v46 = vadd.f32 %v2136_v47, %v4408_v13  ;;  %2264 = vst [vmem:[#allocation2 + $0x120] sm:$0xff] %v2136_v47  ;;  %v4557_v59 = vadd.f32 %v2138_v10, %v4411_v20  ;;  %2266 = vst [vmem:[#allocation2 + $0x130] sm:$0xff] %v2138_v10 }
 0x282   : >> { %2231 = vst.msk [vmem:[#allocation3 + $0x18] sm:$0xff] %vm561_vm1, %v2199_v57  ;;  %v2201_v16 = vadd.f32 %v2137_v6, %v4423_v17  ;;  %2265 = vst [vmem:[#allocation2 + $0x128] sm:$0xff] %v2137_v6  ;;  %v2203_v43 = vadd.f32 %v2171_v14, %v2139_v25  ;;  %v2030_v9 = vpop.f32.mrb[36].mxu0  ;;  %v2103_v51 = vpop.f32.mrb[36].mxu1 }
 0x283   : >> { %2267 = vst.msk [vmem:[#allocation2 + $0x138] sm:$0xff] %vm561_vm1, %v2139_v25  ;;  %v2031_v12 = vadd.f32 %v2030_v9, %v3801_v35  ;;  %v2104_v13 = vadd.f32 %v2103_v51, %v3801_v35  ;;  %v2032_v18 = vpop.f32.mrb[37].mxu0  ;;  %v2105_v36 = vpop.f32.mrb[37].mxu1  ;;  %v2324_v20 = vpack.c.bf16 %v2200_v46, %v2196_v24  ;;  %v2326_v40 = vpack.c.bf16 %v4557_v59, %v4551_v30 }
 0x284   : >> { %2235 = vst.msk [vmem:[#allocation3 + $0x38] sm:$0xff] %vm561_vm1, %v2203_v43  ;;  %v2033_v17 = vadd.f32 %v2032_v18, %v3801_v35  ;;  %v2106_v61 = vadd.f32 %v2105_v36, %v3801_v35  ;;  %v2034_v4 = vpop.f32.mrb[38].mxu0  ;;  %v2107_v23 = vpop.f32.mrb[38].mxu1  ;;  %v2325_v28 = vpack.c.bf16 %v2201_v16, %v2197_v2 }
 0x285   : >> { %v2140_v7 = vmax.f32 %v2031_v12, 0.0  ;;  %v2142_v49 = vmax.f32 %v2104_v13, 0.0  ;;  %v2035_v27 = vadd.f32 %v2034_v4, %v3812_v60  ;;  %v2108_v56 = vadd.f32 %v2107_v23, %v3812_v60  ;;  %v2036_v48 = vpop.f32.mrb[39].mxu0  ;;  %v2109_v44 = vpop.f32.mrb[39].mxu1 }
 0x286   : >> { %v2141_v29 = vmax.f32 %v2033_v17, 0.0  ;;  %v2143_v42 = vmax.f32 %v2106_v61, 0.0  ;;  %v2037_v52 = vadd.f32 %v2036_v48, %v3812_v60  ;;  %v2110_v19 = vadd.f32 %v2109_v44, %v3812_v60  ;;  %2736 = vmatprep.mubr.bf16.mxu1 %v2325_v28 }
 0x287   : >> { %v2204_v8 = vadd.f32 %v2140_v7, %v4452_v53  ;;  %2268 = vst [vmem:[#allocation2 + $0x140] sm:$0xff] %v2140_v7  ;;  %v4575_v24 = vadd.f32 %v2142_v49, %v4455_v54  ;;  %2270 = vst [vmem:[#allocation2 + $0x150] sm:$0xff] %v2142_v49  ;;  %v2144_v47 = vmax.f32 %v2035_v27, 0.0  ;;  %v2146_v10 = vmax.f32 %v2108_v56, 0.0  ;;  %2737 = vmatmul.mubr.bf16.vlgmr.msra.gmra.mrb[48].mxu1 %v2324_v20  ;;  %v2179_v54 = vld [vmem:[#allocation3 + $0x78] sm:$0xff] }
 0x288   : >> { %v2205_v2 = vadd.f32 %v2141_v29, %v4458_v11  ;;  %2269 = vst [vmem:[#allocation2 + $0x148] sm:$0xff] %v2141_v29  ;;  %v2207_v57 = vadd.f32 %v2175_v5, %v2143_v42  ;;  %2271 = vst.msk [vmem:[#allocation2 + $0x158] sm:$0xff] %vm561_vm1, %v2143_v42  ;;  %v2145_v6 = vmax.f32 %v2037_v52, 0.0  ;;  %v2147_v25 = vmax.f32 %v2110_v19, 0.0  ;;  %v2183_v5 = vld [vmem:[#allocation3 + $0x98] sm:$0xff] }
 0x289   : >> { %v2208_v46 = vadd.f32 %v2144_v47, %v4466_v62  ;;  %2272 = vst [vmem:[#allocation2 + $0x160] sm:$0xff] %v2144_v47  ;;  %v4581_v53 = vadd.f32 %v2146_v10, %v4469_v31  ;;  %2274 = vst [vmem:[#allocation2 + $0x170] sm:$0xff] %v2146_v10  ;;  %v2295_v31 = vld [vmem:[#allocation3 + $0x18] sm:$0xff] }
 0x28a   : >> { %2239 = vst.msk [vmem:[#allocation3 + $0x58] sm:$0xff] %vm561_vm1, %v2207_v57  ;;  %v2209_v14 = vadd.f32 %v2145_v6, %v4475_v32  ;;  %2273 = vst [vmem:[#allocation2 + $0x168] sm:$0xff] %v2145_v6  ;;  %v2211_v11 = vadd.f32 %v2179_v54, %v2147_v25  ;;  %v2040_v16 = vpop.f32.mrb[40].mxu0  ;;  %v2113_v43 = vpop.f32.mrb[40].mxu1 }
 0x28b   : >> { %2275 = vst.msk [vmem:[#allocation2 + $0x178] sm:$0xff] %vm561_vm1, %v2147_v25  ;;  %v2041_v9 = vadd.f32 %v2040_v16, %v3824_v21  ;;  %v2114_v62 = vadd.f32 %v2113_v43, %v3824_v21  ;;  %v2042_v51 = vpop.f32.mrb[41].mxu0  ;;  %v2115_v12 = vpop.f32.mrb[41].mxu1  ;;  %v2299_v13 = vld [vmem:[#allocation3 + $0x38] sm:$0xff]  ;;  %v2328_v18 = vpack.c.bf16 %v2208_v46, %v2204_v8  ;;  %v2330_v36 = vpack.c.bf16 %v4581_v53, %v4575_v24 }
 0x28c   : >> { %2243 = vst.msk [vmem:[#allocation3 + $0x78] sm:$0xff] %vm561_vm1, %v2211_v11  ;;  %v2043_v32 = vadd.f32 %v2042_v51, %v3824_v21  ;;  %v2116_v20 = vadd.f32 %v2115_v12, %v3824_v21  ;;  %v2044_v17 = vpop.f32.mrb[42].mxu0  ;;  %v2117_v61 = vpop.f32.mrb[42].mxu1  ;;  %v2327_v4 = vpack.c.bf16 %v2299_v13, %v2295_v31  ;;  %v2329_v23 = vpack.c.bf16 %v2209_v14, %v2205_v2  ;;  %v2187_v46 = vld [vmem:[#allocation3 + $0xb8] sm:$0xff] }
 0x28d   : >> { %v2148_v28 = vmax.f32 %v2041_v9, 0.0  ;;  %v2150_v7 = vmax.f32 %v2114_v62, 0.0  ;;  %v2045_v49 = vadd.f32 %v2044_v17, %v3826_v22  ;;  %v2118_v27 = vadd.f32 %v2117_v61, %v3826_v22  ;;  %v2046_v56 = vpop.f32.mrb[43].mxu0  ;;  %v2119_v48 = vpop.f32.mrb[43].mxu1 }
 0x28e   : >> { %v2149_v44 = vmax.f32 %v2043_v32, 0.0  ;;  %v2151_v29 = vmax.f32 %v2116_v20, 0.0  ;;  %v2047_v42 = vadd.f32 %v2046_v56, %v3826_v22  ;;  %v2120_v52 = vadd.f32 %v2119_v48, %v3826_v22  ;;  %3200 = vmatprep.mubr.msk.bf16.mxu0 %vm561_vm1, %v2327_v4  ;;  %2746 = vmatprep.mubr.bf16.mxu1 %v2329_v23  ;;  %v2191_v48 = vld [vmem:[#allocation3 + $0xd8] sm:$0xff] }
 0x28f   : >> { %v2212_v19 = vadd.f32 %v2148_v28, %v4492_v37  ;;  %2276 = vst [vmem:[#allocation2 + $0x180] sm:$0xff] %v2148_v28  ;;  %v4600_v8 = vadd.f32 %v2150_v7, %v4495_v41  ;;  %2278 = vst [vmem:[#allocation2 + $0x190] sm:$0xff] %v2150_v7  ;;  %v2152_v47 = vmax.f32 %v2045_v49, 0.0  ;;  %v2154_v10 = vmax.f32 %v2118_v27, 0.0  ;;  %2810 = vmatmul.mubr.bf16.vlgmr.msra.gmra.mrb[48].mxu0 %v2326_v40 }
 0x290   : >> { %2747 = vmatmul.mubr.bf16.gmra.mrb[52].mxu1 %v2328_v18  ;;  %v2213_v2 = vadd.f32 %v2149_v44, %v4498_v45  ;;  %2277 = vst [vmem:[#allocation2 + $0x188] sm:$0xff] %v2149_v44  ;;  %v2215_v57 = vadd.f32 %v2183_v5, %v2151_v29  ;;  %2279 = vst.msk [vmem:[#allocation2 + $0x198] sm:$0xff] %vm561_vm1, %v2151_v29  ;;  %v2153_v37 = vmax.f32 %v2047_v42, 0.0  ;;  %v2155_v6 = vmax.f32 %v2120_v52, 0.0  ;;  %v2195_v5 = vld [vmem:[#allocation3 + $0xf8] sm:$0xff] }
 0x291   : >> { %v2216_v41 = vadd.f32 %v2152_v47, %v4502_v26  ;;  %2280 = vst [vmem:[#allocation2 + $0x1a0] sm:$0xff] %v2152_v47  ;;  %v4609_v25 = vadd.f32 %v2154_v10, %v4504_v50  ;;  %2282 = vst [vmem:[#allocation2 + $0x1b0] sm:$0xff] %v2154_v10  ;;  %v2303_v50 = vld [vmem:[#allocation3 + $0x58] sm:$0xff] }
 0x292   : >> { %2247 = vst.msk [vmem:[#allocation3 + $0x98] sm:$0xff] %vm561_vm1, %v2215_v57  ;;  %v2217_v30 = vadd.f32 %v2153_v37, %v4509_v3  ;;  %2281 = vst [vmem:[#allocation2 + $0x1a8] sm:$0xff] %v2153_v37  ;;  %v2219_v45 = vadd.f32 %v2187_v46, %v2155_v6  ;;  %v2050_v59 = vpop.f32.mrb[44].mxu0  ;;  %v2123_v40 = vpop.f32.mrb[44].mxu1 }
 0x293   : >> { %2283 = vst.msk [vmem:[#allocation2 + $0x1b8] sm:$0xff] %vm561_vm1, %v2155_v6  ;;  %v2051_v54 = vadd.f32 %v2050_v59, %v4709_v38  ;;  %v2124_v26 = vadd.f32 %v2123_v40, %v4709_v38  ;;  %v2052_v14 = vpop.f32.mrb[45].mxu0  ;;  %v2125_v11 = vpop.f32.mrb[45].mxu1  ;;  %v2307_v16 = vld [vmem:[#allocation3 + $0x78] sm:$0xff]  ;;  %v2332_v43 = vpack.c.bf16 %v2216_v41, %v2212_v19  ;;  %v2334_v9 = vpack.c.bf16 %v4609_v25, %v4600_v8 }
 0x294   : >> { %2251 = vst.msk [vmem:[#allocation3 + $0xb8] sm:$0xff] %vm561_vm1, %v2219_v45  ;;  %v2053_v3 = vadd.f32 %v2052_v14, %v4709_v38  ;;  %v2126_v62 = vadd.f32 %v2125_v11, %v4709_v38  ;;  %v2054_v51 = vpop.f32.mrb[46].mxu0  ;;  %v2127_v12 = vpop.f32.mrb[46].mxu1  ;;  %v2331_v31 = vpack.c.bf16 %v2307_v16, %v2303_v50  ;;  %v2333_v13 = vpack.c.bf16 %v2217_v30, %v2213_v2 }
 0x295   : >> { %v2156_v18 = vmax.f32 %v2051_v54, 0.0  ;;  %v2158_v32 = vmax.f32 %v2124_v26, 0.0  ;;  %v2055_v20 = vadd.f32 %v2054_v51, %v4710_v15  ;;  %v2128_v17 = vadd.f32 %v2127_v12, %v4710_v15  ;;  %v2056_v61 = vpop.f32.mrb[47].mxu0  ;;  %v2129_v4 = vpop.f32.mrb[47].mxu1 }
 0x296   : >> { %v2157_v23 = vmax.f32 %v2053_v3, 0.0  ;;  %v2159_v28 = vmax.f32 %v2126_v62, 0.0  ;;  %v2057_v7 = vadd.f32 %v2056_v61, %v4710_v15  ;;  %v2130_v49 = vadd.f32 %v2129_v4, %v4710_v15  ;;  %3201 = vmatprep.mubr.msk.bf16.mxu0 %vm561_vm1, %v2331_v31  ;;  %2756 = vmatprep.mubr.bf16.mxu1 %v2333_v13 }
 0x297   : >> { %v2220_v27 = vadd.f32 %v2156_v18, %v4525_v58  ;;  %2284 = vst [vmem:[#allocation2 + $0x1c0] sm:$0xff] %v2156_v18  ;;  %v2222_v56 = vadd.f32 %v2158_v32, %v4527_v63  ;;  %2286 = vst [vmem:[#allocation2 + $0x1d0] sm:$0xff] %v2158_v32  ;;  %v2160_v44 = vmax.f32 %v2055_v20, 0.0  ;;  %v2162_v29 = vmax.f32 %v2128_v17, 0.0  ;;  %2820 = vmatmul.mubr.bf16.gmra.mrb[52].mxu0 %v2330_v36 }
 0x298   : >> { %2757 = vmatmul.mubr.bf16.gmra.mrb[56].mxu1 %v2332_v43  ;;  %v2221_v42 = vadd.f32 %v2157_v23, %v4529_v0  ;;  %2285 = vst [vmem:[#allocation2 + $0x1c8] sm:$0xff] %v2157_v23  ;;  %v2223_v52 = vadd.f32 %v2191_v48, %v2159_v28  ;;  %2287 = vst.msk [vmem:[#allocation2 + $0x1d8] sm:$0xff] %vm561_vm1, %v2159_v28  ;;  %v2161_v19 = vmax.f32 %v2057_v7, 0.0  ;;  %v2163_v58 = vmax.f32 %v2130_v49, 0.0 }
 0x299   : >> { %v2224_v8 = vadd.f32 %v2160_v44, %v4532_v39  ;;  %2288 = vst [vmem:[#allocation2 + $0x1e0] sm:$0xff] %v2160_v44  ;;  %v2226_v63 = vadd.f32 %v2162_v29, %v4534_v55  ;;  %2290 = vst [vmem:[#allocation2 + $0x1f0] sm:$0xff] %v2162_v29  ;;  %v2311_v0 = vld [vmem:[#allocation3 + $0x98] sm:$0xff] }
 0x29a   : >> { %2255 = vst.msk [vmem:[#allocation3 + $0xd8] sm:$0xff] %vm561_vm1, %v2223_v52  ;;  %v2225_v24 = vadd.f32 %v2161_v19, %v4537_v1  ;;  %2289 = vst [vmem:[#allocation2 + $0x1e8] sm:$0xff] %v2161_v19  ;;  %v2227_v53 = vadd.f32 %v2195_v5, %v2163_v58 }
 0x29b   : >> { %2291 = vst.msk [vmem:[#allocation2 + $0x1f8] sm:$0xff] %vm561_vm1, %v2163_v58  ;;  %v2315_v36 = vld [vmem:[#allocation3 + $0xb8] sm:$0xff]  ;;  %v2336_v47 = vpack.c.bf16 %v2224_v8, %v2220_v27  ;;  %v2338_v10 = vpack.c.bf16 %v2226_v63, %v2222_v56 }
 0x29c   : >> { %2259 = vst.msk [vmem:[#allocation3 + $0xf8] sm:$0xff] %vm561_vm1, %v2227_v53  ;;  %v2335_v39 = vpack.c.bf16 %v2315_v36, %v2311_v0  ;;  %v2337_v2 = vpack.c.bf16 %v2225_v24, %v2221_v42 }
 0x29e   : >> { %3202 = vmatprep.mubr.msk.bf16.mxu0 %vm561_vm1, %v2335_v39  ;;  %2766 = vmatprep.mubr.bf16.mxu1 %v2337_v2 }
 0x29f   : >> { %2830 = vmatmul.mubr.bf16.gmra.mrb[56].mxu0 %v2334_v9 }
 0x2a0   : >> { %2767 = vmatmul.mubr.bf16.gmra.mrb[60].mxu1 %v2336_v47 }
 0x2a1   : >> { %v2319_v55 = vld [vmem:[#allocation3 + $0xd8] sm:$0xff] }
 0x2a3   : >> { %v2323_v1 = vld [vmem:[#allocation3 + $0xf8] sm:$0xff] }
 0x2a4   : >> { %v2339_v57 = vpack.c.bf16 %v2323_v1, %v2319_v55 }
 0x2a6   : >> { %3203 = vmatprep.mubr.msk.bf16.mxu0 %vm561_vm1, %v2339_v57 }
 0x2a7   : >> { %2840 = vmatmul.mubr.bf16.gmra.mrb[60].mxu0 %v2338_v10 }
 0x35a   : >> { %v2738_v37 = vpop.f32.mrb[48].mxu1 }
 0x35b   : >> { %v2740_v6 = vpop.f32.mrb[49].mxu1 }
 0x35c   : >> { %v2742_v41 = vpop.f32.mrb[50].mxu1 }
 0x35d   : >> { %v2744_v25 = vpop.f32.mrb[51].mxu1 }
 0x362   : >> { %v2811_v46 = vpop.f32.mrb[48].mxu0 }
 0x363   : >> { %v2748_v30 = vpop.f32.mrb[52].mxu1  ;;  %v2812_v45 = vadd.f32 %v2811_v46, %v2738_v37  ;;  %v2813_v59 = vpop.f32.mrb[49].mxu0 }
 0x364   : >> { %v2750_v40 = vpop.f32.mrb[53].mxu1  ;;  %v2814_v54 = vadd.f32 %v2813_v59, %v2740_v6  ;;  %v2815_v26 = vpop.f32.mrb[50].mxu0 }
 0x365   : >> { %v2752_v14 = vpop.f32.mrb[54].mxu1  ;;  %v2850_v11 = vmul.f32 0.04, %v2812_v45  ;;  %v2816_v50 = vadd.f32 %v2815_v26, %v2742_v41  ;;  %v2817_v16 = vpop.f32.mrb[51].mxu0 }
 0x366   : >> { %v2754_v43 = vpop.f32.mrb[55].mxu1  ;;  %v2851_v9 = vmul.f32 0.04, %v2814_v54  ;;  %v2818_v3 = vadd.f32 %v2817_v16, %v2744_v25 }
 0x367   : >> { %v2852_v51 = vmul.f32 0.04, %v2816_v50 }
 0x368   : >> { %v3225_v12 = vpack.c.bf16 %v2851_v9, %v2850_v11  ;;  %v2853_v31 = vmul.f32 0.04, %v2818_v3 }
 0x36a   : >> { %2919 = vst.msk [vmem:[%s4648_s27] sm:$0xff] %vm4643_vm5, %v3225_v12  ;;  %v3226_v13 = vpack.c.bf16 %v2853_v31, %v2852_v51  ;;  %v2821_v18 = vpop.f32.mrb[52].mxu0 }
 0x36b   : >> { %v2758_v32 = vpop.f32.mrb[56].mxu1  ;;  %v2822_v20 = vadd.f32 %v2821_v18, %v2748_v30  ;;  %v2823_v17 = vpop.f32.mrb[53].mxu0 }
 0x36c   : >> { %v2760_v61 = vpop.f32.mrb[57].mxu1  ;;  %2920 = vst.msk [vmem:[%s4648_s27 + $0x8] sm:$0xff] %vm4643_vm5, %v3226_v13  ;;  %v2824_v4 = vadd.f32 %v2823_v17, %v2750_v40  ;;  %v2825_v23 = vpop.f32.mrb[54].mxu0 }
 0x36d   : >> { %v2762_v28 = vpop.f32.mrb[58].mxu1  ;;  %v2854_v7 = vmul.f32 0.04, %v2822_v20  ;;  %v2826_v49 = vadd.f32 %v2825_v23, %v2752_v14  ;;  %v2827_v27 = vpop.f32.mrb[55].mxu0 }
 0x36e   : >> { %v2764_v56 = vpop.f32.mrb[59].mxu1  ;;  %v2855_v48 = vmul.f32 0.04, %v2824_v4  ;;  %v2828_v44 = vadd.f32 %v2827_v27, %v2754_v43 }
 0x36f   : >> { %v2856_v29 = vmul.f32 0.04, %v2826_v49 }
 0x370   : >> { %v3227_v42 = vpack.c.bf16 %v2855_v48, %v2854_v7  ;;  %v2857_v52 = vmul.f32 0.04, %v2828_v44 }
 0x372   : >> { %2921 = vst.msk [vmem:[%s4648_s27 + $0x10] sm:$0xff] %vm4643_vm5, %v3227_v42  ;;  %v3228_v19 = vpack.c.bf16 %v2857_v52, %v2856_v29  ;;  %v2831_v58 = vpop.f32.mrb[56].mxu0 }
 0x373   : >> { %v2768_v8 = vpop.f32.mrb[60].mxu1  ;;  %v2832_v63 = vadd.f32 %v2831_v58, %v2758_v32  ;;  %v2833_v5 = vpop.f32.mrb[57].mxu0 }
 0x374   : >> { %v2770_v24 = vpop.f32.mrb[61].mxu1  ;;  %2922 = vst.msk [vmem:[%s4648_s27 + $0x18] sm:$0xff] %vm4643_vm5, %v3228_v19  ;;  %v2834_v53 = vadd.f32 %v2833_v5, %v2760_v61  ;;  %v2835_v0 = vpop.f32.mrb[58].mxu0 }
 0x375   : >> { %v2772_v36 = vpop.f32.mrb[62].mxu1  ;;  %v2858_v47 = vmul.f32 0.04, %v2832_v63  ;;  %v2836_v10 = vadd.f32 %v2835_v0, %v2762_v28  ;;  %v2837_v39 = vpop.f32.mrb[59].mxu0 }
 0x376   : >> { %v2774_v2 = vpop.f32.mrb[63].mxu1  ;;  %v2859_v55 = vmul.f32 0.04, %v2834_v53  ;;  %v2838_v1 = vadd.f32 %v2837_v39, %v2764_v56 }
 0x377   : >> { %v2860_v57 = vmul.f32 0.04, %v2836_v10 }
 0x378   : >> { %v3229_v37 = vpack.c.bf16 %v2859_v55, %v2858_v47  ;;  %v2861_v6 = vmul.f32 0.04, %v2838_v1 }
 0x37a   : >> { %2923 = vst.msk [vmem:[%s4648_s27 + $0x20] sm:$0xff] %vm4643_vm5, %v3229_v37  ;;  %v3230_v41 = vpack.c.bf16 %v2861_v6, %v2860_v57  ;;  %v2841_v25 = vpop.f32.mrb[60].mxu0 }
 0x37b   : >> { %v2842_v46 = vadd.f32 %v2841_v25, %v2768_v8  ;;  %v2843_v30 = vpop.f32.mrb[61].mxu0 }
 0x37c   : >> { %2924 = vst.msk [vmem:[%s4648_s27 + $0x28] sm:$0xff] %vm4643_vm5, %v3230_v41  ;;  %v2844_v45 = vadd.f32 %v2843_v30, %v2770_v24  ;;  %v2845_v59 = vpop.f32.mrb[62].mxu0 }
 0x37d   : >> { %v2862_v40 = vmul.f32 0.04, %v2842_v46  ;;  %v2846_v54 = vadd.f32 %v2845_v59, %v2772_v36  ;;  %v2847_v26 = vpop.f32.mrb[63].mxu0 }
 0x37e   : >> { %v2863_v14 = vmul.f32 0.04, %v2844_v45  ;;  %v2848_v11 = vadd.f32 %v2847_v26, %v2774_v2  ;;  %918 = sbr.rel (!%p916_p7) target bundleno = 340 (0x154), region = 88 }
 0x37f   : >> { %v2864_v50 = vmul.f32 0.04, %v2846_v54 }
 0x380   : >> { %v3231_v16 = vpack.c.bf16 %v2863_v14, %v2862_v40  ;;  %v2865_v43 = vmul.f32 0.04, %v2848_v11 }
 0x382   : >> { %2925 = vst.msk [vmem:[%s4648_s27 + $0x30] sm:$0xff] %vm4643_vm5, %v3231_v16  ;;  %v3232_v9 = vpack.c.bf16 %v2865_v43, %v2864_v50 }
 0x384   : >> { %2926 = vst.msk [vmem:[%s4648_s27 + $0x38] sm:$0xff] %vm4643_vm5, %v3232_v9 }
 0x385 PF: > { %p14_p9 = scmp.ge.s32.totalorder %s3622_s20, 4   ;;  %s4714_s15 = smov %s3555_s16 }
 0x386   : > { %s4715_s16 = smov %s3559_s17  ;;  %s4716_s17 = smov %s3632_s23 }
 0x387   : > { %s4717_s18 = smov %s3622_s20  ;;  %16 = sbr.rel (!%p14_p9) target bundleno = 3 (0x3), region = 99 }
 0x38e   :  { %2948 = vsyncpa [#allocation5], 1 }
 0x38f   :  { %2950 = vsyncpa [#allocation5 + $0x1], 1 }

// kernel: deep_q_forward.5
= control target key start
LH: loop header
LB: loop body
LE: loop exit
PB: predicated region body
PF: predicated region fallthrough
CT: control target
= control target key end

     0   :  { %s5519_s15 = smov 0   ;;  %s7237_s0 = inlined_call_operand.vmem [shape: bf16[2,13120,151], index: 0, kind: input, shape index: {}]   ;;  %s7238_s1 = inlined_call_operand.vmem [shape: bf16[3,64,192], index: 1, kind: input, shape index: {}]   ;;  %s7239_s2 = inlined_call_operand.vmem [shape: f32[64,1], index: 2, kind: input, shape index: {}]   ;;  %s7240_s3 = inlined_call_operand.vmem [shape: bf16[149,49], index: 3, kind: input, shape index: {}]   ;;  %s7241_s4 = inlined_call_operand.vmem [shape: bf16[2,67,64,49], index: 4, kind: output, shape index: {}]  }
   0x1 LB: > { %s4593_s16 = sadd.s32 4294967295, %s5481_s15   ;;  %p4597_p0 = scmp.ge.s32.totalorder %s5481_s15, 1  ;;  %s5481_s15 = sphi %s5519_s15, %s14_s15  }
   0x2   : > { %p162_p1 = scmp.lt.s32.totalorder %s5481_s15, 3 }
   0x4   : > { %p163_p2 = pnand %p4597_p0, %p162_p1 }
   0x5   : > { %p188_p3 = scmp.lt.s32.totalorder (!%p163_p2), %s4593_s16, 1  ;;  %s5487_s25 = smov (!%p163_p2), 127   ;;  %v5273_v28 = vld [vmem:[%s7238_s1 + $0x44] ss:$8 sps:$4 sm:$0xff] (!%p163_p2)   ;;  %vm465_vm0 = vcmask (!%p163_p2), 523264   ;;  %vm428_vm1 = vcmask (!%p163_p2), 1039360  }
   0x6   : > { %166 = sbr.rel (%p163_p2) target bundleno = 1456 (0x5b0), region = 36  ;;  %4640 = vmatprep.mubr.msk.bf16.mxu0 (!%p163_p2), %vm465_vm0, %v5273_v28  ;;  %4716 = vmatprep.mubr.msk.bf16.mxu1 (!%p163_p2), %vm465_vm0, %v5273_v28  ;;  %s5488_s28 = smov (!%p163_p2), 126   ;;  %vm789_vm2 = vcmask (!%p163_p2), 1031168   ;;  %vm1000_vm3 = vcmask (!%p163_p2), 171008  }
   0x7   : > { %s6189_s20 = smov (!%p163_p2), 0  }
   0xd   : > { %s7306_s16 = smov (!%p188_p3, %s4593_s16), 1 }
   0xe   : > { %s5196_s17 = smul.u32 13120, %s7306_s16 }
   0xf   : > { %s5197_s18 = smul.u32 2144, %s7306_s16 }
  0x10   : > { %s5530_s21 = scalar_lea.vmem %s7237_s0, %s5196_s17 }
  0x11   : > { %s5535_s24 = scalar_lea.vmem %s7241_s4, %s5197_s18  ;;  %v5538_v0 = vld [vmem:[%s5530_s21 + $0x40] ss:$8 sps:$4 sm:$0xff]   ;;  %v5546_v2 = vld [vmem:[%s5530_s21 + $0x44] ss:$8 sps:$4 sm:$0xff]   ;;  %v5556_v4 = vld [vmem:[%s5530_s21 + $0x14] ss:$8 sps:$4 sm:$0xff]  }
  0x12   : > { %v5541_v1 = vld [vmem:[%s5530_s21] ss:$8 sps:$4 sm:$0xff]   ;;  %1188 = vrot.lane.b32.xlu1 %v5538_v0, %s5487_s25  ;;  %v5551_v3 = vld [vmem:[%s5530_s21 + $0x4] ss:$8 sps:$4 sm:$0xff]   ;;  %v5561_v5 = vld [vmem:[%s5530_s21 + $0x10] ss:$8 sps:$4 sm:$0xff]  }
  0x13   : > { %380 = vrot.lane.b32.xlu0 %v5541_v1, %s5487_s25  ;;  %v5566_v6 = vld [vmem:[%s5530_s21 + $0x54] ss:$8 sps:$4 sm:$0xff]   ;;  %v5571_v7 = vld [vmem:[%s5530_s21 + $0x50] ss:$8 sps:$4 sm:$0xff]   ;;  %v5576_v8 = vld [vmem:[%s5530_s21 + $0x24] ss:$8 sps:$4 sm:$0xff]  }
  0x14   : > { %v5581_v9 = vld [vmem:[%s5530_s21 + $0x20] ss:$8 sps:$4 sm:$0xff]   ;;  %v5586_v10 = vld [vmem:[%s5530_s21 + $0x64] ss:$8 sps:$4 sm:$0xff]   ;;  %v5596_v12 = vld [vmem:[%s5530_s21 + $0x34] ss:$8 sps:$4 sm:$0xff]  }
  0x15   : > { %v5591_v11 = vld [vmem:[%s5530_s21 + $0x60] ss:$8 sps:$4 sm:$0xff]   ;;  %v5601_v13 = vld [vmem:[%s5530_s21 + $0x30] ss:$8 sps:$4 sm:$0xff]   ;;  %v5606_v14 = vld [vmem:[%s5530_s21 + $0x74] ss:$8 sps:$4 sm:$0xff]  }
  0x16   : > { %1190 = vrot.lane.b32.xlu1 %v5546_v2, %s5487_s25  ;;  %v5611_v15 = vld [vmem:[%s5530_s21 + $0x70] ss:$8 sps:$4 sm:$0xff]   ;;  %v5620_v16 = vld [vmem:[%s5530_s21 + $0x84] ss:$8 sps:$4 sm:$0xff]   ;;  %v5625_v17 = vld [vmem:[%s5530_s21 + $0x80] ss:$8 sps:$4 sm:$0xff]  }
  0x17   : > { %382 = vrot.lane.b32.xlu0 %v5551_v3, %s5487_s25  ;;  %v5634_v18 = vld [vmem:[%s5530_s21 + $0x94] ss:$8 sps:$4 sm:$0xff]   ;;  %v5639_v19 = vld [vmem:[%s5530_s21 + $0x90] ss:$8 sps:$4 sm:$0xff]   ;;  %v5648_v20 = vld [vmem:[%s5530_s21 + $0xa4] ss:$8 sps:$4 sm:$0xff]  }
  0x18   : > { %v5653_v21 = vld [vmem:[%s5530_s21 + $0xa0] ss:$8 sps:$4 sm:$0xff]   ;;  %v5662_v22 = vld [vmem:[%s5530_s21 + $0xb4] ss:$8 sps:$4 sm:$0xff]   ;;  %v5667_v23 = vld [vmem:[%s5530_s21 + $0xb0] ss:$8 sps:$4 sm:$0xff]  }
  0x19   : > { %v5676_v24 = vld [vmem:[%s5530_s21 + $0xc4] ss:$8 sps:$4 sm:$0xff]   ;;  %v5681_v25 = vld [vmem:[%s5530_s21 + $0xc0] ss:$8 sps:$4 sm:$0xff]   ;;  %v5690_v26 = vld [vmem:[%s5530_s21 + $0xd4] ss:$8 sps:$4 sm:$0xff]  }
  0x1a   : > { %386 = vrot.lane.b32.xlu1 %v5556_v4, %s5487_s25  ;;  %v5695_v27 = vld [vmem:[%s5530_s21 + $0xd0] ss:$8 sps:$4 sm:$0xff]   ;;  %v5707_v29 = vld [vmem:[%s5530_s21 + $0xe4] ss:$8 sps:$4 sm:$0xff]   ;;  %v5712_v30 = vld [vmem:[%s5530_s21 + $0xe0] ss:$8 sps:$4 sm:$0xff]  }
  0x1b   : > { %384 = vrot.lane.b32.xlu0 %v5561_v5, %s5487_s25  ;;  %v5723_v31 = vld [vmem:[%s5530_s21 + $0xf4] ss:$8 sps:$4 sm:$0xff]   ;;  %v5728_v32 = vld [vmem:[%s5530_s21 + $0xf0] ss:$8 sps:$4 sm:$0xff]  }
  0x1e   : > { %1194 = vrot.lane.b32.xlu1 %v5566_v6, %s5487_s25 }
  0x1f   : > { %1192 = vrot.lane.b32.xlu0 %v5571_v7, %s5487_s25 }
  0x22   : > { %390 = vrot.lane.b32.xlu1 %v5576_v8, %s5487_s25 }
  0x23   : > { %388 = vrot.lane.b32.xlu0 %v5581_v9, %s5487_s25 }
  0x26   : > { %1198 = vrot.lane.b32.xlu1 %v5586_v10, %s5487_s25 }
  0x27   : > { %1196 = vrot.lane.b32.xlu0 %v5591_v11, %s5487_s25 }
  0x2a   : > { %394 = vrot.lane.b32.xlu1 %v5596_v12, %s5487_s25 }
  0x2b   : > { %392 = vrot.lane.b32.xlu0 %v5601_v13, %s5487_s25 }
  0x2e   : > { %1202 = vrot.lane.b32.xlu1 %v5606_v14, %s5487_s25 }
  0x2f   : > { %1200 = vrot.lane.b32.xlu0 %v5611_v15, %s5487_s25 }
  0x32   : > { %398 = vrot.lane.b32.xlu1 %v5546_v2, %s5487_s25 }
  0x33   : > { %396 = vrot.lane.b32.xlu0 %v5538_v0, %s5487_s25 }
  0x36   : > { %1206 = vrot.lane.b32.xlu1 %v5620_v16, %s5487_s25 }
  0x37   : > { %1204 = vrot.lane.b32.xlu0 %v5625_v17, %s5487_s25 }
  0x3a   : > { %402 = vrot.lane.b32.xlu1 %v5566_v6, %s5487_s25 }
  0x3b   : > { %400 = vrot.lane.b32.xlu0 %v5571_v7, %s5487_s25 }
  0x3e   : > { %1210 = vrot.lane.b32.xlu1 %v5634_v18, %s5487_s25 }
  0x3f   : > { %1208 = vrot.lane.b32.xlu0 %v5639_v19, %s5487_s25 }
  0x42   : > { %406 = vrot.lane.b32.xlu1 %v5586_v10, %s5487_s25 }
  0x43   : > { %404 = vrot.lane.b32.xlu0 %v5591_v11, %s5487_s25 }
  0x46   : > { %1214 = vrot.lane.b32.xlu1 %v5648_v20, %s5487_s25 }
  0x47   : > { %1212 = vrot.lane.b32.xlu0 %v5653_v21, %s5487_s25 }
  0x4a   : > { %410 = vrot.lane.b32.xlu1 %v5606_v14, %s5487_s25 }
  0x4b   : > { %408 = vrot.lane.b32.xlu0 %v5611_v15, %s5487_s25 }
  0x4e   : > { %1218 = vrot.lane.b32.xlu1 %v5662_v22, %s5487_s25 }
  0x4f   : > { %1216 = vrot.lane.b32.xlu0 %v5667_v23, %s5487_s25 }
  0x52   : > { %414 = vrot.lane.b32.xlu1 %v5620_v16, %s5487_s25 }
  0x53   : > { %412 = vrot.lane.b32.xlu0 %v5625_v17, %s5487_s25 }
  0x56   : > { %1222 = vrot.lane.b32.xlu1 %v5676_v24, %s5487_s25 }
  0x57   : > { %1220 = vrot.lane.b32.xlu0 %v5681_v25, %s5487_s25 }
  0x5a   : > { %418 = vrot.lane.b32.xlu1 %v5634_v18, %s5487_s25 }
  0x5b   : > { %416 = vrot.lane.b32.xlu0 %v5639_v19, %s5487_s25 }
  0x5e   : > { %1226 = vrot.lane.b32.xlu1 %v5690_v26, %s5487_s25 }
  0x5f   : > { %1224 = vrot.lane.b32.xlu0 %v5695_v27, %s5487_s25 }
  0x62   : > { %422 = vrot.lane.b32.xlu1 %v5648_v20, %s5487_s25 }
  0x63   : > { %420 = vrot.lane.b32.xlu0 %v5653_v21, %s5487_s25 }
  0x66   : > { %1230 = vrot.lane.b32.xlu1 %v5707_v29, %s5487_s25 }
  0x67   : > { %1228 = vrot.lane.b32.xlu0 %v5712_v30, %s5487_s25 }
  0x6a   : > { %426 = vrot.lane.b32.xlu1 %v5662_v22, %s5487_s25 }
  0x6b   : > { %424 = vrot.lane.b32.xlu0 %v5667_v23, %s5487_s25 }
  0x6e   : > { %1234 = vrot.lane.b32.xlu1 %v5723_v31, %s5487_s25 }
  0x6f   : > { %1232 = vrot.lane.b32.xlu0 %v5728_v32, %s5487_s25 }
  0x72   : > { %743 = vrot.lane.b32.xlu1 %v5551_v3, %s5488_s28 }
  0x73   : > { %741 = vrot.lane.b32.xlu0 %v5541_v1, %s5488_s28 }
  0x76   : > { %1548 = vrot.lane.b32.xlu1 %v5546_v2, %s5488_s28 }
  0x77   : > { %1546 = vrot.lane.b32.xlu0 %v5538_v0, %s5488_s28 }
  0x7a   : > { %747 = vrot.lane.b32.xlu1 %v5556_v4, %s5488_s28 }
  0x7b   : > { %745 = vrot.lane.b32.xlu0 %v5561_v5, %s5488_s28 }
  0x7e   : > { %1552 = vrot.lane.b32.xlu1 %v5566_v6, %s5488_s28 }
  0x7f   : > { %1550 = vrot.lane.b32.xlu0 %v5571_v7, %s5488_s28 }
  0x82   : > { %751 = vrot.lane.b32.xlu1 %v5576_v8, %s5488_s28 }
  0x83   : > { %749 = vrot.lane.b32.xlu0 %v5581_v9, %s5488_s28 }
  0x84   : > { %v1189_v33 = vpop.permute.xlu1 %1188 }
  0x85   : > { %v381_v34 = vpop.permute.xlu0 %380 }
  0x86   : > { %1556 = vrot.lane.b32.xlu1 %v5586_v10, %s5488_s28 }
  0x87   : > { %1554 = vrot.lane.b32.xlu0 %v5591_v11, %s5488_s28 }
  0x88   : > { %v1191_v35 = vpop.permute.xlu1 %1190 }
  0x89   : > { %v383_v36 = vpop.permute.xlu0 %382  ;;  %1284 = vmatprep.subr.bf16.mxu1 %v1191_v35  ;;  %v1236_v37 = vsel %vm428_vm1, %v1189_v33, %v1191_v35 }
  0x8a   : > { %478 = vmatprep.subr.bf16.mxu0 %v383_v36  ;;  %1285 = vmatpush1.bf16.msra.mxu1 %v1236_v37  ;;  %v429_v38 = vsel %vm428_vm1, %v381_v34, %v383_v36 }
  0x8b   : > { %755 = vrot.lane.b32.xlu1 %v5596_v12, %s5488_s28  ;;  %753 = vrot.lane.b32.xlu0 %v5601_v13, %s5488_s28 }
  0x8c   : > { %479 = vmatpush1.bf16.msra.mxu0 %v429_v38  ;;  %v387_v39 = vpop.permute.xlu1 %386 }
  0x8d   : > { %v385_v40 = vpop.permute.xlu0 %384  ;;  %480 = vmatprep.subr.bf16.mxu0 %v387_v39 }
  0x8e   : > { %v430_v41 = vsel %vm428_vm1, %v385_v40, %v387_v39 }
  0x8f   : > { %1560 = vrot.lane.b32.xlu1 %v5606_v14, %s5488_s28  ;;  %1558 = vrot.lane.b32.xlu0 %v5611_v15, %s5488_s28 }
  0x90   : > { %481 = vmatpush1.bf16.msra.mxu0 %v430_v41  ;;  %v1195_v42 = vpop.permute.xlu1 %1194 }
  0x91   : > { %v1193_v43 = vpop.permute.xlu0 %1192  ;;  %1286 = vmatprep.subr.bf16.mxu1 %v1195_v42 }
  0x92   : > { %v1237_v44 = vsel %vm428_vm1, %v1193_v43, %v1195_v42 }
  0x93   : > { %759 = vrot.lane.b32.xlu1 %v5546_v2, %s5488_s28  ;;  %757 = vrot.lane.b32.xlu0 %v5538_v0, %s5488_s28 }
  0x94   : > { %1287 = vmatpush1.bf16.msra.mxu1 %v1237_v44  ;;  %v391_v45 = vpop.permute.xlu1 %390 }
  0x95   : > { %v389_v46 = vpop.permute.xlu0 %388  ;;  %482 = vmatprep.subr.bf16.mxu0 %v391_v45 }
  0x96   : > { %v431_v47 = vsel %vm428_vm1, %v389_v46, %v391_v45 }
  0x97   : > { %1564 = vrot.lane.b32.xlu1 %v5620_v16, %s5488_s28  ;;  %1562 = vrot.lane.b32.xlu0 %v5625_v17, %s5488_s28 }
  0x98   : > { %483 = vmatpush1.bf16.msra.mxu0 %v431_v47  ;;  %v1199_v48 = vpop.permute.xlu1 %1198 }
  0x99   : > { %v1197_v49 = vpop.permute.xlu0 %1196  ;;  %1288 = vmatprep.subr.bf16.mxu1 %v1199_v48 }
  0x9a   : > { %v1238_v50 = vsel %vm428_vm1, %v1197_v49, %v1199_v48 }
  0x9b   : > { %763 = vrot.lane.b32.xlu1 %v5566_v6, %s5488_s28  ;;  %761 = vrot.lane.b32.xlu0 %v5571_v7, %s5488_s28 }
  0x9c   : > { %1289 = vmatpush1.bf16.msra.mxu1 %v1238_v50  ;;  %v395_v51 = vpop.permute.xlu1 %394 }
  0x9d   : > { %v393_v52 = vpop.permute.xlu0 %392  ;;  %484 = vmatprep.subr.bf16.mxu0 %v395_v51 }
  0x9e   : > { %v432_v53 = vsel %vm428_vm1, %v393_v52, %v395_v51 }
  0x9f   : > { %1568 = vrot.lane.b32.xlu1 %v5634_v18, %s5488_s28  ;;  %1566 = vrot.lane.b32.xlu0 %v5639_v19, %s5488_s28 }
  0xa0   : > { %485 = vmatpush1.bf16.msra.mxu0 %v432_v53  ;;  %v1203_v54 = vpop.permute.xlu1 %1202 }
  0xa1   : > { %v1201_v55 = vpop.permute.xlu0 %1200  ;;  %1290 = vmatprep.subr.bf16.mxu1 %v1203_v54 }
  0xa2   : > { %v1239_v56 = vsel %vm428_vm1, %v1201_v55, %v1203_v54 }
  0xa3   : > { %767 = vrot.lane.b32.xlu1 %v5586_v10, %s5488_s28  ;;  %765 = vrot.lane.b32.xlu0 %v5591_v11, %s5488_s28 }
  0xa4   : > { %1291 = vmatpush1.bf16.msra.mxu1 %v1239_v56  ;;  %v399_v57 = vpop.permute.xlu1 %398 }
  0xa5   : > { %v397_v58 = vpop.permute.xlu0 %396  ;;  %486 = vmatprep.subr.bf16.mxu0 %v399_v57 }
  0xa6   : > { %v433_v59 = vsel %vm428_vm1, %v397_v58, %v399_v57 }
  0xa7   : > { %1572 = vrot.lane.b32.xlu1 %v5648_v20, %s5488_s28  ;;  %1570 = vrot.lane.b32.xlu0 %v5653_v21, %s5488_s28 }
  0xa8   : > { %487 = vmatpush1.bf16.msra.mxu0 %v433_v59  ;;  %v1207_v60 = vpop.permute.xlu1 %1206 }
  0xa9   : > { %v1205_v61 = vpop.permute.xlu0 %1204  ;;  %1292 = vmatprep.subr.bf16.mxu1 %v1207_v60 }
  0xaa   : > { %v1240_v62 = vsel %vm428_vm1, %v1205_v61, %v1207_v60 }
  0xab   : > { %771 = vrot.lane.b32.xlu1 %v5606_v14, %s5488_s28  ;;  %769 = vrot.lane.b32.xlu0 %v5611_v15, %s5488_s28 }
  0xac   : > { %1293 = vmatpush1.bf16.msra.mxu1 %v1240_v62  ;;  %v403_v63 = vpop.permute.xlu1 %402 }
  0xad   : > { %v401_v28 = vpop.permute.xlu0 %400  ;;  %488 = vmatprep.subr.bf16.mxu0 %v403_v63 }
  0xae   : > { %v434_v33 = vsel %vm428_vm1, %v401_v28, %v403_v63 }
  0xaf   : > { %1576 = vrot.lane.b32.xlu1 %v5662_v22, %s5488_s28  ;;  %1574 = vrot.lane.b32.xlu0 %v5667_v23, %s5488_s28 }
  0xb0   : > { %489 = vmatpush1.bf16.msra.mxu0 %v434_v33  ;;  %v1211_v34 = vpop.permute.xlu1 %1210 }
  0xb1   : > { %v1209_v35 = vpop.permute.xlu0 %1208  ;;  %1294 = vmatprep.subr.bf16.mxu1 %v1211_v34 }
  0xb2   : > { %v1241_v36 = vsel %vm428_vm1, %v1209_v35, %v1211_v34 }
  0xb3   : > { %775 = vrot.lane.b32.xlu1 %v5620_v16, %s5488_s28  ;;  %773 = vrot.lane.b32.xlu0 %v5625_v17, %s5488_s28 }
  0xb4   : > { %1295 = vmatpush1.bf16.msra.mxu1 %v1241_v36  ;;  %v407_v37 = vpop.permute.xlu1 %406 }
  0xb5   : > { %v405_v38 = vpop.permute.xlu0 %404  ;;  %490 = vmatprep.subr.bf16.mxu0 %v407_v37 }
  0xb6   : > { %v435_v39 = vsel %vm428_vm1, %v405_v38, %v407_v37  ;;  %v5271_v38 = vld [vmem:[%s7238_s1 + $0x40] ss:$8 sps:$4 sm:$0xff]  }
  0xb7   : > { %1580 = vrot.lane.b32.xlu1 %v5676_v24, %s5488_s28  ;;  %1578 = vrot.lane.b32.xlu0 %v5681_v25, %s5488_s28 }
  0xb8   : > { %491 = vmatpush1.bf16.msra.mxu0 %v435_v39  ;;  %v1215_v40 = vpop.permute.xlu1 %1214  ;;  %v199_v39 = vld [vmem:[%s7239_s2] sm:$0xff] }
  0xb9   : > { %v1213_v41 = vpop.permute.xlu0 %1212  ;;  %1296 = vmatprep.subr.bf16.mxu1 %v1215_v40 }
  0xba   : > { %v1242_v42 = vsel %vm428_vm1, %v1213_v41, %v1215_v40  ;;  %v5489_v40 = vmov 0   ;;  %v200_v41 = vld [vmem:[%s7239_s2 + $0x8] sm:$0xff] }
  0xbb   : > { %779 = vrot.lane.b32.xlu1 %v5634_v18, %s5488_s28  ;;  %777 = vrot.lane.b32.xlu0 %v5639_v19, %s5488_s28 }
  0xbc   : > { %1297 = vmatpush1.bf16.msra.mxu1 %v1242_v42  ;;  %v411_v43 = vpop.permute.xlu1 %410  ;;  %5221 = vset.pattern.permute.xlu0 %v5489_v40 }
  0xbd   : > { %v409_v44 = vpop.permute.xlu0 %408  ;;  %492 = vmatprep.subr.bf16.mxu0 %v411_v43  ;;  %5222 = vset.pattern.permute.xlu1 %v5489_v40 }
  0xbe   : > { %v436_v45 = vsel %vm428_vm1, %v409_v44, %v411_v43  ;;  %v5274_v44 = vld [vmem:[%s7238_s1 + $0x54] ss:$8 sps:$4 sm:$0xff]  }
  0xbf   : > { %1584 = vrot.lane.b32.xlu1 %v5690_v26, %s5488_s28  ;;  %1582 = vrot.lane.b32.xlu0 %v5695_v27, %s5488_s28 }
  0xc0   : > { %493 = vmatpush1.bf16.msra.mxu0 %v436_v45  ;;  %v1219_v46 = vpop.permute.xlu1 %1218 }
  0xc1   : > { %v1217_v47 = vpop.permute.xlu0 %1216  ;;  %1298 = vmatprep.subr.bf16.mxu1 %v1219_v46 }
  0xc2   : > { %v1243_v48 = vsel %vm428_vm1, %v1217_v47, %v1219_v46  ;;  %v202_v46 = vld [vmem:[%s7239_s2 + $0x18] sm:$0xff] }
  0xc3   : > { %783 = vrot.lane.b32.xlu1 %v5648_v20, %s5488_s28  ;;  %781 = vrot.lane.b32.xlu0 %v5653_v21, %s5488_s28 }
  0xc4   : > { %1299 = vmatpush1.bf16.msra.mxu1 %v1243_v48  ;;  %v415_v49 = vpop.permute.xlu1 %414 }
  0xc5   : > { %v413_v50 = vpop.permute.xlu0 %412  ;;  %494 = vmatprep.subr.bf16.mxu0 %v415_v49 }
  0xc6   : > { %v437_v51 = vsel %vm428_vm1, %v413_v50, %v415_v49  ;;  %v204_v49 = vld [vmem:[%s7239_s2 + $0x28] sm:$0xff] }
  0xc7   : > { %1588 = vrot.lane.b32.xlu1 %v5707_v29, %s5488_s28  ;;  %1586 = vrot.lane.b32.xlu0 %v5712_v30, %s5488_s28 }
  0xc8   : > { %495 = vmatpush1.bf16.msra.mxu0 %v437_v51  ;;  %v1223_v52 = vpop.permute.xlu1 %1222 }
  0xc9   : > { %v1221_v53 = vpop.permute.xlu0 %1220  ;;  %1300 = vmatprep.subr.bf16.mxu1 %v1223_v52 }
  0xca   : > { %v1244_v54 = vsel %vm428_vm1, %v1221_v53, %v1223_v52  ;;  %v206_v52 = vld [vmem:[%s7239_s2 + $0x38] sm:$0xff] }
  0xcb   : > { %787 = vrot.lane.b32.xlu1 %v5662_v22, %s5488_s28  ;;  %785 = vrot.lane.b32.xlu0 %v5667_v23, %s5488_s28 }
  0xcc   : > { %1301 = vmatpush1.bf16.msra.mxu1 %v1244_v54  ;;  %v419_v55 = vpop.permute.xlu1 %418 }
  0xcd   : > { %v417_v56 = vpop.permute.xlu0 %416  ;;  %496 = vmatprep.subr.bf16.mxu0 %v419_v55 }
  0xce   : > { %v438_v57 = vsel %vm428_vm1, %v417_v56, %v419_v55  ;;  %v5280_v56 = vld [vmem:[%s7238_s1 + $0x74] ss:$8 sps:$4 sm:$0xff]  }
  0xcf   : > { %1592 = vrot.lane.b32.xlu1 %v5723_v31, %s5488_s28  ;;  %1590 = vrot.lane.b32.xlu0 %v5728_v32, %s5488_s28 }
  0xd0   : > { %497 = vmatpush1.bf16.msra.mxu0 %v438_v57  ;;  %v1227_v58 = vpop.permute.xlu1 %1226  ;;  %v5282_v57 = vld [vmem:[%s7238_s1 + $0x70] ss:$8 sps:$4 sm:$0xff]  }
  0xd1   : > { %v1225_v59 = vpop.permute.xlu0 %1224  ;;  %1302 = vmatprep.subr.bf16.mxu1 %v1227_v58 }
  0xd2   : > { %v1245_v60 = vsel %vm428_vm1, %v1225_v59, %v1227_v58  ;;  %v5285_v58 = vld [vmem:[%s7238_s1 + $0x4] ss:$8 sps:$4 sm:$0xff]  }
  0xd3   : > { %1303 = vmatpush1.bf16.msra.mxu1 %v1245_v60  ;;  %929 = vperm.xlu0 %5221, %v199_v39   ;;  %v5289_v60 = vld [vmem:[%s7238_s1 + $0x24] ss:$8 sps:$4 sm:$0xff]  }
  0xd4   : > { %v423_v61 = vpop.permute.xlu1 %422  ;;  %934 = vperm.xlu1 %5222, %v200_v41  }
  0xd5   : > { %v421_v62 = vpop.permute.xlu0 %420  ;;  %498 = vmatprep.subr.bf16.mxu0 %v423_v61 }
  0xd6   : > { %v439_v63 = vsel %vm428_vm1, %v421_v62, %v423_v61 }
  0xd7   : > { %499 = vmatpush1.bf16.msra.mxu0 %v439_v63  ;;  %944 = vperm.xlu0 %5221, %v202_v46  }
  0xd8   : > { %v1231_v28 = vpop.permute.xlu1 %1230 }
  0xd9   : > { %v1229_v33 = vpop.permute.xlu0 %1228  ;;  %1304 = vmatprep.subr.bf16.mxu1 %v1231_v28 }
  0xda   : > { %v1246_v34 = vsel %vm428_vm1, %v1229_v33, %v1231_v28 }
  0xdb   : > { %1305 = vmatpush1.bf16.msra.mxu1 %v1246_v34  ;;  %954 = vperm.xlu0 %5221, %v204_v49  }
  0xdc   : > { %v427_v35 = vpop.permute.xlu1 %426 }
  0xdd   : > { %v425_v36 = vpop.permute.xlu0 %424  ;;  %500 = vmatprep.subr.bf16.mxu0 %v427_v35 }
  0xde   : > { %v440_v37 = vsel %vm428_vm1, %v425_v36, %v427_v35  ;;  %v5291_v35 = vld [vmem:[%s7238_s1 + $0x20] ss:$8 sps:$4 sm:$0xff]  }
  0xdf   : > { %501 = vmatpush1.bf16.msra.mxu0 %v440_v37  ;;  %964 = vperm.xlu0 %5221, %v206_v52  }
  0xe0   : > { %v1235_v42 = vpop.permute.xlu1 %1234  ;;  %623 = vmatprep.subr.bf16.mxu0 %v5551_v3  ;;  %v201_v3 = vld [vmem:[%s7239_s2 + $0x10] sm:$0xff] }
  0xe1   : > { %v1233_v43 = vpop.permute.xlu0 %1232  ;;  %1306 = vmatprep.subr.bf16.mxu1 %v1235_v42  ;;  %939 = vperm.xlu1 %5222, %v201_v3  }
  0xe2   : > { %511 = vmatmul.mubr.bf16.vlgmr.msra.gmra.mrb[0].mxu0 %v5271_v38  ;;  %v1247_v45 = vsel %vm428_vm1, %v1233_v43, %v1235_v42 }
  0xe3   : > { %624 = vmatpush1.bf16.msra.mxu0 %v5541_v1  ;;  %1307 = vmatpush1.bf16.msra.mxu1 %v1247_v45  ;;  %v5276_v1 = vld [vmem:[%s7238_s1 + $0x50] ss:$8 sps:$4 sm:$0xff]  }
  0xe4   : > { %v5874_v47 = vpop.permute.xlu1 %743  ;;  %625 = vmatprep.subr.bf16.mxu0 %v5556_v4  ;;  %1429 = vmatprep.subr.bf16.mxu1 %v5546_v2  ;;  %v203_v4 = vld [vmem:[%s7239_s2 + $0x20] sm:$0xff]  ;;  %v5294_v45 = vld [vmem:[%s7238_s1 + $0x30] ss:$8 sps:$4 sm:$0xff]  }
  0xe5   : > { %v5878_v48 = vpop.permute.xlu0 %741  ;;  %4641 = vmatprep.mubr.msk.bf16.mxu0 %vm465_vm0, %v5274_v44  ;;  %949 = vperm.xlu1 %5222, %v203_v4  }
  0xe6   : > { %1317 = vmatmul.mubr.bf16.vlgmr.msra.gmra.mrb[0].mxu1 %v5271_v38  ;;  %v5292_v38 = vld [vmem:[%s7238_s1 + $0x34] ss:$8 sps:$4 sm:$0xff]  }
  0xe7   : > { %626 = vmatpush1.bf16.msra.mxu0 %v5561_v5  ;;  %1430 = vmatpush1.bf16.msra.mxu1 %v5538_v0  ;;  %v5277_v5 = vld [vmem:[%s7238_s1 + $0x64] ss:$8 sps:$4 sm:$0xff]  }
  0xe8   : > { %v5892_v50 = vpop.permute.xlu1 %1548  ;;  %627 = vmatprep.subr.bf16.mxu0 %v5576_v8  ;;  %1431 = vmatprep.subr.bf16.mxu1 %v5566_v6  ;;  %v205_v8 = vld [vmem:[%s7239_s2 + $0x30] sm:$0xff] }
  0xe9   : > { %v5896_v51 = vpop.permute.xlu0 %1546  ;;  %4717 = vmatprep.mubr.msk.bf16.mxu1 %vm465_vm0, %v5274_v44  ;;  %959 = vperm.xlu1 %5222, %v205_v8  }
  0xea   : > { %521 = vmatmul.mubr.bf16.gmra.mrb[4].mxu0 %v5276_v1 }
  0xeb   : > { %628 = vmatpush1.bf16.msra.mxu0 %v5581_v9  ;;  %1432 = vmatpush1.bf16.msra.mxu1 %v5571_v7  ;;  %v5279_v9 = vld [vmem:[%s7238_s1 + $0x60] ss:$8 sps:$4 sm:$0xff]  }
  0xec   : > { %v5910_v53 = vpop.permute.xlu1 %747  ;;  %629 = vmatprep.subr.bf16.mxu0 %v5596_v12  ;;  %1433 = vmatprep.subr.bf16.mxu1 %v5586_v10 }
  0xed   : > { %v5914_v54 = vpop.permute.xlu0 %745  ;;  %4642 = vmatprep.mubr.msk.bf16.mxu0 %vm465_vm0, %v5277_v5 }
  0xee   : > { %1327 = vmatmul.mubr.bf16.gmra.mrb[4].mxu1 %v5276_v1 }
  0xef   : > { %630 = vmatpush1.bf16.msra.mxu0 %v5601_v13  ;;  %1434 = vmatpush1.bf16.msra.mxu1 %v5591_v11 }
  0xf0   : > { %v5922_v55 = vpop.permute.xlu1 %1552  ;;  %631 = vmatprep.subr.bf16.mxu0 %v5546_v2  ;;  %1435 = vmatprep.subr.bf16.mxu1 %v5606_v14 }
  0xf1   : > { %v5926_v12 = vpop.permute.xlu0 %1550  ;;  %4718 = vmatprep.mubr.msk.bf16.mxu1 %vm465_vm0, %v5277_v5 }
  0xf2   : > { %531 = vmatmul.mubr.bf16.gmra.mrb[8].mxu0 %v5279_v9  ;;  %v1595_v61 = vsel %vm789_vm2, %v5926_v12, %v5922_v55 }
  0xf3   : > { %632 = vmatpush1.bf16.msra.mxu0 %v5538_v0  ;;  %1436 = vmatpush1.bf16.msra.mxu1 %v5611_v15 }
  0xf4   : > { %v5934_v13 = vpop.permute.xlu1 %751  ;;  %633 = vmatprep.subr.bf16.mxu0 %v5566_v6  ;;  %1437 = vmatprep.subr.bf16.mxu1 %v5620_v16 }
  0xf5   : > { %v5938_v2 = vpop.permute.xlu0 %749  ;;  %4643 = vmatprep.mubr.msk.bf16.mxu0 %vm465_vm0, %v5280_v56 }
  0xf6   : > { %1337 = vmatmul.mubr.bf16.gmra.mrb[8].mxu1 %v5279_v9  ;;  %v792_v62 = vsel %vm789_vm2, %v5938_v2, %v5934_v13 }
  0xf7   : > { %634 = vmatpush1.bf16.msra.mxu0 %v5571_v7  ;;  %1438 = vmatpush1.bf16.msra.mxu1 %v5625_v17 }
  0xf8   : > { %v5946_v0 = vpop.permute.xlu1 %1556  ;;  %635 = vmatprep.subr.bf16.mxu0 %v5586_v10  ;;  %1439 = vmatprep.subr.bf16.mxu1 %v5634_v18 }
  0xf9   : > { %v5950_v6 = vpop.permute.xlu0 %1554  ;;  %4719 = vmatprep.mubr.msk.bf16.mxu1 %vm465_vm0, %v5280_v56 }
  0xfa   : > { %541 = vmatmul.mubr.bf16.gmra.mrb[12].mxu0 %v5282_v57  ;;  %v1596_v33 = vsel %vm789_vm2, %v5950_v6, %v5946_v0 }
  0xfb   : > { %636 = vmatpush1.bf16.msra.mxu0 %v5591_v11  ;;  %1440 = vmatpush1.bf16.msra.mxu1 %v5639_v19 }
  0xfc   : > { %637 = vmatprep.subr.bf16.mxu0 %v5606_v14  ;;  %1441 = vmatprep.subr.bf16.mxu1 %v5648_v20 }
  0xfd   : > { %v5960_v7 = vpop.permute.xlu1 %755  ;;  %v5962_v10 = vpop.permute.xlu0 %753  ;;  %4652 = vmatprep.mubr.msk.bf16.mxu0 %vm465_vm0, %v5285_v58 }
  0xfe   : > { %1347 = vmatmul.mubr.bf16.gmra.mrb[12].mxu1 %v5282_v57  ;;  %v793_v34 = vsel %vm789_vm2, %v5962_v10, %v5960_v7  ;;  %v5295_v10 = vld [vmem:[%s7238_s1 + $0x80] ss:$8 sps:$4 sm:$0xff]  }
  0xff   : > { %638 = vmatpush1.bf16.msra.mxu0 %v5611_v15  ;;  %1442 = vmatpush1.bf16.msra.mxu1 %v5653_v21 }
 0x100   : > { %639 = vmatprep.subr.bf16.mxu0 %v5620_v16  ;;  %1443 = vmatprep.subr.bf16.mxu1 %v5662_v22 }
 0x101   : > { %v5969_v11 = vpop.permute.xlu1 %1560  ;;  %v5971_v14 = vpop.permute.xlu0 %1558  ;;  %4728 = vmatprep.mubr.msk.bf16.mxu1 %vm465_vm0, %v5285_v58 }
 0x102   : > { %v1597_v39 = vsel %vm789_vm2, %v5971_v14, %v5969_v11 }
 0x103   : > { %640 = vmatpush1.bf16.msra.mxu0 %v5625_v17  ;;  %1444 = vmatpush1.bf16.msra.mxu1 %v5667_v23 }
 0x104   : > { %641 = vmatprep.subr.bf16.mxu0 %v5634_v18  ;;  %1445 = vmatprep.subr.bf16.mxu1 %v5676_v24  ;;  %v5286_v24 = vld [vmem:[%s7238_s1 + $0x14] ss:$8 sps:$4 sm:$0xff]  }
 0x105   : > { %v5978_v15 = vpop.permute.xlu1 %759  ;;  %v5980_v59 = vpop.permute.xlu0 %757 }
 0x106   : > { %v794_v40 = vsel %vm789_vm2, %v5980_v59, %v5978_v15 }
 0x107   : > { %642 = vmatpush1.bf16.msra.mxu0 %v5639_v19  ;;  %1446 = vmatpush1.bf16.msra.mxu1 %v5681_v25  ;;  %v790_v25 = vsel %vm789_vm2, %v5878_v48, %v5874_v47 }
 0x108   : > { %643 = vmatprep.subr.bf16.mxu0 %v5648_v20  ;;  %1447 = vmatprep.subr.bf16.mxu1 %v5690_v26  ;;  %v5283_v20 = vld [vmem:[%s7238_s1] ss:$8 sps:$4 sm:$0xff]  }
 0x109   : > { %v5986_v16 = vpop.permute.xlu1 %1564  ;;  %v5988_v17 = vpop.permute.xlu0 %1562 }
 0x10a   : > { %v1598_v43 = vsel %vm789_vm2, %v5988_v17, %v5986_v16  ;;  %v5301_v17 = vld [vmem:[%s7238_s1 + $0xa4] ss:$8 sps:$4 sm:$0xff]  }
 0x10b   : > { %644 = vmatpush1.bf16.msra.mxu0 %v5653_v21  ;;  %1448 = vmatpush1.bf16.msra.mxu1 %v5695_v27  ;;  %v1594_v27 = vsel %vm789_vm2, %v5896_v51, %v5892_v50 }
 0x10c   : > { %645 = vmatprep.subr.bf16.mxu0 %v5662_v22  ;;  %1449 = vmatprep.subr.bf16.mxu1 %v5707_v29  ;;  %v791_v29 = vsel %vm789_vm2, %v5914_v54, %v5910_v53 }
 0x10d   : > { %v5994_v18 = vpop.permute.xlu1 %763  ;;  %v5996_v19 = vpop.permute.xlu0 %761 }
 0x10e   : > { %v795_v44 = vsel %vm789_vm2, %v5996_v19, %v5994_v18  ;;  %v5304_v19 = vld [vmem:[%s7238_s1 + $0xb4] ss:$8 sps:$4 sm:$0xff]  }
 0x10f   : > { %646 = vmatpush1.bf16.msra.mxu0 %v5667_v23  ;;  %1450 = vmatpush1.bf16.msra.mxu1 %v5712_v30  ;;  %v5288_v30 = vld [vmem:[%s7238_s1 + $0x10] ss:$8 sps:$4 sm:$0xff]  }
 0x110   : > { %838 = vmatprep.subr.bf16.mxu0 %v5874_v47  ;;  %1451 = vmatprep.subr.bf16.mxu1 %v5723_v31  ;;  %v5297_v47 = vld [vmem:[%s7238_s1 + $0x84] ss:$8 sps:$4 sm:$0xff]  }
 0x111   : > { %v6005_v21 = vpop.permute.xlu1 %1568  ;;  %v6007_v22 = vpop.permute.xlu0 %1566 }
 0x112   : > { %656 = vmatmul.mubr.bf16.vlgmr.msra.gmra.mrb[0].mxu0 %v5283_v20  ;;  %v1599_v48 = vsel %vm789_vm2, %v6007_v22, %v6005_v21 }
 0x113   : > { %839 = vmatpush1.bf16.msra.mxu0 %v790_v25  ;;  %1452 = vmatpush1.bf16.msra.mxu1 %v5728_v32 }
 0x114   : > { %840 = vmatprep.subr.bf16.mxu0 %v5910_v53  ;;  %1642 = vmatprep.subr.bf16.mxu1 %v5892_v50 }
 0x115   : > { %v768_v23 = vpop.permute.xlu1 %767  ;;  %v766_v26 = vpop.permute.xlu0 %765  ;;  %4653 = vmatprep.mubr.msk.bf16.mxu0 %vm465_vm0, %v5286_v24 }
 0x116   : > { %1462 = vmatmul.mubr.bf16.vlgmr.msra.gmra.mrb[0].mxu1 %v5283_v20  ;;  %v796_v1 = vsel %vm789_vm2, %v766_v26, %v768_v23  ;;  %v5306_v20 = vld [vmem:[%s7238_s1 + $0xb0] ss:$8 sps:$4 sm:$0xff]  }
 0x117   : > { %841 = vmatpush1.bf16.msra.mxu0 %v791_v29  ;;  %1643 = vmatpush1.bf16.msra.mxu1 %v1594_v27 }
 0x118   : > { %842 = vmatprep.subr.bf16.mxu0 %v5934_v13  ;;  %1644 = vmatprep.subr.bf16.mxu1 %v5922_v55 }
 0x119   : > { %v1573_v31 = vpop.permute.xlu1 %1572  ;;  %v1571_v32 = vpop.permute.xlu0 %1570  ;;  %4729 = vmatprep.mubr.msk.bf16.mxu1 %vm465_vm0, %v5286_v24 }
 0x11a   : > { %666 = vmatmul.mubr.bf16.gmra.mrb[4].mxu0 %v5288_v30  ;;  %v1600_v50 = vsel %vm789_vm2, %v1571_v32, %v1573_v31 }
 0x11b   : > { %843 = vmatpush1.bf16.msra.mxu0 %v792_v62  ;;  %1645 = vmatpush1.bf16.msra.mxu1 %v1595_v61 }
 0x11c   : > { %844 = vmatprep.subr.bf16.mxu0 %v5960_v7  ;;  %1646 = vmatprep.subr.bf16.mxu1 %v5946_v0 }
 0x11d   : > { %v772_v63 = vpop.permute.xlu1 %771  ;;  %v770_v28 = vpop.permute.xlu0 %769  ;;  %4654 = vmatprep.mubr.msk.bf16.mxu0 %vm465_vm0, %v5289_v60 }
 0x11e   : > { %1472 = vmatmul.mubr.bf16.gmra.mrb[4].mxu1 %v5288_v30  ;;  %v797_v51 = vsel %vm789_vm2, %v770_v28, %v772_v63 }
 0x11f   : > { %845 = vmatpush1.bf16.msra.mxu0 %v793_v34  ;;  %1647 = vmatpush1.bf16.msra.mxu1 %v1596_v33 }
 0x120   : > { %846 = vmatprep.subr.bf16.mxu0 %v5978_v15  ;;  %1648 = vmatprep.subr.bf16.mxu1 %v5969_v11  ;;  %v5298_v11 = vld [vmem:[%s7238_s1 + $0x94] ss:$8 sps:$4 sm:$0xff]  }
 0x121   : > { %v1577_v36 = vpop.permute.xlu1 %1576  ;;  %v1575_v37 = vpop.permute.xlu0 %1574  ;;  %4730 = vmatprep.mubr.msk.bf16.mxu1 %vm465_vm0, %v5289_v60 }
 0x122   : > { %676 = vmatmul.mubr.bf16.gmra.mrb[8].mxu0 %v5291_v35  ;;  %v1601_v8 = vsel %vm789_vm2, %v1575_v37, %v1577_v36 }
 0x123   : > { %847 = vmatpush1.bf16.msra.mxu0 %v794_v40  ;;  %1649 = vmatpush1.bf16.msra.mxu1 %v1597_v39 }
 0x124   : > { %848 = vmatprep.subr.bf16.mxu0 %v5994_v18  ;;  %1650 = vmatprep.subr.bf16.mxu1 %v5986_v16  ;;  %v5300_v16 = vld [vmem:[%s7238_s1 + $0x90] ss:$8 sps:$4 sm:$0xff]   ;;  %v5303_v18 = vld [vmem:[%s7238_s1 + $0xa0] ss:$8 sps:$4 sm:$0xff]  }
 0x125   : > { %v776_v41 = vpop.permute.xlu1 %775  ;;  %v774_v42 = vpop.permute.xlu0 %773  ;;  %4655 = vmatprep.mubr.msk.bf16.mxu0 %vm465_vm0, %v5292_v38 }
 0x126   : > { %1482 = vmatmul.mubr.bf16.gmra.mrb[8].mxu1 %v5291_v35  ;;  %v798_v53 = vsel %vm789_vm2, %v774_v42, %v776_v41 }
 0x127   : > { %849 = vmatpush1.bf16.msra.mxu0 %v795_v44  ;;  %1651 = vmatpush1.bf16.msra.mxu1 %v1598_v43 }
 0x128   : > { %850 = vmatprep.subr.bf16.mxu0 %v768_v23  ;;  %1652 = vmatprep.subr.bf16.mxu1 %v6005_v21 }
 0x129   : > { %v1581_v46 = vpop.permute.xlu1 %1580  ;;  %v1579_v3 = vpop.permute.xlu0 %1578  ;;  %4731 = vmatprep.mubr.msk.bf16.mxu1 %vm465_vm0, %v5292_v38 }
 0x12a   : > { %686 = vmatmul.mubr.bf16.gmra.mrb[12].mxu0 %v5294_v45  ;;  %v1602_v55 = vsel %vm789_vm2, %v1579_v3, %v1581_v46 }
 0x12b   : > { %851 = vmatpush1.bf16.msra.mxu0 %v796_v1  ;;  %1653 = vmatpush1.bf16.msra.mxu1 %v1599_v48 }
 0x12c   : > { %852 = vmatprep.subr.bf16.mxu0 %v772_v63  ;;  %1654 = vmatprep.subr.bf16.mxu1 %v1573_v31 }
 0x12d   : > { %v780_v49 = vpop.permute.xlu1 %779  ;;  %v778_v4 = vpop.permute.xlu0 %777  ;;  %4672 = vmatprep.mubr.msk.bf16.mxu0 %vm465_vm0, %v5297_v47 }
 0x12e   : > { %1492 = vmatmul.mubr.bf16.gmra.mrb[12].mxu1 %v5294_v45  ;;  %v799_v12 = vsel %vm789_vm2, %v778_v4, %v780_v49 }
 0x12f   : > { %853 = vmatpush1.bf16.msra.mxu0 %v797_v51  ;;  %1655 = vmatpush1.bf16.msra.mxu1 %v1600_v50 }
 0x130   : > { %854 = vmatprep.subr.bf16.mxu0 %v776_v41  ;;  %1656 = vmatprep.subr.bf16.mxu1 %v1577_v36 }
 0x131   : > { %v1585_v5 = vpop.permute.xlu1 %1584  ;;  %v1583_v52 = vpop.permute.xlu0 %1582  ;;  %4748 = vmatprep.mubr.msk.bf16.mxu1 %vm465_vm0, %v5297_v47 }
 0x132   : > { %v1603_v2 = vsel %vm789_vm2, %v1583_v52, %v1585_v5 }
 0x133   : > { %855 = vmatpush1.bf16.msra.mxu0 %v798_v53  ;;  %1657 = vmatpush1.bf16.msra.mxu1 %v1601_v8 }
 0x134   : > { %856 = vmatprep.subr.bf16.mxu0 %v780_v49  ;;  %1658 = vmatprep.subr.bf16.mxu1 %v1581_v46 }
 0x135   : > { %v784_v54 = vpop.permute.xlu1 %783  ;;  %v782_v9 = vpop.permute.xlu0 %781 }
 0x136   : > { %v800_v57 = vsel %vm789_vm2, %v782_v9, %v784_v54 }
 0x137   : > { %857 = vmatpush1.bf16.msra.mxu0 %v799_v12  ;;  %1659 = vmatpush1.bf16.msra.mxu1 %v1602_v55 }
 0x138   : > { %858 = vmatprep.subr.bf16.mxu0 %v784_v54  ;;  %1660 = vmatprep.subr.bf16.mxu1 %v1585_v5 }
 0x139   : > { %v1589_v56 = vpop.permute.xlu1 %1588  ;;  %v1587_v13 = vpop.permute.xlu0 %1586 }
 0x13a   : > { %v1604_v58 = vsel %vm789_vm2, %v1587_v13, %v1589_v56 }
 0x13b   : > { %859 = vmatpush1.bf16.msra.mxu0 %v800_v57  ;;  %1661 = vmatpush1.bf16.msra.mxu1 %v1603_v2 }
 0x13c   : > { %1662 = vmatprep.subr.bf16.mxu1 %v1589_v56 }
 0x13d   : > { %v788_v0 = vpop.permute.xlu1 %787  ;;  %v786_v6 = vpop.permute.xlu0 %785 }
 0x13e   : > { %v801_v7 = vsel %vm789_vm2, %v786_v6, %v788_v0  ;;  %860 = vmatprep.subr.bf16.mxu0 %v788_v0 }
 0x13f   : > { %861 = vmatpush1.bf16.msra.mxu0 %v801_v7  ;;  %1663 = vmatpush1.bf16.msra.mxu1 %v1604_v58 }
 0x141   : > { %v1593_v14 = vpop.permute.xlu1 %1592  ;;  %v1591_v15 = vpop.permute.xlu0 %1590 }
 0x142   : > { %v1605_v59 = vsel %vm789_vm2, %v1591_v15, %v1593_v14  ;;  %871 = vmatmul.mubr.bf16.vlgmr.msra.gmra.mrb[0].mxu0 %v5295_v10  ;;  %1664 = vmatprep.subr.bf16.mxu1 %v1593_v14 }
 0x143   : > { %1665 = vmatpush1.bf16.msra.mxu1 %v1605_v59  ;;  %4673 = vmatprep.mubr.msk.bf16.mxu0 %vm465_vm0, %v5298_v11 }
 0x146   : > { %1675 = vmatmul.mubr.bf16.vlgmr.msra.gmra.mrb[0].mxu1 %v5295_v10 }
 0x147   : > { %4749 = vmatprep.mubr.msk.bf16.mxu1 %vm465_vm0, %v5298_v11 }
 0x14a   : > { %881 = vmatmul.mubr.bf16.gmra.mrb[4].mxu0 %v5300_v16 }
 0x14b   : > { %4674 = vmatprep.mubr.msk.bf16.mxu0 %vm465_vm0, %v5301_v17 }
 0x14e   : > { %1685 = vmatmul.mubr.bf16.gmra.mrb[4].mxu1 %v5300_v16 }
 0x14f   : > { %4750 = vmatprep.mubr.msk.bf16.mxu1 %vm465_vm0, %v5301_v17 }
 0x152   : > { %891 = vmatmul.mubr.bf16.gmra.mrb[8].mxu0 %v5303_v18  ;;  %v6125_v21 = vpop.permute.xlu0 %929 }
 0x153   : > { %4675 = vmatprep.mubr.msk.bf16.mxu0 %vm465_vm0, %v5304_v19  ;;  %7273 = vst [vmem:[#allocation4_spill] sm:$0xff] %v6125_v21  ;;  %v6127_v24 = vpop.permute.xlu1 %934 }
 0x154   : > { %7274 = vst [vmem:[#allocation5_spill] sm:$0xff] %v6127_v24 }
 0x156   : > { %1695 = vmatmul.mubr.bf16.gmra.mrb[8].mxu1 %v5303_v18  ;;  %v6141_v43 = vpop.permute.xlu0 %944 }
 0x157   : > { %4751 = vmatprep.mubr.msk.bf16.mxu1 %vm465_vm0, %v5304_v19  ;;  %7276 = vst [vmem:[#allocation7_spill] sm:$0xff] %v6141_v43 }
 0x15a   : > { %901 = vmatmul.mubr.bf16.gmra.mrb[12].mxu0 %v5306_v20  ;;  %v6159_v14 = vpop.permute.xlu0 %954 }
 0x15b   : > { %7278 = vst [vmem:[#allocation9_spill] sm:$0xff] %v6159_v14 }
 0x15e   : > { %1705 = vmatmul.mubr.bf16.gmra.mrb[12].mxu1 %v5306_v20 }
 0x160   : > { %v6136_v36 = vpop.permute.xlu1 %939 }
 0x161   : > { %7275 = vst [vmem:[#allocation6_spill] sm:$0xff] %v6136_v36 }
 0x164   : > { %v6152_v12 = vpop.permute.xlu1 %949 }
 0x165   : > { %7277 = vst [vmem:[#allocation8_spill] sm:$0xff] %v6152_v12 }
 0x215   : > { %v872_v22 = vpop.f32.mrb[0].mxu0 }
 0x216   : > { %v967_v25 = vadd.f32 %v6125_v21, %v872_v22  ;;  %v874_v23 = vpop.f32.mrb[1].mxu0 }
 0x217   : > { %v968_v26 = vadd.f32 %v6125_v21, %v874_v23  ;;  %v876_v27 = vpop.f32.mrb[2].mxu0 }
 0x218   : > { %v983_v29 = vmax.f32 %v967_v25, 0.0  ;;  %v969_v30 = vadd.f32 %v6127_v24, %v876_v27  ;;  %v878_v31 = vpop.f32.mrb[3].mxu0 }
 0x219   : > { %v984_v32 = vmax.f32 %v968_v26, 0.0  ;;  %v970_v60 = vadd.f32 %v6127_v24, %v878_v31  ;;  %v1676_v61 = vpop.f32.mrb[0].mxu1 }
 0x21a   : > { %999 = vst [vmem:[#allocation2] sm:$0xff] %v983_v29  ;;  %v985_v62 = vmax.f32 %v969_v30, 0.0  ;;  %v1731_v63 = vadd.f32 %v1676_v61, %v6125_v21  ;;  %v1678_v28 = vpop.f32.mrb[1].mxu1  ;;  %v6169_v61 = vpop.permute.xlu1 %959 }
 0x21b   : > { %1001 = vst.msk [vmem:[#allocation2 + $0x8] sm:$0xff] %vm1000_vm3, %v984_v32  ;;  %v986_v33 = vmax.f32 %v970_v60, 0.0  ;;  %v1732_v34 = vadd.f32 %v1678_v28, %v6125_v21  ;;  %v1680_v35 = vpop.f32.mrb[2].mxu1  ;;  %7279 = vst [vmem:[#allocation10_spill] sm:$0xff] %v6169_v61 }
 0x21c   : > { %1002 = vst [vmem:[#allocation2 + $0x10] sm:$0xff] %v985_v62  ;;  %v1747_v37 = vmax.f32 %v1731_v63, 0.0  ;;  %v1733_v38 = vadd.f32 %v1680_v35, %v6127_v24  ;;  %v1682_v39 = vpop.f32.mrb[3].mxu1 }
 0x21d   : > { %1003 = vst.msk [vmem:[#allocation2 + $0x18] sm:$0xff] %vm1000_vm3, %v986_v33  ;;  %v1748_v40 = vmax.f32 %v1732_v34, 0.0  ;;  %v1734_v41 = vadd.f32 %v1682_v39, %v6127_v24  ;;  %v882_v42 = vpop.f32.mrb[4].mxu0 }
 0x21e   : > { %1764 = vst [vmem:[#allocation2 + $0x80] sm:$0xff] %v1747_v37  ;;  %v1749_v44 = vmax.f32 %v1733_v38, 0.0  ;;  %v971_v45 = vadd.f32 %v6136_v36, %v882_v42  ;;  %v884_v46 = vpop.f32.mrb[5].mxu0  ;;  %v6174_v37 = vpop.permute.xlu0 %964 }
 0x21f   : > { %1765 = vst.msk [vmem:[#allocation2 + $0x88] sm:$0xff] %vm1000_vm3, %v1748_v40  ;;  %v1750_v3 = vmax.f32 %v1734_v41, 0.0  ;;  %v972_v47 = vadd.f32 %v6136_v36, %v884_v46  ;;  %v886_v48 = vpop.f32.mrb[6].mxu0  ;;  %7280 = vst [vmem:[#allocation11_spill] sm:$0xff] %v6174_v37 }
 0x220   : > { %1766 = vst [vmem:[#allocation2 + $0x90] sm:$0xff] %v1749_v44  ;;  %v987_v1 = vmax.f32 %v971_v45, 0.0  ;;  %v973_v49 = vadd.f32 %v6141_v43, %v886_v48  ;;  %v888_v4 = vpop.f32.mrb[7].mxu0 }
 0x221   : > { %1767 = vst.msk [vmem:[#allocation2 + $0x98] sm:$0xff] %vm1000_vm3, %v1750_v3  ;;  %v988_v50 = vmax.f32 %v972_v47, 0.0  ;;  %v974_v51 = vadd.f32 %v6141_v43, %v888_v4  ;;  %v1686_v5 = vpop.f32.mrb[4].mxu1 }
 0x222   : > { %1004 = vst [vmem:[#allocation2 + $0x20] sm:$0xff] %v987_v1  ;;  %v989_v52 = vmax.f32 %v973_v49, 0.0  ;;  %v1735_v8 = vadd.f32 %v1686_v5, %v6136_v36  ;;  %v1688_v53 = vpop.f32.mrb[5].mxu1 }
 0x223   : > { %1005 = vst.msk [vmem:[#allocation2 + $0x28] sm:$0xff] %vm1000_vm3, %v988_v50  ;;  %v990_v54 = vmax.f32 %v974_v51, 0.0  ;;  %v1736_v9 = vadd.f32 %v1688_v53, %v6136_v36  ;;  %v1690_v55 = vpop.f32.mrb[6].mxu1 }
 0x224   : > { %1006 = vst [vmem:[#allocation2 + $0x30] sm:$0xff] %v989_v52  ;;  %v1751_v56 = vmax.f32 %v1735_v8, 0.0  ;;  %v1737_v13 = vadd.f32 %v1690_v55, %v6141_v43  ;;  %v1692_v2 = vpop.f32.mrb[7].mxu1 }
 0x225   : > { %1007 = vst.msk [vmem:[#allocation2 + $0x38] sm:$0xff] %vm1000_vm3, %v990_v54  ;;  %v1752_v57 = vmax.f32 %v1736_v9, 0.0  ;;  %v1738_v0 = vadd.f32 %v1692_v2, %v6141_v43  ;;  %v892_v6 = vpop.f32.mrb[8].mxu0 }
 0x226   : > { %1768 = vst [vmem:[#allocation2 + $0xa0] sm:$0xff] %v1751_v56  ;;  %v1753_v58 = vmax.f32 %v1737_v13, 0.0  ;;  %v975_v7 = vadd.f32 %v6152_v12, %v892_v6  ;;  %v894_v10 = vpop.f32.mrb[9].mxu0 }
 0x227   : > { %1769 = vst.msk [vmem:[#allocation2 + $0xa8] sm:$0xff] %vm1000_vm3, %v1752_v57  ;;  %v1754_v11 = vmax.f32 %v1738_v0, 0.0  ;;  %v976_v15 = vadd.f32 %v6152_v12, %v894_v10  ;;  %v896_v59 = vpop.f32.mrb[10].mxu0 }
 0x228   : > { %1770 = vst [vmem:[#allocation2 + $0xb0] sm:$0xff] %v1753_v58  ;;  %v991_v16 = vmax.f32 %v975_v7, 0.0  ;;  %v977_v17 = vadd.f32 %v6159_v14, %v896_v59  ;;  %v898_v18 = vpop.f32.mrb[11].mxu0 }
 0x229   : > { %1771 = vst.msk [vmem:[#allocation2 + $0xb8] sm:$0xff] %vm1000_vm3, %v1754_v11  ;;  %v992_v19 = vmax.f32 %v976_v15, 0.0  ;;  %v978_v20 = vadd.f32 %v6159_v14, %v898_v18  ;;  %v1696_v22 = vpop.f32.mrb[8].mxu1 }
 0x22a   : > { %1008 = vst [vmem:[#allocation2 + $0x40] sm:$0xff] %v991_v16  ;;  %v993_v25 = vmax.f32 %v977_v17, 0.0  ;;  %v1739_v23 = vadd.f32 %v1696_v22, %v6152_v12  ;;  %v1698_v26 = vpop.f32.mrb[9].mxu1 }
 0x22b   : > { %1009 = vst.msk [vmem:[#allocation2 + $0x48] sm:$0xff] %vm1000_vm3, %v992_v19  ;;  %v994_v27 = vmax.f32 %v978_v20, 0.0  ;;  %v1740_v29 = vadd.f32 %v1698_v26, %v6152_v12  ;;  %v1700_v30 = vpop.f32.mrb[10].mxu1 }
 0x22c   : > { %1010 = vst [vmem:[#allocation2 + $0x50] sm:$0xff] %v993_v25  ;;  %v1755_v31 = vmax.f32 %v1739_v23, 0.0  ;;  %v1741_v32 = vadd.f32 %v1700_v30, %v6159_v14  ;;  %v1702_v60 = vpop.f32.mrb[11].mxu1 }
 0x22d   : > { %1011 = vst.msk [vmem:[#allocation2 + $0x58] sm:$0xff] %vm1000_vm3, %v994_v27  ;;  %v1756_v62 = vmax.f32 %v1740_v29, 0.0  ;;  %v1742_v63 = vadd.f32 %v1702_v60, %v6159_v14  ;;  %v902_v28 = vpop.f32.mrb[12].mxu0 }
 0x22e   : > { %1772 = vst [vmem:[#allocation2 + $0xc0] sm:$0xff] %v1755_v31  ;;  %v1757_v33 = vmax.f32 %v1741_v32, 0.0  ;;  %v979_v34 = vadd.f32 %v6169_v61, %v902_v28  ;;  %v904_v35 = vpop.f32.mrb[13].mxu0 }
 0x22f   : > { %1773 = vst.msk [vmem:[#allocation2 + $0xc8] sm:$0xff] %vm1000_vm3, %v1756_v62  ;;  %v1758_v38 = vmax.f32 %v1742_v63, 0.0  ;;  %v980_v39 = vadd.f32 %v6169_v61, %v904_v35  ;;  %v906_v40 = vpop.f32.mrb[14].mxu0 }
 0x230   : > { %1774 = vst [vmem:[#allocation2 + $0xd0] sm:$0xff] %v1757_v33  ;;  %v995_v41 = vmax.f32 %v979_v34, 0.0  ;;  %v981_v42 = vadd.f32 %v6174_v37, %v906_v40  ;;  %v908_v44 = vpop.f32.mrb[15].mxu0 }
 0x231   : > { %1775 = vst.msk [vmem:[#allocation2 + $0xd8] sm:$0xff] %vm1000_vm3, %v1758_v38  ;;  %v996_v45 = vmax.f32 %v980_v39, 0.0  ;;  %v982_v46 = vadd.f32 %v6174_v37, %v908_v44  ;;  %v1706_v3 = vpop.f32.mrb[12].mxu1 }
 0x232   : > { %1012 = vst [vmem:[#allocation2 + $0x60] sm:$0xff] %v995_v41  ;;  %v997_v47 = vmax.f32 %v981_v42, 0.0  ;;  %v1743_v48 = vadd.f32 %v1706_v3, %v6169_v61  ;;  %v1708_v1 = vpop.f32.mrb[13].mxu1 }
 0x233   : > { %1013 = vst.msk [vmem:[#allocation2 + $0x68] sm:$0xff] %vm1000_vm3, %v996_v45  ;;  %v998_v49 = vmax.f32 %v982_v46, 0.0  ;;  %v1744_v4 = vadd.f32 %v1708_v1, %v6169_v61  ;;  %v1710_v50 = vpop.f32.mrb[14].mxu1 }
 0x234   : > { %1014 = vst [vmem:[#allocation2 + $0x70] sm:$0xff] %v997_v47  ;;  %v1759_v51 = vmax.f32 %v1743_v48, 0.0  ;;  %v1745_v5 = vadd.f32 %v1710_v50, %v6174_v37  ;;  %v1712_v52 = vpop.f32.mrb[15].mxu1 }
 0x235   : > { %1015 = vst.msk [vmem:[#allocation2 + $0x78] sm:$0xff] %vm1000_vm3, %v998_v49  ;;  %v1760_v8 = vmax.f32 %v1744_v4, 0.0  ;;  %v1746_v53 = vadd.f32 %v1712_v52, %v6174_v37 }
 0x236   : > { %1776 = vst [vmem:[#allocation2 + $0xe0] sm:$0xff] %v1759_v51  ;;  %v1761_v54 = vmax.f32 %v1745_v5, 0.0 }
 0x237   : > { %1777 = vst.msk [vmem:[#allocation2 + $0xe8] sm:$0xff] %vm1000_vm3, %v1760_v8  ;;  %v1762_v9 = vmax.f32 %v1746_v53, 0.0 }
 0x238   : > { %1778 = vst [vmem:[#allocation2 + $0xf0] sm:$0xff] %v1761_v54 }
 0x239   : > { %1779 = vst.msk [vmem:[#allocation2 + $0xf8] sm:$0xff] %vm1000_vm3, %v1762_v9 }
 0x23a LB: >> { %s6195_s22 = smul.u32 192, %s5485_s20  ;;  %s5490_s28 = smov 127   ;;  %v5369_v17 = vld [vmem:[%s7238_s1 + $0x4] ss:$8 sps:$4 sm:$0xff]   ;;  %v5367_v31 = vld [vmem:[%s7238_s1] ss:$8 sps:$4 sm:$0xff]   ;;  %s5485_s20 = sphi %s6189_s20, %s1785_s20  }
 0x23b   : >> { %s5491_s8 = smov 126   ;;  %4807 = vmatprep.mubr.msk.bf16.mxu0 %vm465_vm0, %v5369_v17  ;;  %v5418_v32 = vld [vmem:[%s7238_s1 + $0x14] ss:$8 sps:$4 sm:$0xff]   ;;  %v5420_v60 = vld [vmem:[%s7238_s1 + $0x10] ss:$8 sps:$4 sm:$0xff]   ;;  %vm4401_vm4 = vcmask 1041408  }
 0x23c   : >> { %s5016_s23 = sadd.s32 128, %s6195_s22  ;;  %s5019_s29 = sadd.s32 192, %s6195_s22  ;;  %v5421_v62 = vld [vmem:[%s7238_s1 + $0x24] ss:$8 sps:$4 sm:$0xff]   ;;  %v5426_v28 = vld [vmem:[%s7238_s1 + $0x20] ss:$8 sps:$4 sm:$0xff]  }
 0x23d   : >> { %s1869_s25 = sshra.s32 %s5016_s23, 3  ;;  %s2655_s30 = sshra.s32 %s5019_s29, 3  ;;  %v6291_v63 = vld [vmem:[%s7238_s1 + $0x44] ss:$8 sps:$4 sm:$0xff]   ;;  %v5427_v33 = vld [vmem:[%s7238_s1 + $0x34] ss:$8 sps:$4 sm:$0xff]  }
 0x23e   : >> { %s5017_s26 = sshll.u32 %s1869_s25, 3  ;;  %s5022_s5 = sadd.s32 256, %s6195_s22  ;;  %4795 = vmatprep.mubr.msk.bf16.mxu1 %vm465_vm0, %v6291_v63  ;;  %v5429_v34 = vld [vmem:[%s7238_s1 + $0x30] ss:$8 sps:$4 sm:$0xff]   ;;  %v5432_v39 = vld [vmem:[%s7238_s1 + $0x84] ss:$8 sps:$4 sm:$0xff]  }
 0x23f   : >> { %s6199_s27 = scalar_lea.vmem %s5530_s21, %s5017_s26  ;;  %s5020_s6 = sshll.u32 %s2655_s30, 3  ;;  %v6659_v43 = vld [vmem:[%s7238_s1 + $0x94] ss:$8 sps:$4 sm:$0xff]   ;;  %v6690_v21 = vld [vmem:[%s7238_s1 + $0xa4] ss:$8 sps:$4 sm:$0xff]   ;;  %vm4402_vm5 = vcmask 1042432  }
 0x240   : >> { %v5307_v55 = vld [vmem:[%s6199_s27 + $0x10] ss:$8 sps:$4 sm:$0xff]   ;;  %v5309_v56 = vld [vmem:[%s6199_s27] ss:$8 sps:$4 sm:$0xff]   ;;  %v5311_v13 = vld [vmem:[%s6199_s27 + $0x14] ss:$8 sps:$4 sm:$0xff]   ;;  %s6220_s9 = scalar_lea.vmem %s5530_s21, %s5020_s6 }
 0x241   : >> { %2050 = vrot.lane.b32.xlu1 %v5307_v55, %s5490_s28  ;;  %v5312_v2 = vld [vmem:[%s6199_s27 + $0x4] ss:$8 sps:$4 sm:$0xff]   ;;  %2046 = vrot.lane.b32.xlu0 %v5309_v56, %s5490_s28  ;;  %v5315_v0 = vld [vmem:[%s6199_s27 + $0x20] ss:$8 sps:$4 sm:$0xff]   ;;  %s3473_s7 = sshra.s32 %s5022_s5, 3  ;;  %7283 = vst [vmem:[#allocation14_spill] sm:$0xff] %v6659_v43 }
 0x242   : >> { %2287 = vmatprep.subr.bf16.mxu0 %v5312_v2  ;;  %v5313_v57 = vld [vmem:[%s6199_s27 + $0x24] ss:$8 sps:$4 sm:$0xff]   ;;  %v5316_v6 = vld [vmem:[%s6199_s27 + $0x34] ss:$8 sps:$4 sm:$0xff]   ;;  %v5318_v58 = vld [vmem:[%s6199_s27 + $0x30] ss:$8 sps:$4 sm:$0xff]  }
 0x243   : >> { %2288 = vmatpush1.bf16.msra.mxu0 %v5309_v56  ;;  %v5319_v7 = vld [vmem:[%s6199_s27 + $0x44] ss:$8 sps:$4 sm:$0xff]   ;;  %s5023_s10 = sshll.u32 %s3473_s7, 3  ;;  %v5321_v10 = vld [vmem:[%s6199_s27 + $0x40] ss:$8 sps:$4 sm:$0xff]   ;;  %7285 = vst [vmem:[#allocation16_spill] sm:$0xff] %v6690_v21 }
 0x244   : >> { %2289 = vmatprep.subr.bf16.mxu0 %v5311_v13  ;;  %s6227_s11 = scalar_lea.vmem %s5530_s21, %s5023_s10  ;;  %v5322_v11 = vld [vmem:[%s6199_s27 + $0x54] ss:$8 sps:$4 sm:$0xff]   ;;  %v5324_v15 = vld [vmem:[%s6199_s27 + $0x50] ss:$8 sps:$4 sm:$0xff]   ;;  %v5325_v59 = vld [vmem:[%s6199_s27 + $0x64] ss:$8 sps:$4 sm:$0xff]  }
 0x245   : >> { %2052 = vrot.lane.b32.xlu1 %v5311_v13, %s5490_s28  ;;  %2048 = vrot.lane.b32.xlu0 %v5312_v2, %s5490_s28  ;;  %v5327_v16 = vld [vmem:[%s6199_s27 + $0x60] ss:$8 sps:$4 sm:$0xff]   ;;  %v5328_v18 = vld [vmem:[%s6199_s27 + $0x74] ss:$8 sps:$4 sm:$0xff]   ;;  %vm4516_vm6 = vcmask 396288  }
 0x246   : >> { %v5330_v19 = vld [vmem:[%s6199_s27 + $0x70] ss:$8 sps:$4 sm:$0xff]   ;;  %v5331_v20 = vld [vmem:[%s6199_s27 + $0x84] ss:$8 sps:$4 sm:$0xff]   ;;  %v5333_v22 = vld [vmem:[%s6199_s27 + $0x80] ss:$8 sps:$4 sm:$0xff]  }
 0x247   : >> { %2290 = vmatpush1.bf16.msra.mxu0 %v5307_v55  ;;  %v5334_v25 = vld [vmem:[%s6199_s27 + $0x94] ss:$8 sps:$4 sm:$0xff]   ;;  %v5336_v23 = vld [vmem:[%s6199_s27 + $0x90] ss:$8 sps:$4 sm:$0xff]   ;;  %v5337_v26 = vld [vmem:[%s6199_s27 + $0xa4] ss:$8 sps:$4 sm:$0xff]  }
 0x248   : >> { %2291 = vmatprep.subr.bf16.mxu0 %v5313_v57  ;;  %v5339_v27 = vld [vmem:[%s6199_s27 + $0xa0] ss:$8 sps:$4 sm:$0xff]   ;;  %v5340_v29 = vld [vmem:[%s6199_s27 + $0xb4] ss:$8 sps:$4 sm:$0xff]   ;;  %v5342_v30 = vld [vmem:[%s6199_s27 + $0xb0] ss:$8 sps:$4 sm:$0xff]  }
 0x249   : >> { %2056 = vrot.lane.b32.xlu1 %v5313_v57, %s5490_s28  ;;  %2054 = vrot.lane.b32.xlu0 %v5315_v0, %s5490_s28  ;;  %v6311_v35 = vld [vmem:[%s6220_s9 + $0x4] ss:$8 sps:$4 sm:$0xff]   ;;  %v6316_v38 = vld [vmem:[%s6220_s9] ss:$8 sps:$4 sm:$0xff]  }
 0x24a   : >> { %v6327_v40 = vld [vmem:[%s6220_s9 + $0x14] ss:$8 sps:$4 sm:$0xff]   ;;  %v6332_v41 = vld [vmem:[%s6220_s9 + $0x10] ss:$8 sps:$4 sm:$0xff]   ;;  %v6340_v42 = vld [vmem:[%s6220_s9 + $0x24] ss:$8 sps:$4 sm:$0xff]  }
 0x24b   : >> { %2292 = vmatpush1.bf16.msra.mxu0 %v5315_v0  ;;  %v6344_v44 = vld [vmem:[%s6220_s9 + $0x20] ss:$8 sps:$4 sm:$0xff]   ;;  %v6349_v45 = vld [vmem:[%s6227_s11 + $0x4] ss:$8 sps:$4 sm:$0xff]   ;;  %v6359_v3 = vld [vmem:[%s6220_s9 + $0x34] ss:$8 sps:$4 sm:$0xff]  }
 0x24c   : >> { %2293 = vmatprep.subr.bf16.mxu0 %v5316_v6  ;;  %v6354_v46 = vld [vmem:[%s6227_s11] ss:$8 sps:$4 sm:$0xff]   ;;  %v6364_v47 = vld [vmem:[%s6220_s9 + $0x30] ss:$8 sps:$4 sm:$0xff]   ;;  %v6369_v48 = vld [vmem:[%s6227_s11 + $0x14] ss:$8 sps:$4 sm:$0xff]  }
 0x24d   : >> { %2406 = vrot.lane.b32.xlu1 %v5312_v2, %s5491_s8  ;;  %2404 = vrot.lane.b32.xlu0 %v5309_v56, %s5491_s8  ;;  %v6374_v1 = vld [vmem:[%s6227_s11 + $0x10] ss:$8 sps:$4 sm:$0xff]   ;;  %v6379_v50 = vld [vmem:[%s6220_s9 + $0x44] ss:$8 sps:$4 sm:$0xff]  }
 0x24e   : >> { %v6384_v51 = vld [vmem:[%s6220_s9 + $0x40] ss:$8 sps:$4 sm:$0xff]   ;;  %v6390_v53 = vld [vmem:[%s6227_s11 + $0x24] ss:$8 sps:$4 sm:$0xff]   ;;  %v6406_v2 = vld [vmem:[%s6220_s9 + $0x50] ss:$8 sps:$4 sm:$0xff]  }
 0x24f   : >> { %2294 = vmatpush1.bf16.msra.mxu0 %v5318_v58  ;;  %v6395_v54 = vld [vmem:[%s6227_s11 + $0x20] ss:$8 sps:$4 sm:$0xff]  }
 0x250   : >> { %2295 = vmatprep.subr.bf16.mxu0 %v5319_v7  ;;  %v6429_v17 = vld [vmem:[%s6220_s9 + $0x60] ss:$8 sps:$4 sm:$0xff]  }
 0x251   : >> { %2060 = vrot.lane.b32.xlu1 %v5316_v6, %s5490_s28  ;;  %2058 = vrot.lane.b32.xlu0 %v5318_v58, %s5490_s28 }
 0x253   : >> { %2296 = vmatpush1.bf16.msra.mxu0 %v5321_v10 }
 0x254   : >> { %2297 = vmatprep.subr.bf16.mxu0 %v5322_v11 }
 0x255   : >> { %2410 = vrot.lane.b32.xlu1 %v5311_v13, %s5491_s8  ;;  %2408 = vrot.lane.b32.xlu0 %v5307_v55, %s5491_s8  ;;  %v6401_v13 = vld [vmem:[%s6220_s9 + $0x54] ss:$8 sps:$4 sm:$0xff]  }
 0x257   : >> { %2298 = vmatpush1.bf16.msra.mxu0 %v5324_v15 }
 0x258   : >> { %2299 = vmatprep.subr.bf16.mxu0 %v5325_v59 }
 0x259   : >> { %2064 = vrot.lane.b32.xlu1 %v5319_v7, %s5490_s28  ;;  %2062 = vrot.lane.b32.xlu0 %v5321_v10, %s5490_s28 }
 0x25b   : >> { %2300 = vmatpush1.bf16.msra.mxu0 %v5327_v16 }
 0x25c   : >> { %2301 = vmatprep.subr.bf16.mxu0 %v5328_v18 }
 0x25d   : >> { %2414 = vrot.lane.b32.xlu1 %v5313_v57, %s5491_s8  ;;  %2412 = vrot.lane.b32.xlu0 %v5315_v0, %s5491_s8 }
 0x25f   : >> { %2302 = vmatpush1.bf16.msra.mxu0 %v5330_v19 }
 0x260   : >> { %2303 = vmatprep.subr.bf16.mxu0 %v5331_v20 }
 0x261   : >> { %2068 = vrot.lane.b32.xlu1 %v5322_v11, %s5490_s28  ;;  %2066 = vrot.lane.b32.xlu0 %v5324_v15, %s5490_s28 }
 0x263   : >> { %2304 = vmatpush1.bf16.msra.mxu0 %v5333_v22 }
 0x264   : >> { %2305 = vmatprep.subr.bf16.mxu0 %v5334_v25 }
 0x265   : >> { %2418 = vrot.lane.b32.xlu1 %v5316_v6, %s5491_s8  ;;  %2416 = vrot.lane.b32.xlu0 %v5318_v58, %s5491_s8 }
 0x267   : >> { %2306 = vmatpush1.bf16.msra.mxu0 %v5336_v23 }
 0x268   : >> { %2307 = vmatprep.subr.bf16.mxu0 %v5337_v26 }
 0x269   : >> { %2072 = vrot.lane.b32.xlu1 %v5325_v59, %s5490_s28  ;;  %2070 = vrot.lane.b32.xlu0 %v5327_v16, %s5490_s28 }
 0x26b   : >> { %2308 = vmatpush1.bf16.msra.mxu0 %v5339_v27 }
 0x26c   : >> { %2309 = vmatprep.subr.bf16.mxu0 %v5340_v29 }
 0x26d   : >> { %2422 = vrot.lane.b32.xlu1 %v5319_v7, %s5491_s8  ;;  %2420 = vrot.lane.b32.xlu0 %v5321_v10, %s5491_s8  ;;  %v6413_v7 = vld [vmem:[%s6227_s11 + $0x34] ss:$8 sps:$4 sm:$0xff]   ;;  %v6418_v10 = vld [vmem:[%s6227_s11 + $0x30] ss:$8 sps:$4 sm:$0xff]  }
 0x26f   : >> { %2310 = vmatpush1.bf16.msra.mxu0 %v5342_v30 }
 0x271   : >> { %2076 = vrot.lane.b32.xlu1 %v5328_v18, %s5490_s28  ;;  %2074 = vrot.lane.b32.xlu0 %v5330_v19, %s5490_s28 }
 0x272   : >> { %2320 = vmatmul.mubr.bf16.vlgmr.msra.gmra.mrb[0].mxu0 %v5367_v31 }
 0x273   : >> { %4808 = vmatprep.mubr.msk.bf16.mxu0 %vm465_vm0, %v5418_v32 }
 0x275   : >> { %2426 = vrot.lane.b32.xlu1 %v5322_v11, %s5491_s8  ;;  %2424 = vrot.lane.b32.xlu0 %v5324_v15, %s5491_s8 }
 0x279   : >> { %2080 = vrot.lane.b32.xlu1 %v5331_v20, %s5490_s28  ;;  %2078 = vrot.lane.b32.xlu0 %v5333_v22, %s5490_s28 }
 0x27a   : >> { %2330 = vmatmul.mubr.bf16.gmra.mrb[4].mxu0 %v5420_v60 }
 0x27b   : >> { %4809 = vmatprep.mubr.msk.bf16.mxu0 %vm465_vm0, %v5421_v62  ;;  %v6457_v62 = vld [vmem:[%s6227_s11 + $0x54] ss:$8 sps:$4 sm:$0xff]  }
 0x27d   : >> { %2430 = vrot.lane.b32.xlu1 %v5325_v59, %s5491_s8  ;;  %2428 = vrot.lane.b32.xlu0 %v5327_v16, %s5491_s8  ;;  %v6424_v16 = vld [vmem:[%s6220_s9 + $0x64] ss:$8 sps:$4 sm:$0xff]  }
 0x281   : >> { %2084 = vrot.lane.b32.xlu1 %v5334_v25, %s5490_s28  ;;  %2082 = vrot.lane.b32.xlu0 %v5336_v23, %s5490_s28 }
 0x282   : >> { %2340 = vmatmul.mubr.bf16.gmra.mrb[8].mxu0 %v5426_v28  ;;  %v6462_v28 = vld [vmem:[%s6227_s11 + $0x50] ss:$8 sps:$4 sm:$0xff]  }
 0x283   : >> { %4810 = vmatprep.mubr.msk.bf16.mxu0 %vm465_vm0, %v5427_v33 }
 0x285   : >> { %2434 = vrot.lane.b32.xlu1 %v5328_v18, %s5491_s8  ;;  %2432 = vrot.lane.b32.xlu0 %v5330_v19, %s5491_s8 }
 0x289   : >> { %2088 = vrot.lane.b32.xlu1 %v5337_v26, %s5490_s28  ;;  %2086 = vrot.lane.b32.xlu0 %v5339_v27, %s5490_s28 }
 0x28a   : >> { %2350 = vmatmul.mubr.bf16.gmra.mrb[12].mxu0 %v5429_v34 }
 0x28b   : >> { %4827 = vmatprep.mubr.msk.bf16.mxu0 %vm465_vm0, %v5432_v39 }
 0x28d   : >> { %2438 = vrot.lane.b32.xlu1 %v5331_v20, %s5491_s8  ;;  %2436 = vrot.lane.b32.xlu0 %v5333_v22, %s5491_s8  ;;  %v6435_v22 = vld [vmem:[%s6227_s11 + $0x44] ss:$8 sps:$4 sm:$0xff]  }
 0x291   : >> { %2092 = vrot.lane.b32.xlu1 %v5340_v29, %s5490_s28  ;;  %2090 = vrot.lane.b32.xlu0 %v5342_v30, %s5490_s28 }
 0x295   : >> { %2442 = vrot.lane.b32.xlu1 %v5334_v25, %s5491_s8  ;;  %2440 = vrot.lane.b32.xlu0 %v5336_v23, %s5491_s8  ;;  %v6440_v25 = vld [vmem:[%s6227_s11 + $0x40] ss:$8 sps:$4 sm:$0xff]  }
 0x299   : >> { %2834 = vrot.lane.b32.xlu1 %v6311_v35, %s5490_s28  ;;  %2832 = vrot.lane.b32.xlu0 %v6316_v38, %s5490_s28 }
 0x29d   : >> { %2446 = vrot.lane.b32.xlu1 %v5337_v26, %s5491_s8  ;;  %2444 = vrot.lane.b32.xlu0 %v5339_v27, %s5491_s8 }
 0x2a1   : >> { %2838 = vrot.lane.b32.xlu1 %v6327_v40, %s5490_s28  ;;  %2836 = vrot.lane.b32.xlu0 %v6332_v41, %s5490_s28 }
 0x2a5   : >> { %2450 = vrot.lane.b32.xlu1 %v5340_v29, %s5491_s8  ;;  %2448 = vrot.lane.b32.xlu0 %v5342_v30, %s5491_s8  ;;  %v6446_v29 = vld [vmem:[%s6220_s9 + $0x74] ss:$8 sps:$4 sm:$0xff]   ;;  %v6451_v30 = vld [vmem:[%s6220_s9 + $0x70] ss:$8 sps:$4 sm:$0xff]  }
 0x2a9   : >> { %2842 = vrot.lane.b32.xlu1 %v6340_v42, %s5490_s28  ;;  %2840 = vrot.lane.b32.xlu0 %v6344_v44, %s5490_s28 }
 0x2ad   : >> { %3652 = vrot.lane.b32.xlu1 %v6349_v45, %s5490_s28  ;;  %3650 = vrot.lane.b32.xlu0 %v6354_v46, %s5490_s28 }
 0x2b1   : >> { %2846 = vrot.lane.b32.xlu1 %v6359_v3, %s5490_s28  ;;  %2844 = vrot.lane.b32.xlu0 %v6364_v47, %s5490_s28 }
 0x2b3   : >> { %v2051_v49 = vpop.permute.xlu1 %2050  ;;  %v2047_v4 = vpop.permute.xlu0 %2046 }
 0x2b5   : >> { %3656 = vrot.lane.b32.xlu1 %v6369_v48, %s5490_s28  ;;  %3654 = vrot.lane.b32.xlu0 %v6374_v1, %s5490_s28 }
 0x2b7   : >> { %v2053_v5 = vpop.permute.xlu1 %2052  ;;  %v2049_v52 = vpop.permute.xlu0 %2048 }
 0x2b8   : >> { %2142 = vmatprep.subr.bf16.mxu1 %v2049_v52  ;;  %v2094_v8 = vsel %vm428_vm1, %v2047_v4, %v2049_v52  ;;  %v2095_v56 = vsel %vm428_vm1, %v2051_v49, %v2053_v5  ;;  %v6468_v49 = vld [vmem:[%s6220_s9 + $0x84] ss:$8 sps:$4 sm:$0xff]   ;;  %v6473_v4 = vld [vmem:[%s6220_s9 + $0x80] ss:$8 sps:$4 sm:$0xff]  }
 0x2b9   : >> { %2850 = vrot.lane.b32.xlu1 %v6379_v50, %s5490_s28  ;;  %2848 = vrot.lane.b32.xlu0 %v6384_v51, %s5490_s28 }
 0x2ba   : >> { %2143 = vmatpush1.bf16.msra.mxu1 %v2094_v8 }
 0x2bb   : >> { %2144 = vmatprep.subr.bf16.mxu1 %v2053_v5  ;;  %v2057_v9 = vpop.permute.xlu1 %2056  ;;  %v2055_v55 = vpop.permute.xlu0 %2054 }
 0x2bc   : >> { %v2096_v58 = vsel %vm428_vm1, %v2055_v55, %v2057_v9  ;;  %v6484_v55 = vld [vmem:[%s6227_s11 + $0x60] ss:$8 sps:$4 sm:$0xff]  }
 0x2bd   : >> { %3660 = vrot.lane.b32.xlu1 %v6390_v53, %s5490_s28  ;;  %3658 = vrot.lane.b32.xlu0 %v6395_v54, %s5490_s28 }
 0x2be   : >> { %2145 = vmatpush1.bf16.msra.mxu1 %v2095_v56 }
 0x2bf   : >> { %2146 = vmatprep.subr.bf16.mxu1 %v2057_v9  ;;  %v2407_v57 = vpop.permute.xlu1 %2406  ;;  %v2405_v0 = vpop.permute.xlu0 %2404  ;;  %v6479_v9 = vld [vmem:[%s6227_s11 + $0x64] ss:$8 sps:$4 sm:$0xff]  }
 0x2c0   : >> { %2500 = vmatprep.subr.bf16.mxu0 %v2407_v57  ;;  %v2452_v6 = vsel %vm789_vm2, %v2405_v0, %v2407_v57 }
 0x2c1   : >> { %2854 = vrot.lane.b32.xlu1 %v6401_v13, %s5490_s28  ;;  %2852 = vrot.lane.b32.xlu0 %v6406_v2, %s5490_s28 }
 0x2c2   : >> { %2147 = vmatpush1.bf16.msra.mxu1 %v2096_v58  ;;  %2501 = vmatpush1.bf16.msra.mxu0 %v2452_v6  ;;  %v6490_v6 = vld [vmem:[%s6220_s9 + $0x94] ss:$8 sps:$4 sm:$0xff]   ;;  %v6495_v58 = vld [vmem:[%s6220_s9 + $0x90] ss:$8 sps:$4 sm:$0xff]  }
 0x2c3   : >> { %v2061_v11 = vpop.permute.xlu1 %2060  ;;  %v2059_v15 = vpop.permute.xlu0 %2058 }
 0x2c4   : >> { %2148 = vmatprep.subr.bf16.mxu1 %v2061_v11  ;;  %v2097_v59 = vsel %vm428_vm1, %v2059_v15, %v2061_v11 }
 0x2c5   : >> { %3664 = vrot.lane.b32.xlu1 %v6413_v7, %s5490_s28  ;;  %3662 = vrot.lane.b32.xlu0 %v6418_v10, %s5490_s28 }
 0x2c6   : >> { %2149 = vmatpush1.bf16.msra.mxu1 %v2097_v59 }
 0x2c7   : >> { %v2411_v18 = vpop.permute.xlu1 %2410  ;;  %v2409_v19 = vpop.permute.xlu0 %2408 }
 0x2c8   : >> { %2502 = vmatprep.subr.bf16.mxu0 %v2411_v18  ;;  %v2453_v20 = vsel %vm789_vm2, %v2409_v19, %v2411_v18  ;;  %v6501_v18 = vld [vmem:[%s6227_s11 + $0x74] ss:$8 sps:$4 sm:$0xff]   ;;  %v6506_v19 = vld [vmem:[%s6227_s11 + $0x70] ss:$8 sps:$4 sm:$0xff]  }
 0x2c9   : >> { %2858 = vrot.lane.b32.xlu1 %v6424_v16, %s5490_s28  ;;  %2856 = vrot.lane.b32.xlu0 %v6429_v17, %s5490_s28 }
 0x2ca   : >> { %2503 = vmatpush1.bf16.msra.mxu0 %v2453_v20 }
 0x2cb   : >> { %v2065_v23 = vpop.permute.xlu1 %2064  ;;  %v2063_v26 = vpop.permute.xlu0 %2062 }
 0x2cc   : >> { %2150 = vmatprep.subr.bf16.mxu1 %v2065_v23  ;;  %v2098_v27 = vsel %vm428_vm1, %v2063_v26, %v2065_v23 }
 0x2cd   : >> { %3668 = vrot.lane.b32.xlu1 %v6435_v22, %s5490_s28  ;;  %3666 = vrot.lane.b32.xlu0 %v6440_v25, %s5490_s28 }
 0x2ce   : >> { %2151 = vmatpush1.bf16.msra.mxu1 %v2098_v27  ;;  %v6512_v27 = vld [vmem:[%s6220_s9 + $0xa4] ss:$8 sps:$4 sm:$0xff]  }
 0x2cf   : >> { %v2415_v31 = vpop.permute.xlu1 %2414  ;;  %v2413_v32 = vpop.permute.xlu0 %2412 }
 0x2d0   : >> { %2504 = vmatprep.subr.bf16.mxu0 %v2415_v31  ;;  %v2454_v60 = vsel %vm789_vm2, %v2413_v32, %v2415_v31  ;;  %v6517_v31 = vld [vmem:[%s6220_s9 + $0xa0] ss:$8 sps:$4 sm:$0xff]  }
 0x2d1   : >> { %2862 = vrot.lane.b32.xlu1 %v6446_v29, %s5490_s28  ;;  %2860 = vrot.lane.b32.xlu0 %v6451_v30, %s5490_s28 }
 0x2d2   : >> { %2505 = vmatpush1.bf16.msra.mxu0 %v2454_v60 }
 0x2d3   : >> { %v2069_v33 = vpop.permute.xlu1 %2068  ;;  %v2067_v34 = vpop.permute.xlu0 %2066 }
 0x2d4   : >> { %2152 = vmatprep.subr.bf16.mxu1 %v2069_v33  ;;  %v2099_v39 = vsel %vm428_vm1, %v2067_v34, %v2069_v33  ;;  %v6523_v34 = vld [vmem:[%s6227_s11 + $0x84] ss:$8 sps:$4 sm:$0xff]  }
 0x2d5   : >> { %3672 = vrot.lane.b32.xlu1 %v6457_v62, %s5490_s28  ;;  %3670 = vrot.lane.b32.xlu0 %v6462_v28, %s5490_s28 }
 0x2d6   : >> { %2153 = vmatpush1.bf16.msra.mxu1 %v2099_v39  ;;  %v6528_v39 = vld [vmem:[%s6227_s11 + $0x80] ss:$8 sps:$4 sm:$0xff]  }
 0x2d7   : >> { %v2419_v5 = vpop.permute.xlu1 %2418  ;;  %v2417_v52 = vpop.permute.xlu0 %2416 }
 0x2d8   : >> { %2506 = vmatprep.subr.bf16.mxu0 %v2419_v5  ;;  %v2455_v8 = vsel %vm789_vm2, %v2417_v52, %v2419_v5 }
 0x2d9   : >> { %2866 = vrot.lane.b32.xlu1 %v6468_v49, %s5490_s28  ;;  %2864 = vrot.lane.b32.xlu0 %v6473_v4, %s5490_s28 }
 0x2da   : >> { %2507 = vmatpush1.bf16.msra.mxu0 %v2455_v8 }
 0x2db   : >> { %v2073_v56 = vpop.permute.xlu1 %2072  ;;  %v2071_v57 = vpop.permute.xlu0 %2070 }
 0x2dc   : >> { %2154 = vmatprep.subr.bf16.mxu1 %v2073_v56  ;;  %v2100_v0 = vsel %vm428_vm1, %v2071_v57, %v2073_v56  ;;  %v6534_v56 = vld [vmem:[%s6220_s9 + $0xb4] ss:$8 sps:$4 sm:$0xff]   ;;  %v6539_v57 = vld [vmem:[%s6220_s9 + $0xb0] ss:$8 sps:$4 sm:$0xff]   ;;  %s5032_s9 = sshll.u32 %s5485_s20, 5  ;;  %s1785_s20 = sadd.s32 1, %s5485_s20  }
 0x2dd   : >> { %3676 = vrot.lane.b32.xlu1 %v6479_v9, %s5490_s28  ;;  %3674 = vrot.lane.b32.xlu0 %v6484_v55, %s5490_s28  ;;  %p1782_p4 = scmp.ge.s32.totalorder %s1785_s20, 67  }
 0x2de   : >> { %2155 = vmatpush1.bf16.msra.mxu1 %v2100_v0 }
 0x2df   : >> { %v2423_v11 = vpop.permute.xlu1 %2422  ;;  %v2421_v15 = vpop.permute.xlu0 %2420 }
 0x2e0   : >> { %2508 = vmatprep.subr.bf16.mxu0 %v2423_v11  ;;  %v2456_v59 = vsel %vm789_vm2, %v2421_v15, %v2423_v11 }
 0x2e1   : >> { %2870 = vrot.lane.b32.xlu1 %v6490_v6, %s5490_s28  ;;  %2868 = vrot.lane.b32.xlu0 %v6495_v58, %s5490_s28 }
 0x2e2   : >> { %2509 = vmatpush1.bf16.msra.mxu0 %v2456_v59  ;;  %v6545_v59 = vld [vmem:[%s6227_s11 + $0x94] ss:$8 sps:$4 sm:$0xff]  }
 0x2e3   : >> { %v2077_v20 = vpop.permute.xlu1 %2076  ;;  %v2075_v23 = vpop.permute.xlu0 %2074 }
 0x2e4   : >> { %2156 = vmatprep.subr.bf16.mxu1 %v2077_v20  ;;  %v2101_v26 = vsel %vm428_vm1, %v2075_v23, %v2077_v20  ;;  %v6550_v20 = vld [vmem:[%s6227_s11 + $0x90] ss:$8 sps:$4 sm:$0xff]  }
 0x2e5   : >> { %3680 = vrot.lane.b32.xlu1 %v6501_v18, %s5490_s28  ;;  %3678 = vrot.lane.b32.xlu0 %v6506_v19, %s5490_s28 }
 0x2e6   : >> { %2157 = vmatpush1.bf16.msra.mxu1 %v2101_v26 }
 0x2e7   : >> { %v2427_v32 = vpop.permute.xlu1 %2426  ;;  %v2425_v60 = vpop.permute.xlu0 %2424 }
 0x2e8   : >> { %2510 = vmatprep.subr.bf16.mxu0 %v2427_v32  ;;  %v2457_v33 = vsel %vm789_vm2, %v2425_v60, %v2427_v32  ;;  %v6556_v60 = vld [vmem:[%s6227_s11 + $0xa4] ss:$8 sps:$4 sm:$0xff]  }
 0x2e9   : >> { %2874 = vrot.lane.b32.xlu1 %v6512_v27, %s5490_s28  ;;  %2872 = vrot.lane.b32.xlu0 %v6517_v31, %s5490_s28 }
 0x2ea   : >> { %2511 = vmatpush1.bf16.msra.mxu0 %v2457_v33  ;;  %v6561_v33 = vld [vmem:[%s6227_s11 + $0xa0] ss:$8 sps:$4 sm:$0xff]  }
 0x2eb   : >> { %v2081_v5 = vpop.permute.xlu1 %2080  ;;  %v2079_v52 = vpop.permute.xlu0 %2078 }
 0x2ec   : >> { %2158 = vmatprep.subr.bf16.mxu1 %v2081_v5  ;;  %v2102_v8 = vsel %vm428_vm1, %v2079_v52, %v2081_v5 }
 0x2ed   : >> { %3684 = vrot.lane.b32.xlu1 %v6523_v34, %s5490_s28  ;;  %3682 = vrot.lane.b32.xlu0 %v6528_v39, %s5490_s28 }
 0x2ee   : >> { %2159 = vmatpush1.bf16.msra.mxu1 %v2102_v8 }
 0x2ef   : >> { %v2431_v0 = vpop.permute.xlu1 %2430  ;;  %v2429_v11 = vpop.permute.xlu0 %2428 }
 0x2f0   : >> { %2512 = vmatprep.subr.bf16.mxu0 %v2431_v0  ;;  %v2458_v15 = vsel %vm789_vm2, %v2429_v11, %v2431_v0  ;;  %v6567_v0 = vld [vmem:[%s6227_s11 + $0xb4] ss:$8 sps:$4 sm:$0xff]   ;;  %v6572_v11 = vld [vmem:[%s6227_s11 + $0xb0] ss:$8 sps:$4 sm:$0xff]   ;;  %s7213_s11 = scalar_lea.vmem %s5535_s24, %s5032_s9 }
 0x2f1   : >> { %2878 = vrot.lane.b32.xlu1 %v6534_v56, %s5490_s28  ;;  %2876 = vrot.lane.b32.xlu0 %v6539_v57, %s5490_s28  ;;  %7281 = vst [vmem:[#allocation12_spill] sm:$0xff] %v6572_v11 }
 0x2f2   : >> { %2513 = vmatpush1.bf16.msra.mxu0 %v2458_v15 }
 0x2f3   : >> { %v2085_v23 = vpop.permute.xlu1 %2084  ;;  %v2083_v26 = vpop.permute.xlu0 %2082 }
 0x2f4   : >> { %2160 = vmatprep.subr.bf16.mxu1 %v2085_v23  ;;  %v2103_v32 = vsel %vm428_vm1, %v2083_v26, %v2085_v23 }
 0x2f5   : >> { %3688 = vrot.lane.b32.xlu1 %v6545_v59, %s5490_s28  ;;  %3686 = vrot.lane.b32.xlu0 %v6550_v20, %s5490_s28 }
 0x2f6   : >> { %2161 = vmatpush1.bf16.msra.mxu1 %v2103_v32 }
 0x2f7   : >> { %v2435_v5 = vpop.permute.xlu1 %2434  ;;  %v2433_v52 = vpop.permute.xlu0 %2432 }
 0x2f8   : >> { %2514 = vmatprep.subr.bf16.mxu0 %v2435_v5  ;;  %v2459_v8 = vsel %vm789_vm2, %v2433_v52, %v2435_v5 }
 0x2f9   : >> { %3692 = vrot.lane.b32.xlu1 %v6556_v60, %s5490_s28  ;;  %3690 = vrot.lane.b32.xlu0 %v6561_v33, %s5490_s28 }
 0x2fa   : >> { %2515 = vmatpush1.bf16.msra.mxu0 %v2459_v8 }
 0x2fb   : >> { %v2089_v15 = vpop.permute.xlu1 %2088  ;;  %v2087_v23 = vpop.permute.xlu0 %2086 }
 0x2fc   : >> { %2162 = vmatprep.subr.bf16.mxu1 %v2089_v15  ;;  %v2104_v26 = vsel %vm428_vm1, %v2087_v23, %v2089_v15  ;;  %v6590_v23 = vld [vmem:[%s7238_s1 + $0x40] ss:$8 sps:$4 sm:$0xff]  }
 0x2fd   : >> { %3696 = vrot.lane.b32.xlu1 %v6567_v0, %s5490_s28  ;;  %3694 = vrot.lane.b32.xlu0 %v6572_v11, %s5490_s28 }
 0x2fe   : >> { %2163 = vmatpush1.bf16.msra.mxu1 %v2104_v26 }
 0x2ff   : >> { %v2439_v32 = vpop.permute.xlu1 %2438  ;;  %v2437_v5 = vpop.permute.xlu0 %2436 }
 0x300   : >> { %2516 = vmatprep.subr.bf16.mxu0 %v2439_v32  ;;  %v2460_v52 = vsel %vm789_vm2, %v2437_v5, %v2439_v32  ;;  %v6597_v32 = vld [vmem:[%s7238_s1 + $0x54] ss:$8 sps:$4 sm:$0xff]  }
 0x301   : >> { %3192 = vrot.lane.b32.xlu1 %v6311_v35, %s5491_s8  ;;  %3190 = vrot.lane.b32.xlu0 %v6316_v38, %s5491_s8 }
 0x302   : >> { %2517 = vmatpush1.bf16.msra.mxu0 %v2460_v52 }
 0x303   : >> { %v2093_v8 = vpop.permute.xlu1 %2092  ;;  %v2091_v37 = vpop.permute.xlu0 %2090 }
 0x304   : >> { %2164 = vmatprep.subr.bf16.mxu1 %v2093_v8  ;;  %v2105_v15 = vsel %vm428_vm1, %v2091_v37, %v2093_v8 }
 0x305   : >> { %3196 = vrot.lane.b32.xlu1 %v6327_v40, %s5491_s8  ;;  %3194 = vrot.lane.b32.xlu0 %v6332_v41, %s5491_s8 }
 0x306   : >> { %2165 = vmatpush1.bf16.msra.mxu1 %v2105_v15 }
 0x307   : >> { %v2443_v26 = vpop.permute.xlu1 %2442  ;;  %v2441_v5 = vpop.permute.xlu0 %2440 }
 0x308   : >> { %2518 = vmatprep.subr.bf16.mxu0 %v2443_v26  ;;  %v2461_v52 = vsel %vm789_vm2, %v2441_v5, %v2443_v26  ;;  %v6613_v26 = vld [vmem:[%s7238_s1 + $0x50] ss:$8 sps:$4 sm:$0xff]  }
 0x309   : >> { %3200 = vrot.lane.b32.xlu1 %v6340_v42, %s5491_s8  ;;  %2175 = vmatmul.mubr.bf16.vlgmr.msra.gmra.mrb[0].mxu1 %v6590_v23 }
 0x30a   : >> { %3198 = vrot.lane.b32.xlu0 %v6344_v44, %s5491_s8  ;;  %2519 = vmatpush1.bf16.msra.mxu0 %v2461_v52  ;;  %v6620_v52 = vld [vmem:[%s7238_s1 + $0x64] ss:$8 sps:$4 sm:$0xff]  }
 0x30b   : >> { %v2835_v37 = vpop.permute.xlu1 %2834  ;;  %4796 = vmatprep.mubr.msk.bf16.mxu1 %vm465_vm0, %v6597_v32  ;;  %v2833_v8 = vpop.permute.xlu0 %2832 }
 0x30c   : >> { %2928 = vmatprep.subr.bf16.mxu1 %v2835_v37  ;;  %v2880_v15 = vsel %vm428_vm1, %v2833_v8, %v2835_v37 }
 0x30d   : >> { %4010 = vrot.lane.b32.xlu1 %v6349_v45, %s5491_s8  ;;  %2929 = vmatpush1.bf16.msra.mxu1 %v2880_v15 }
 0x30e   : >> { %4008 = vrot.lane.b32.xlu0 %v6354_v46, %s5491_s8 }
 0x30f   : >> { %v2447_v5 = vpop.permute.xlu1 %2446  ;;  %v2445_v61 = vpop.permute.xlu0 %2444 }
 0x310   : >> { %2520 = vmatprep.subr.bf16.mxu0 %v2447_v5  ;;  %v2462_v37 = vsel %vm789_vm2, %v2445_v61, %v2447_v5  ;;  %v6636_v61 = vld [vmem:[%s7238_s1 + $0x60] ss:$8 sps:$4 sm:$0xff]  }
 0x311   : >> { %3204 = vrot.lane.b32.xlu1 %v6359_v3, %s5491_s8  ;;  %2185 = vmatmul.mubr.bf16.gmra.mrb[4].mxu1 %v6613_v26 }
 0x312   : >> { %3202 = vrot.lane.b32.xlu0 %v6364_v47, %s5491_s8  ;;  %2521 = vmatpush1.bf16.msra.mxu0 %v2462_v37  ;;  %v6643_v37 = vld [vmem:[%s7238_s1 + $0x74] ss:$8 sps:$4 sm:$0xff]  }
 0x313   : >> { %v2839_v8 = vpop.permute.xlu1 %2838  ;;  %4797 = vmatprep.mubr.msk.bf16.mxu1 %vm465_vm0, %v6620_v52  ;;  %v2837_v15 = vpop.permute.xlu0 %2836 }
 0x314   : >> { %2930 = vmatprep.subr.bf16.mxu1 %v2839_v8  ;;  %v2881_v14 = vsel %vm428_vm1, %v2837_v15, %v2839_v8  ;;  %v6651_v15 = vld [vmem:[%s7238_s1 + $0x80] ss:$8 sps:$4 sm:$0xff]  }
 0x315   : >> { %4014 = vrot.lane.b32.xlu1 %v6369_v48, %s5491_s8  ;;  %2931 = vmatpush1.bf16.msra.mxu1 %v2881_v14  ;;  %7282 = vst [vmem:[#allocation13_spill] sm:$0xff] %v6651_v15 }
 0x316   : >> { %4012 = vrot.lane.b32.xlu0 %v6374_v1, %s5491_s8 }
 0x317   : >> { %v2451_v5 = vpop.permute.xlu1 %2450  ;;  %v2449_v12 = vpop.permute.xlu0 %2448 }
 0x318   : >> { %2522 = vmatprep.subr.bf16.mxu0 %v2451_v5  ;;  %v2463_v8 = vsel %vm789_vm2, %v2449_v12, %v2451_v5 }
 0x319   : >> { %3208 = vrot.lane.b32.xlu1 %v6379_v50, %s5491_s8  ;;  %2195 = vmatmul.mubr.bf16.gmra.mrb[8].mxu1 %v6636_v61 }
 0x31a   : >> { %3206 = vrot.lane.b32.xlu0 %v6384_v51, %s5491_s8  ;;  %2523 = vmatpush1.bf16.msra.mxu0 %v2463_v8  ;;  %v6670_v8 = vld [vmem:[%s7238_s1 + $0x70] ss:$8 sps:$4 sm:$0xff]  }
 0x31b   : >> { %v2843_v14 = vpop.permute.xlu1 %2842  ;;  %4798 = vmatprep.mubr.msk.bf16.mxu1 %vm465_vm0, %v6643_v37  ;;  %v2841_v12 = vpop.permute.xlu0 %2840 }
 0x31c   : >> { %2932 = vmatprep.subr.bf16.mxu1 %v2843_v14  ;;  %v2882_v5 = vsel %vm428_vm1, %v2841_v12, %v2843_v14  ;;  %v6682_v12 = vld [vmem:[%s7238_s1 + $0x90] ss:$8 sps:$4 sm:$0xff]  }
 0x31d   : >> { %2533 = vmatmul.mubr.bf16.vlgmr.msra.gmra.mrb[0].mxu0 %v6651_v15  ;;  %4018 = vrot.lane.b32.xlu1 %v6390_v53, %s5491_s8  ;;  %7284 = vst [vmem:[#allocation15_spill] sm:$0xff] %v6682_v12 }
 0x31e   : >> { %4016 = vrot.lane.b32.xlu0 %v6395_v54, %s5491_s8  ;;  %2933 = vmatpush1.bf16.msra.mxu1 %v2882_v5 }
 0x31f   : >> { %v3653_v36 = vpop.permute.xlu1 %3652  ;;  %4828 = vmatprep.mubr.msk.bf16.mxu0 %vm465_vm0, %v6659_v43  ;;  %v3651_v24 = vpop.permute.xlu0 %3650 }
 0x320   : >> { %3746 = vmatprep.subr.bf16.mxu0 %v3653_v36  ;;  %v3698_v14 = vsel %vm428_vm1, %v3651_v24, %v3653_v36 }
 0x321   : >> { %3212 = vrot.lane.b32.xlu1 %v6401_v13, %s5491_s8  ;;  %2205 = vmatmul.mubr.bf16.gmra.mrb[12].mxu1 %v6670_v8 }
 0x322   : >> { %3210 = vrot.lane.b32.xlu0 %v6406_v2, %s5491_s8  ;;  %3747 = vmatpush1.bf16.msra.mxu0 %v3698_v14 }
 0x323   : >> { %v2847_v5 = vpop.permute.xlu1 %2846  ;;  %4874 = vmatprep.mubr.msk.bf16.mxu1 %vm465_vm0, %v6291_v63  ;;  %v2845_v24 = vpop.permute.xlu0 %2844 }
 0x324   : >> { %2934 = vmatprep.subr.bf16.mxu1 %v2847_v5  ;;  %v2883_v36 = vsel %vm428_vm1, %v2845_v24, %v2847_v5  ;;  %v6708_v5 = vld [vmem:[%s7238_s1 + $0xa0] ss:$8 sps:$4 sm:$0xff]  }
 0x325   : >> { %4022 = vrot.lane.b32.xlu1 %v6413_v7, %s5491_s8  ;;  %2543 = vmatmul.mubr.bf16.gmra.mrb[4].mxu0 %v6682_v12  ;;  %7286 = vst [vmem:[#allocation17_spill] sm:$0xff] %v6708_v5 }
 0x326   : >> { %4020 = vrot.lane.b32.xlu0 %v6418_v10, %s5491_s8  ;;  %2935 = vmatpush1.bf16.msra.mxu1 %v2883_v36  ;;  %v6715_v36 = vld [vmem:[%s7238_s1 + $0xb4] ss:$8 sps:$4 sm:$0xff]  }
 0x327   : >> { %v3657_v14 = vpop.permute.xlu1 %3656  ;;  %4829 = vmatprep.mubr.msk.bf16.mxu0 %vm465_vm0, %v6690_v21  ;;  %v3655_v43 = vpop.permute.xlu0 %3654  ;;  %7287 = vst [vmem:[#allocation18_spill] sm:$0xff] %v6715_v36 }
 0x328   : >> { %3748 = vmatprep.subr.bf16.mxu0 %v3657_v14  ;;  %v3699_v15 = vsel %vm428_vm1, %v3655_v43, %v3657_v14 }
 0x329   : >> { %3216 = vrot.lane.b32.xlu1 %v6424_v16, %s5491_s8  ;;  %3749 = vmatpush1.bf16.msra.mxu0 %v3699_v15 }
 0x32a   : >> { %3214 = vrot.lane.b32.xlu0 %v6429_v17, %s5491_s8 }
 0x32b   : >> { %v2851_v24 = vpop.permute.xlu1 %2850  ;;  %v2849_v21 = vpop.permute.xlu0 %2848 }
 0x32c   : >> { %2936 = vmatprep.subr.bf16.mxu1 %v2851_v24  ;;  %v2884_v43 = vsel %vm428_vm1, %v2849_v21, %v2851_v24  ;;  %v6731_v21 = vld [vmem:[%s7238_s1 + $0xb0] ss:$8 sps:$4 sm:$0xff]  }
 0x32d   : >> { %4026 = vrot.lane.b32.xlu1 %v6435_v22, %s5491_s8  ;;  %2553 = vmatmul.mubr.bf16.gmra.mrb[8].mxu0 %v6708_v5  ;;  %7288 = vst [vmem:[#allocation19_spill] sm:$0xff] %v6731_v21 }
 0x32e   : >> { %4024 = vrot.lane.b32.xlu0 %v6440_v25, %s5491_s8  ;;  %2937 = vmatpush1.bf16.msra.mxu1 %v2884_v43 }
 0x32f   : >> { %v3661_v15 = vpop.permute.xlu1 %3660  ;;  %4830 = vmatprep.mubr.msk.bf16.mxu0 %vm465_vm0, %v6715_v36  ;;  %v3659_v14 = vpop.permute.xlu0 %3658 }
 0x330   : >> { %3750 = vmatprep.subr.bf16.mxu0 %v3661_v15  ;;  %v3700_v12 = vsel %vm428_vm1, %v3659_v14, %v3661_v15 }
 0x331   : >> { %3220 = vrot.lane.b32.xlu1 %v6446_v29, %s5491_s8  ;;  %3751 = vmatpush1.bf16.msra.mxu0 %v3700_v12 }
 0x332   : >> { %3218 = vrot.lane.b32.xlu0 %v6451_v30, %s5491_s8 }
 0x333   : >> { %v2855_v24 = vpop.permute.xlu1 %2854  ;;  %v2853_v43 = vpop.permute.xlu0 %2852 }
 0x334   : >> { %2938 = vmatprep.subr.bf16.mxu1 %v2855_v24  ;;  %v2885_v36 = vsel %vm428_vm1, %v2853_v43, %v2855_v24 }
 0x335   : >> { %4030 = vrot.lane.b32.xlu1 %v6457_v62, %s5491_s8  ;;  %2563 = vmatmul.mubr.bf16.gmra.mrb[12].mxu0 %v6731_v21 }
 0x336   : >> { %4028 = vrot.lane.b32.xlu0 %v6462_v28, %s5491_s8  ;;  %2939 = vmatpush1.bf16.msra.mxu1 %v2885_v36 }
 0x337   : >> { %v3665_v15 = vpop.permute.xlu1 %3664  ;;  %4953 = vmatprep.mubr.msk.bf16.mxu0 %vm465_vm0, %v6291_v63  ;;  %v3663_v14 = vpop.permute.xlu0 %3662 }
 0x338   : >> { %3752 = vmatprep.subr.bf16.mxu0 %v3665_v15  ;;  %v3701_v12 = vsel %vm428_vm1, %v3663_v14, %v3665_v15 }
 0x339   : >> { %3224 = vrot.lane.b32.xlu1 %v6468_v49, %s5491_s8  ;;  %3753 = vmatpush1.bf16.msra.mxu0 %v3701_v12 }
 0x33a   : >> { %3222 = vrot.lane.b32.xlu0 %v6473_v4, %s5491_s8 }
 0x33b   : >> { %v2859_v24 = vpop.permute.xlu1 %2858  ;;  %v2857_v43 = vpop.permute.xlu0 %2856 }
 0x33c   : >> { %2940 = vmatprep.subr.bf16.mxu1 %v2859_v24  ;;  %v2886_v36 = vsel %vm428_vm1, %v2857_v43, %v2859_v24 }
 0x33d   : >> { %4034 = vrot.lane.b32.xlu1 %v6479_v9, %s5491_s8  ;;  %2941 = vmatpush1.bf16.msra.mxu1 %v2886_v36 }
 0x33e   : >> { %4032 = vrot.lane.b32.xlu0 %v6484_v55, %s5491_s8 }
 0x33f   : >> { %v3669_v63 = vpop.permute.xlu1 %3668  ;;  %v3667_v15 = vpop.permute.xlu0 %3666 }
 0x340   : >> { %3754 = vmatprep.subr.bf16.mxu0 %v3669_v63  ;;  %v3702_v14 = vsel %vm428_vm1, %v3667_v15, %v3669_v63 }
 0x341   : >> { %3228 = vrot.lane.b32.xlu1 %v6490_v6, %s5491_s8  ;;  %3755 = vmatpush1.bf16.msra.mxu0 %v3702_v14 }
 0x342   : >> { %3226 = vrot.lane.b32.xlu0 %v6495_v58, %s5491_s8 }
 0x343   : >> { %v2863_v12 = vpop.permute.xlu1 %2862  ;;  %v2861_v24 = vpop.permute.xlu0 %2860 }
 0x344   : >> { %2942 = vmatprep.subr.bf16.mxu1 %v2863_v12  ;;  %v2887_v43 = vsel %vm428_vm1, %v2861_v24, %v2863_v12 }
 0x345   : >> { %4038 = vrot.lane.b32.xlu1 %v6501_v18, %s5491_s8  ;;  %2943 = vmatpush1.bf16.msra.mxu1 %v2887_v43 }
 0x346   : >> { %4036 = vrot.lane.b32.xlu0 %v6506_v19, %s5491_s8 }
 0x347   : >> { %v3673_v36 = vpop.permute.xlu1 %3672  ;;  %v3671_v63 = vpop.permute.xlu0 %3670 }
 0x348   : >> { %3756 = vmatprep.subr.bf16.mxu0 %v3673_v36  ;;  %v3703_v15 = vsel %vm428_vm1, %v3671_v63, %v3673_v36 }
 0x349   : >> { %3232 = vrot.lane.b32.xlu1 %v6512_v27, %s5491_s8  ;;  %3757 = vmatpush1.bf16.msra.mxu0 %v3703_v15 }
 0x34a   : >> { %3230 = vrot.lane.b32.xlu0 %v6517_v31, %s5491_s8 }
 0x34b   : >> { %v2867_v14 = vpop.permute.xlu1 %2866  ;;  %v2865_v12 = vpop.permute.xlu0 %2864 }
 0x34c   : >> { %2944 = vmatprep.subr.bf16.mxu1 %v2867_v14  ;;  %v2888_v24 = vsel %vm428_vm1, %v2865_v12, %v2867_v14 }
 0x34d   : >> { %4042 = vrot.lane.b32.xlu1 %v6523_v34, %s5491_s8  ;;  %2945 = vmatpush1.bf16.msra.mxu1 %v2888_v24 }
 0x34e   : >> { %4040 = vrot.lane.b32.xlu0 %v6528_v39, %s5491_s8 }
 0x34f   : >> { %v3677_v43 = vpop.permute.xlu1 %3676  ;;  %v3675_v36 = vpop.permute.xlu0 %3674 }
 0x350   : >> { %3758 = vmatprep.subr.bf16.mxu0 %v3677_v43  ;;  %v3704_v63 = vsel %vm428_vm1, %v3675_v36, %v3677_v43 }
 0x351   : >> { %3236 = vrot.lane.b32.xlu1 %v6534_v56, %s5491_s8  ;;  %3759 = vmatpush1.bf16.msra.mxu0 %v3704_v63 }
 0x352   : >> { %3234 = vrot.lane.b32.xlu0 %v6539_v57, %s5491_s8 }
 0x353   : >> { %v2871_v15 = vpop.permute.xlu1 %2870  ;;  %v2869_v14 = vpop.permute.xlu0 %2868 }
 0x354   : >> { %2946 = vmatprep.subr.bf16.mxu1 %v2871_v15  ;;  %v2889_v12 = vsel %vm428_vm1, %v2869_v14, %v2871_v15 }
 0x355   : >> { %4046 = vrot.lane.b32.xlu1 %v6545_v59, %s5491_s8  ;;  %2947 = vmatpush1.bf16.msra.mxu1 %v2889_v12 }
 0x356   : >> { %4044 = vrot.lane.b32.xlu0 %v6550_v20, %s5491_s8 }
 0x357   : >> { %v3681_v24 = vpop.permute.xlu1 %3680  ;;  %v3679_v43 = vpop.permute.xlu0 %3678 }
 0x358   : >> { %3760 = vmatprep.subr.bf16.mxu0 %v3681_v24  ;;  %v3705_v36 = vsel %vm428_vm1, %v3679_v43, %v3681_v24 }
 0x359   : >> { %4050 = vrot.lane.b32.xlu1 %v6556_v60, %s5491_s8  ;;  %3761 = vmatpush1.bf16.msra.mxu0 %v3705_v36 }
 0x35a   : >> { %4048 = vrot.lane.b32.xlu0 %v6561_v33, %s5491_s8 }
 0x35b   : >> { %v2875_v63 = vpop.permute.xlu1 %2874  ;;  %v2873_v15 = vpop.permute.xlu0 %2872 }
 0x35c   : >> { %2948 = vmatprep.subr.bf16.mxu1 %v2875_v63  ;;  %v2890_v14 = vsel %vm428_vm1, %v2873_v15, %v2875_v63 }
 0x35d   : >> { %4054 = vrot.lane.b32.xlu1 %v6567_v0, %s5491_s8  ;;  %2949 = vmatpush1.bf16.msra.mxu1 %v2890_v14 }
 0x35e   : >> { %4052 = vrot.lane.b32.xlu0 %v6572_v11, %s5491_s8 }
 0x35f   : >> { %v3685_v12 = vpop.permute.xlu1 %3684  ;;  %v3683_v24 = vpop.permute.xlu0 %3682 }
 0x360   : >> { %3762 = vmatprep.subr.bf16.mxu0 %v3685_v12  ;;  %v3706_v43 = vsel %vm428_vm1, %v3683_v24, %v3685_v12  ;;  %v1804_v12 = vld [vmem:[#allocation2 + $0x88] sm:$0xff] }
 0x361   : >> { %3763 = vmatpush1.bf16.msra.mxu0 %v3706_v43  ;;  %v1790_v43 = vld [vmem:[#allocation2 + $0x18] sm:$0xff] }
 0x363   : >> { %v2879_v21 = vpop.permute.xlu1 %2878  ;;  %v2877_v36 = vpop.permute.xlu0 %2876 }
 0x364   : >> { %2950 = vmatprep.subr.bf16.mxu1 %v2879_v21  ;;  %v2891_v5 = vsel %vm428_vm1, %v2877_v36, %v2879_v21 }
 0x365   : >> { %2951 = vmatpush1.bf16.msra.mxu1 %v2891_v5 }
 0x366   : >> { %3073 = vmatprep.subr.bf16.mxu1 %v6311_v35  ;;  %v1788_v35 = vld [vmem:[#allocation2 + $0x8] sm:$0xff] }
 0x367   : >> { %v3689_v63 = vpop.permute.xlu1 %3688  ;;  %v3687_v15 = vpop.permute.xlu0 %3686 }
 0x368   : >> { %3764 = vmatprep.subr.bf16.mxu0 %v3689_v63  ;;  %v3707_v11 = vsel %vm428_vm1, %v3687_v15, %v3689_v63  ;;  %2961 = vmatmul.mubr.bf16.vlgmr.msra.gmra.mrb[16].mxu1 %v6590_v23  ;;  %v7289_v15 = vld [vmem:[#allocation12_spill] sm:$0xff] }
 0x369   : >> { %3074 = vmatpush1.bf16.msra.mxu1 %v6316_v38  ;;  %3765 = vmatpush1.bf16.msra.mxu0 %v3707_v11  ;;  %v1820_v38 = vadd.f32 %v1804_v12, %v1788_v35 }
 0x36a   : >> { %3075 = vmatprep.subr.bf16.mxu1 %v6327_v40  ;;  %4875 = vmatprep.mubr.msk.bf16.mxu1 %vm465_vm0, %v6597_v32  ;;  %v1806_v40 = vld [vmem:[#allocation2 + $0x98] sm:$0xff] }
 0x36b   : >> { %v3693_v14 = vpop.permute.xlu1 %3692  ;;  %v3691_v21 = vpop.permute.xlu0 %3690  ;;  %1836 = vst.msk [vmem:[#allocation3 + $0x8] sm:$0xff] %vm1000_vm3, %v1820_v38  ;;  %v1822_v63 = vadd.f32 %v1806_v40, %v1790_v43 }
 0x36c   : >> { %3766 = vmatprep.subr.bf16.mxu0 %v3693_v14  ;;  %v3708_v5 = vsel %vm428_vm1, %v3691_v21, %v3693_v14 }
 0x36d   : >> { %3076 = vmatpush1.bf16.msra.mxu1 %v6332_v41  ;;  %3767 = vmatpush1.bf16.msra.mxu0 %v3708_v5  ;;  %1838 = vst.msk [vmem:[#allocation3 + $0x18] sm:$0xff] %vm1000_vm3, %v1822_v63 }
 0x36e   : >> { %3077 = vmatprep.subr.bf16.mxu1 %v6340_v42 }
 0x36f   : >> { %v3697_v24 = vpop.permute.xlu1 %3696  ;;  %v3695_v11 = vpop.permute.xlu0 %3694 }
 0x370   : >> { %3768 = vmatprep.subr.bf16.mxu0 %v3697_v24  ;;  %v3709_v36 = vsel %vm428_vm1, %v3695_v11, %v3697_v24  ;;  %2971 = vmatmul.mubr.bf16.gmra.mrb[20].mxu1 %v6613_v26  ;;  %v5467_v11 = vld [vmem:[%s7238_s1 + $0x20] ss:$8 sps:$4 sm:$0xff]  }
 0x371   : >> { %3078 = vmatpush1.bf16.msra.mxu1 %v6344_v44  ;;  %3769 = vmatpush1.bf16.msra.mxu0 %v3709_v36  ;;  %v5468_v36 = vld [vmem:[%s7238_s1 + $0x34] ss:$8 sps:$4 sm:$0xff]  }
 0x372   : >> { %3079 = vmatprep.subr.bf16.mxu1 %v6359_v3  ;;  %3891 = vmatprep.subr.bf16.mxu0 %v6349_v45 }
 0x373   : >> { %v6809_v41 = vpop.permute.xlu1 %3192  ;;  %v6814_v42 = vpop.permute.xlu0 %3190  ;;  %4876 = vmatprep.mubr.msk.bf16.mxu1 %vm465_vm0, %v6620_v52 }
 0x374   : >> { %3779 = vmatmul.mubr.bf16.vlgmr.msra.gmra.mrb[16].mxu0 %v6590_v23  ;;  %v1798_v23 = vld [vmem:[#allocation2 + $0x58] sm:$0xff] }
 0x375   : >> { %3080 = vmatpush1.bf16.msra.mxu1 %v6364_v47  ;;  %3892 = vmatpush1.bf16.msra.mxu0 %v6354_v46  ;;  %v1792_v47 = vld [vmem:[#allocation2 + $0x28] sm:$0xff] }
 0x376   : >> { %3081 = vmatprep.subr.bf16.mxu1 %v6379_v50  ;;  %3893 = vmatprep.subr.bf16.mxu0 %v6369_v48  ;;  %v1808_v48 = vld [vmem:[#allocation2 + $0xa8] sm:$0xff] }
 0x377   : >> { %v6821_v44 = vpop.permute.xlu1 %3196  ;;  %v6825_v45 = vpop.permute.xlu0 %3194  ;;  %4954 = vmatprep.mubr.msk.bf16.mxu0 %vm465_vm0, %v6597_v32 }
 0x378   : >> { %2981 = vmatmul.mubr.bf16.gmra.mrb[24].mxu1 %v6636_v61 }
 0x379   : >> { %3082 = vmatpush1.bf16.msra.mxu1 %v6384_v51  ;;  %3894 = vmatpush1.bf16.msra.mxu0 %v6374_v1  ;;  %v1794_v1 = vld [vmem:[#allocation2 + $0x38] sm:$0xff]  ;;  %v1824_v51 = vadd.f32 %v1808_v48, %v1792_v47 }
 0x37a   : >> { %3083 = vmatprep.subr.bf16.mxu1 %v6401_v13  ;;  %3895 = vmatprep.subr.bf16.mxu0 %v6390_v53  ;;  %v1810_v53 = vld [vmem:[#allocation2 + $0xb8] sm:$0xff] }
 0x37b   : >> { %v6832_v3 = vpop.permute.xlu1 %3200  ;;  %4877 = vmatprep.mubr.msk.bf16.mxu1 %vm465_vm0, %v6643_v37  ;;  %1840 = vst.msk [vmem:[#allocation3 + $0x28] sm:$0xff] %vm1000_vm3, %v1824_v51 }
 0x37c   : >> { %v6836_v46 = vpop.permute.xlu0 %3198  ;;  %3789 = vmatmul.mubr.bf16.gmra.mrb[20].mxu0 %v6613_v26 }
 0x37d   : >> { %3084 = vmatpush1.bf16.msra.mxu1 %v6406_v2  ;;  %3896 = vmatpush1.bf16.msra.mxu0 %v6395_v54  ;;  %v5453_v54 = vld [vmem:[%s7238_s1 + $0x4] ss:$8 sps:$4 sm:$0xff]   ;;  %v1826_v2 = vadd.f32 %v1810_v53, %v1794_v1 }
 0x37e   : >> { %3085 = vmatprep.subr.bf16.mxu1 %v6424_v16  ;;  %3897 = vmatprep.subr.bf16.mxu0 %v6413_v7  ;;  %v5470_v1 = vld [vmem:[%s7238_s1 + $0x84] ss:$8 sps:$4 sm:$0xff]  }
 0x37f   : >> { %v6843_v50 = vpop.permute.xlu1 %4010  ;;  %4955 = vmatprep.mubr.msk.bf16.mxu0 %vm465_vm0, %v6620_v52  ;;  %1842 = vst.msk [vmem:[#allocation3 + $0x38] sm:$0xff] %vm1000_vm3, %v1826_v2 }
 0x380   : >> { %v6847_v13 = vpop.permute.xlu0 %4008  ;;  %2991 = vmatmul.mubr.bf16.gmra.mrb[28].mxu1 %v6670_v8 }
 0x381   : >> { %3086 = vmatpush1.bf16.msra.mxu1 %v6429_v17  ;;  %3898 = vmatpush1.bf16.msra.mxu0 %v6418_v10  ;;  %v1796_v17 = vld [vmem:[#allocation2 + $0x48] sm:$0xff]  ;;  %v4056_v21 = vsel %vm789_vm2, %v6847_v13, %v6843_v50 }
 0x382   : >> { %3087 = vmatprep.subr.bf16.mxu1 %v6446_v29  ;;  %3899 = vmatprep.subr.bf16.mxu0 %v6435_v22  ;;  %v1812_v10 = vld [vmem:[#allocation2 + $0xc8] sm:$0xff]  ;;  %v1814_v29 = vld [vmem:[#allocation2 + $0xd8] sm:$0xff] }
 0x383   : >> { %v6859_v7 = vpop.permute.xlu1 %3204  ;;  %4886 = vmatprep.mubr.msk.bf16.mxu1 %vm465_vm0, %v5453_v54  ;;  %v1828_v22 = vadd.f32 %v1812_v10, %v1796_v17  ;;  %v1830_v52 = vadd.f32 %v1814_v29, %v1798_v23 }
 0x384   : >> { %v6863_v16 = vpop.permute.xlu0 %3202  ;;  %3799 = vmatmul.mubr.bf16.gmra.mrb[24].mxu0 %v6636_v61  ;;  %v1818_v61 = vld [vmem:[#allocation2 + $0xf8] sm:$0xff] }
 0x385   : >> { %3088 = vmatpush1.bf16.msra.mxu1 %v6451_v30  ;;  %3900 = vmatpush1.bf16.msra.mxu0 %v6440_v25  ;;  %1844 = vst.msk [vmem:[#allocation3 + $0x48] sm:$0xff] %vm1000_vm3, %v1828_v22  ;;  %1846 = vst.msk [vmem:[#allocation3 + $0x58] sm:$0xff] %vm1000_vm3, %v1830_v52  ;;  %v3241_v5 = vsel %vm789_vm2, %v6863_v16, %v6859_v7 }
 0x386   : >> { %3089 = vmatprep.subr.bf16.mxu1 %v6468_v49  ;;  %3901 = vmatprep.subr.bf16.mxu0 %v6457_v62  ;;  %v1800_v62 = vld [vmem:[#allocation2 + $0x68] sm:$0xff] }
 0x387   : >> { %v6869_v32 = vpop.permute.xlu1 %4014  ;;  %4956 = vmatprep.mubr.msk.bf16.mxu0 %vm465_vm0, %v6643_v37  ;;  %v1816_v49 = vld [vmem:[#allocation2 + $0xe8] sm:$0xff] }
 0x388   : >> { %v6873_v26 = vpop.permute.xlu0 %4012 }
 0x389   : >> { %3090 = vmatpush1.bf16.msra.mxu1 %v6473_v4  ;;  %3902 = vmatpush1.bf16.msra.mxu0 %v6462_v28  ;;  %v1802_v4 = vld [vmem:[#allocation2 + $0x78] sm:$0xff]  ;;  %v4057_v24 = vsel %vm789_vm2, %v6873_v26, %v6869_v32 }
 0x38a   : >> { %3091 = vmatprep.subr.bf16.mxu1 %v6490_v6  ;;  %3903 = vmatprep.subr.bf16.mxu0 %v6479_v9  ;;  %v1832_v6 = vadd.f32 %v1816_v49, %v1800_v62  ;;  %v1834_v37 = vadd.f32 %v1818_v61, %v1802_v4  ;;  %v5492_v49 = vmov 0   ;;  %v5454_v4 = vld [vmem:[%s7240_s3] sm:$0xff]   ;;  %v7290_v61 = vld [vmem:[#allocation13_spill] sm:$0xff] }
 0x38b   : >> { %v6881_v25 = vpop.permute.xlu1 %3208 }
 0x38c   : >> { %v6885_v30 = vpop.permute.xlu0 %3206  ;;  %3809 = vmatmul.mubr.bf16.gmra.mrb[28].mxu0 %v6670_v8  ;;  %1848 = vst.msk [vmem:[#allocation3 + $0x68] sm:$0xff] %vm1000_vm3, %v1832_v6  ;;  %1850 = vst.msk [vmem:[#allocation3 + $0x78] sm:$0xff] %vm1000_vm3, %v1834_v37  ;;  %v5465_v8 = vld [vmem:[%s7238_s1 + $0x10] ss:$8 sps:$4 sm:$0xff]  }
 0x38d   : >> { %3092 = vmatpush1.bf16.msra.mxu1 %v6495_v58  ;;  %3904 = vmatpush1.bf16.msra.mxu0 %v6484_v55  ;;  %v3242_v38 = vsel %vm789_vm2, %v6885_v30, %v6881_v25 }
 0x38e   : >> { %3093 = vmatprep.subr.bf16.mxu1 %v6512_v27  ;;  %3905 = vmatprep.subr.bf16.mxu0 %v6501_v18  ;;  %v5451_v18 = vld [vmem:[%s7238_s1] ss:$8 sps:$4 sm:$0xff]  }
 0x38f   : >> { %v6890_v28 = vpop.permute.xlu1 %4018  ;;  %4965 = vmatprep.mubr.msk.bf16.mxu0 %vm465_vm0, %v5453_v54 }
 0x390   : >> { %v6894_v9 = vpop.permute.xlu0 %4016 }
 0x391   : >> { %3094 = vmatpush1.bf16.msra.mxu1 %v6517_v31  ;;  %3906 = vmatpush1.bf16.msra.mxu0 %v6506_v19  ;;  %v3238_v31 = vsel %vm789_vm2, %v6814_v42, %v6809_v41  ;;  %v4058_v63 = vsel %vm789_vm2, %v6894_v9, %v6890_v28  ;;  %v7291_v9 = vld [vmem:[#allocation14_spill] sm:$0xff] }
 0x392   : >> { %3095 = vmatprep.subr.bf16.mxu1 %v6534_v56  ;;  %3907 = vmatprep.subr.bf16.mxu0 %v6523_v34  ;;  %v5464_v56 = vld [vmem:[%s7238_s1 + $0x14] ss:$8 sps:$4 sm:$0xff]  }
 0x393   : >> { %v6901_v55 = vpop.permute.xlu1 %3212 }
 0x394   : >> { %v3211_v58 = vpop.permute.xlu0 %3210 }
 0x395   : >> { %3096 = vmatpush1.bf16.msra.mxu1 %v6539_v57  ;;  %3908 = vmatpush1.bf16.msra.mxu0 %v6528_v39  ;;  %v3239_v57 = vsel %vm789_vm2, %v6825_v45, %v6821_v44 }
 0x396   : >> { %3286 = vmatprep.subr.bf16.mxu1 %v6809_v41  ;;  %3909 = vmatprep.subr.bf16.mxu0 %v6545_v59  ;;  %v3243_v41 = vsel %vm789_vm2, %v3211_v58, %v6901_v55 }
 0x397   : >> { %v6911_v19 = vpop.permute.xlu1 %4022 }
 0x398   : >> { %v4021_v27 = vpop.permute.xlu0 %4020  ;;  %3106 = vmatmul.mubr.bf16.vlgmr.msra.gmra.mrb[16].mxu1 %v5451_v18 }
 0x399   : >> { %3287 = vmatpush1.bf16.msra.mxu1 %v3238_v31  ;;  %3910 = vmatpush1.bf16.msra.mxu0 %v6550_v20  ;;  %v4059_v45 = vsel %vm789_vm2, %v4021_v27, %v6911_v19 }
 0x39a   : >> { %3288 = vmatprep.subr.bf16.mxu1 %v6821_v44  ;;  %3911 = vmatprep.subr.bf16.mxu0 %v6556_v60  ;;  %v3240_v60 = vsel %vm789_vm2, %v6836_v46, %v6832_v3  ;;  %v5469_v46 = vld [vmem:[%s7238_s1 + $0x30] ss:$8 sps:$4 sm:$0xff]  }
 0x39b   : >> { %v3217_v34 = vpop.permute.xlu1 %3216  ;;  %4887 = vmatprep.mubr.msk.bf16.mxu1 %vm465_vm0, %v5464_v56 }
 0x39c   : >> { %v3215_v39 = vpop.permute.xlu0 %3214 }
 0x39d   : >> { %3289 = vmatpush1.bf16.msra.mxu1 %v3239_v57  ;;  %3912 = vmatpush1.bf16.msra.mxu0 %v6561_v33  ;;  %v7295_v57 = vld [vmem:[#allocation18_spill] sm:$0xff] }
 0x39e   : >> { %3290 = vmatprep.subr.bf16.mxu1 %v6832_v3  ;;  %3913 = vmatprep.subr.bf16.mxu0 %v6567_v0  ;;  %v5466_v0 = vld [vmem:[%s7238_s1 + $0x24] ss:$8 sps:$4 sm:$0xff]   ;;  %v3244_v3 = vsel %vm789_vm2, %v3215_v39, %v3217_v34 }
 0x39f   : >> { %v4027_v59 = vpop.permute.xlu1 %4026  ;;  %v7293_v39 = vld [vmem:[#allocation16_spill] sm:$0xff] }
 0x3a0   : >> { %v4025_v20 = vpop.permute.xlu0 %4024  ;;  %3116 = vmatmul.mubr.bf16.gmra.mrb[20].mxu1 %v5465_v8 }
 0x3a1   : >> { %3291 = vmatpush1.bf16.msra.mxu1 %v3240_v60  ;;  %3914 = vmatpush1.bf16.msra.mxu0 %v7289_v15  ;;  %v7296_v15 = vld [vmem:[#allocation19_spill] sm:$0xff] }
 0x3a2   : >> { %3292 = vmatprep.subr.bf16.mxu1 %v6859_v7  ;;  %4104 = vmatprep.subr.bf16.mxu0 %v6843_v50  ;;  %v4060_v50 = vsel %vm789_vm2, %v4025_v20, %v4027_v59 }
 0x3a3   : >> { %v3221_v33 = vpop.permute.xlu1 %3220  ;;  %4888 = vmatprep.mubr.msk.bf16.mxu1 %vm465_vm0, %v5466_v0 }
 0x3a4   : >> { %v3219_v14 = vpop.permute.xlu0 %3218  ;;  %3924 = vmatmul.mubr.bf16.vlgmr.msra.gmra.mrb[16].mxu0 %v5451_v18 }
 0x3a5   : >> { %3293 = vmatpush1.bf16.msra.mxu1 %v3241_v5  ;;  %4105 = vmatpush1.bf16.msra.mxu0 %v4056_v21  ;;  %v3245_v51 = vsel %vm789_vm2, %v3219_v14, %v3221_v33 }
 0x3a6   : >> { %3294 = vmatprep.subr.bf16.mxu1 %v6881_v25  ;;  %4106 = vmatprep.subr.bf16.mxu0 %v6869_v32 }
 0x3a7   : >> { %v4031_v35 = vpop.permute.xlu1 %4030  ;;  %4966 = vmatprep.mubr.msk.bf16.mxu0 %vm465_vm0, %v5464_v56  ;;  %v7294_v56 = vld [vmem:[#allocation17_spill] sm:$0xff] }
 0x3a8   : >> { %v4029_v12 = vpop.permute.xlu0 %4028  ;;  %3126 = vmatmul.mubr.bf16.gmra.mrb[24].mxu1 %v5467_v11 }
 0x3a9   : >> { %3295 = vmatpush1.bf16.msra.mxu1 %v3242_v38  ;;  %4107 = vmatpush1.bf16.msra.mxu0 %v4057_v24  ;;  %v4061_v54 = vsel %vm789_vm2, %v4029_v12, %v4031_v35 }
 0x3aa   : >> { %3296 = vmatprep.subr.bf16.mxu1 %v6901_v55  ;;  %4108 = vmatprep.subr.bf16.mxu0 %v6890_v28  ;;  %v5455_v55 = vld [vmem:[%s7240_s3 + $0x8] sm:$0xff]  }
 0x3ab   : >> { %v3225_v43 = vpop.permute.xlu1 %3224  ;;  %4889 = vmatprep.mubr.msk.bf16.mxu1 %vm465_vm0, %v5468_v36 }
 0x3ac   : >> { %v3223_v40 = vpop.permute.xlu0 %3222  ;;  %3934 = vmatmul.mubr.bf16.gmra.mrb[20].mxu0 %v5465_v8 }
 0x3ad   : >> { %3297 = vmatpush1.bf16.msra.mxu1 %v3243_v41  ;;  %4109 = vmatpush1.bf16.msra.mxu0 %v4058_v63  ;;  %v3246_v2 = vsel %vm789_vm2, %v3223_v40, %v3225_v43 }
 0x3ae   : >> { %3298 = vmatprep.subr.bf16.mxu1 %v3217_v34  ;;  %4110 = vmatprep.subr.bf16.mxu0 %v6911_v19  ;;  %v7292_v34 = vld [vmem:[#allocation15_spill] sm:$0xff] }
 0x3af   : >> { %v4035_v42 = vpop.permute.xlu1 %4034  ;;  %4967 = vmatprep.mubr.msk.bf16.mxu0 %vm465_vm0, %v5466_v0 }
 0x3b0   : >> { %v4033_v44 = vpop.permute.xlu0 %4032  ;;  %3136 = vmatmul.mubr.bf16.gmra.mrb[28].mxu1 %v5469_v46 }
 0x3b1   : >> { %3299 = vmatpush1.bf16.msra.mxu1 %v3244_v3  ;;  %4111 = vmatpush1.bf16.msra.mxu0 %v4059_v45  ;;  %v4062_v17 = vsel %vm789_vm2, %v4033_v44, %v4035_v42 }
 0x3b2   : >> { %3300 = vmatprep.subr.bf16.mxu1 %v3221_v33  ;;  %4112 = vmatprep.subr.bf16.mxu0 %v4027_v59 }
 0x3b3   : >> { %v3229_v47 = vpop.permute.xlu1 %3228  ;;  %4906 = vmatprep.mubr.msk.bf16.mxu1 %vm465_vm0, %v5470_v1 }
 0x3b4   : >> { %v3227_v48 = vpop.permute.xlu0 %3226  ;;  %3944 = vmatmul.mubr.bf16.gmra.mrb[24].mxu0 %v5467_v11 }
 0x3b5   : >> { %3301 = vmatpush1.bf16.msra.mxu1 %v3245_v51  ;;  %4113 = vmatpush1.bf16.msra.mxu0 %v4060_v50  ;;  %v3247_v10 = vsel %vm789_vm2, %v3227_v48, %v3229_v47 }
 0x3b6   : >> { %3302 = vmatprep.subr.bf16.mxu1 %v3225_v43  ;;  %4114 = vmatprep.subr.bf16.mxu0 %v4031_v35 }
 0x3b7   : >> { %v4039_v53 = vpop.permute.xlu1 %4038  ;;  %4968 = vmatprep.mubr.msk.bf16.mxu0 %vm465_vm0, %v5468_v36 }
 0x3b8   : >> { %v4037_v13 = vpop.permute.xlu0 %4036 }
 0x3b9   : >> { %3303 = vmatpush1.bf16.msra.mxu1 %v3246_v2  ;;  %4115 = vmatpush1.bf16.msra.mxu0 %v4061_v54  ;;  %v4063_v22 = vsel %vm789_vm2, %v4037_v13, %v4039_v53 }
 0x3ba   : >> { %3304 = vmatprep.subr.bf16.mxu1 %v3229_v47  ;;  %4116 = vmatprep.subr.bf16.mxu0 %v4035_v42  ;;  %v7297_v42 = vld [vmem:[#allocation4_spill] sm:$0xff] }
 0x3bb   : >> { %v3233_v7 = vpop.permute.xlu1 %3232 }
 0x3bc   : >> { %v3231_v16 = vpop.permute.xlu0 %3230  ;;  %3954 = vmatmul.mubr.bf16.gmra.mrb[28].mxu0 %v5469_v46  ;;  %v1852_v46 = vld [vmem:[#allocation3 + $0x8] sm:$0xff] }
 0x3bd   : >> { %3305 = vmatpush1.bf16.msra.mxu1 %v3247_v10  ;;  %4117 = vmatpush1.bf16.msra.mxu0 %v4062_v17  ;;  %v3248_v29 = vsel %vm789_vm2, %v3231_v16, %v3233_v7 }
 0x3be   : >> { %3306 = vmatprep.subr.bf16.mxu1 %v3233_v7  ;;  %4118 = vmatprep.subr.bf16.mxu0 %v4039_v53  ;;  %v1854_v53 = vld [vmem:[#allocation3 + $0x18] sm:$0xff] }
 0x3bf   : >> { %v4043_v23 = vpop.permute.xlu1 %4042  ;;  %4985 = vmatprep.mubr.msk.bf16.mxu0 %vm465_vm0, %v5470_v1  ;;  %v7298_v1 = vld [vmem:[#allocation5_spill] sm:$0xff] }
 0x3c0   : >> { %v4041_v32 = vpop.permute.xlu0 %4040 }
 0x3c1   : >> { %3307 = vmatpush1.bf16.msra.mxu1 %v3248_v29  ;;  %4119 = vmatpush1.bf16.msra.mxu0 %v4063_v22  ;;  %v4064_v25 = vsel %vm789_vm2, %v4041_v32, %v4043_v23 }
 0x3c2   : >> { %4120 = vmatprep.subr.bf16.mxu0 %v4043_v23 }
 0x3c3   : >> { %v3237_v26 = vpop.permute.xlu1 %3236 }
 0x3c4   : >> { %v3235_v52 = vpop.permute.xlu0 %3234  ;;  %3308 = vmatprep.subr.bf16.mxu1 %v3237_v26 }
 0x3c5   : >> { %v3249_v30 = vsel %vm789_vm2, %v3235_v52, %v3237_v26  ;;  %4121 = vmatpush1.bf16.msra.mxu0 %v4064_v25  ;;  %v7299_v26 = vld [vmem:[#allocation6_spill] sm:$0xff] }
 0x3c6   : >> { %3309 = vmatpush1.bf16.msra.mxu1 %v3249_v30  ;;  %v1856_v30 = vld [vmem:[#allocation3 + $0x28] sm:$0xff] }
 0x3c7   : >> { %v4047_v62 = vpop.permute.xlu1 %4046  ;;  %4408 = vmatprep.subr.bf16.mxu1 %v5492_v49 }
 0x3c8   : >> { %v4045_v28 = vpop.permute.xlu0 %4044  ;;  %4122 = vmatprep.subr.bf16.mxu0 %v4047_v62 }
 0x3c9   : >> { %v4065_v6 = vsel %vm789_vm2, %v4045_v28, %v4047_v62  ;;  %3319 = vmatmul.mubr.bf16.vlgmr.msra.gmra.mrb[16].mxu1 %v7290_v61 }
 0x3ca   : >> { %4123 = vmatpush1.bf16.msra.mxu0 %v4065_v6  ;;  %4907 = vmatprep.mubr.msk.bf16.mxu1 %vm465_vm0, %v7291_v9  ;;  %v1858_v6 = vld [vmem:[#allocation3 + $0x38] sm:$0xff] }
 0x3cb   : >> { %v4051_v37 = vpop.permute.xlu1 %4050  ;;  %4409 = vmatpush1.bf16.msra.mxu1 %v5454_v4  ;;  %v7300_v4 = vld [vmem:[#allocation7_spill] sm:$0xff] }
 0x3cc   : >> { %v4049_v58 = vpop.permute.xlu0 %4048  ;;  %4124 = vmatprep.subr.bf16.mxu0 %v4051_v37  ;;  %4410 = vmatprep.subr.bf16.mxu1 %v5492_v49 }
 0x3cd   : >> { %v4066_v18 = vsel %vm789_vm2, %v4049_v58, %v4051_v37 }
 0x3ce   : >> { %4125 = vmatpush1.bf16.msra.mxu0 %v4066_v18 }
 0x3cf   : >> { %v4055_v19 = vpop.permute.xlu1 %4054  ;;  %4411 = vmatpush1.bf16.msra.mxu1 %v5455_v55 }
 0x3d0   : >> { %v4053_v27 = vpop.permute.xlu0 %4052  ;;  %4126 = vmatprep.subr.bf16.mxu0 %v4055_v19  ;;  %4412 = vmatprep.subr.bf16.mxu1 %v5492_v49 }
 0x3d1   : >> { %v4067_v31 = vsel %vm789_vm2, %v4053_v27, %v4055_v19  ;;  %3329 = vmatmul.mubr.bf16.gmra.mrb[20].mxu1 %v7292_v34 }
 0x3d2   : >> { %4127 = vmatpush1.bf16.msra.mxu0 %v4067_v31  ;;  %4908 = vmatprep.mubr.msk.bf16.mxu1 %vm465_vm0, %v7293_v39 }
 0x3d5   : >> { %4137 = vmatmul.mubr.bf16.vlgmr.msra.gmra.mrb[16].mxu0 %v7290_v61 }
 0x3d6   : >> { %4986 = vmatprep.mubr.msk.bf16.mxu0 %vm465_vm0, %v7291_v9 }
 0x3d9   : >> { %3339 = vmatmul.mubr.bf16.gmra.mrb[24].mxu1 %v7294_v56 }
 0x3da   : >> { %4909 = vmatprep.mubr.msk.bf16.mxu1 %vm465_vm0, %v7295_v57 }
 0x3dc   : >> { %v2176_v59 = vpop.f32.mrb[0].mxu1 }
 0x3dd   : >> { %4147 = vmatmul.mubr.bf16.gmra.mrb[20].mxu0 %v7292_v34  ;;  %v2178_v20 = vpop.f32.mrb[1].mxu1 }
 0x3de   : >> { %4987 = vmatprep.mubr.msk.bf16.mxu0 %vm465_vm0, %v7293_v39  ;;  %v2180_v60 = vpop.f32.mrb[2].mxu1  ;;  %v7301_v39 = vld [vmem:[#allocation8_spill] sm:$0xff] }
 0x3df   : >> { %v2182_v8 = vpop.f32.mrb[3].mxu1 }
 0x3e1   : >> { %3349 = vmatmul.mubr.bf16.gmra.mrb[28].mxu1 %v7296_v15 }
 0x3e4   : >> { %v2186_v33 = vpop.f32.mrb[4].mxu1 }
 0x3e5   : >> { %4157 = vmatmul.mubr.bf16.gmra.mrb[24].mxu0 %v7294_v56  ;;  %v2188_v14 = vpop.f32.mrb[5].mxu1 }
 0x3e6   : >> { %4988 = vmatprep.mubr.msk.bf16.mxu0 %vm465_vm0, %v7295_v57  ;;  %v2190_v0 = vpop.f32.mrb[6].mxu1 }
 0x3e7   : >> { %v2192_v21 = vpop.f32.mrb[7].mxu1 }
 0x3ec   : >> { %v2196_v5 = vpop.f32.mrb[8].mxu1 }
 0x3ed   : >> { %4167 = vmatmul.mubr.bf16.gmra.mrb[28].mxu0 %v7296_v15  ;;  %v2198_v35 = vpop.f32.mrb[9].mxu1  ;;  %v1862_v15 = vld [vmem:[#allocation3 + $0x58] sm:$0xff] }
 0x3ee   : >> { %v2200_v12 = vpop.f32.mrb[10].mxu1 }
 0x3ef   : >> { %v2202_v24 = vpop.f32.mrb[11].mxu1 }
 0x3f0   : >> { %v2534_v38 = vpop.f32.mrb[0].mxu0 }
 0x3f1   : >> { %v7028_v11 = vadd.f32 %v2534_v38, %v2176_v59  ;;  %v2536_v43 = vpop.f32.mrb[1].mxu0  ;;  %v1860_v59 = vld [vmem:[#allocation3 + $0x48] sm:$0xff] }
 0x3f2   : >> { %v5101_v40 = vadd.f32 %v2536_v43, %v2178_v20  ;;  %v2538_v36 = vpop.f32.mrb[2].mxu0 }
 0x3f3   : >> { %v7030_v63 = vadd.f32 %v2538_v36, %v2180_v60  ;;  %v2540_v41 = vpop.f32.mrb[3].mxu0  ;;  %v7302_v60 = vld [vmem:[#allocation9_spill] sm:$0xff] }
 0x3f4   : >> { %v2590_v44 = vadd.f32 %v5101_v40, %v7297_v42  ;;  %v5103_v45 = vadd.f32 %v2540_v41, %v2182_v8  ;;  %v2206_v3 = vpop.f32.mrb[12].mxu1 }
 0x3f5   : >> { %v2208_v47 = vpop.f32.mrb[13].mxu1 }
 0x3f6   : >> { %v2606_v48 = vmax.f32 %v2590_v44, 0.0  ;;  %v2592_v50 = vadd.f32 %v5103_v45, %v7298_v1  ;;  %v2210_v51 = vpop.f32.mrb[14].mxu1  ;;  %v1864_v44 = vld [vmem:[#allocation3 + $0x68] sm:$0xff] }
 0x3f7   : >> { %v2212_v13 = vpop.f32.mrb[15].mxu1 }
 0x3f8   : >> { %v2622_v54 = vadd.f32 %v2606_v48, %v1852_v46  ;;  %v2608_v2 = vmax.f32 %v2592_v50, 0.0  ;;  %v2544_v7 = vpop.f32.mrb[4].mxu0  ;;  %v7304_v46 = vld [vmem:[#allocation11_spill] sm:$0xff] }
 0x3f9   : >> { %v7034_v16 = vadd.f32 %v2544_v7, %v2186_v33  ;;  %v2546_v17 = vpop.f32.mrb[5].mxu0  ;;  %v5460_v7 = vld [vmem:[%s7240_s3 + $0x30] sm:$0xff]  }
 0x3fa   : >> { %2638 = vst.msk [vmem:[#allocation3 + $0x8] sm:$0xff] %vm1000_vm3, %v2622_v54  ;;  %v2624_v10 = vadd.f32 %v2608_v2, %v1854_v53  ;;  %v5105_v23 = vadd.f32 %v2546_v17, %v2188_v14  ;;  %v2548_v32 = vpop.f32.mrb[6].mxu0  ;;  %v5459_v2 = vld [vmem:[%s7240_s3 + $0x28] sm:$0xff]   ;;  %v5461_v17 = vld [vmem:[%s7240_s3 + $0x38] sm:$0xff]  }
 0x3fb   : >> { %v7037_v22 = vadd.f32 %v2548_v32, %v2190_v0  ;;  %v2550_v29 = vpop.f32.mrb[7].mxu0  ;;  %v5493_v32 = vmov 65535  }
 0x3fc   : >> { %2640 = vst.msk [vmem:[#allocation3 + $0x18] sm:$0xff] %vm1000_vm3, %v2624_v10  ;;  %v2594_v52 = vadd.f32 %v5105_v23, %v7299_v26  ;;  %v5107_v25 = vadd.f32 %v2550_v29, %v2192_v21  ;;  %v5462_v10 = vld [vmem:[%s7240_s3 + $0x40] sm:$0xff]   ;;  %v5463_v23 = vld [vmem:[%s7240_s3 + $0x48] ss:$0 sps:$4 sm:$0x77]   ;;  %v4403_v29 = vsel %vm4401_vm4, 4294967295, %v5493_v32 }
 0x3fe   : >> { %v2610_v62 = vmax.f32 %v2594_v52, 0.0  ;;  %v2596_v28 = vadd.f32 %v5107_v25, %v7300_v4  ;;  %v4404_v52 = vsel %vm4402_vm5, %v4403_v29, 0 }
 0x3ff   : >> { %v4406_v25 = vand.u32 %v5463_v23, %v4404_v52 }
 0x400   : >> { %v2626_v61 = vadd.f32 %v2610_v62, %v1856_v30  ;;  %v2612_v9 = vmax.f32 %v2596_v28, 0.0  ;;  %v2554_v37 = vpop.f32.mrb[8].mxu0  ;;  %v2589_v30 = vadd.f32 %v7028_v11, %v7297_v42  ;;  %v1787_v62 = vld [vmem:[#allocation2] sm:$0xff]  ;;  %v2593_v11 = vadd.f32 %v7034_v16, %v7299_v26 }
 0x401   : >> { %v7042_v55 = vadd.f32 %v2554_v37, %v2196_v5  ;;  %v2556_v58 = vpop.f32.mrb[9].mxu0  ;;  %v1803_v28 = vld [vmem:[#allocation2 + $0x80] sm:$0xff] }
 0x402   : >> { %2642 = vst.msk [vmem:[#allocation3 + $0x28] sm:$0xff] %vm1000_vm3, %v2626_v61  ;;  %v2628_v18 = vadd.f32 %v2612_v9, %v1858_v6  ;;  %v5109_v19 = vadd.f32 %v2556_v58, %v2198_v35  ;;  %v2558_v27 = vpop.f32.mrb[10].mxu0  ;;  %v2591_v6 = vadd.f32 %v7030_v63, %v7298_v1  ;;  %v1789_v61 = vld [vmem:[#allocation2 + $0x10] sm:$0xff]  ;;  %v1819_v37 = vadd.f32 %v1803_v28, %v1787_v62 }
 0x403   : >> { %v7045_v31 = vadd.f32 %v2558_v27, %v2200_v12  ;;  %v2560_v34 = vpop.f32.mrb[11].mxu0  ;;  %v1805_v9 = vld [vmem:[#allocation2 + $0x90] sm:$0xff]  ;;  %v2605_v58 = vmax.f32 %v2589_v30, 0.0 }
 0x404   : >> { %2644 = vst.msk [vmem:[#allocation3 + $0x38] sm:$0xff] %vm1000_vm3, %v2628_v18  ;;  %v2598_v56 = vadd.f32 %v5109_v19, %v7301_v39  ;;  %v5111_v57 = vadd.f32 %v2560_v34, %v2202_v24  ;;  %v7303_v24 = vld [vmem:[#allocation10_spill] sm:$0xff]  ;;  %v1821_v19 = vadd.f32 %v1805_v9, %v1789_v61  ;;  %v2607_v27 = vmax.f32 %v2591_v6, 0.0 }
 0x405   : >> { %v2599_v32 = vadd.f32 %v7045_v31, %v7302_v60  ;;  %v1815_v31 = vld [vmem:[#allocation2 + $0xe0] sm:$0xff] }
 0x406   : >> { %v2614_v20 = vmax.f32 %v2598_v56, 0.0  ;;  %v2600_v8 = vadd.f32 %v5111_v57, %v7302_v60 }
 0x408   : >> { %v2630_v33 = vadd.f32 %v2614_v20, %v1860_v59  ;;  %v2616_v14 = vmax.f32 %v2600_v8, 0.0  ;;  %v2564_v0 = vpop.f32.mrb[12].mxu0  ;;  %v2621_v59 = vadd.f32 %v2605_v58, %v1819_v37 }
 0x409   : >> { %v7050_v21 = vadd.f32 %v2564_v0, %v2206_v3  ;;  %v2566_v5 = vpop.f32.mrb[13].mxu0  ;;  %v1866_v3 = vld [vmem:[#allocation3 + $0x78] sm:$0xff] }
 0x40a   : >> { %2646 = vst.msk [vmem:[#allocation3 + $0x48] sm:$0xff] %vm1000_vm3, %v2630_v33  ;;  %v2632_v35 = vadd.f32 %v2616_v14, %v1862_v15  ;;  %v5113_v12 = vadd.f32 %v2566_v5, %v2208_v47  ;;  %v2568_v38 = vpop.f32.mrb[14].mxu0  ;;  %v5456_v47 = vld [vmem:[%s7240_s3 + $0x10] sm:$0xff]   ;;  %v1791_v15 = vld [vmem:[#allocation2 + $0x20] sm:$0xff]  ;;  %v2595_v14 = vadd.f32 %v7037_v22, %v7300_v4  ;;  %v3410_v22 = vld [vmem:[#allocation3 + $0x18] sm:$0xff] }
 0x40b   : >> { %v7053_v43 = vadd.f32 %v2568_v38, %v2210_v51  ;;  %v2570_v40 = vpop.f32.mrb[15].mxu0  ;;  %4413 = vmatpush1.bf16.msra.mxu1 %v5456_v47  ;;  %v5457_v51 = vld [vmem:[%s7240_s3 + $0x18] sm:$0xff]   ;;  %v1807_v33 = vld [vmem:[#allocation2 + $0xa0] sm:$0xff]  ;;  %v1809_v38 = vld [vmem:[#allocation2 + $0xb0] sm:$0xff] }
 0x40c   : >> { %2648 = vst.msk [vmem:[#allocation3 + $0x58] sm:$0xff] %vm1000_vm3, %v2632_v35  ;;  %v2602_v36 = vadd.f32 %v5113_v12, %v7303_v24  ;;  %v5115_v41 = vadd.f32 %v2570_v40, %v2212_v13  ;;  %4414 = vmatprep.subr.bf16.mxu1 %v5492_v49  ;;  %v5458_v13 = vld [vmem:[%s7240_s3 + $0x20] sm:$0xff]   ;;  %v2623_v35 = vadd.f32 %v2607_v27, %v1821_v19  ;;  %v1793_v12 = vld [vmem:[#allocation2 + $0x30] sm:$0xff] }
 0x40d   : >> { %v1811_v47 = vld [vmem:[#allocation2 + $0xc0] sm:$0xff] }
 0x40e   : >> { %v2618_v45 = vmax.f32 %v2602_v36, 0.0  ;;  %v2604_v48 = vadd.f32 %v5115_v41, %v7304_v46  ;;  %v3408_v36 = vld [vmem:[#allocation3 + $0x8] sm:$0xff]  ;;  %v1799_v19 = vld [vmem:[#allocation2 + $0x60] sm:$0xff] }
 0x40f   : >> { %4415 = vmatpush1.bf16.msra.mxu1 %v5457_v51 }
 0x410   : >> { %v2634_v50 = vadd.f32 %v2618_v45, %v1864_v44  ;;  %v2620_v53 = vmax.f32 %v2604_v48, 0.0  ;;  %4416 = vmatprep.subr.bf16.mxu1 %v5492_v49  ;;  %v1823_v45 = vadd.f32 %v1807_v33, %v1791_v15  ;;  %v2609_v48 = vmax.f32 %v2593_v11, 0.0  ;;  %v3414_v33 = vld [vmem:[#allocation3 + $0x38] sm:$0xff] }
 0x412   : >> { %2650 = vst.msk [vmem:[#allocation3 + $0x68] sm:$0xff] %vm1000_vm3, %v2634_v50  ;;  %v2636_v54 = vadd.f32 %v2620_v53, %v1866_v3  ;;  %v1825_v50 = vadd.f32 %v1809_v38, %v1793_v12  ;;  %v2611_v53 = vmax.f32 %v2595_v14, 0.0 }
 0x413   : >> { %4417 = vmatpush1.bf16.msra.mxu1 %v5458_v13 }
 0x414   : >> { %2652 = vst.msk [vmem:[#allocation3 + $0x78] sm:$0xff] %vm1000_vm3, %v2636_v54  ;;  %4418 = vmatprep.subr.bf16.mxu1 %v5492_v49  ;;  %v1795_v54 = vld [vmem:[#allocation2 + $0x40] sm:$0xff] }
 0x415   : >> { %v1827_v30 = vadd.f32 %v1811_v47, %v1795_v54 }
 0x417   : >> { %4419 = vmatpush1.bf16.msra.mxu1 %v5459_v2  ;;  %v2597_v2 = vadd.f32 %v7042_v55, %v7301_v39  ;;  %v2627_v55 = vadd.f32 %v2611_v53, %v1825_v50 }
 0x418   : >> { %4420 = vmatprep.subr.bf16.mxu1 %v5492_v49 }
 0x41b   : >> { %4421 = vmatpush1.bf16.msra.mxu1 %v5460_v7  ;;  %v1797_v7 = vld [vmem:[#allocation2 + $0x50] sm:$0xff] }
 0x41c   : >> { %4422 = vmatprep.subr.bf16.mxu1 %v5492_v49 }
 0x41f   : >> { %4423 = vmatpush1.bf16.msra.mxu1 %v5461_v17  ;;  %v1813_v17 = vld [vmem:[#allocation2 + $0xd0] sm:$0xff] }
 0x420   : >> { %4424 = vmatprep.subr.bf16.mxu1 %v5492_v49  ;;  %v1829_v61 = vadd.f32 %v1813_v17, %v1797_v7  ;;  %v1817_v7 = vld [vmem:[#allocation2 + $0xf0] sm:$0xff] }
 0x423   : >> { %4425 = vmatpush1.bf16.msra.mxu1 %v5462_v10 }
 0x424   : >> { %4426 = vmatprep.subr.bf16.mxu1 %v5492_v49 }
 0x427   : >> { %4427 = vmatpush1.bf16.msra.mxu1 %v4406_v25  ;;  %v2625_v25 = vadd.f32 %v2609_v48, %v1823_v45 }
 0x49c   : >> { %v3320_v18 = vpop.f32.mrb[16].mxu1 }
 0x49d   : >> { %v3375_v49 = vadd.f32 %v3320_v18, %v7297_v42  ;;  %v3322_v34 = vpop.f32.mrb[17].mxu1  ;;  %v2613_v18 = vmax.f32 %v2597_v2, 0.0  ;;  %v1801_v2 = vld [vmem:[#allocation2 + $0x70] sm:$0xff] }
 0x49e   : >> { %v3376_v56 = vadd.f32 %v3322_v34, %v7297_v42  ;;  %v3324_v57 = vpop.f32.mrb[18].mxu1 }
 0x49f   : >> { %v3391_v20 = vmax.f32 %v3375_v49, 0.0  ;;  %v3377_v63 = vadd.f32 %v3324_v57, %v7298_v1  ;;  %v3326_v8 = vpop.f32.mrb[19].mxu1  ;;  %v3412_v49 = vld [vmem:[#allocation3 + $0x28] sm:$0xff] }
 0x4a0   : >> { %v3392_v0 = vmax.f32 %v3376_v56, 0.0  ;;  %v3378_v5 = vadd.f32 %v3326_v8, %v7298_v1 }
 0x4a1   : >> { %v7103_v40 = vadd.f32 %v3391_v20, %v2621_v59  ;;  %3455 = vst [vmem:[#allocation2] sm:$0xff] %v3391_v20  ;;  %v3393_v16 = vmax.f32 %v3377_v63, 0.0  ;;  %v2615_v59 = vmax.f32 %v2599_v32, 0.0 }
 0x4a2   : >> { %v3424_v41 = vadd.f32 %v3408_v36, %v3392_v0  ;;  %3456 = vst.msk [vmem:[#allocation2 + $0x8] sm:$0xff] %vm1000_vm3, %v3392_v0  ;;  %v3394_v44 = vmax.f32 %v3378_v5, 0.0 }
 0x4a3   : >> { %v7106_v3 = vadd.f32 %v3393_v16, %v2623_v35  ;;  %3457 = vst [vmem:[#allocation2 + $0x10] sm:$0xff] %v3393_v16  ;;  %v7127_v35 = vadd.f32 %v1815_v31, %v1799_v19  ;;  %v2631_v53 = vadd.f32 %v2615_v59, %v1829_v61 }
 0x4a4   : >> { %3440 = vst.msk [vmem:[#allocation3 + $0x8] sm:$0xff] %vm1000_vm3, %v3424_v41  ;;  %v3426_v51 = vadd.f32 %v3410_v22, %v3394_v44  ;;  %3458 = vst.msk [vmem:[#allocation2 + $0x18] sm:$0xff] %vm1000_vm3, %v3394_v44  ;;  %v3330_v13 = vpop.f32.mrb[20].mxu1  ;;  %v2629_v41 = vadd.f32 %v2613_v18, %v1827_v30 }
 0x4a5   : >> { %v3379_v10 = vadd.f32 %v3330_v13, %v7299_v26  ;;  %v3332_v23 = vpop.f32.mrb[21].mxu1 }
 0x4a6   : >> { %3442 = vst.msk [vmem:[#allocation3 + $0x18] sm:$0xff] %vm1000_vm3, %v3426_v51  ;;  %v3380_v29 = vadd.f32 %v3332_v23, %v7299_v26  ;;  %v3334_v52 = vpop.f32.mrb[22].mxu1 }
 0x4a7   : >> { %v3395_v62 = vmax.f32 %v3379_v10, 0.0  ;;  %v3381_v28 = vadd.f32 %v3334_v52, %v7300_v4  ;;  %v3336_v6 = vpop.f32.mrb[23].mxu1  ;;  %v2603_v52 = vadd.f32 %v7053_v43, %v7304_v46 }
 0x4a8   : >> { %v3396_v9 = vmax.f32 %v3380_v29, 0.0  ;;  %v3382_v37 = vadd.f32 %v3336_v6, %v7300_v4  ;;  %v4138_v58 = vpop.f32.mrb[16].mxu0 }
 0x4a9   : >> { %v7119_v27 = vadd.f32 %v3395_v62, %v2625_v25  ;;  %3459 = vst [vmem:[#allocation2 + $0x20] sm:$0xff] %v3395_v62  ;;  %v3397_v34 = vmax.f32 %v3381_v28, 0.0  ;;  %v4193_v56 = vadd.f32 %v4138_v58, %v7297_v42  ;;  %v4140_v57 = vpop.f32.mrb[17].mxu0  ;;  %v3416_v28 = vld [vmem:[#allocation3 + $0x48] sm:$0xff] }
 0x4aa   : >> { %v3428_v11 = vadd.f32 %v3412_v49, %v3396_v9  ;;  %3460 = vst.msk [vmem:[#allocation2 + $0x28] sm:$0xff] %vm1000_vm3, %v3396_v9  ;;  %v3398_v20 = vmax.f32 %v3382_v37, 0.0  ;;  %v4194_v63 = vadd.f32 %v4140_v57, %v7297_v42  ;;  %v4142_v8 = vpop.f32.mrb[18].mxu0  ;;  %v1833_v9 = vadd.f32 %v1817_v7, %v1801_v2 }
 0x4ab   : >> { %v7124_v15 = vadd.f32 %v3397_v34, %v2627_v55  ;;  %3461 = vst [vmem:[#allocation2 + $0x30] sm:$0xff] %v3397_v34  ;;  %v4209_v14 = vmax.f32 %v4193_v56, 0.0  ;;  %v4195_v0 = vadd.f32 %v4142_v8, %v7298_v1  ;;  %v4144_v5 = vpop.f32.mrb[19].mxu0  ;;  %v4226_v45 = vld [vmem:[#allocation3 + $0x8] sm:$0xff]  ;;  %v3418_v34 = vld [vmem:[#allocation3 + $0x58] sm:$0xff] }
 0x4ac   : >> { %3444 = vst.msk [vmem:[#allocation3 + $0x28] sm:$0xff] %vm1000_vm3, %v3428_v11  ;;  %v3430_v12 = vadd.f32 %v3414_v33, %v3398_v20  ;;  %3462 = vst.msk [vmem:[#allocation2 + $0x38] sm:$0xff] %vm1000_vm3, %v3398_v20  ;;  %v4210_v38 = vmax.f32 %v4194_v63, 0.0  ;;  %v4196_v36 = vadd.f32 %v4144_v5, %v7298_v1  ;;  %v3340_v16 = vpop.f32.mrb[24].mxu1  ;;  %v2619_v11 = vmax.f32 %v2603_v52, 0.0 }
 0x4ad   : >> { %v7133_v44 = vadd.f32 %v4209_v14, %v7103_v40  ;;  %4273 = vst [vmem:[#allocation2 + $0x80] sm:$0xff] %v4209_v14  ;;  %v4211_v48 = vmax.f32 %v4195_v0, 0.0  ;;  %v3383_v22 = vadd.f32 %v3340_v16, %v7301_v39  ;;  %v3342_v50 = vpop.f32.mrb[25].mxu1  ;;  %v2601_v40 = vadd.f32 %v7050_v21, %v7303_v24  ;;  %v4228_v10 = vld [vmem:[#allocation3 + $0x18] sm:$0xff] }
 0x4ae   : >> { %3446 = vst.msk [vmem:[#allocation3 + $0x38] sm:$0xff] %vm1000_vm3, %v3430_v12  ;;  %v4242_v54 = vadd.f32 %v4226_v45, %v4210_v38  ;;  %4274 = vst.msk [vmem:[#allocation2 + $0x88] sm:$0xff] %vm1000_vm3, %v4210_v38  ;;  %v4212_v47 = vmax.f32 %v4196_v36, 0.0  ;;  %v3384_v51 = vadd.f32 %v3342_v50, %v7301_v39  ;;  %v3344_v13 = vpop.f32.mrb[26].mxu1 }
 0x4af   : >> { %v7142_v17 = vadd.f32 %v4211_v48, %v7106_v3  ;;  %4275 = vst [vmem:[#allocation2 + $0x90] sm:$0xff] %v4211_v48  ;;  %v3399_v23 = vmax.f32 %v3383_v22, 0.0  ;;  %v3385_v32 = vadd.f32 %v3344_v13, %v7302_v60  ;;  %v3346_v29 = vpop.f32.mrb[27].mxu1  ;;  %v2617_v31 = vmax.f32 %v2601_v40, 0.0 }
 0x4b0   : >> { %4258 = vst.msk [vmem:[#allocation3 + $0x8] sm:$0xff] %vm1000_vm3, %v4242_v54  ;;  %v4244_v25 = vadd.f32 %v4228_v10, %v4212_v47  ;;  %4276 = vst.msk [vmem:[#allocation2 + $0x98] sm:$0xff] %vm1000_vm3, %v4212_v47  ;;  %v3400_v21 = vmax.f32 %v3384_v51, 0.0  ;;  %v3386_v30 = vadd.f32 %v3346_v29, %v7302_v60  ;;  %v4148_v62 = vpop.f32.mrb[20].mxu0  ;;  %v2635_v47 = vadd.f32 %v2619_v11, %v1833_v9 }
 0x4b1   : >> { %v7150_v3 = vadd.f32 %v3399_v23, %v2629_v41  ;;  %3463 = vst [vmem:[#allocation2 + $0x40] sm:$0xff] %v3399_v23  ;;  %v3401_v6 = vmax.f32 %v3385_v32, 0.0  ;;  %v4197_v55 = vadd.f32 %v4148_v62, %v7299_v26  ;;  %v4150_v61 = vpop.f32.mrb[21].mxu0  ;;  %v4305_v43 = vpack.c.bf16 %v7142_v17, %v7133_v44 }
 0x4b2   : >> { %4260 = vst.msk [vmem:[#allocation3 + $0x18] sm:$0xff] %vm1000_vm3, %v4244_v25  ;;  %v3432_v37 = vadd.f32 %v3416_v28, %v3400_v21  ;;  %3464 = vst.msk [vmem:[#allocation2 + $0x48] sm:$0xff] %vm1000_vm3, %v3400_v21  ;;  %v3402_v58 = vmax.f32 %v3386_v30, 0.0  ;;  %v4198_v18 = vadd.f32 %v4150_v61, %v7299_v26  ;;  %v4152_v19 = vpop.f32.mrb[22].mxu0  ;;  %v2633_v48 = vadd.f32 %v2617_v31, %v7127_v35 }
 0x4b3   : >> { %v7158_v49 = vadd.f32 %v3401_v6, %v2631_v53  ;;  %3465 = vst [vmem:[#allocation2 + $0x50] sm:$0xff] %v3401_v6  ;;  %v4213_v56 = vmax.f32 %v4197_v55, 0.0  ;;  %v4199_v57 = vadd.f32 %v4152_v19, %v7300_v4  ;;  %v4154_v59 = vpop.f32.mrb[23].mxu0  ;;  %v4230_v0 = vld [vmem:[#allocation3 + $0x28] sm:$0xff]  ;;  %v3422_v55 = vld [vmem:[#allocation3 + $0x78] sm:$0xff] }
 0x4b4   : >> { %3448 = vst.msk [vmem:[#allocation3 + $0x48] sm:$0xff] %vm1000_vm3, %v3432_v37  ;;  %v3434_v20 = vadd.f32 %v3418_v34, %v3402_v58  ;;  %3466 = vst.msk [vmem:[#allocation2 + $0x58] sm:$0xff] %vm1000_vm3, %v3402_v58  ;;  %v4214_v63 = vmax.f32 %v4198_v18, 0.0  ;;  %v4200_v8 = vadd.f32 %v4154_v59, %v7300_v4  ;;  %v3350_v33 = vpop.f32.mrb[28].mxu1 }
 0x4b5   : >> { %v7165_v14 = vadd.f32 %v4213_v56, %v7119_v27  ;;  %4277 = vst [vmem:[#allocation2 + $0xa0] sm:$0xff] %v4213_v56  ;;  %v4215_v5 = vmax.f32 %v4199_v57, 0.0  ;;  %v3387_v12 = vadd.f32 %v3350_v33, %v7303_v24  ;;  %v3352_v38 = vpop.f32.mrb[29].mxu1  ;;  %v4232_v22 = vld [vmem:[#allocation3 + $0x38] sm:$0xff] }
 0x4b6   : >> { %3450 = vst.msk [vmem:[#allocation3 + $0x58] sm:$0xff] %vm1000_vm3, %v3434_v20  ;;  %v4246_v36 = vadd.f32 %v4230_v0, %v4214_v63  ;;  %4278 = vst.msk [vmem:[#allocation2 + $0xa8] sm:$0xff] %vm1000_vm3, %v4214_v63  ;;  %v4216_v16 = vmax.f32 %v4200_v8, 0.0  ;;  %v3388_v41 = vadd.f32 %v3352_v38, %v7303_v24  ;;  %v3354_v45 = vpop.f32.mrb[30].mxu1 }
 0x4b7   : >> { %v7173_v27 = vadd.f32 %v4215_v5, %v7124_v15  ;;  %4279 = vst [vmem:[#allocation2 + $0xb0] sm:$0xff] %v4215_v5  ;;  %v3403_v50 = vmax.f32 %v3387_v12, 0.0  ;;  %v3389_v53 = vadd.f32 %v3354_v45, %v7304_v46  ;;  %v3356_v54 = vpop.f32.mrb[31].mxu1  ;;  %v3420_v15 = vld [vmem:[#allocation3 + $0x68] sm:$0xff] }
 0x4b8   : >> { %4262 = vst.msk [vmem:[#allocation3 + $0x28] sm:$0xff] %vm1000_vm3, %v4246_v36  ;;  %v4248_v51 = vadd.f32 %v4232_v22, %v4216_v16  ;;  %4280 = vst.msk [vmem:[#allocation2 + $0xb8] sm:$0xff] %vm1000_vm3, %v4216_v16  ;;  %v3404_v13 = vmax.f32 %v3388_v41, 0.0  ;;  %v3390_v40 = vadd.f32 %v3356_v54, %v7304_v46  ;;  %v4158_v2 = vpop.f32.mrb[24].mxu0  ;;  %v4290_v32 = vld [vmem:[#allocation3 + $0x8] sm:$0xff] }
 0x4b9   : >> { %v3435_v35 = vadd.f32 %v3403_v50, %v2633_v48  ;;  %3467 = vst [vmem:[#allocation2 + $0x60] sm:$0xff] %v3403_v50  ;;  %v3405_v7 = vmax.f32 %v3389_v53, 0.0  ;;  %v4201_v10 = vadd.f32 %v4158_v2, %v7301_v39  ;;  %v4160_v23 = vpop.f32.mrb[25].mxu0  ;;  %v4292_v29 = vld [vmem:[#allocation3 + $0x18] sm:$0xff]  ;;  %v4307_v52 = vpack.c.bf16 %v7173_v27, %v7165_v14 }
 0x4ba   : >> { %4264 = vst.msk [vmem:[#allocation3 + $0x38] sm:$0xff] %vm1000_vm3, %v4248_v51  ;;  %v3436_v25 = vadd.f32 %v3420_v15, %v3404_v13  ;;  %3468 = vst.msk [vmem:[#allocation2 + $0x68] sm:$0xff] %vm1000_vm3, %v3404_v13  ;;  %v3406_v21 = vmax.f32 %v3390_v40, 0.0  ;;  %v4202_v30 = vadd.f32 %v4160_v23, %v7301_v39  ;;  %v4162_v62 = vpop.f32.mrb[26].mxu0  ;;  %v4306_v28 = vpack.c.bf16 %v4292_v29, %v4290_v32 }
 0x4bb   : >> { %v3437_v6 = vadd.f32 %v3405_v7, %v2635_v47  ;;  %3469 = vst [vmem:[#allocation2 + $0x70] sm:$0xff] %v3405_v7  ;;  %v4217_v61 = vmax.f32 %v4201_v10, 0.0  ;;  %v4203_v9 = vadd.f32 %v4162_v62, %v7302_v60  ;;  %v4164_v37 = vpop.f32.mrb[27].mxu0  ;;  %v4234_v34 = vld [vmem:[#allocation3 + $0x48] sm:$0xff] }
 0x4bc   : >> { %3452 = vst.msk [vmem:[#allocation3 + $0x68] sm:$0xff] %vm1000_vm3, %v3436_v25  ;;  %v3438_v58 = vadd.f32 %v3422_v55, %v3406_v21  ;;  %3470 = vst.msk [vmem:[#allocation2 + $0x78] sm:$0xff] %vm1000_vm3, %v3406_v21  ;;  %v4218_v18 = vmax.f32 %v4202_v30, 0.0  ;;  %v4204_v19 = vadd.f32 %v4164_v37, %v7302_v60  ;;  %4999 = vmatprep.mubr.msk.bf16.mxu1 %vm1000_vm3, %v4306_v28 }
 0x4bd   : >> { %v4249_v31 = vadd.f32 %v4217_v61, %v7150_v3  ;;  %4281 = vst [vmem:[#allocation2 + $0xc0] sm:$0xff] %v4217_v61  ;;  %v4219_v56 = vmax.f32 %v4203_v9, 0.0  ;;  %4441 = vmatmul.mubr.bf16.vlgmr.msra.gmra.mrb[32].mxu1 %v4305_v43  ;;  %v4236_v20 = vld [vmem:[#allocation3 + $0x58] sm:$0xff] }
 0x4be   : >> { %3454 = vst.msk [vmem:[#allocation3 + $0x78] sm:$0xff] %vm1000_vm3, %v3438_v58  ;;  %v4250_v57 = vadd.f32 %v4234_v34, %v4218_v18  ;;  %4282 = vst.msk [vmem:[#allocation2 + $0xc8] sm:$0xff] %vm1000_vm3, %v4218_v18  ;;  %v4220_v59 = vmax.f32 %v4204_v19, 0.0 }
 0x4bf   : >> { %v4251_v11 = vadd.f32 %v4219_v56, %v7158_v49  ;;  %4283 = vst [vmem:[#allocation2 + $0xd0] sm:$0xff] %v4219_v56  ;;  %v4294_v17 = vld [vmem:[#allocation3 + $0x28] sm:$0xff] }
 0x4c0   : >> { %4266 = vst.msk [vmem:[#allocation3 + $0x48] sm:$0xff] %vm1000_vm3, %v4250_v57  ;;  %v4252_v3 = vadd.f32 %v4236_v20, %v4220_v59  ;;  %4284 = vst.msk [vmem:[#allocation2 + $0xd8] sm:$0xff] %vm1000_vm3, %v4220_v59  ;;  %v4168_v63 = vpop.f32.mrb[28].mxu0 }
 0x4c1   : >> { %v4205_v8 = vadd.f32 %v4168_v63, %v7303_v24  ;;  %v4170_v44 = vpop.f32.mrb[29].mxu0  ;;  %v4296_v43 = vld [vmem:[#allocation3 + $0x38] sm:$0xff]  ;;  %v4309_v33 = vpack.c.bf16 %v4251_v11, %v4249_v31 }
 0x4c2   : >> { %4268 = vst.msk [vmem:[#allocation3 + $0x58] sm:$0xff] %vm1000_vm3, %v4252_v3  ;;  %v4206_v14 = vadd.f32 %v4170_v44, %v7303_v24  ;;  %v4172_v0 = vpop.f32.mrb[30].mxu0  ;;  %v4308_v49 = vpack.c.bf16 %v4296_v43, %v4294_v17 }
 0x4c3   : >> { %v4221_v5 = vmax.f32 %v4205_v8, 0.0  ;;  %v4207_v12 = vadd.f32 %v4172_v0, %v7304_v46  ;;  %v4174_v38 = vpop.f32.mrb[31].mxu0  ;;  %v4238_v45 = vld [vmem:[#allocation3 + $0x68] sm:$0xff] }
 0x4c4   : >> { %v4222_v36 = vmax.f32 %v4206_v14, 0.0  ;;  %v4208_v16 = vadd.f32 %v4174_v38, %v7304_v46  ;;  %5000 = vmatprep.mubr.msk.bf16.mxu1 %vm1000_vm3, %v4308_v49 }
 0x4c5   : >> { %v4253_v41 = vadd.f32 %v4221_v5, %v3435_v35  ;;  %4285 = vst [vmem:[#allocation2 + $0xe0] sm:$0xff] %v4221_v5  ;;  %v4223_v48 = vmax.f32 %v4207_v12, 0.0  ;;  %4449 = vmatmul.mubr.bf16.gmra.mrb[36].mxu1 %v4307_v52  ;;  %v4240_v53 = vld [vmem:[#allocation3 + $0x78] sm:$0xff] }
 0x4c6   : >> { %v4254_v27 = vadd.f32 %v4238_v45, %v4222_v36  ;;  %4286 = vst.msk [vmem:[#allocation2 + $0xe8] sm:$0xff] %vm1000_vm3, %v4222_v36  ;;  %v4224_v22 = vmax.f32 %v4208_v16, 0.0 }
 0x4c7   : >> { %v4255_v50 = vadd.f32 %v4223_v48, %v3437_v6  ;;  %4287 = vst [vmem:[#allocation2 + $0xf0] sm:$0xff] %v4223_v48  ;;  %v4298_v47 = vld [vmem:[#allocation3 + $0x48] sm:$0xff] }
 0x4c8   : >> { %4270 = vst.msk [vmem:[#allocation3 + $0x68] sm:$0xff] %vm1000_vm3, %v4254_v27  ;;  %v4256_v54 = vadd.f32 %v4240_v53, %v4224_v22  ;;  %4288 = vst.msk [vmem:[#allocation2 + $0xf8] sm:$0xff] %vm1000_vm3, %v4224_v22 }
 0x4c9   : >> { %v4300_v51 = vld [vmem:[#allocation3 + $0x58] sm:$0xff]  ;;  %v4311_v13 = vpack.c.bf16 %v4255_v50, %v4253_v41 }
 0x4ca   : >> { %4272 = vst.msk [vmem:[#allocation3 + $0x78] sm:$0xff] %vm1000_vm3, %v4256_v54  ;;  %v4310_v40 = vpack.c.bf16 %v4300_v51, %v4298_v47 }
 0x4cc   : >> { %5001 = vmatprep.mubr.msk.bf16.mxu1 %vm1000_vm3, %v4310_v40 }
 0x4cd   : >> { %4457 = vmatmul.mubr.bf16.gmra.mrb[40].mxu1 %v4309_v33 }
 0x4cf   : >> { %v4302_v2 = vld [vmem:[#allocation3 + $0x68] sm:$0xff] }
 0x4d1   : >> { %v4304_v35 = vld [vmem:[#allocation3 + $0x78] sm:$0xff] }
 0x4d2   : >> { %v4312_v15 = vpack.c.bf16 %v4304_v35, %v4302_v2 }
 0x4d4   : >> { %5002 = vmatprep.mubr.msk.bf16.mxu1 %vm1000_vm3, %v4312_v15 }
 0x4d5   : >> { %4465 = vmatmul.mubr.bf16.gmra.mrb[44].mxu1 %v4311_v13 }
 0x590   : >> { %v4442_v7 = vpop.f32.mrb[32].mxu1 }
 0x591   : >> { %v4473_v10 = vmul.f32 0.04, %v4442_v7  ;;  %v4444_v23 = vpop.f32.mrb[33].mxu1 }
 0x592   : >> { %v4445_v32 = vpop.f32.mrb[34].mxu1 }
 0x593   : >> { %v5024_v29 = vpack.c.bf16 %v4473_v10, %v4473_v10  ;;  %v4474_v52 = vmul.f32 0.04, %v4445_v32  ;;  %v4447_v25 = vpop.f32.mrb[35].mxu1 }
 0x595   : >> { %4517 = vst.msk [vmem:[%s7213_s11] sm:$0xf] %vm4516_vm6, %v5024_v29  ;;  %v5025_v21 = vpack.c.bf16 %v4474_v52, %v4474_v52 }
 0x597   : >> { %4518 = vst.msk [vmem:[%s7213_s11 + $0x4] sm:$0xf] %vm4516_vm6, %v5025_v21 }
 0x598   : >> { %v4450_v30 = vpop.f32.mrb[36].mxu1 }
 0x599   : >> { %v4475_v62 = vmul.f32 0.04, %v4450_v30  ;;  %v4452_v28 = vpop.f32.mrb[37].mxu1 }
 0x59a   : >> { %v4453_v6 = vpop.f32.mrb[38].mxu1 }
 0x59b   : >> { %v5026_v55 = vpack.c.bf16 %v4475_v62, %v4475_v62  ;;  %v4476_v61 = vmul.f32 0.04, %v4453_v6  ;;  %v4455_v9 = vpop.f32.mrb[39].mxu1 }
 0x59d   : >> { %4519 = vst.msk [vmem:[%s7213_s11 + $0x8] sm:$0xf] %vm4516_vm6, %v5026_v55  ;;  %v5027_v37 = vpack.c.bf16 %v4476_v61, %v4476_v61 }
 0x59f   : >> { %4520 = vst.msk [vmem:[%s7213_s11 + $0xc] sm:$0xf] %vm4516_vm6, %v5027_v37 }
 0x5a0   : >> { %v4458_v58 = vpop.f32.mrb[40].mxu1 }
 0x5a1   : >> { %v4477_v18 = vmul.f32 0.04, %v4458_v58  ;;  %v4460_v19 = vpop.f32.mrb[41].mxu1 }
 0x5a2   : >> { %v4461_v31 = vpop.f32.mrb[42].mxu1 }
 0x5a3   : >> { %v5028_v34 = vpack.c.bf16 %v4477_v18, %v4477_v18  ;;  %v4478_v56 = vmul.f32 0.04, %v4461_v31  ;;  %v4463_v57 = vpop.f32.mrb[43].mxu1 }
 0x5a5   : >> { %4521 = vst.msk [vmem:[%s7213_s11 + $0x10] sm:$0xf] %vm4516_vm6, %v5028_v34  ;;  %v5029_v59 = vpack.c.bf16 %v4478_v56, %v4478_v56 }
 0x5a7   : >> { %4522 = vst.msk [vmem:[%s7213_s11 + $0x14] sm:$0xf] %vm4516_vm6, %v5029_v59 }
 0x5a8   : >> { %v4466_v11 = vpop.f32.mrb[44].mxu1 }
 0x5a9   : >> { %v4479_v20 = vmul.f32 0.04, %v4466_v11  ;;  %v4468_v3 = vpop.f32.mrb[45].mxu1  ;;  %1784 = sbr.rel (!%p1782_p4) target bundleno = 570 (0x23a), region = 80 }
 0x5aa   : >> { %v4469_v63 = vpop.f32.mrb[46].mxu1 }
 0x5ab   : >> { %v5030_v8 = vpack.c.bf16 %v4479_v20, %v4479_v20  ;;  %v4480_v44 = vmul.f32 0.04, %v4469_v63  ;;  %v4471_v17 = vpop.f32.mrb[47].mxu1 }
 0x5ad   : >> { %4523 = vst.msk [vmem:[%s7213_s11 + $0x18] sm:$0xf] %vm4516_vm6, %v5030_v8  ;;  %v5031_v43 = vpack.c.bf16 %v4480_v44, %v4480_v44 }
 0x5af   : >> { %4524 = vst.msk [vmem:[%s7213_s11 + $0x1c] sm:$0xf] %vm4516_vm6, %v5031_v43 }
 0x5b0 PF: > { %s14_s15 = sadd.s32 1, %s5481_s15  }
 0x5b1   : > { %p11_p5 = scmp.ge.s32.totalorder %s14_s15, 4  }
 0x5b3   :  { %13 = sbr.rel (!%p11_p5) target bundleno = 1 (0x1), region = 91 }

// kernel: deep_q_forward.6
= control target key start
LH: loop header
LB: loop body
LE: loop exit
PB: predicated region body
PF: predicated region fallthrough
CT: control target
= control target key end

     0   :  { %s4028_s15 = smov 0   ;;  %s5263_s0 = inlined_call_operand.vmem [shape: bf16[2,4288,49], index: 0, kind: input, shape index: {}]   ;;  %s5264_s1 = inlined_call_operand.vmem [shape: bf16[3,64,192], index: 1, kind: input, shape index: {}]   ;;  %s5265_s2 = inlined_call_operand.vmem [shape: f32[64,1], index: 2, kind: input, shape index: {}]   ;;  %s5266_s3 = inlined_call_operand.vmem [shape: bf16[47,15], index: 3, kind: input, shape index: {}]   ;;  %s5267_s4 = inlined_call_operand.vmem [shape: bf16[2,21,64,15], index: 4, kind: output, shape index: {}]  }
   0x1 LB: > { %s3427_s16 = sadd.s32 4294967295, %s3990_s15   ;;  %p3431_p0 = scmp.ge.s32.totalorder %s3990_s15, 1  ;;  %s3990_s15 = sphi %s4028_s15, %s14_s15  }
   0x2   : > { %p162_p1 = scmp.lt.s32.totalorder %s3990_s15, 3 }
   0x4   : > { %p163_p2 = pnand %p3431_p0, %p162_p1 }
   0x5   : > { %p188_p3 = scmp.lt.s32.totalorder (!%p163_p2), %s3427_s16, 1  ;;  %v3996_v0 = vmov (!%p163_p2), 0   ;;  %s3997_s25 = smov (!%p163_p2), 127   ;;  %v3871_v16 = vld [vmem:[%s5264_s1 + $0x44] ss:$8 sps:$4 sm:$0xff] (!%p163_p2)   ;;  %vm380_vm0 = vcmask (!%p163_p2), 523264  }
   0x6   : > { %166 = sbr.rel (%p163_p2) target bundleno = 1360 (0x550), region = 36  ;;  %518 = vmatprep.subr.bf16.mxu1 (!%p163_p2), %v3996_v0  ;;  %393 = vmatprep.subr.bf16.mxu0 (!%p163_p2), %v3996_v0  ;;  %s3998_s26 = smov (!%p163_p2), 126   ;;  %v4110_v17 = vld [vmem:[%s5264_s1 + $0x4] ss:$8 sps:$4 sm:$0xff] (!%p163_p2)   ;;  %v4139_v21 = vld [vmem:[%s5264_s1] ss:$8 sps:$4 sm:$0xff] (!%p163_p2)  }
   0x7   : > { %3843 = vset.pattern.permute.xlu0 (!%p163_p2), %v3996_v0  ;;  %3844 = vset.pattern.permute.xlu1 (!%p163_p2), %v3996_v0  ;;  %v4165_v25 = vld [vmem:[%s5264_s1 + $0x14] ss:$8 sps:$4 sm:$0xff] (!%p163_p2)   ;;  %v4170_v26 = vld [vmem:[%s5264_s1 + $0x10] ss:$8 sps:$4 sm:$0xff] (!%p163_p2)   ;;  %v4190_v29 = vld [vmem:[%s5264_s1 + $0x24] ss:$8 sps:$4 sm:$0xff] (!%p163_p2)  }
   0x8   : > { %3462 = vmatprep.mubr.msk.bf16.mxu0 (!%p163_p2), %vm380_vm0, %v3871_v16  ;;  %3474 = vmatprep.mubr.msk.bf16.mxu1 (!%p163_p2), %vm380_vm0, %v4110_v17  ;;  %v4195_v30 = vld [vmem:[%s5264_s1 + $0x20] ss:$8 sps:$4 sm:$0xff] (!%p163_p2)   ;;  %v4214_v32 = vld [vmem:[%s5264_s1 + $0x34] ss:$8 sps:$4 sm:$0xff] (!%p163_p2)   ;;  %v4219_v33 = vld [vmem:[%s5264_s1 + $0x30] ss:$8 sps:$4 sm:$0xff] (!%p163_p2)  }
   0x9   : > { %v199_v55 = vld [vmem:[%s5265_s2] sm:$0xff] (!%p163_p2)  ;;  %v200_v56 = vld [vmem:[%s5265_s2 + $0x8] sm:$0xff] (!%p163_p2)  ;;  %v202_v58 = vld [vmem:[%s5265_s2 + $0x18] sm:$0xff] (!%p163_p2)  ;;  %vm805_vm1 = vcmask (!%p163_p2), 384000   ;;  %s4503_s20 = smov (!%p163_p2), 0  }
   0xa   : > { %v201_v59 = vld [vmem:[%s5265_s2 + $0x10] sm:$0xff] (!%p163_p2)  ;;  %v4281_v60 = vld [vmem:[%s5264_s1 + $0x40] ss:$8 sps:$4 sm:$0xff] (!%p163_p2)  }
   0xb   : > { %v4287_v62 = vld [vmem:[%s5264_s1 + $0x54] ss:$8 sps:$4 sm:$0xff] (!%p163_p2)  }
   0xd   : > { %s5269_s16 = smov (!%p188_p3, %s3427_s16), 1 }
   0xe   : > { %s3818_s17 = smul.u32 2144, %s5269_s16 }
   0xf   : > { %s3819_s18 = smul.u32 672, %s5269_s16 }
  0x10   : > { %s4043_s21 = scalar_lea.vmem %s5263_s0, %s3818_s17 }
  0x11   : > { %s4048_s24 = scalar_lea.vmem %s5267_s4, %s3819_s18  ;;  %v3845_v1 = vld [vmem:[%s4043_s21] sm:$0xff]   ;;  %v3846_v2 = vld [vmem:[%s4043_s21 + $0x8] sm:$0xff]   ;;  %v3847_v3 = vld [vmem:[%s4043_s21 + $0x10] sm:$0xff]  }
  0x12   : > { %344 = vrot.lane.b32.xlu0 %v3845_v1, %s3997_s25  ;;  %519 = vmatpush1.bf16.msra.mxu1 %v3845_v1  ;;  %v3848_v4 = vld [vmem:[%s4043_s21 + $0x18] sm:$0xff]   ;;  %v3849_v5 = vld [vmem:[%s4043_s21 + $0x20] sm:$0xff]   ;;  %v3850_v6 = vld [vmem:[%s4043_s21 + $0x28] sm:$0xff]  }
  0x13   : > { %520 = vmatprep.subr.bf16.mxu1 %v3996_v0  ;;  %348 = vrot.lane.b32.xlu1 %v3847_v3, %s3997_s25  ;;  %v3851_v7 = vld [vmem:[%s4043_s21 + $0x30] sm:$0xff]   ;;  %v3852_v8 = vld [vmem:[%s4043_s21 + $0x38] sm:$0xff]   ;;  %v3853_v9 = vld [vmem:[%s4043_s21 + $0x40] sm:$0xff]  }
  0x14   : > { %v3854_v10 = vld [vmem:[%s4043_s21 + $0x48] sm:$0xff]   ;;  %v4074_v11 = vld [vmem:[%s4043_s21 + $0x50] sm:$0xff]   ;;  %v4079_v12 = vld [vmem:[%s4043_s21 + $0x58] sm:$0xff]  }
  0x15   : > { %v4084_v13 = vld [vmem:[%s4043_s21 + $0x20] sm:$0xff]   ;;  %v4094_v14 = vld [vmem:[%s4043_s21 + $0x28] sm:$0xff]   ;;  %v4101_v15 = vld [vmem:[%s4043_s21 + $0x30] sm:$0xff]  }
  0x16   : > { %346 = vrot.lane.b32.xlu0 %v3846_v2, %s3997_s25  ;;  %521 = vmatpush1.bf16.msra.mxu1 %v3846_v2  ;;  %v4117_v18 = vld [vmem:[%s4043_s21 + $0x38] sm:$0xff]   ;;  %v4126_v19 = vld [vmem:[%s4043_s21 + $0x40] sm:$0xff]   ;;  %v4134_v20 = vld [vmem:[%s4043_s21 + $0x48] sm:$0xff]  }
  0x17   : > { %522 = vmatprep.subr.bf16.mxu1 %v3996_v0  ;;  %350 = vrot.lane.b32.xlu1 %v3848_v4, %s3997_s25  ;;  %v4147_v22 = vld [vmem:[%s4043_s21 + $0x50] sm:$0xff]   ;;  %v4154_v23 = vld [vmem:[%s4043_s21 + $0x58] sm:$0xff]   ;;  %v4160_v24 = vld [vmem:[%s4043_s21 + $0x60] sm:$0xff]  }
  0x18   : > { %v4179_v27 = vld [vmem:[%s4043_s21 + $0x68] sm:$0xff]   ;;  %v4185_v28 = vld [vmem:[%s4043_s21 + $0x70] sm:$0xff]   ;;  %v4205_v31 = vld [vmem:[%s4043_s21 + $0x78] sm:$0xff]  }
  0x1a   : > { %352 = vrot.lane.b32.xlu0 %v3849_v5, %s3997_s25  ;;  %523 = vmatpush1.bf16.msra.mxu1 %v3847_v3 }
  0x1b   : > { %524 = vmatprep.subr.bf16.mxu1 %v3996_v0  ;;  %354 = vrot.lane.b32.xlu1 %v3850_v6, %s3997_s25 }
  0x1e   : > { %356 = vrot.lane.b32.xlu0 %v3851_v7, %s3997_s25  ;;  %525 = vmatpush1.bf16.msra.mxu1 %v3848_v4 }
  0x1f   : > { %526 = vmatprep.subr.bf16.mxu1 %v3996_v0  ;;  %358 = vrot.lane.b32.xlu1 %v3852_v8, %s3997_s25 }
  0x22   : > { %360 = vrot.lane.b32.xlu0 %v3853_v9, %s3997_s25  ;;  %527 = vmatpush1.bf16.msra.mxu1 %v3849_v5 }
  0x23   : > { %528 = vmatprep.subr.bf16.mxu1 %v3996_v0  ;;  %362 = vrot.lane.b32.xlu1 %v3854_v10, %s3997_s25 }
  0x26   : > { %364 = vrot.lane.b32.xlu0 %v4074_v11, %s3997_s25  ;;  %529 = vmatpush1.bf16.msra.mxu1 %v3850_v6 }
  0x27   : > { %530 = vmatprep.subr.bf16.mxu1 %v3996_v0  ;;  %366 = vrot.lane.b32.xlu1 %v4079_v12, %s3997_s25 }
  0x2a   : > { %628 = vrot.lane.b32.xlu0 %v3845_v1, %s3998_s26  ;;  %531 = vmatpush1.bf16.msra.mxu1 %v3851_v7  ;;  %v203_v1 = vld [vmem:[%s5265_s2 + $0x20] sm:$0xff] }
  0x2b   : > { %532 = vmatprep.subr.bf16.mxu1 %v3996_v0  ;;  %950 = vrot.lane.b32.xlu1 %v4084_v13, %s3997_s25 }
  0x2e   : > { %630 = vrot.lane.b32.xlu0 %v3846_v2, %s3998_s26  ;;  %533 = vmatpush1.bf16.msra.mxu1 %v3852_v8 }
  0x2f   : > { %534 = vmatprep.subr.bf16.mxu1 %v3996_v0  ;;  %952 = vrot.lane.b32.xlu1 %v4094_v14, %s3997_s25 }
  0x32   : > { %632 = vrot.lane.b32.xlu0 %v3847_v3, %s3998_s26  ;;  %535 = vmatpush1.bf16.msra.mxu1 %v3853_v9  ;;  %v204_v3 = vld [vmem:[%s5265_s2 + $0x28] sm:$0xff] }
  0x33   : > { %536 = vmatprep.subr.bf16.mxu1 %v3996_v0  ;;  %954 = vrot.lane.b32.xlu1 %v4101_v15, %s3997_s25 }
  0x36   : > { %634 = vrot.lane.b32.xlu0 %v3848_v4, %s3998_s26  ;;  %537 = vmatpush1.bf16.msra.mxu1 %v3854_v10 }
  0x37   : > { %538 = vmatprep.subr.bf16.mxu1 %v3996_v0  ;;  %956 = vrot.lane.b32.xlu1 %v4117_v18, %s3997_s25 }
  0x3a   : > { %636 = vrot.lane.b32.xlu0 %v3849_v5, %s3998_s26  ;;  %539 = vmatpush1.bf16.msra.mxu1 %v4074_v11  ;;  %v205_v5 = vld [vmem:[%s5265_s2 + $0x30] sm:$0xff] }
  0x3b   : > { %540 = vmatprep.subr.bf16.mxu1 %v3996_v0  ;;  %958 = vrot.lane.b32.xlu1 %v4126_v19, %s3997_s25 }
  0x3e   : > { %638 = vrot.lane.b32.xlu0 %v3850_v6, %s3998_s26  ;;  %541 = vmatpush1.bf16.msra.mxu1 %v4079_v12  ;;  %v3877_v6 = vld [vmem:[%s5264_s1 + $0x50] ss:$8 sps:$4 sm:$0xff]  }
  0x3f   : > { %998 = vmatprep.subr.bf16.mxu1 %v3996_v0  ;;  %960 = vrot.lane.b32.xlu1 %v4134_v20, %s3997_s25 }
  0x41   : > { %551 = vmatmul.mubr.bf16.vlgmr.msra.gmra.mrb[0].mxu1 %v4139_v21 }
  0x42   : > { %640 = vrot.lane.b32.xlu0 %v3851_v7, %s3998_s26  ;;  %3475 = vmatprep.mubr.msk.bf16.mxu1 %vm380_vm0, %v4165_v25 }
  0x43   : > { %962 = vrot.lane.b32.xlu1 %v4147_v22, %s3997_s25 }
  0x46   : > { %642 = vrot.lane.b32.xlu0 %v3852_v8, %s3998_s26  ;;  %v206_v8 = vld [vmem:[%s5265_s2 + $0x38] sm:$0xff] }
  0x47   : > { %964 = vrot.lane.b32.xlu1 %v4154_v23, %s3997_s25 }
  0x49   : > { %559 = vmatmul.mubr.bf16.gmra.mrb[4].mxu1 %v4170_v26 }
  0x4a   : > { %644 = vrot.lane.b32.xlu0 %v3853_v9, %s3998_s26  ;;  %3476 = vmatprep.mubr.msk.bf16.mxu1 %vm380_vm0, %v4190_v29  ;;  %v3881_v9 = vld [vmem:[%s5264_s1 + $0x64] ss:$8 sps:$4 sm:$0xff]  }
  0x4b   : > { %966 = vrot.lane.b32.xlu1 %v4160_v24, %s3997_s25 }
  0x4e   : > { %646 = vrot.lane.b32.xlu0 %v3854_v10, %s3998_s26 }
  0x4f   : > { %968 = vrot.lane.b32.xlu1 %v4179_v27, %s3997_s25 }
  0x51   : > { %567 = vmatmul.mubr.bf16.gmra.mrb[8].mxu1 %v4195_v30 }
  0x52   : > { %648 = vrot.lane.b32.xlu0 %v4074_v11, %s3998_s26  ;;  %3477 = vmatprep.mubr.msk.bf16.mxu1 %vm380_vm0, %v4214_v32 }
  0x53   : > { %970 = vrot.lane.b32.xlu1 %v4185_v28, %s3997_s25 }
  0x56   : > { %650 = vrot.lane.b32.xlu0 %v4079_v12, %s3998_s26 }
  0x57   : > { %972 = vrot.lane.b32.xlu1 %v4205_v31, %s3997_s25 }
  0x59   : > { %575 = vmatmul.mubr.bf16.gmra.mrb[12].mxu1 %v4219_v33 }
  0x5a   : > { %1232 = vrot.lane.b32.xlu0 %v4084_v13, %s3998_s26  ;;  %3526 = vmatprep.mubr.msk.bf16.mxu1 %vm380_vm0, %v3871_v16  ;;  %v3883_v16 = vld [vmem:[%s5264_s1 + $0x60] ss:$8 sps:$4 sm:$0xff]  }
  0x5b   : > { %1234 = vrot.lane.b32.xlu1 %v4094_v14, %s3998_s26 }
  0x5e   : > { %1236 = vrot.lane.b32.xlu0 %v4101_v15, %s3998_s26 }
  0x5f   : > { %1238 = vrot.lane.b32.xlu1 %v4117_v18, %s3998_s26 }
  0x62   : > { %1240 = vrot.lane.b32.xlu0 %v4126_v19, %s3998_s26 }
  0x63   : > { %1242 = vrot.lane.b32.xlu1 %v4134_v20, %s3998_s26 }
  0x66   : > { %1244 = vrot.lane.b32.xlu0 %v4147_v22, %s3998_s26 }
  0x67   : > { %1246 = vrot.lane.b32.xlu1 %v4154_v23, %s3998_s26 }
  0x6a   : > { %1248 = vrot.lane.b32.xlu0 %v4160_v24, %s3998_s26 }
  0x6b   : > { %1250 = vrot.lane.b32.xlu1 %v4179_v27, %s3998_s26 }
  0x6e   : > { %1252 = vrot.lane.b32.xlu0 %v4185_v28, %s3998_s26 }
  0x6f   : > { %1254 = vrot.lane.b32.xlu1 %v4205_v31, %s3998_s26 }
  0x72   : > { %751 = vperm.xlu0 %3843, %v199_v55  }
  0x73   : > { %756 = vperm.xlu1 %3844, %v200_v56   ;;  %v3902_v56 = vld [vmem:[%s5264_s1 + $0xb4] ss:$8 sps:$4 sm:$0xff]  }
  0x76   : > { %766 = vperm.xlu0 %3843, %v202_v58  }
  0x77   : > { %761 = vperm.xlu1 %3844, %v201_v59  }
  0x7a   : > { %776 = vperm.xlu0 %3843, %v204_v3  }
  0x7b   : > { %771 = vperm.xlu1 %3844, %v203_v1  }
  0x7e   : > { %786 = vperm.xlu0 %3843, %v206_v8  }
  0x7f   : > { %781 = vperm.xlu1 %3844, %v205_v5  }
  0x84   : > { %v345_v34 = vpop.permute.xlu0 %344 }
  0x85   : > { %394 = vmatpush1.bf16.msra.mxu0 %v345_v34  ;;  %v349_v35 = vpop.permute.xlu1 %348 }
  0x86   : > { %395 = vmatprep.subr.bf16.mxu0 %v3996_v0 }
  0x88   : > { %v347_v36 = vpop.permute.xlu0 %346 }
  0x89   : > { %396 = vmatpush1.bf16.msra.mxu0 %v347_v36  ;;  %v351_v37 = vpop.permute.xlu1 %350 }
  0x8a   : > { %397 = vmatprep.subr.bf16.mxu0 %v3996_v0 }
  0x8c   : > { %v353_v38 = vpop.permute.xlu0 %352 }
  0x8d   : > { %398 = vmatpush1.bf16.msra.mxu0 %v349_v35  ;;  %v355_v39 = vpop.permute.xlu1 %354  ;;  %v3887_v35 = vld [vmem:[%s5264_s1 + $0x74] ss:$8 sps:$4 sm:$0xff]  }
  0x8e   : > { %399 = vmatprep.subr.bf16.mxu0 %v3996_v0 }
  0x90   : > { %v357_v40 = vpop.permute.xlu0 %356 }
  0x91   : > { %400 = vmatpush1.bf16.msra.mxu0 %v351_v37  ;;  %v359_v41 = vpop.permute.xlu1 %358 }
  0x92   : > { %401 = vmatprep.subr.bf16.mxu0 %v3996_v0 }
  0x94   : > { %v361_v42 = vpop.permute.xlu0 %360 }
  0x95   : > { %402 = vmatpush1.bf16.msra.mxu0 %v353_v38  ;;  %v363_v43 = vpop.permute.xlu1 %362 }
  0x96   : > { %403 = vmatprep.subr.bf16.mxu0 %v3996_v0 }
  0x98   : > { %v365_v44 = vpop.permute.xlu0 %364 }
  0x99   : > { %404 = vmatpush1.bf16.msra.mxu0 %v355_v39  ;;  %v367_v45 = vpop.permute.xlu1 %366  ;;  %v3889_v39 = vld [vmem:[%s5264_s1 + $0x70] ss:$8 sps:$4 sm:$0xff]  }
  0x9a   : > { %405 = vmatprep.subr.bf16.mxu0 %v3996_v0 }
  0x9c   : > { %v629_v46 = vpop.permute.xlu0 %628 }
  0x9d   : > { %406 = vmatpush1.bf16.msra.mxu0 %v357_v40  ;;  %v951_v47 = vpop.permute.xlu1 %950 }
  0x9e   : > { %407 = vmatprep.subr.bf16.mxu0 %v3996_v0  ;;  %999 = vmatpush1.bf16.msra.mxu1 %v951_v47 }
  0x9f   : > { %1000 = vmatprep.subr.bf16.mxu1 %v3996_v0 }
  0xa0   : > { %v631_v48 = vpop.permute.xlu0 %630 }
  0xa1   : > { %408 = vmatpush1.bf16.msra.mxu0 %v359_v41  ;;  %v953_v49 = vpop.permute.xlu1 %952  ;;  %v3895_v41 = vld [vmem:[%s5264_s1 + $0x84] ss:$8 sps:$4 sm:$0xff]  }
  0xa2   : > { %409 = vmatprep.subr.bf16.mxu0 %v3996_v0  ;;  %1001 = vmatpush1.bf16.msra.mxu1 %v953_v49 }
  0xa3   : > { %1002 = vmatprep.subr.bf16.mxu1 %v3996_v0 }
  0xa4   : > { %v633_v50 = vpop.permute.xlu0 %632 }
  0xa5   : > { %410 = vmatpush1.bf16.msra.mxu0 %v361_v42  ;;  %v955_v51 = vpop.permute.xlu1 %954 }
  0xa6   : > { %411 = vmatprep.subr.bf16.mxu0 %v3996_v0  ;;  %1003 = vmatpush1.bf16.msra.mxu1 %v955_v51 }
  0xa7   : > { %1004 = vmatprep.subr.bf16.mxu1 %v3996_v0 }
  0xa8   : > { %v635_v52 = vpop.permute.xlu0 %634 }
  0xa9   : > { %412 = vmatpush1.bf16.msra.mxu0 %v363_v43  ;;  %v957_v53 = vpop.permute.xlu1 %956 }
  0xaa   : > { %413 = vmatprep.subr.bf16.mxu0 %v3996_v0  ;;  %1005 = vmatpush1.bf16.msra.mxu1 %v957_v53 }
  0xab   : > { %1006 = vmatprep.subr.bf16.mxu1 %v3996_v0 }
  0xac   : > { %v4262_v54 = vpop.permute.xlu0 %636 }
  0xad   : > { %414 = vmatpush1.bf16.msra.mxu0 %v365_v44  ;;  %v959_v57 = vpop.permute.xlu1 %958 }
  0xae   : > { %415 = vmatprep.subr.bf16.mxu0 %v3996_v0  ;;  %1007 = vmatpush1.bf16.msra.mxu1 %v959_v57 }
  0xaf   : > { %1008 = vmatprep.subr.bf16.mxu1 %v3996_v0 }
  0xb0   : > { %v639_v61 = vpop.permute.xlu0 %638 }
  0xb1   : > { %416 = vmatpush1.bf16.msra.mxu0 %v367_v45  ;;  %v961_v63 = vpop.permute.xlu1 %960 }
  0xb2   : > { %676 = vmatprep.subr.bf16.mxu0 %v3996_v0  ;;  %1009 = vmatpush1.bf16.msra.mxu1 %v961_v63 }
  0xb3   : > { %1010 = vmatprep.subr.bf16.mxu1 %v3996_v0 }
  0xb4   : > { %426 = vmatmul.mubr.bf16.vlgmr.msra.gmra.mrb[0].mxu0 %v4281_v60  ;;  %v641_v2 = vpop.permute.xlu0 %640 }
  0xb5   : > { %677 = vmatpush1.bf16.msra.mxu0 %v629_v46  ;;  %3463 = vmatprep.mubr.msk.bf16.mxu0 %vm380_vm0, %v4287_v62  ;;  %v963_v4 = vpop.permute.xlu1 %962 }
  0xb6   : > { %678 = vmatprep.subr.bf16.mxu0 %v3996_v0  ;;  %1011 = vmatpush1.bf16.msra.mxu1 %v963_v4 }
  0xb7   : > { %1012 = vmatprep.subr.bf16.mxu1 %v3996_v0 }
  0xb8   : > { %v643_v7 = vpop.permute.xlu0 %642 }
  0xb9   : > { %679 = vmatpush1.bf16.msra.mxu0 %v631_v48  ;;  %v965_v10 = vpop.permute.xlu1 %964  ;;  %v3893_v48 = vld [vmem:[%s5264_s1 + $0x80] ss:$8 sps:$4 sm:$0xff]  }
  0xba   : > { %680 = vmatprep.subr.bf16.mxu0 %v3996_v0  ;;  %1013 = vmatpush1.bf16.msra.mxu1 %v965_v10 }
  0xbb   : > { %1014 = vmatprep.subr.bf16.mxu1 %v3996_v0 }
  0xbc   : > { %434 = vmatmul.mubr.bf16.gmra.mrb[4].mxu0 %v3877_v6  ;;  %v645_v11 = vpop.permute.xlu0 %644 }
  0xbd   : > { %681 = vmatpush1.bf16.msra.mxu0 %v633_v50  ;;  %3464 = vmatprep.mubr.msk.bf16.mxu0 %vm380_vm0, %v3881_v9  ;;  %v967_v12 = vpop.permute.xlu1 %966  ;;  %v3896_v50 = vld [vmem:[%s5264_s1 + $0x94] ss:$8 sps:$4 sm:$0xff]  }
  0xbe   : > { %682 = vmatprep.subr.bf16.mxu0 %v3996_v0  ;;  %1015 = vmatpush1.bf16.msra.mxu1 %v967_v12 }
  0xbf   : > { %1016 = vmatprep.subr.bf16.mxu1 %v3996_v0 }
  0xc0   : > { %v647_v34 = vpop.permute.xlu0 %646 }
  0xc1   : > { %683 = vmatpush1.bf16.msra.mxu0 %v635_v52  ;;  %v969_v36 = vpop.permute.xlu1 %968  ;;  %v3898_v52 = vld [vmem:[%s5264_s1 + $0x90] ss:$8 sps:$4 sm:$0xff]  }
  0xc2   : > { %684 = vmatprep.subr.bf16.mxu0 %v3996_v0  ;;  %1017 = vmatpush1.bf16.msra.mxu1 %v969_v36 }
  0xc3   : > { %1018 = vmatprep.subr.bf16.mxu1 %v3996_v0 }
  0xc4   : > { %442 = vmatmul.mubr.bf16.gmra.mrb[8].mxu0 %v3883_v16  ;;  %v649_v37 = vpop.permute.xlu0 %648 }
  0xc5   : > { %685 = vmatpush1.bf16.msra.mxu0 %v4262_v54  ;;  %3465 = vmatprep.mubr.msk.bf16.mxu0 %vm380_vm0, %v3887_v35  ;;  %v971_v38 = vpop.permute.xlu1 %970 }
  0xc6   : > { %686 = vmatprep.subr.bf16.mxu0 %v3996_v0  ;;  %1019 = vmatpush1.bf16.msra.mxu1 %v971_v38 }
  0xc7   : > { %1020 = vmatprep.subr.bf16.mxu1 %v3996_v0 }
  0xc8   : > { %v651_v40 = vpop.permute.xlu0 %650 }
  0xc9   : > { %687 = vmatpush1.bf16.msra.mxu0 %v639_v61  ;;  %v973_v42 = vpop.permute.xlu1 %972 }
  0xca   : > { %688 = vmatprep.subr.bf16.mxu0 %v3996_v0  ;;  %1021 = vmatpush1.bf16.msra.mxu1 %v973_v42 }
  0xcb   : > { %1280 = vmatprep.subr.bf16.mxu1 %v3996_v0 }
  0xcc   : > { %450 = vmatmul.mubr.bf16.gmra.mrb[12].mxu0 %v3889_v39  ;;  %v1233_v43 = vpop.permute.xlu0 %1232 }
  0xcd   : > { %689 = vmatpush1.bf16.msra.mxu0 %v641_v2  ;;  %3494 = vmatprep.mubr.msk.bf16.mxu0 %vm380_vm0, %v3895_v41  ;;  %v1235_v44 = vpop.permute.xlu1 %1234 }
  0xce   : > { %690 = vmatprep.subr.bf16.mxu0 %v3996_v0  ;;  %1031 = vmatmul.mubr.bf16.vlgmr.msra.gmra.mrb[16].mxu1 %v4281_v60 }
  0xcf   : > { %1281 = vmatpush1.bf16.msra.mxu1 %v1233_v43  ;;  %3527 = vmatprep.mubr.msk.bf16.mxu1 %vm380_vm0, %v4287_v62 }
  0xd0   : > { %1282 = vmatprep.subr.bf16.mxu1 %v3996_v0  ;;  %v1237_v45 = vpop.permute.xlu0 %1236 }
  0xd1   : > { %691 = vmatpush1.bf16.msra.mxu0 %v643_v7  ;;  %v1239_v46 = vpop.permute.xlu1 %1238 }
  0xd2   : > { %692 = vmatprep.subr.bf16.mxu0 %v3996_v0 }
  0xd3   : > { %1283 = vmatpush1.bf16.msra.mxu1 %v1235_v44 }
  0xd4   : > { %1284 = vmatprep.subr.bf16.mxu1 %v3996_v0  ;;  %v1241_v47 = vpop.permute.xlu0 %1240 }
  0xd5   : > { %693 = vmatpush1.bf16.msra.mxu0 %v645_v11  ;;  %v1243_v49 = vpop.permute.xlu1 %1242 }
  0xd6   : > { %694 = vmatprep.subr.bf16.mxu0 %v3996_v0  ;;  %1039 = vmatmul.mubr.bf16.gmra.mrb[20].mxu1 %v3877_v6 }
  0xd7   : > { %1285 = vmatpush1.bf16.msra.mxu1 %v1237_v45  ;;  %3528 = vmatprep.mubr.msk.bf16.mxu1 %vm380_vm0, %v3881_v9 }
  0xd8   : > { %1286 = vmatprep.subr.bf16.mxu1 %v3996_v0  ;;  %v1245_v51 = vpop.permute.xlu0 %1244 }
  0xd9   : > { %695 = vmatpush1.bf16.msra.mxu0 %v647_v34  ;;  %v1247_v53 = vpop.permute.xlu1 %1246 }
  0xda   : > { %696 = vmatprep.subr.bf16.mxu0 %v3996_v0 }
  0xdb   : > { %1287 = vmatpush1.bf16.msra.mxu1 %v1239_v46 }
  0xdc   : > { %1288 = vmatprep.subr.bf16.mxu1 %v3996_v0  ;;  %v1249_v54 = vpop.permute.xlu0 %1248 }
  0xdd   : > { %697 = vmatpush1.bf16.msra.mxu0 %v649_v37  ;;  %v1251_v55 = vpop.permute.xlu1 %1250 }
  0xde   : > { %698 = vmatprep.subr.bf16.mxu0 %v3996_v0  ;;  %1047 = vmatmul.mubr.bf16.gmra.mrb[24].mxu1 %v3883_v16 }
  0xdf   : > { %1289 = vmatpush1.bf16.msra.mxu1 %v1241_v47  ;;  %3529 = vmatprep.mubr.msk.bf16.mxu1 %vm380_vm0, %v3887_v35 }
  0xe0   : > { %1290 = vmatprep.subr.bf16.mxu1 %v3996_v0 }
  0xe1   : > { %699 = vmatpush1.bf16.msra.mxu0 %v651_v40  ;;  %v1255_v57 = vpop.permute.xlu1 %1254 }
  0xe2   : > { %1123 = vmatprep.subr.bf16.mxu0 %v3996_v0 }
  0xe3   : > { %1291 = vmatpush1.bf16.msra.mxu1 %v1243_v49 }
  0xe4   : > { %709 = vmatmul.mubr.bf16.vlgmr.msra.gmra.mrb[16].mxu0 %v3893_v48  ;;  %1292 = vmatprep.subr.bf16.mxu1 %v3996_v0 }
  0xe5   : > { %1124 = vmatpush1.bf16.msra.mxu0 %v4084_v13  ;;  %3495 = vmatprep.mubr.msk.bf16.mxu0 %vm380_vm0, %v3896_v50  ;;  %v3899_v13 = vld [vmem:[%s5264_s1 + $0xa4] ss:$8 sps:$4 sm:$0xff]  }
  0xe6   : > { %1125 = vmatprep.subr.bf16.mxu0 %v3996_v0  ;;  %1055 = vmatmul.mubr.bf16.gmra.mrb[28].mxu1 %v3889_v39 }
  0xe7   : > { %1293 = vmatpush1.bf16.msra.mxu1 %v1245_v51  ;;  %3558 = vmatprep.mubr.msk.bf16.mxu1 %vm380_vm0, %v3895_v41 }
  0xe8   : > { %1294 = vmatprep.subr.bf16.mxu1 %v3996_v0 }
  0xe9   : > { %1126 = vmatpush1.bf16.msra.mxu0 %v4094_v14  ;;  %v3901_v14 = vld [vmem:[%s5264_s1 + $0xa0] ss:$8 sps:$4 sm:$0xff]  }
  0xea   : > { %1127 = vmatprep.subr.bf16.mxu0 %v3996_v0 }
  0xeb   : > { %1295 = vmatpush1.bf16.msra.mxu1 %v1247_v53 }
  0xec   : > { %717 = vmatmul.mubr.bf16.gmra.mrb[20].mxu0 %v3898_v52  ;;  %1296 = vmatprep.subr.bf16.mxu1 %v3996_v0 }
  0xed   : > { %1128 = vmatpush1.bf16.msra.mxu0 %v4101_v15  ;;  %3496 = vmatprep.mubr.msk.bf16.mxu0 %vm380_vm0, %v3899_v13  ;;  %v1253_v15 = vpop.permute.xlu0 %1252 }
  0xee   : > { %1129 = vmatprep.subr.bf16.mxu0 %v3996_v0 }
  0xef   : > { %1297 = vmatpush1.bf16.msra.mxu1 %v1249_v54 }
  0xf0   : > { %1298 = vmatprep.subr.bf16.mxu1 %v3996_v0 }
  0xf1   : > { %1130 = vmatpush1.bf16.msra.mxu0 %v4117_v18  ;;  %v3904_v18 = vld [vmem:[%s5264_s1 + $0xb0] ss:$8 sps:$4 sm:$0xff]   ;;  %v4441_v51 = vpop.permute.xlu0 %751 }
  0xf2   : > { %1131 = vmatprep.subr.bf16.mxu0 %v3996_v0 }
  0xf3   : > { %1299 = vmatpush1.bf16.msra.mxu1 %v1251_v55 }
  0xf4   : > { %725 = vmatmul.mubr.bf16.gmra.mrb[24].mxu0 %v3901_v14  ;;  %1300 = vmatprep.subr.bf16.mxu1 %v3996_v0 }
  0xf5   : > { %1132 = vmatpush1.bf16.msra.mxu0 %v4126_v19  ;;  %3497 = vmatprep.mubr.msk.bf16.mxu0 %vm380_vm0, %v3902_v56 }
  0xf6   : > { %1133 = vmatprep.subr.bf16.mxu0 %v3996_v0 }
  0xf7   : > { %1301 = vmatpush1.bf16.msra.mxu1 %v1253_v15 }
  0xf8   : > { %1302 = vmatprep.subr.bf16.mxu1 %v3996_v0 }
  0xf9   : > { %1134 = vmatpush1.bf16.msra.mxu0 %v4134_v20 }
  0xfa   : > { %1135 = vmatprep.subr.bf16.mxu0 %v3996_v0 }
  0xfb   : > { %1303 = vmatpush1.bf16.msra.mxu1 %v1255_v57 }
  0xfc   : > { %733 = vmatmul.mubr.bf16.gmra.mrb[28].mxu0 %v3904_v18 }
  0xfd   : > { %1136 = vmatpush1.bf16.msra.mxu0 %v4147_v22  ;;  %3538 = vmatprep.mubr.msk.bf16.mxu0 %vm380_vm0, %v4110_v17 }
  0xfe   : > { %1137 = vmatprep.subr.bf16.mxu0 %v3996_v0  ;;  %1313 = vmatmul.mubr.bf16.vlgmr.msra.gmra.mrb[32].mxu1 %v3893_v48 }
  0xff   : > { %3559 = vmatprep.mubr.msk.bf16.mxu1 %vm380_vm0, %v3896_v50 }
 0x101   : > { %1138 = vmatpush1.bf16.msra.mxu0 %v4154_v23 }
 0x102   : > { %1139 = vmatprep.subr.bf16.mxu0 %v3996_v0 }
 0x105   : > { %1140 = vmatpush1.bf16.msra.mxu0 %v4160_v24 }
 0x106   : > { %1141 = vmatprep.subr.bf16.mxu0 %v3996_v0  ;;  %1321 = vmatmul.mubr.bf16.gmra.mrb[36].mxu1 %v3898_v52 }
 0x107   : > { %3560 = vmatprep.mubr.msk.bf16.mxu1 %vm380_vm0, %v3899_v13  ;;  %v4443_v13 = vpop.permute.xlu1 %756 }
 0x109   : > { %1142 = vmatpush1.bf16.msra.mxu0 %v4179_v27 }
 0x10a   : > { %1143 = vmatprep.subr.bf16.mxu0 %v3996_v0 }
 0x10d   : > { %1144 = vmatpush1.bf16.msra.mxu0 %v4185_v28 }
 0x10e   : > { %1145 = vmatprep.subr.bf16.mxu0 %v3996_v0  ;;  %1329 = vmatmul.mubr.bf16.gmra.mrb[40].mxu1 %v3901_v14 }
 0x10f   : > { %3561 = vmatprep.mubr.msk.bf16.mxu1 %vm380_vm0, %v3902_v56 }
 0x111   : > { %1146 = vmatpush1.bf16.msra.mxu0 %v4205_v31 }
 0x114   : > { %1156 = vmatmul.mubr.bf16.vlgmr.msra.gmra.mrb[32].mxu0 %v4139_v21  ;;  %v552_v17 = vpop.f32.mrb[0].mxu1 }
 0x115   : > { %3539 = vmatprep.mubr.msk.bf16.mxu0 %vm380_vm0, %v4165_v25  ;;  %v554_v19 = vpop.f32.mrb[1].mxu1 }
 0x116   : > { %1337 = vmatmul.mubr.bf16.gmra.mrb[44].mxu1 %v3904_v18  ;;  %v555_v20 = vpop.f32.mrb[2].mxu1 }
 0x117   : > { %v557_v22 = vpop.f32.mrb[3].mxu1 }
 0x11c   : > { %1164 = vmatmul.mubr.bf16.gmra.mrb[36].mxu0 %v4170_v26  ;;  %v560_v0 = vpop.f32.mrb[4].mxu1 }
 0x11d   : > { %3540 = vmatprep.mubr.msk.bf16.mxu0 %vm380_vm0, %v4190_v29  ;;  %v562_v23 = vpop.f32.mrb[5].mxu1 }
 0x11e   : > { %v563_v24 = vpop.f32.mrb[6].mxu1  ;;  %v4452_v23 = vpop.permute.xlu1 %761 }
 0x11f   : > { %v565_v27 = vpop.f32.mrb[7].mxu1 }
 0x124   : > { %1172 = vmatmul.mubr.bf16.gmra.mrb[40].mxu0 %v4195_v30  ;;  %v568_v21 = vpop.f32.mrb[8].mxu1 }
 0x125   : > { %3541 = vmatprep.mubr.msk.bf16.mxu0 %vm380_vm0, %v4214_v32  ;;  %v570_v25 = vpop.f32.mrb[9].mxu1 }
 0x126   : > { %v571_v28 = vpop.f32.mrb[10].mxu1  ;;  %v4455_v25 = vpop.permute.xlu0 %766 }
 0x127   : > { %v573_v31 = vpop.f32.mrb[11].mxu1 }
 0x12c   : > { %1180 = vmatmul.mubr.bf16.gmra.mrb[44].mxu0 %v4219_v33  ;;  %v576_v58 = vpop.f32.mrb[12].mxu1 }
 0x12d   : > { %v578_v26 = vpop.f32.mrb[13].mxu1 }
 0x12e   : > { %v579_v59 = vpop.f32.mrb[14].mxu1 }
 0x12f   : > { %v581_v60 = vpop.f32.mrb[15].mxu1 }
 0x187   : > { %v427_v29 = vpop.f32.mrb[0].mxu0 }
 0x188   : > { %v553_v61 = vadd.f32 %v552_v17, %v427_v29  ;;  %v429_v62 = vpop.f32.mrb[1].mxu0 }
 0x189   : > { %v430_v63 = vpop.f32.mrb[2].mxu0 }
 0x18a   : > { %v556_v1 = vadd.f32 %v555_v20, %v430_v63  ;;  %v432_v2 = vpop.f32.mrb[3].mxu0 }
 0x18b   : > { %v4463_v2 = vpop.permute.xlu0 %776 }
 0x18f   : > { %v435_v30 = vpop.f32.mrb[4].mxu0 }
 0x190   : > { %v437_v3 = vpop.f32.mrb[5].mxu0  ;;  %v561_v4 = vadd.f32 %v560_v0, %v435_v30 }
 0x191   : > { %v438_v32 = vpop.f32.mrb[6].mxu0 }
 0x192   : > { %v440_v5 = vpop.f32.mrb[7].mxu0  ;;  %v564_v6 = vadd.f32 %v563_v24, %v438_v32 }
 0x197   : > { %v443_v7 = vpop.f32.mrb[8].mxu0 }
 0x198   : > { %v445_v8 = vpop.f32.mrb[9].mxu0  ;;  %v569_v9 = vadd.f32 %v568_v21, %v443_v7 }
 0x199   : > { %v446_v33 = vpop.f32.mrb[10].mxu0 }
 0x19a   : > { %v448_v10 = vpop.f32.mrb[11].mxu0  ;;  %v572_v11 = vadd.f32 %v571_v28, %v446_v33 }
 0x19b   : > { %v4472_v10 = vpop.permute.xlu0 %786 }
 0x19f   : > { %v451_v12 = vpop.f32.mrb[12].mxu0 }
 0x1a0   : > { %v453_v16 = vpop.f32.mrb[13].mxu0  ;;  %v4425_v34 = vadd.f32 %v576_v58, %v451_v12 }
 0x1a1   : > { %v454_v35 = vpop.f32.mrb[14].mxu0  ;;  %v4427_v36 = vpop.f32.mrb[16].mxu1 }
 0x1a2   : > { %v456_v37 = vpop.f32.mrb[15].mxu0  ;;  %v4429_v38 = vadd.f32 %v579_v59, %v454_v35  ;;  %v1034_v39 = vpop.f32.mrb[17].mxu1 }
 0x1a3   : > { %v4431_v40 = vpop.f32.mrb[18].mxu1 }
 0x1a4   : > { %v1037_v41 = vpop.f32.mrb[19].mxu1 }
 0x1a9   : > { %v4433_v42 = vpop.f32.mrb[20].mxu1 }
 0x1aa   : > { %v1042_v43 = vpop.f32.mrb[21].mxu1 }
 0x1ab   : > { %v4435_v44 = vpop.f32.mrb[22].mxu1 }
 0x1ac   : > { %v1045_v45 = vpop.f32.mrb[23].mxu1 }
 0x1b1   : > { %v4437_v46 = vpop.f32.mrb[24].mxu1 }
 0x1b2   : > { %v1050_v47 = vpop.f32.mrb[25].mxu1 }
 0x1b3   : > { %v4439_v48 = vpop.f32.mrb[26].mxu1 }
 0x1b4   : > { %v1053_v49 = vpop.f32.mrb[27].mxu1 }
 0x1b7   : > { %v710_v50 = vpop.f32.mrb[16].mxu0 }
 0x1b8   : > { %v741_v52 = vadd.f32 %v710_v50, %v553_v61  ;;  %v712_v53 = vpop.f32.mrb[17].mxu0  ;;  %v4460_v61 = vpop.permute.xlu1 %771 }
 0x1b9   : > { %v713_v54 = vpop.f32.mrb[18].mxu0  ;;  %v4445_v14 = vpop.f32.mrb[28].mxu1 }
 0x1ba   : > { %v742_v55 = vadd.f32 %v713_v54, %v556_v1  ;;  %v789_v56 = vadd.f32 %v4441_v51, %v741_v52  ;;  %v715_v15 = vpop.f32.mrb[19].mxu0  ;;  %v1058_v18 = vpop.f32.mrb[29].mxu1 }
 0x1bb   : > { %v4448_v57 = vpop.f32.mrb[30].mxu1 }
 0x1bc   : > { %v797_v17 = vmax.f32 %v789_v56, 0.0  ;;  %v790_v19 = vadd.f32 %v4443_v13, %v742_v55  ;;  %v1061_v20 = vpop.f32.mrb[31].mxu1  ;;  %v4468_v8 = vpop.permute.xlu1 %781 }
 0x1be   : > { %806 = vst.msk [vmem:[#allocation2] sm:$0xff] %vm805_vm1, %v797_v17  ;;  %v798_v22 = vmax.f32 %v790_v19, 0.0 }
 0x1bf   : > { %v718_v0 = vpop.f32.mrb[20].mxu0 }
 0x1c0   : > { %807 = vst.msk [vmem:[#allocation2 + $0x8] sm:$0xff] %vm805_vm1, %v798_v22  ;;  %v743_v24 = vadd.f32 %v718_v0, %v561_v4  ;;  %v720_v27 = vpop.f32.mrb[21].mxu0 }
 0x1c1   : > { %v721_v21 = vpop.f32.mrb[22].mxu0 }
 0x1c2   : > { %v791_v28 = vadd.f32 %v4452_v23, %v743_v24  ;;  %v744_v31 = vadd.f32 %v721_v21, %v564_v6  ;;  %v723_v58 = vpop.f32.mrb[23].mxu0 }
 0x1c4   : > { %v799_v26 = vmax.f32 %v791_v28, 0.0  ;;  %v792_v59 = vadd.f32 %v4455_v25, %v744_v31 }
 0x1c6   : > { %808 = vst.msk [vmem:[#allocation2 + $0x10] sm:$0xff] %vm805_vm1, %v799_v26  ;;  %v800_v60 = vmax.f32 %v792_v59, 0.0 }
 0x1c7   : > { %v726_v29 = vpop.f32.mrb[24].mxu0 }
 0x1c8   : > { %809 = vst.msk [vmem:[#allocation2 + $0x18] sm:$0xff] %vm805_vm1, %v800_v60  ;;  %v745_v62 = vadd.f32 %v726_v29, %v569_v9  ;;  %v728_v63 = vpop.f32.mrb[25].mxu0 }
 0x1c9   : > { %v729_v1 = vpop.f32.mrb[26].mxu0 }
 0x1ca   : > { %v793_v30 = vadd.f32 %v4460_v61, %v745_v62  ;;  %v746_v3 = vadd.f32 %v729_v1, %v572_v11  ;;  %v731_v4 = vpop.f32.mrb[27].mxu0 }
 0x1cc   : > { %v801_v32 = vmax.f32 %v793_v30, 0.0  ;;  %v794_v5 = vadd.f32 %v4463_v2, %v746_v3 }
 0x1ce   : > { %810 = vst.msk [vmem:[#allocation2 + $0x20] sm:$0xff] %vm805_vm1, %v801_v32  ;;  %v802_v6 = vmax.f32 %v794_v5, 0.0 }
 0x1cf   : > { %v734_v7 = vpop.f32.mrb[28].mxu0 }
 0x1d0   : > { %811 = vst.msk [vmem:[#allocation2 + $0x28] sm:$0xff] %vm805_vm1, %v802_v6  ;;  %v747_v9 = vadd.f32 %v734_v7, %v4425_v34  ;;  %v736_v33 = vpop.f32.mrb[29].mxu0 }
 0x1d1   : > { %v737_v12 = vpop.f32.mrb[30].mxu0  ;;  %v1314_v16 = vpop.f32.mrb[32].mxu1 }
 0x1d2   : > { %v795_v11 = vadd.f32 %v4468_v8, %v747_v9  ;;  %v748_v35 = vadd.f32 %v737_v12, %v4429_v38  ;;  %v739_v37 = vpop.f32.mrb[31].mxu0  ;;  %v1316_v39 = vpop.f32.mrb[33].mxu1 }
 0x1d3   : > { %v1317_v41 = vpop.f32.mrb[34].mxu1 }
 0x1d4   : > { %v803_v43 = vmax.f32 %v795_v11, 0.0  ;;  %v796_v45 = vadd.f32 %v4472_v10, %v748_v35  ;;  %v1319_v47 = vpop.f32.mrb[35].mxu1 }
 0x1d6   : > { %812 = vst.msk [vmem:[#allocation2 + $0x30] sm:$0xff] %vm805_vm1, %v803_v43  ;;  %v804_v49 = vmax.f32 %v796_v45, 0.0 }
 0x1d8   : > { %813 = vst.msk [vmem:[#allocation2 + $0x38] sm:$0xff] %vm805_vm1, %v804_v49 }
 0x1d9   : > { %v1322_v34 = vpop.f32.mrb[36].mxu1 }
 0x1da   : > { %v1324_v50 = vpop.f32.mrb[37].mxu1 }
 0x1db   : > { %v1325_v52 = vpop.f32.mrb[38].mxu1 }
 0x1dc   : > { %v1327_v53 = vpop.f32.mrb[39].mxu1 }
 0x1e1   : > { %v1330_v54 = vpop.f32.mrb[40].mxu1 }
 0x1e2   : > { %v1332_v55 = vpop.f32.mrb[41].mxu1 }
 0x1e3   : > { %v1333_v56 = vpop.f32.mrb[42].mxu1 }
 0x1e4   : > { %v1335_v38 = vpop.f32.mrb[43].mxu1 }
 0x1e7   : > { %v1157_v15 = vpop.f32.mrb[32].mxu0 }
 0x1e8   : > { %v1158_v18 = vadd.f32 %v1157_v15, %v4427_v36  ;;  %v1159_v17 = vpop.f32.mrb[33].mxu0 }
 0x1e9   : > { %v1160_v19 = vpop.f32.mrb[34].mxu0  ;;  %v1338_v20 = vpop.f32.mrb[44].mxu1 }
 0x1ea   : > { %v1345_v22 = vadd.f32 %v1314_v16, %v1158_v18  ;;  %v1161_v0 = vadd.f32 %v1160_v19, %v4431_v40  ;;  %v1162_v24 = vpop.f32.mrb[35].mxu0  ;;  %v1340_v27 = vpop.f32.mrb[45].mxu1 }
 0x1eb   : > { %v1341_v21 = vpop.f32.mrb[46].mxu1 }
 0x1ec   : > { %v1353_v28 = vadd.f32 %v1345_v22, %v4441_v51  ;;  %v1346_v31 = vadd.f32 %v1317_v41, %v1161_v0  ;;  %v1343_v58 = vpop.f32.mrb[47].mxu1 }
 0x1ee   : > { %v1361_v26 = vmax.f32 %v1353_v28, 0.0  ;;  %v1354_v59 = vadd.f32 %v1346_v31, %v4443_v13 }
 0x1ef   : > { %v1165_v60 = vpop.f32.mrb[36].mxu0 }
 0x1f0   : > { %1370 = vst.msk [vmem:[#allocation2 + $0x40] sm:$0xff] %vm805_vm1, %v1361_v26  ;;  %v1362_v36 = vmax.f32 %v1354_v59, 0.0  ;;  %v1166_v29 = vadd.f32 %v1165_v60, %v4433_v42  ;;  %v1167_v62 = vpop.f32.mrb[37].mxu0 }
 0x1f1   : > { %v1168_v63 = vpop.f32.mrb[38].mxu0 }
 0x1f2   : > { %1371 = vst.msk [vmem:[#allocation2 + $0x48] sm:$0xff] %vm805_vm1, %v1362_v36  ;;  %v1347_v40 = vadd.f32 %v1322_v34, %v1166_v29  ;;  %v1169_v1 = vadd.f32 %v1168_v63, %v4435_v44  ;;  %v1170_v30 = vpop.f32.mrb[39].mxu0 }
 0x1f4   : > { %v1355_v3 = vadd.f32 %v1347_v40, %v4452_v23  ;;  %v1348_v4 = vadd.f32 %v1325_v52, %v1169_v1 }
 0x1f6   : > { %v1363_v32 = vmax.f32 %v1355_v3, 0.0  ;;  %v1356_v5 = vadd.f32 %v1348_v4, %v4455_v25 }
 0x1f7   : > { %v1173_v6 = vpop.f32.mrb[40].mxu0 }
 0x1f8   : > { %1372 = vst.msk [vmem:[#allocation2 + $0x50] sm:$0xff] %vm805_vm1, %v1363_v32  ;;  %v1364_v7 = vmax.f32 %v1356_v5, 0.0  ;;  %v1174_v42 = vadd.f32 %v1173_v6, %v4437_v46  ;;  %v1175_v9 = vpop.f32.mrb[41].mxu0 }
 0x1f9   : > { %v1176_v33 = vpop.f32.mrb[42].mxu0 }
 0x1fa   : > { %1373 = vst.msk [vmem:[#allocation2 + $0x58] sm:$0xff] %vm805_vm1, %v1364_v7  ;;  %v1349_v12 = vadd.f32 %v1330_v54, %v1174_v42  ;;  %v1177_v44 = vadd.f32 %v1176_v33, %v4439_v48  ;;  %v1178_v16 = vpop.f32.mrb[43].mxu0 }
 0x1fc   : > { %v1357_v11 = vadd.f32 %v1349_v12, %v4460_v61  ;;  %v1350_v35 = vadd.f32 %v1333_v56, %v1177_v44 }
 0x1fe   : > { %v1365_v37 = vmax.f32 %v1357_v11, 0.0  ;;  %v1358_v39 = vadd.f32 %v1350_v35, %v4463_v2 }
 0x1ff   : > { %v1181_v41 = vpop.f32.mrb[44].mxu0 }
 0x200   : > { %1374 = vst.msk [vmem:[#allocation2 + $0x60] sm:$0xff] %vm805_vm1, %v1365_v37  ;;  %v1366_v43 = vmax.f32 %v1358_v39, 0.0  ;;  %v1182_v46 = vadd.f32 %v1181_v41, %v4445_v14  ;;  %v1183_v45 = vpop.f32.mrb[45].mxu0 }
 0x201   : > { %v1184_v47 = vpop.f32.mrb[46].mxu0 }
 0x202   : > { %1375 = vst.msk [vmem:[#allocation2 + $0x68] sm:$0xff] %vm805_vm1, %v1366_v43  ;;  %v1351_v49 = vadd.f32 %v1338_v20, %v1182_v46  ;;  %v1185_v48 = vadd.f32 %v1184_v47, %v4448_v57  ;;  %v1186_v34 = vpop.f32.mrb[47].mxu0 }
 0x204   : > { %v1359_v50 = vadd.f32 %v1351_v49, %v4468_v8  ;;  %v1352_v52 = vadd.f32 %v1341_v21, %v1185_v48 }
 0x206   : > { %v1367_v53 = vmax.f32 %v1359_v50, 0.0  ;;  %v1360_v54 = vadd.f32 %v1352_v52, %v4472_v10 }
 0x208   : > { %1376 = vst.msk [vmem:[#allocation2 + $0x70] sm:$0xff] %vm805_vm1, %v1367_v53  ;;  %v1368_v55 = vmax.f32 %v1360_v54, 0.0 }
 0x20a   : > { %1377 = vst.msk [vmem:[#allocation2 + $0x78] sm:$0xff] %vm805_vm1, %v1368_v55 }
 0x20b LB: >> { %v3999_v14 = vmov 0   ;;  %s4511_s22 = smul.u32 192, %s3994_s20  ;;  %s4000_s28 = smov 127   ;;  %v4564_v21 = vld [vmem:[%s5264_s1 + $0x44] ss:$8 sps:$4 sm:$0xff]   ;;  %vm3235_vm2 = vcmask 1046528   ;;  %s3994_s20 = sphi %s4503_s20, %s1383_s20  }
 0x20c   : >> { %1615 = vmatprep.subr.bf16.mxu0 %v3999_v14  ;;  %1740 = vmatprep.subr.bf16.mxu1 %v3999_v14  ;;  %s4001_s11 = smov 126   ;;  %v4570_v28 = vld [vmem:[%s5264_s1 + $0x4] ss:$8 sps:$4 sm:$0xff]   ;;  %v4587_v31 = vld [vmem:[%s5264_s1] ss:$8 sps:$4 sm:$0xff]   ;;  %vm3236_vm3 = vcmask 1047552  }
 0x20d   : >> { %s3780_s23 = sadd.s32 128, %s4511_s22  ;;  %s3782_s29 = sadd.s32 192, %s4511_s22  ;;  %3592 = vmatprep.mubr.msk.bf16.mxu0 %vm380_vm0, %v4564_v21  ;;  %3604 = vmatprep.mubr.msk.bf16.mxu1 %vm380_vm0, %v4570_v28  ;;  %v4622_v62 = vld [vmem:[%s5264_s1 + $0x14] ss:$8 sps:$4 sm:$0xff]   ;;  %v4627_v63 = vld [vmem:[%s5264_s1 + $0x10] ss:$8 sps:$4 sm:$0xff]  }
 0x20e   : >> { %s1427_s25 = sshra.s32 %s3780_s23, 3  ;;  %s2004_s30 = sshra.s32 %s3782_s29, 3  ;;  %v4655_v4 = vld [vmem:[%s5264_s1 + $0x24] ss:$8 sps:$4 sm:$0xff]   ;;  %v4660_v32 = vld [vmem:[%s5264_s1 + $0x20] ss:$8 sps:$4 sm:$0xff]  }
 0x20f   : >> { %s3563_s26 = sshll.u32 %s1427_s25, 2  ;;  %s3629_s5 = sshll.u32 %s2004_s30, 2  ;;  %v4685_v42 = vld [vmem:[%s5264_s1 + $0x34] ss:$8 sps:$4 sm:$0xff]   ;;  %v4690_v9 = vld [vmem:[%s5264_s1 + $0x30] ss:$8 sps:$4 sm:$0xff]  }
 0x210   : >> { %s4515_s27 = scalar_lea.vmem %s4043_s21, %s3563_s26  ;;  %s4535_s6 = scalar_lea.vmem %s4043_s21, %s3629_s5  ;;  %vm3350_vm4 = vcmask 117760  }
 0x211   : >> { %v3905_v57 = vld [vmem:[%s4515_s27] sm:$0xff]   ;;  %v3906_v56 = vld [vmem:[%s4515_s27 + $0x10] sm:$0xff]   ;;  %v3907_v38 = vld [vmem:[%s4515_s27 + $0x8] sm:$0xff]   ;;  %s3784_s7 = sadd.s32 256, %s4511_s22  ;;  %s3793_s26 = sshll.u32 %s3994_s20, 5 }
 0x212   : >> { %1567 = vrot.lane.b32.xlu0 %v3905_v57, %s4000_s28  ;;  %1741 = vmatpush1.bf16.msra.mxu1 %v3905_v57  ;;  %v3908_v15 = vld [vmem:[%s4515_s27 + $0x18] sm:$0xff]   ;;  %v3909_v18 = vld [vmem:[%s4515_s27 + $0x20] sm:$0xff]   ;;  %v3910_v17 = vld [vmem:[%s4515_s27 + $0x28] sm:$0xff]   ;;  %s2597_s8 = sshra.s32 %s3784_s7, 3  ;;  %s1383_s20 = sadd.s32 1, %s3994_s20  }
 0x213   : >> { %1571 = vrot.lane.b32.xlu1 %v3906_v56, %s4000_s28  ;;  %1742 = vmatprep.subr.bf16.mxu1 %v3999_v14  ;;  %v3911_v19 = vld [vmem:[%s4515_s27 + $0x30] sm:$0xff]   ;;  %v3912_v20 = vld [vmem:[%s4515_s27 + $0x38] sm:$0xff]   ;;  %v3913_v22 = vld [vmem:[%s4515_s27 + $0x40] sm:$0xff]   ;;  %s3695_s9 = sshll.u32 %s2597_s8, 2  ;;  %p1380_p4 = scmp.ge.s32.totalorder %s1383_s20, 21  }
 0x214   : >> { %v3914_v0 = vld [vmem:[%s4515_s27 + $0x48] sm:$0xff]   ;;  %v3915_v24 = vld [vmem:[%s4515_s27 + $0x50] sm:$0xff]   ;;  %v3916_v27 = vld [vmem:[%s4515_s27 + $0x58] sm:$0xff]   ;;  %s4553_s10 = scalar_lea.vmem %s4043_s21, %s3695_s9  ;;  %s3349_s27 = scalar_lea.vmem %s4048_s24, %s3793_s26 }
 0x215   : >> { %v4591_v58 = vld [vmem:[%s4535_s6] sm:$0xff]   ;;  %v4595_v26 = vld [vmem:[%s4535_s6 + $0x8] sm:$0xff]   ;;  %v4602_v59 = vld [vmem:[%s4535_s6 + $0x10] sm:$0xff]  }
 0x216   : >> { %1569 = vrot.lane.b32.xlu0 %v3907_v38, %s4000_s28  ;;  %1743 = vmatpush1.bf16.msra.mxu1 %v3907_v38  ;;  %v4607_v60 = vld [vmem:[%s4535_s6 + $0x18] sm:$0xff]   ;;  %v4612_v36 = vld [vmem:[%s4535_s6 + $0x20] sm:$0xff]   ;;  %v4617_v29 = vld [vmem:[%s4535_s6 + $0x28] sm:$0xff]  }
 0x217   : >> { %1573 = vrot.lane.b32.xlu1 %v3908_v15, %s4000_s28  ;;  %1744 = vmatprep.subr.bf16.mxu1 %v3999_v14  ;;  %v4632_v40 = vld [vmem:[%s4535_s6 + $0x30] sm:$0xff]   ;;  %v4639_v1 = vld [vmem:[%s4535_s6 + $0x38] sm:$0xff]   ;;  %v4645_v30 = vld [vmem:[%s4535_s6 + $0x40] sm:$0xff]  }
 0x218   : >> { %v4650_v3 = vld [vmem:[%s4535_s6 + $0x48] sm:$0xff]   ;;  %v4665_v5 = vld [vmem:[%s4535_s6 + $0x50] sm:$0xff]   ;;  %v4672_v6 = vld [vmem:[%s4535_s6 + $0x58] sm:$0xff]  }
 0x219   : >> { %v4680_v7 = vld [vmem:[%s4553_s10] sm:$0xff]   ;;  %v4699_v33 = vld [vmem:[%s4553_s10 + $0x8] sm:$0xff]   ;;  %v4709_v12 = vld [vmem:[%s4553_s10 + $0x10] sm:$0xff]  }
 0x21a   : >> { %1575 = vrot.lane.b32.xlu0 %v3909_v18, %s4000_s28  ;;  %1745 = vmatpush1.bf16.msra.mxu1 %v3906_v56  ;;  %v4716_v44 = vld [vmem:[%s4553_s10 + $0x18] sm:$0xff]   ;;  %v4723_v16 = vld [vmem:[%s4553_s10 + $0x20] sm:$0xff]   ;;  %v4730_v11 = vld [vmem:[%s4553_s10 + $0x28] sm:$0xff]  }
 0x21b   : >> { %1577 = vrot.lane.b32.xlu1 %v3910_v17, %s4000_s28  ;;  %1746 = vmatprep.subr.bf16.mxu1 %v3999_v14  ;;  %v4737_v35 = vld [vmem:[%s4553_s10 + $0x30] sm:$0xff]   ;;  %v4744_v37 = vld [vmem:[%s4553_s10 + $0x38] sm:$0xff]   ;;  %v4751_v39 = vld [vmem:[%s4553_s10 + $0x40] sm:$0xff]  }
 0x21c   : >> { %v4758_v41 = vld [vmem:[%s4553_s10 + $0x48] sm:$0xff]   ;;  %v4765_v43 = vld [vmem:[%s4553_s10 + $0x50] sm:$0xff]   ;;  %v4772_v46 = vld [vmem:[%s4553_s10 + $0x58] sm:$0xff]  }
 0x21e   : >> { %1579 = vrot.lane.b32.xlu0 %v3911_v19, %s4000_s28  ;;  %1747 = vmatpush1.bf16.msra.mxu1 %v3908_v15 }
 0x21f   : >> { %1581 = vrot.lane.b32.xlu1 %v3912_v20, %s4000_s28  ;;  %1748 = vmatprep.subr.bf16.mxu1 %v3999_v14 }
 0x222   : >> { %1583 = vrot.lane.b32.xlu0 %v3913_v22, %s4000_s28  ;;  %1749 = vmatpush1.bf16.msra.mxu1 %v3909_v18 }
 0x223   : >> { %1585 = vrot.lane.b32.xlu1 %v3914_v0, %s4000_s28  ;;  %1750 = vmatprep.subr.bf16.mxu1 %v3999_v14 }
 0x226   : >> { %1587 = vrot.lane.b32.xlu0 %v3915_v24, %s4000_s28  ;;  %1751 = vmatpush1.bf16.msra.mxu1 %v3910_v17 }
 0x227   : >> { %1589 = vrot.lane.b32.xlu1 %v3916_v27, %s4000_s28  ;;  %1752 = vmatprep.subr.bf16.mxu1 %v3999_v14 }
 0x22a   : >> { %1849 = vrot.lane.b32.xlu0 %v3905_v57, %s4001_s11  ;;  %1753 = vmatpush1.bf16.msra.mxu1 %v3911_v19 }
 0x22b   : >> { %1851 = vrot.lane.b32.xlu1 %v3907_v38, %s4001_s11  ;;  %1754 = vmatprep.subr.bf16.mxu1 %v3999_v14 }
 0x22e   : >> { %1853 = vrot.lane.b32.xlu0 %v3906_v56, %s4001_s11  ;;  %1755 = vmatpush1.bf16.msra.mxu1 %v3912_v20 }
 0x22f   : >> { %1855 = vrot.lane.b32.xlu1 %v3908_v15, %s4001_s11  ;;  %1756 = vmatprep.subr.bf16.mxu1 %v3999_v14 }
 0x232   : >> { %1857 = vrot.lane.b32.xlu0 %v3909_v18, %s4001_s11  ;;  %1757 = vmatpush1.bf16.msra.mxu1 %v3913_v22 }
 0x233   : >> { %1859 = vrot.lane.b32.xlu1 %v3910_v17, %s4001_s11  ;;  %1758 = vmatprep.subr.bf16.mxu1 %v3999_v14 }
 0x236   : >> { %1861 = vrot.lane.b32.xlu0 %v3911_v19, %s4001_s11  ;;  %1759 = vmatpush1.bf16.msra.mxu1 %v3914_v0 }
 0x237   : >> { %1863 = vrot.lane.b32.xlu1 %v3912_v20, %s4001_s11  ;;  %1760 = vmatprep.subr.bf16.mxu1 %v3999_v14 }
 0x23a   : >> { %1865 = vrot.lane.b32.xlu0 %v3913_v22, %s4001_s11  ;;  %1761 = vmatpush1.bf16.msra.mxu1 %v3915_v24 }
 0x23b   : >> { %1867 = vrot.lane.b32.xlu1 %v3914_v0, %s4001_s11  ;;  %1762 = vmatprep.subr.bf16.mxu1 %v3999_v14 }
 0x23e   : >> { %1869 = vrot.lane.b32.xlu0 %v3915_v24, %s4001_s11  ;;  %1763 = vmatpush1.bf16.msra.mxu1 %v3916_v27 }
 0x23f   : >> { %1871 = vrot.lane.b32.xlu1 %v3916_v27, %s4001_s11  ;;  %2192 = vmatprep.subr.bf16.mxu1 %v3999_v14 }
 0x241   : >> { %1773 = vmatmul.mubr.bf16.vlgmr.msra.gmra.mrb[0].mxu1 %v4587_v31 }
 0x242   : >> { %2144 = vrot.lane.b32.xlu0 %v4591_v58, %s4000_s28  ;;  %3605 = vmatprep.mubr.msk.bf16.mxu1 %vm380_vm0, %v4622_v62 }
 0x243   : >> { %2146 = vrot.lane.b32.xlu1 %v4595_v26, %s4000_s28 }
 0x246   : >> { %2148 = vrot.lane.b32.xlu0 %v4602_v59, %s4000_s28 }
 0x247   : >> { %2150 = vrot.lane.b32.xlu1 %v4607_v60, %s4000_s28 }
 0x249   : >> { %1781 = vmatmul.mubr.bf16.gmra.mrb[4].mxu1 %v4627_v63 }
 0x24a   : >> { %2152 = vrot.lane.b32.xlu0 %v4612_v36, %s4000_s28  ;;  %3606 = vmatprep.mubr.msk.bf16.mxu1 %vm380_vm0, %v4655_v4 }
 0x24b   : >> { %2154 = vrot.lane.b32.xlu1 %v4617_v29, %s4000_s28 }
 0x24e   : >> { %2156 = vrot.lane.b32.xlu0 %v4632_v40, %s4000_s28 }
 0x24f   : >> { %2158 = vrot.lane.b32.xlu1 %v4639_v1, %s4000_s28 }
 0x251   : >> { %1789 = vmatmul.mubr.bf16.gmra.mrb[8].mxu1 %v4660_v32 }
 0x252   : >> { %2160 = vrot.lane.b32.xlu0 %v4645_v30, %s4000_s28  ;;  %3607 = vmatprep.mubr.msk.bf16.mxu1 %vm380_vm0, %v4685_v42 }
 0x253   : >> { %2162 = vrot.lane.b32.xlu1 %v4650_v3, %s4000_s28 }
 0x256   : >> { %2164 = vrot.lane.b32.xlu0 %v4665_v5, %s4000_s28 }
 0x257   : >> { %2166 = vrot.lane.b32.xlu1 %v4672_v6, %s4000_s28 }
 0x259   : >> { %1797 = vmatmul.mubr.bf16.gmra.mrb[12].mxu1 %v4690_v9 }
 0x25a   : >> { %2426 = vrot.lane.b32.xlu0 %v4591_v58, %s4001_s11  ;;  %3658 = vmatprep.mubr.msk.bf16.mxu1 %vm380_vm0, %v4564_v21 }
 0x25b   : >> { %2737 = vrot.lane.b32.xlu1 %v4680_v7, %s4000_s28 }
 0x25e   : >> { %2428 = vrot.lane.b32.xlu0 %v4595_v26, %s4001_s11 }
 0x25f   : >> { %2739 = vrot.lane.b32.xlu1 %v4699_v33, %s4000_s28 }
 0x262   : >> { %2430 = vrot.lane.b32.xlu0 %v4602_v59, %s4001_s11 }
 0x263   : >> { %2741 = vrot.lane.b32.xlu1 %v4709_v12, %s4000_s28 }
 0x266   : >> { %2432 = vrot.lane.b32.xlu0 %v4607_v60, %s4001_s11 }
 0x267   : >> { %2743 = vrot.lane.b32.xlu1 %v4716_v44, %s4000_s28 }
 0x26a   : >> { %2434 = vrot.lane.b32.xlu0 %v4612_v36, %s4001_s11 }
 0x26b   : >> { %2745 = vrot.lane.b32.xlu1 %v4723_v16, %s4000_s28 }
 0x26e   : >> { %2436 = vrot.lane.b32.xlu0 %v4617_v29, %s4001_s11 }
 0x26f   : >> { %2747 = vrot.lane.b32.xlu1 %v4730_v11, %s4000_s28 }
 0x272   : >> { %2438 = vrot.lane.b32.xlu0 %v4632_v40, %s4001_s11 }
 0x273   : >> { %2749 = vrot.lane.b32.xlu1 %v4737_v35, %s4000_s28 }
 0x276   : >> { %2440 = vrot.lane.b32.xlu0 %v4639_v1, %s4001_s11 }
 0x277   : >> { %2751 = vrot.lane.b32.xlu1 %v4744_v37, %s4000_s28 }
 0x27a   : >> { %2442 = vrot.lane.b32.xlu0 %v4645_v30, %s4001_s11 }
 0x27b   : >> { %2753 = vrot.lane.b32.xlu1 %v4751_v39, %s4000_s28 }
 0x27e   : >> { %2444 = vrot.lane.b32.xlu0 %v4650_v3, %s4001_s11 }
 0x27f   : >> { %2755 = vrot.lane.b32.xlu1 %v4758_v41, %s4000_s28 }
 0x282   : >> { %2446 = vrot.lane.b32.xlu0 %v4665_v5, %s4001_s11 }
 0x283   : >> { %2757 = vrot.lane.b32.xlu1 %v4765_v43, %s4000_s28 }
 0x284   : >> { %v1568_v45 = vpop.permute.xlu0 %1567 }
 0x285   : >> { %1616 = vmatpush1.bf16.msra.mxu0 %v1568_v45  ;;  %v1572_v47 = vpop.permute.xlu1 %1571 }
 0x286   : >> { %1617 = vmatprep.subr.bf16.mxu0 %v3999_v14  ;;  %2448 = vrot.lane.b32.xlu0 %v4672_v6, %s4001_s11 }
 0x287   : >> { %2759 = vrot.lane.b32.xlu1 %v4772_v46, %s4000_s28 }
 0x288   : >> { %v1570_v49 = vpop.permute.xlu0 %1569 }
 0x289   : >> { %1618 = vmatpush1.bf16.msra.mxu0 %v1570_v49  ;;  %v1574_v48 = vpop.permute.xlu1 %1573 }
 0x28a   : >> { %1619 = vmatprep.subr.bf16.mxu0 %v3999_v14  ;;  %3019 = vrot.lane.b32.xlu0 %v4680_v7, %s4001_s11 }
 0x28b   : >> { %3021 = vrot.lane.b32.xlu1 %v4699_v33, %s4001_s11 }
 0x28c   : >> { %v1576_v34 = vpop.permute.xlu0 %1575 }
 0x28d   : >> { %1620 = vmatpush1.bf16.msra.mxu0 %v1572_v47  ;;  %v1578_v50 = vpop.permute.xlu1 %1577  ;;  %v4824_v47 = vld [vmem:[%s5264_s1 + $0x40] ss:$8 sps:$4 sm:$0xff]  }
 0x28e   : >> { %1621 = vmatprep.subr.bf16.mxu0 %v3999_v14  ;;  %3023 = vrot.lane.b32.xlu0 %v4709_v12, %s4001_s11 }
 0x28f   : >> { %3025 = vrot.lane.b32.xlu1 %v4716_v44, %s4001_s11 }
 0x290   : >> { %v1580_v52 = vpop.permute.xlu0 %1579 }
 0x291   : >> { %1622 = vmatpush1.bf16.msra.mxu0 %v1574_v48  ;;  %v1582_v53 = vpop.permute.xlu1 %1581  ;;  %v4832_v48 = vld [vmem:[%s5264_s1 + $0x54] ss:$8 sps:$4 sm:$0xff]  }
 0x292   : >> { %1623 = vmatprep.subr.bf16.mxu0 %v3999_v14  ;;  %3027 = vrot.lane.b32.xlu0 %v4723_v16, %s4001_s11 }
 0x293   : >> { %3029 = vrot.lane.b32.xlu1 %v4730_v11, %s4001_s11 }
 0x294   : >> { %v1584_v54 = vpop.permute.xlu0 %1583 }
 0x295   : >> { %1624 = vmatpush1.bf16.msra.mxu0 %v1576_v34  ;;  %v1586_v55 = vpop.permute.xlu1 %1585 }
 0x296   : >> { %1625 = vmatprep.subr.bf16.mxu0 %v3999_v14  ;;  %3031 = vrot.lane.b32.xlu0 %v4737_v35, %s4001_s11 }
 0x297   : >> { %3033 = vrot.lane.b32.xlu1 %v4744_v37, %s4001_s11 }
 0x298   : >> { %v1588_v57 = vpop.permute.xlu0 %1587 }
 0x299   : >> { %1626 = vmatpush1.bf16.msra.mxu0 %v1578_v50  ;;  %v1590_v56 = vpop.permute.xlu1 %1589 }
 0x29a   : >> { %1627 = vmatprep.subr.bf16.mxu0 %v3999_v14  ;;  %3035 = vrot.lane.b32.xlu0 %v4751_v39, %s4001_s11 }
 0x29b   : >> { %3037 = vrot.lane.b32.xlu1 %v4758_v41, %s4001_s11 }
 0x29c   : >> { %v1850_v38 = vpop.permute.xlu0 %1849 }
 0x29d   : >> { %1628 = vmatpush1.bf16.msra.mxu0 %v1580_v52  ;;  %v1852_v15 = vpop.permute.xlu1 %1851 }
 0x29e   : >> { %1629 = vmatprep.subr.bf16.mxu0 %v3999_v14  ;;  %3039 = vrot.lane.b32.xlu0 %v4765_v43, %s4001_s11 }
 0x29f   : >> { %3041 = vrot.lane.b32.xlu1 %v4772_v46, %s4001_s11 }
 0x2a0   : >> { %v1854_v18 = vpop.permute.xlu0 %1853 }
 0x2a1   : >> { %1630 = vmatpush1.bf16.msra.mxu0 %v1582_v53  ;;  %v1856_v17 = vpop.permute.xlu1 %1855  ;;  %v4842_v53 = vld [vmem:[%s5264_s1 + $0x50] ss:$8 sps:$4 sm:$0xff]  }
 0x2a2   : >> { %1631 = vmatprep.subr.bf16.mxu0 %v3999_v14 }
 0x2a4   : >> { %v1858_v19 = vpop.permute.xlu0 %1857 }
 0x2a5   : >> { %1632 = vmatpush1.bf16.msra.mxu0 %v1584_v54  ;;  %v1860_v20 = vpop.permute.xlu1 %1859  ;;  %v4849_v54 = vld [vmem:[%s5264_s1 + $0x64] ss:$8 sps:$4 sm:$0xff]  }
 0x2a6   : >> { %1633 = vmatprep.subr.bf16.mxu0 %v3999_v14 }
 0x2a8   : >> { %v1862_v22 = vpop.permute.xlu0 %1861 }
 0x2a9   : >> { %1634 = vmatpush1.bf16.msra.mxu0 %v1586_v55  ;;  %v4811_v0 = vpop.permute.xlu1 %1863 }
 0x2aa   : >> { %1635 = vmatprep.subr.bf16.mxu0 %v3999_v14 }
 0x2ac   : >> { %v4814_v24 = vpop.permute.xlu0 %1865 }
 0x2ad   : >> { %1636 = vmatpush1.bf16.msra.mxu0 %v1588_v57  ;;  %v4816_v27 = vpop.permute.xlu1 %1867 }
 0x2ae   : >> { %1637 = vmatprep.subr.bf16.mxu0 %v3999_v14 }
 0x2b0   : >> { %v4819_v45 = vpop.permute.xlu0 %1869 }
 0x2b1   : >> { %1638 = vmatpush1.bf16.msra.mxu0 %v1590_v56  ;;  %v4826_v49 = vpop.permute.xlu1 %1871 }
 0x2b2   : >> { %1897 = vmatprep.subr.bf16.mxu0 %v3999_v14 }
 0x2b4   : >> { %1648 = vmatmul.mubr.bf16.vlgmr.msra.gmra.mrb[0].mxu0 %v4824_v47  ;;  %v2145_v34 = vpop.permute.xlu0 %2144 }
 0x2b5   : >> { %1898 = vmatpush1.bf16.msra.mxu0 %v1850_v38  ;;  %2193 = vmatpush1.bf16.msra.mxu1 %v2145_v34  ;;  %v2147_v50 = vpop.permute.xlu1 %2146  ;;  %v4859_v38 = vld [vmem:[%s5264_s1 + $0x60] ss:$8 sps:$4 sm:$0xff]  }
 0x2b6   : >> { %1899 = vmatprep.subr.bf16.mxu0 %v3999_v14  ;;  %2194 = vmatprep.subr.bf16.mxu1 %v3999_v14 }
 0x2b7   : >> { %3593 = vmatprep.mubr.msk.bf16.mxu0 %vm380_vm0, %v4832_v48 }
 0x2b8   : >> { %v2149_v52 = vpop.permute.xlu0 %2148 }
 0x2b9   : >> { %1900 = vmatpush1.bf16.msra.mxu0 %v1852_v15  ;;  %2195 = vmatpush1.bf16.msra.mxu1 %v2147_v50  ;;  %v2151_v57 = vpop.permute.xlu1 %2150  ;;  %v4866_v15 = vld [vmem:[%s5264_s1 + $0x74] ss:$8 sps:$4 sm:$0xff]  }
 0x2ba   : >> { %1901 = vmatprep.subr.bf16.mxu0 %v3999_v14  ;;  %2196 = vmatprep.subr.bf16.mxu1 %v3999_v14 }
 0x2bc   : >> { %v2153_v55 = vpop.permute.xlu0 %2152  ;;  %1656 = vmatmul.mubr.bf16.gmra.mrb[4].mxu0 %v4842_v53 }
 0x2bd   : >> { %1902 = vmatpush1.bf16.msra.mxu0 %v1854_v18  ;;  %2197 = vmatpush1.bf16.msra.mxu1 %v2149_v52  ;;  %v2155_v34 = vpop.permute.xlu1 %2154 }
 0x2be   : >> { %1903 = vmatprep.subr.bf16.mxu0 %v3999_v14  ;;  %2198 = vmatprep.subr.bf16.mxu1 %v3999_v14 }
 0x2bf   : >> { %3594 = vmatprep.mubr.msk.bf16.mxu0 %vm380_vm0, %v4849_v54 }
 0x2c0   : >> { %v2157_v56 = vpop.permute.xlu0 %2156 }
 0x2c1   : >> { %1904 = vmatpush1.bf16.msra.mxu0 %v1856_v17  ;;  %2199 = vmatpush1.bf16.msra.mxu1 %v2151_v57  ;;  %v4876_v17 = vld [vmem:[%s5264_s1 + $0x70] ss:$8 sps:$4 sm:$0xff]  }
 0x2c2   : >> { %1905 = vmatprep.subr.bf16.mxu0 %v3999_v14  ;;  %2200 = vmatprep.subr.bf16.mxu1 %v3999_v14 }
 0x2c4   : >> { %1664 = vmatmul.mubr.bf16.gmra.mrb[8].mxu0 %v4859_v38  ;;  %v2161_v18 = vpop.permute.xlu0 %2160 }
 0x2c5   : >> { %1906 = vmatpush1.bf16.msra.mxu0 %v1858_v19  ;;  %2201 = vmatpush1.bf16.msra.mxu1 %v2153_v55  ;;  %v4883_v19 = vld [vmem:[%s5264_s1 + $0x84] ss:$8 sps:$4 sm:$0xff]   ;;  %v2159_v55 = vpop.permute.xlu1 %2158 }
 0x2c6   : >> { %1907 = vmatprep.subr.bf16.mxu0 %v3999_v14  ;;  %2202 = vmatprep.subr.bf16.mxu1 %v3999_v14 }
 0x2c7   : >> { %3595 = vmatprep.mubr.msk.bf16.mxu0 %vm380_vm0, %v4866_v15 }
 0x2c8   : >> { %v2165_v50 = vpop.permute.xlu0 %2164 }
 0x2c9   : >> { %1908 = vmatpush1.bf16.msra.mxu0 %v1860_v20  ;;  %2203 = vmatpush1.bf16.msra.mxu1 %v2155_v34 }
 0x2ca   : >> { %1909 = vmatprep.subr.bf16.mxu0 %v3999_v14  ;;  %2204 = vmatprep.subr.bf16.mxu1 %v3999_v14 }
 0x2cc   : >> { %1672 = vmatmul.mubr.bf16.gmra.mrb[12].mxu0 %v4876_v17  ;;  %v2427_v52 = vpop.permute.xlu0 %2426 }
 0x2cd   : >> { %1910 = vmatpush1.bf16.msra.mxu0 %v1862_v22  ;;  %2205 = vmatpush1.bf16.msra.mxu1 %v2157_v56  ;;  %v2163_v22 = vpop.permute.xlu1 %2162  ;;  %v4905_v56 = vld [vmem:[%s5264_s1 + $0x80] ss:$8 sps:$4 sm:$0xff]  }
 0x2ce   : >> { %1911 = vmatprep.subr.bf16.mxu0 %v3999_v14  ;;  %2206 = vmatprep.subr.bf16.mxu1 %v3999_v14 }
 0x2cf   : >> { %3624 = vmatprep.mubr.msk.bf16.mxu0 %vm380_vm0, %v4883_v19 }
 0x2d0   : >> { %v2429_v20 = vpop.permute.xlu0 %2428 }
 0x2d1   : >> { %1912 = vmatpush1.bf16.msra.mxu0 %v4811_v0  ;;  %2207 = vmatpush1.bf16.msra.mxu1 %v2159_v55  ;;  %v2167_v0 = vpop.permute.xlu1 %2166 }
 0x2d2   : >> { %1913 = vmatprep.subr.bf16.mxu0 %v3999_v14  ;;  %2208 = vmatprep.subr.bf16.mxu1 %v3999_v14 }
 0x2d4   : >> { %v2431_v57 = vpop.permute.xlu0 %2430 }
 0x2d5   : >> { %1914 = vmatpush1.bf16.msra.mxu0 %v4814_v24  ;;  %2209 = vmatpush1.bf16.msra.mxu1 %v2161_v18  ;;  %v4935_v18 = vld [vmem:[%s5264_s1 + $0xa4] ss:$8 sps:$4 sm:$0xff]  }
 0x2d6   : >> { %1915 = vmatprep.subr.bf16.mxu0 %v3999_v14  ;;  %2210 = vmatprep.subr.bf16.mxu1 %v3999_v14 }
 0x2d8   : >> { %v2433_v24 = vpop.permute.xlu0 %2432 }
 0x2d9   : >> { %1916 = vmatpush1.bf16.msra.mxu0 %v4816_v27  ;;  %2211 = vmatpush1.bf16.msra.mxu1 %v2163_v22  ;;  %v4913_v27 = vld [vmem:[%s5264_s1 + $0x94] ss:$8 sps:$4 sm:$0xff]  }
 0x2da   : >> { %1917 = vmatprep.subr.bf16.mxu0 %v3999_v14  ;;  %2212 = vmatprep.subr.bf16.mxu1 %v3999_v14 }
 0x2dd   : >> { %1918 = vmatpush1.bf16.msra.mxu0 %v4819_v45  ;;  %2213 = vmatpush1.bf16.msra.mxu1 %v2165_v50  ;;  %v2435_v45 = vpop.permute.xlu0 %2434  ;;  %v4971_v50 = vld [vmem:[%s5264_s1 + $0xb0] ss:$8 sps:$4 sm:$0xff]  }
 0x2de   : >> { %1919 = vmatprep.subr.bf16.mxu0 %v3999_v14  ;;  %2214 = vmatprep.subr.bf16.mxu1 %v3999_v14 }
 0x2e1   : >> { %1920 = vmatpush1.bf16.msra.mxu0 %v4826_v49  ;;  %2215 = vmatpush1.bf16.msra.mxu1 %v2167_v0  ;;  %v4927_v49 = vld [vmem:[%s5264_s1 + $0x90] ss:$8 sps:$4 sm:$0xff]  }
 0x2e2   : >> { %2317 = vmatprep.subr.bf16.mxu0 %v3999_v14  ;;  %2474 = vmatprep.subr.bf16.mxu1 %v3999_v14 }
 0x2e4   : >> { %1930 = vmatmul.mubr.bf16.vlgmr.msra.gmra.mrb[16].mxu0 %v4905_v56  ;;  %2225 = vmatmul.mubr.bf16.vlgmr.msra.gmra.mrb[16].mxu1 %v4824_v47 }
 0x2e5   : >> { %2318 = vmatpush1.bf16.msra.mxu0 %v4591_v58  ;;  %2475 = vmatpush1.bf16.msra.mxu1 %v2427_v52  ;;  %v2437_v58 = vpop.permute.xlu0 %2436  ;;  %v2738_v52 = vpop.permute.xlu1 %2737 }
 0x2e6   : >> { %2319 = vmatprep.subr.bf16.mxu0 %v3999_v14  ;;  %2476 = vmatprep.subr.bf16.mxu1 %v3999_v14 }
 0x2e7   : >> { %3625 = vmatprep.mubr.msk.bf16.mxu0 %vm380_vm0, %v4913_v27  ;;  %3659 = vmatprep.mubr.msk.bf16.mxu1 %vm380_vm0, %v4832_v48 }
 0x2e9   : >> { %2320 = vmatpush1.bf16.msra.mxu0 %v4595_v26  ;;  %2477 = vmatpush1.bf16.msra.mxu1 %v2429_v20  ;;  %v4949_v26 = vld [vmem:[%s5264_s1 + $0xa0] ss:$8 sps:$4 sm:$0xff]   ;;  %v2439_v34 = vpop.permute.xlu0 %2438 }
 0x2ea   : >> { %2321 = vmatprep.subr.bf16.mxu0 %v3999_v14  ;;  %2478 = vmatprep.subr.bf16.mxu1 %v3999_v14 }
 0x2ec   : >> { %1938 = vmatmul.mubr.bf16.gmra.mrb[20].mxu0 %v4927_v49  ;;  %2233 = vmatmul.mubr.bf16.gmra.mrb[20].mxu1 %v4842_v53 }
 0x2ed   : >> { %2322 = vmatpush1.bf16.msra.mxu0 %v4602_v59  ;;  %2479 = vmatpush1.bf16.msra.mxu1 %v2431_v57  ;;  %v4957_v59 = vld [vmem:[%s5264_s1 + $0xb4] ss:$8 sps:$4 sm:$0xff]  }
 0x2ee   : >> { %2323 = vmatprep.subr.bf16.mxu0 %v3999_v14  ;;  %2480 = vmatprep.subr.bf16.mxu1 %v3999_v14 }
 0x2ef   : >> { %3626 = vmatprep.mubr.msk.bf16.mxu0 %vm380_vm0, %v4935_v18  ;;  %3660 = vmatprep.mubr.msk.bf16.mxu1 %vm380_vm0, %v4849_v54 }
 0x2f1   : >> { %2324 = vmatpush1.bf16.msra.mxu0 %v4607_v60  ;;  %2481 = vmatpush1.bf16.msra.mxu1 %v2433_v24  ;;  %v2441_v60 = vpop.permute.xlu0 %2440 }
 0x2f2   : >> { %2325 = vmatprep.subr.bf16.mxu0 %v3999_v14  ;;  %2482 = vmatprep.subr.bf16.mxu1 %v3999_v14 }
 0x2f4   : >> { %1946 = vmatmul.mubr.bf16.gmra.mrb[24].mxu0 %v4949_v26  ;;  %2241 = vmatmul.mubr.bf16.gmra.mrb[24].mxu1 %v4859_v38 }
 0x2f5   : >> { %2326 = vmatpush1.bf16.msra.mxu0 %v4612_v36  ;;  %2483 = vmatpush1.bf16.msra.mxu1 %v2435_v45  ;;  %v2443_v36 = vpop.permute.xlu0 %2442 }
 0x2f6   : >> { %2327 = vmatprep.subr.bf16.mxu0 %v3999_v14  ;;  %2484 = vmatprep.subr.bf16.mxu1 %v3999_v14 }
 0x2f7   : >> { %3627 = vmatprep.mubr.msk.bf16.mxu0 %vm380_vm0, %v4957_v59  ;;  %3661 = vmatprep.mubr.msk.bf16.mxu1 %vm380_vm0, %v4866_v15 }
 0x2f9   : >> { %2328 = vmatpush1.bf16.msra.mxu0 %v4617_v29  ;;  %2485 = vmatpush1.bf16.msra.mxu1 %v2437_v58  ;;  %v2445_v29 = vpop.permute.xlu0 %2444  ;;  %v1385_v58 = vld [vmem:[#allocation2] sm:$0xff] }
 0x2fa   : >> { %2329 = vmatprep.subr.bf16.mxu0 %v3999_v14  ;;  %2486 = vmatprep.subr.bf16.mxu1 %v3999_v14 }
 0x2fc   : >> { %1954 = vmatmul.mubr.bf16.gmra.mrb[28].mxu0 %v4971_v50  ;;  %2249 = vmatmul.mubr.bf16.gmra.mrb[28].mxu1 %v4876_v17 }
 0x2fd   : >> { %2330 = vmatpush1.bf16.msra.mxu0 %v4632_v40  ;;  %2487 = vmatpush1.bf16.msra.mxu1 %v2439_v34  ;;  %v2740_v40 = vpop.permute.xlu1 %2739  ;;  %v2447_v55 = vpop.permute.xlu0 %2446  ;;  %v1393_v34 = vld [vmem:[#allocation2 + $0x40] sm:$0xff] }
 0x2fe   : >> { %2331 = vmatprep.subr.bf16.mxu0 %v3999_v14  ;;  %2488 = vmatprep.subr.bf16.mxu1 %v3999_v14 }
 0x2ff   : >> { %3670 = vmatprep.mubr.msk.bf16.mxu0 %vm380_vm0, %v4570_v28  ;;  %3690 = vmatprep.mubr.msk.bf16.mxu1 %vm380_vm0, %v4883_v19 }
 0x301   : >> { %2332 = vmatpush1.bf16.msra.mxu0 %v4639_v1  ;;  %2489 = vmatpush1.bf16.msra.mxu1 %v2441_v60  ;;  %v2742_v20 = vpop.permute.xlu1 %2741  ;;  %v2449_v1 = vpop.permute.xlu0 %2448  ;;  %v1401_v60 = vadd.f32 %v1393_v34, %v1385_v58  ;;  %v1390_v34 = vld [vmem:[#allocation2 + $0x28] sm:$0xff] }
 0x302   : >> { %2333 = vmatprep.subr.bf16.mxu0 %v3999_v14  ;;  %2490 = vmatprep.subr.bf16.mxu1 %v3999_v14 }
 0x303   : >> { %1409 = vst.msk [vmem:[#allocation3] sm:$0xff] %vm805_vm1, %v1401_v60  ;;  %v1398_v60 = vld [vmem:[#allocation2 + $0x68] sm:$0xff] }
 0x305   : >> { %2334 = vmatpush1.bf16.msra.mxu0 %v4645_v30  ;;  %2491 = vmatpush1.bf16.msra.mxu1 %v2443_v36  ;;  %v2744_v30 = vpop.permute.xlu1 %2743 }
 0x306   : >> { %2335 = vmatprep.subr.bf16.mxu0 %v3999_v14  ;;  %2492 = vmatprep.subr.bf16.mxu1 %v3999_v14 }
 0x309   : >> { %2336 = vmatpush1.bf16.msra.mxu0 %v4650_v3  ;;  %2493 = vmatpush1.bf16.msra.mxu1 %v2445_v29  ;;  %v2746_v3 = vpop.permute.xlu1 %2745 }
 0x30a   : >> { %2337 = vmatprep.subr.bf16.mxu0 %v3999_v14  ;;  %2494 = vmatprep.subr.bf16.mxu1 %v3999_v14 }
 0x30d   : >> { %2338 = vmatpush1.bf16.msra.mxu0 %v4665_v5  ;;  %2495 = vmatpush1.bf16.msra.mxu1 %v2447_v55 }
 0x30e   : >> { %2339 = vmatprep.subr.bf16.mxu0 %v3999_v14  ;;  %2496 = vmatprep.subr.bf16.mxu1 %v3999_v14 }
 0x311   : >> { %2340 = vmatpush1.bf16.msra.mxu0 %v4672_v6  ;;  %2497 = vmatpush1.bf16.msra.mxu1 %v2449_v1 }
 0x312   : >> { %2785 = vmatprep.subr.bf16.mxu0 %v3999_v14  ;;  %2910 = vmatprep.subr.bf16.mxu1 %v3999_v14 }
 0x314   : >> { %2350 = vmatmul.mubr.bf16.vlgmr.msra.gmra.mrb[32].mxu0 %v4587_v31  ;;  %2507 = vmatmul.mubr.bf16.vlgmr.msra.gmra.mrb[32].mxu1 %v4905_v56  ;;  %v5002_v5 = vpop.f32.mrb[0].mxu1 }
 0x315   : >> { %2786 = vmatpush1.bf16.msra.mxu0 %v2738_v52  ;;  %2911 = vmatpush1.bf16.msra.mxu1 %v4680_v7  ;;  %v1776_v22 = vpop.f32.mrb[1].mxu1  ;;  %v2748_v7 = vpop.permute.xlu1 %2747 }
 0x316   : >> { %2787 = vmatprep.subr.bf16.mxu0 %v3999_v14  ;;  %2912 = vmatprep.subr.bf16.mxu1 %v3999_v14  ;;  %v5007_v6 = vpop.f32.mrb[2].mxu1  ;;  %v1395_v22 = vld [vmem:[#allocation2 + $0x50] sm:$0xff] }
 0x317   : >> { %3671 = vmatprep.mubr.msk.bf16.mxu0 %vm380_vm0, %v4622_v62  ;;  %3691 = vmatprep.mubr.msk.bf16.mxu1 %vm380_vm0, %v4913_v27  ;;  %v1779_v57 = vpop.f32.mrb[3].mxu1 }
 0x318   : >> { %v1388_v57 = vld [vmem:[#allocation2 + $0x18] sm:$0xff] }
 0x319   : >> { %2788 = vmatpush1.bf16.msra.mxu0 %v2740_v40  ;;  %2913 = vmatpush1.bf16.msra.mxu1 %v4699_v33  ;;  %v2750_v24 = vpop.permute.xlu1 %2749 }
 0x31a   : >> { %2789 = vmatprep.subr.bf16.mxu0 %v3999_v14  ;;  %2914 = vmatprep.subr.bf16.mxu1 %v3999_v14 }
 0x31c   : >> { %2358 = vmatmul.mubr.bf16.gmra.mrb[36].mxu0 %v4627_v63  ;;  %2515 = vmatmul.mubr.bf16.gmra.mrb[36].mxu1 %v4927_v49  ;;  %v5021_v0 = vpop.f32.mrb[4].mxu1 }
 0x31d   : >> { %2790 = vmatpush1.bf16.msra.mxu0 %v2742_v20  ;;  %2915 = vmatpush1.bf16.msra.mxu1 %v4709_v12  ;;  %v1784_v33 = vpop.f32.mrb[5].mxu1 }
 0x31e   : >> { %2791 = vmatprep.subr.bf16.mxu0 %v3999_v14  ;;  %2916 = vmatprep.subr.bf16.mxu1 %v3999_v14  ;;  %v5027_v45 = vpop.f32.mrb[6].mxu1 }
 0x31f   : >> { %3672 = vmatprep.mubr.msk.bf16.mxu0 %vm380_vm0, %v4655_v4  ;;  %3692 = vmatprep.mubr.msk.bf16.mxu1 %vm380_vm0, %v4935_v18  ;;  %v1787_v12 = vpop.f32.mrb[7].mxu1 }
 0x320   : >> { %v1389_v12 = vld [vmem:[#allocation2 + $0x20] sm:$0xff] }
 0x321   : >> { %2792 = vmatpush1.bf16.msra.mxu0 %v2744_v30  ;;  %2917 = vmatpush1.bf16.msra.mxu1 %v4716_v44  ;;  %v2752_v44 = vpop.permute.xlu1 %2751  ;;  %v1386_v30 = vld [vmem:[#allocation2 + $0x8] sm:$0xff] }
 0x322   : >> { %2793 = vmatprep.subr.bf16.mxu0 %v3999_v14  ;;  %2918 = vmatprep.subr.bf16.mxu1 %v3999_v14 }
 0x324   : >> { %2366 = vmatmul.mubr.bf16.gmra.mrb[40].mxu0 %v4660_v32  ;;  %2523 = vmatmul.mubr.bf16.gmra.mrb[40].mxu1 %v4949_v26  ;;  %v5038_v36 = vpop.f32.mrb[8].mxu1 }
 0x325   : >> { %2794 = vmatpush1.bf16.msra.mxu0 %v2746_v3  ;;  %2919 = vmatpush1.bf16.msra.mxu1 %v4723_v16  ;;  %v1792_v52 = vpop.f32.mrb[9].mxu1  ;;  %v2754_v40 = vpop.permute.xlu1 %2753 }
 0x326   : >> { %2795 = vmatprep.subr.bf16.mxu0 %v3999_v14  ;;  %2920 = vmatprep.subr.bf16.mxu1 %v3999_v14  ;;  %v5044_v29 = vpop.f32.mrb[10].mxu1  ;;  %v1399_v52 = vld [vmem:[#allocation2 + $0x70] sm:$0xff] }
 0x327   : >> { %3673 = vmatprep.mubr.msk.bf16.mxu0 %vm380_vm0, %v4685_v42  ;;  %3693 = vmatprep.mubr.msk.bf16.mxu1 %vm380_vm0, %v4957_v59  ;;  %v1795_v16 = vpop.f32.mrb[11].mxu1 }
 0x328   : >> { %v1400_v16 = vld [vmem:[#allocation2 + $0x78] sm:$0xff] }
 0x329   : >> { %2796 = vmatpush1.bf16.msra.mxu0 %v2748_v7  ;;  %2921 = vmatpush1.bf16.msra.mxu1 %v4730_v11  ;;  %v1396_v7 = vld [vmem:[#allocation2 + $0x58] sm:$0xff] }
 0x32a   : >> { %2797 = vmatprep.subr.bf16.mxu0 %v3999_v14  ;;  %2922 = vmatprep.subr.bf16.mxu1 %v3999_v14 }
 0x32c   : >> { %2374 = vmatmul.mubr.bf16.gmra.mrb[44].mxu0 %v4690_v9  ;;  %2531 = vmatmul.mubr.bf16.gmra.mrb[44].mxu1 %v4971_v50  ;;  %v5054_v55 = vpop.f32.mrb[12].mxu1 }
 0x32d   : >> { %2798 = vmatpush1.bf16.msra.mxu0 %v2750_v24  ;;  %2923 = vmatpush1.bf16.msra.mxu1 %v4737_v35  ;;  %v1800_v11 = vpop.f32.mrb[13].mxu1  ;;  %v2756_v35 = vpop.permute.xlu1 %2755 }
 0x32e   : >> { %2799 = vmatprep.subr.bf16.mxu0 %v3999_v14  ;;  %2924 = vmatprep.subr.bf16.mxu1 %v3999_v14  ;;  %v5060_v20 = vpop.f32.mrb[14].mxu1  ;;  %v3020_v24 = vpop.permute.xlu0 %3019 }
 0x32f   : >> { %3724 = vmatprep.mubr.msk.bf16.mxu0 %vm380_vm0, %v4564_v21  ;;  %3736 = vmatprep.mubr.msk.bf16.mxu1 %vm380_vm0, %v4570_v28  ;;  %v1803_v1 = vpop.f32.mrb[15].mxu1  ;;  %v1394_v21 = vld [vmem:[#allocation2 + $0x48] sm:$0xff] }
 0x330   : >> { %v1402_v28 = vadd.f32 %v1394_v21, %v1386_v30 }
 0x331   : >> { %2800 = vmatpush1.bf16.msra.mxu0 %v2752_v44  ;;  %2925 = vmatpush1.bf16.msra.mxu1 %v4744_v37  ;;  %v2758_v3 = vpop.permute.xlu1 %2757  ;;  %v1387_v37 = vld [vmem:[#allocation2 + $0x10] sm:$0xff] }
 0x332   : >> { %2801 = vmatprep.subr.bf16.mxu0 %v3999_v14  ;;  %2926 = vmatprep.subr.bf16.mxu1 %v3999_v14  ;;  %1410 = vst.msk [vmem:[#allocation3 + $0x8] sm:$0xff] %vm805_vm1, %v1402_v28 }
 0x335   : >> { %2802 = vmatpush1.bf16.msra.mxu0 %v2754_v40  ;;  %2927 = vmatpush1.bf16.msra.mxu1 %v4751_v39  ;;  %v1403_v39 = vadd.f32 %v1395_v22, %v1387_v37  ;;  %v2760_v33 = vpop.permute.xlu1 %2759 }
 0x336   : >> { %2803 = vmatprep.subr.bf16.mxu0 %v3999_v14  ;;  %2928 = vmatprep.subr.bf16.mxu1 %v3999_v14 }
 0x337   : >> { %1411 = vst.msk [vmem:[#allocation3 + $0x10] sm:$0xff] %vm805_vm1, %v1403_v39 }
 0x339   : >> { %2804 = vmatpush1.bf16.msra.mxu0 %v2756_v35  ;;  %2929 = vmatpush1.bf16.msra.mxu1 %v4758_v41  ;;  %v1404_v41 = vadd.f32 %v1396_v7, %v1388_v57  ;;  %v3022_v44 = vpop.permute.xlu1 %3021 }
 0x33a   : >> { %2805 = vmatprep.subr.bf16.mxu0 %v3999_v14  ;;  %2930 = vmatprep.subr.bf16.mxu1 %v3999_v14 }
 0x33b   : >> { %1412 = vst.msk [vmem:[#allocation3 + $0x18] sm:$0xff] %vm805_vm1, %v1404_v41 }
 0x33d   : >> { %2806 = vmatpush1.bf16.msra.mxu0 %v2758_v3  ;;  %2931 = vmatpush1.bf16.msra.mxu1 %v4765_v43  ;;  %v1397_v43 = vld [vmem:[#allocation2 + $0x60] sm:$0xff]  ;;  %v3026_v40 = vpop.permute.xlu1 %3025 }
 0x33e   : >> { %2807 = vmatprep.subr.bf16.mxu0 %v3999_v14  ;;  %2932 = vmatprep.subr.bf16.mxu1 %v3999_v14  ;;  %v1405_v58 = vadd.f32 %v1397_v43, %v1389_v12 }
 0x340   : >> { %1413 = vst.msk [vmem:[#allocation3 + $0x20] sm:$0xff] %vm805_vm1, %v1405_v58 }
 0x341   : >> { %2808 = vmatpush1.bf16.msra.mxu0 %v2760_v33  ;;  %2933 = vmatpush1.bf16.msra.mxu1 %v4772_v46  ;;  %v1406_v46 = vadd.f32 %v1398_v60, %v1390_v34  ;;  %v1417_v34 = vld [vmem:[#allocation3] sm:$0xff] }
 0x342   : >> { %3067 = vmatprep.subr.bf16.mxu0 %v3999_v14 }
 0x343   : >> { %1414 = vst.msk [vmem:[#allocation3 + $0x28] sm:$0xff] %vm805_vm1, %v1406_v46 }
 0x344   : >> { %2818 = vmatmul.mubr.bf16.vlgmr.msra.gmra.mrb[48].mxu0 %v4824_v47  ;;  %2943 = vmatmul.mubr.bf16.vlgmr.msra.gmra.mrb[48].mxu1 %v4587_v31  ;;  %v3024_v31 = vpop.permute.xlu0 %3023  ;;  %v1391_v47 = vld [vmem:[#allocation2 + $0x30] sm:$0xff] }
 0x345   : >> { %3068 = vmatpush1.bf16.msra.mxu0 %v3020_v24  ;;  %3725 = vmatprep.mubr.msk.bf16.mxu0 %vm380_vm0, %v4832_v48  ;;  %v1407_v48 = vadd.f32 %v1399_v52, %v1391_v47 }
 0x346   : >> { %3069 = vmatprep.subr.bf16.mxu0 %v3999_v14  ;;  %3737 = vmatprep.mubr.msk.bf16.mxu1 %vm380_vm0, %v4622_v62  ;;  %v1392_v62 = vld [vmem:[#allocation2 + $0x38] sm:$0xff] }
 0x347   : >> { %1415 = vst.msk [vmem:[#allocation3 + $0x30] sm:$0xff] %vm805_vm1, %v1407_v48  ;;  %v1408_v11 = vadd.f32 %v1400_v16, %v1392_v62 }
 0x349   : >> { %3070 = vmatpush1.bf16.msra.mxu0 %v3022_v44  ;;  %1416 = vst.msk [vmem:[#allocation3 + $0x38] sm:$0xff] %vm805_vm1, %v1408_v11 }
 0x34a   : >> { %3071 = vmatprep.subr.bf16.mxu0 %v3999_v14 }
 0x34c   : >> { %2826 = vmatmul.mubr.bf16.gmra.mrb[52].mxu0 %v4842_v53  ;;  %2951 = vmatmul.mubr.bf16.gmra.mrb[52].mxu1 %v4627_v63  ;;  %v3028_v63 = vpop.permute.xlu0 %3027  ;;  %v3030_v53 = vpop.permute.xlu1 %3029 }
 0x34d   : >> { %3072 = vmatpush1.bf16.msra.mxu0 %v3024_v31  ;;  %3726 = vmatprep.mubr.msk.bf16.mxu0 %vm380_vm0, %v4849_v54 }
 0x34e   : >> { %3073 = vmatprep.subr.bf16.mxu0 %v3999_v14  ;;  %3738 = vmatprep.mubr.msk.bf16.mxu1 %vm380_vm0, %v4655_v4 }
 0x350   : >> { %v3032_v4 = vpop.permute.xlu0 %3031 }
 0x351   : >> { %3074 = vmatpush1.bf16.msra.mxu0 %v3026_v40 }
 0x352   : >> { %3075 = vmatprep.subr.bf16.mxu0 %v3999_v14 }
 0x354   : >> { %2834 = vmatmul.mubr.bf16.gmra.mrb[56].mxu0 %v4859_v38  ;;  %2959 = vmatmul.mubr.bf16.gmra.mrb[56].mxu1 %v4660_v32  ;;  %v3034_v32 = vpop.permute.xlu1 %3033  ;;  %v3036_v54 = vpop.permute.xlu0 %3035 }
 0x355   : >> { %3076 = vmatpush1.bf16.msra.mxu0 %v3028_v63  ;;  %3727 = vmatprep.mubr.msk.bf16.mxu0 %vm380_vm0, %v4866_v15 }
 0x356   : >> { %3077 = vmatprep.subr.bf16.mxu0 %v3999_v14  ;;  %3739 = vmatprep.mubr.msk.bf16.mxu1 %vm380_vm0, %v4685_v42 }
 0x358   : >> { %v3038_v42 = vpop.permute.xlu1 %3037  ;;  %v3040_v38 = vpop.permute.xlu0 %3039 }
 0x359   : >> { %3078 = vmatpush1.bf16.msra.mxu0 %v3030_v53 }
 0x35a   : >> { %3079 = vmatprep.subr.bf16.mxu0 %v3999_v14 }
 0x35c   : >> { %2842 = vmatmul.mubr.bf16.gmra.mrb[60].mxu0 %v4876_v17  ;;  %2967 = vmatmul.mubr.bf16.gmra.mrb[60].mxu1 %v4690_v9  ;;  %v3042_v9 = vpop.permute.xlu1 %3041 }
 0x35d   : >> { %3080 = vmatpush1.bf16.msra.mxu0 %v3032_v4  ;;  %3756 = vmatprep.mubr.msk.bf16.mxu0 %vm380_vm0, %v4883_v19 }
 0x35e   : >> { %3081 = vmatprep.subr.bf16.mxu0 %v3999_v14 }
 0x361   : >> { %3082 = vmatpush1.bf16.msra.mxu0 %v3034_v32 }
 0x362   : >> { %3083 = vmatprep.subr.bf16.mxu0 %v3999_v14 }
 0x365   : >> { %3084 = vmatpush1.bf16.msra.mxu0 %v3036_v54 }
 0x366   : >> { %3085 = vmatprep.subr.bf16.mxu0 %v3999_v14 }
 0x369   : >> { %3086 = vmatpush1.bf16.msra.mxu0 %v3038_v42  ;;  %v1419_v42 = vld [vmem:[#allocation3 + $0x10] sm:$0xff] }
 0x36a   : >> { %3087 = vmatprep.subr.bf16.mxu0 %v3999_v14 }
 0x36d   : >> { %3088 = vmatpush1.bf16.msra.mxu0 %v3040_v38 }
 0x36e   : >> { %3089 = vmatprep.subr.bf16.mxu0 %v3999_v14 }
 0x371   : >> { %3090 = vmatpush1.bf16.msra.mxu0 %v3042_v9 }
 0x374   : >> { %3100 = vmatmul.mubr.bf16.vlgmr.msra.gmra.mrb[64].mxu0 %v4905_v56 }
 0x375   : >> { %3757 = vmatprep.mubr.msk.bf16.mxu0 %vm380_vm0, %v4913_v27 }
 0x37c   : >> { %3108 = vmatmul.mubr.bf16.gmra.mrb[68].mxu0 %v4927_v49 }
 0x37d   : >> { %3758 = vmatprep.mubr.msk.bf16.mxu0 %vm380_vm0, %v4935_v18 }
 0x384   : >> { %3116 = vmatmul.mubr.bf16.gmra.mrb[72].mxu0 %v4949_v26 }
 0x385   : >> { %3759 = vmatprep.mubr.msk.bf16.mxu0 %vm380_vm0, %v4957_v59 }
 0x387   : >> { %v1649_v15 = vpop.f32.mrb[0].mxu0 }
 0x388   : >> { %v1775_v17 = vadd.f32 %v5002_v5, %v1649_v15  ;;  %v1651_v14 = vpop.f32.mrb[1].mxu0  ;;  %v1420_v15 = vld [vmem:[#allocation3 + $0x18] sm:$0xff] }
 0x389   : >> { %v1652_v19 = vpop.f32.mrb[2].mxu0 }
 0x38a   : >> { %v1778_v56 = vadd.f32 %v5007_v6, %v1652_v19  ;;  %v1654_v1 = vpop.f32.mrb[3].mxu0 }
 0x38c   : >> { %3124 = vmatmul.mubr.bf16.gmra.mrb[76].mxu0 %v4971_v50 }
 0x38f   : >> { %v1657_v27 = vpop.f32.mrb[4].mxu0 }
 0x390   : >> { %v1659_v49 = vpop.f32.mrb[5].mxu0  ;;  %v1783_v35 = vadd.f32 %v5021_v0, %v1657_v27 }
 0x391   : >> { %v1660_v18 = vpop.f32.mrb[6].mxu0 }
 0x392   : >> { %v1662_v30 = vpop.f32.mrb[7].mxu0  ;;  %v1786_v26 = vadd.f32 %v5027_v45, %v1660_v18 }
 0x397   : >> { %v1665_v21 = vpop.f32.mrb[8].mxu0 }
 0x398   : >> { %v1667_v59 = vpop.f32.mrb[9].mxu0  ;;  %v1791_v28 = vadd.f32 %v5038_v36, %v1665_v21 }
 0x399   : >> { %v1668_v5 = vpop.f32.mrb[10].mxu0 }
 0x39a   : >> { %v1670_v3 = vpop.f32.mrb[11].mxu0  ;;  %v1794_v37 = vadd.f32 %v5044_v29, %v1668_v5 }
 0x39b   : >> { %v1421_v3 = vld [vmem:[#allocation3 + $0x20] sm:$0xff] }
 0x39f   : >> { %v1673_v6 = vpop.f32.mrb[12].mxu0 }
 0x3a0   : >> { %v1675_v22 = vpop.f32.mrb[13].mxu0  ;;  %v5133_v50 = vadd.f32 %v5054_v55, %v1673_v6 }
 0x3a1   : >> { %v1676_v39 = vpop.f32.mrb[14].mxu0 }
 0x3a2   : >> { %v1678_v57 = vpop.f32.mrb[15].mxu0  ;;  %v5136_v0 = vadd.f32 %v5060_v20, %v1676_v39  ;;  %v1418_v20 = vld [vmem:[#allocation3 + $0x8] sm:$0xff] }
 0x3a3   : >> { %v1422_v39 = vld [vmem:[#allocation3 + $0x28] sm:$0xff] }
 0x3b7   : >> { %v1931_v7 = vpop.f32.mrb[16].mxu0  ;;  %v5138_v45 = vpop.f32.mrb[16].mxu1 }
 0x3b8   : >> { %v1962_v33 = vadd.f32 %v1931_v7, %v1775_v17  ;;  %v1933_v41 = vpop.f32.mrb[17].mxu0  ;;  %v2228_v36 = vpop.f32.mrb[17].mxu1 }
 0x3b9   : >> { %v1934_v24 = vpop.f32.mrb[18].mxu0  ;;  %v5140_v12 = vpop.f32.mrb[18].mxu1 }
 0x3ba   : >> { %v1970_v29 = vadd.f32 %v1962_v33, %v4441_v51  ;;  %v1963_v43 = vadd.f32 %v1934_v24, %v1778_v56  ;;  %v1936_v58 = vpop.f32.mrb[19].mxu0  ;;  %v2231_v55 = vpop.f32.mrb[19].mxu1 }
 0x3bc   : >> { %v1978_v60 = vmax.f32 %v1970_v29, 0.0  ;;  %v1971_v44 = vadd.f32 %v1963_v43, %v4443_v13 }
 0x3be   : >> { %v1986_v46 = vadd.f32 %v1978_v60, %v1417_v34  ;;  %v1979_v31 = vmax.f32 %v1971_v44, 0.0  ;;  %v3977_v44 = vld [vmem:[%s5266_s3] sm:$0xff]  }
 0x3bf   : >> { %v1939_v47 = vpop.f32.mrb[20].mxu0  ;;  %v5144_v52 = vpop.f32.mrb[20].mxu1  ;;  %3804 = vmatprep.subr.bf16.mxu1 %v3977_v44 }
 0x3c0   : >> { %1994 = vst.msk [vmem:[#allocation3] sm:$0xff] %vm805_vm1, %v1986_v46  ;;  %v1987_v48 = vadd.f32 %v1979_v31, %v1418_v20  ;;  %v1964_v62 = vadd.f32 %v1939_v47, %v1783_v35  ;;  %v1941_v16 = vpop.f32.mrb[21].mxu0  ;;  %v2236_v40 = vpop.f32.mrb[21].mxu1  ;;  %v1423_v20 = vld [vmem:[#allocation3 + $0x30] sm:$0xff]  ;;  %v1424_v31 = vld [vmem:[#allocation3 + $0x38] sm:$0xff]  ;;  %3805 = vmatpush3.bf16.msra.mxu1 %v3977_v44 }
 0x3c1   : >> { %v1942_v11 = vpop.f32.mrb[22].mxu0  ;;  %v5147_v63 = vpop.f32.mrb[22].mxu1  ;;  %v3979_v16 = vld [vmem:[%s5266_s3 + $0x10] sm:$0xff]   ;;  %v4002_v40 = vmov 65535  }
 0x3c2   : >> { %1995 = vst.msk [vmem:[#allocation3 + $0x8] sm:$0xff] %vm805_vm1, %v1987_v48  ;;  %v1972_v53 = vadd.f32 %v1964_v62, %v4452_v23  ;;  %v1965_v4 = vadd.f32 %v1942_v11, %v1786_v26  ;;  %v1944_v32 = vpop.f32.mrb[23].mxu0  ;;  %v2239_v54 = vpop.f32.mrb[23].mxu1  ;;  %v3237_v11 = vsel %vm3235_vm2, 4294967295, %v4002_v40 }
 0x3c4   : >> { %v1980_v38 = vmax.f32 %v1972_v53, 0.0  ;;  %v1973_v9 = vadd.f32 %v1965_v4, %v4455_v25  ;;  %v3238_v53 = vsel %vm3236_vm3, %v3237_v11, 0 }
 0x3c5   : >> { %v3240_v4 = vand.u32 %v3979_v16, %v3238_v53 }
 0x3c6   : >> { %v1988_v17 = vadd.f32 %v1980_v38, %v1419_v42  ;;  %v1981_v14 = vmax.f32 %v1973_v9, 0.0 }
 0x3c7   : >> { %v1947_v19 = vpop.f32.mrb[24].mxu0  ;;  %v5152_v56 = vpop.f32.mrb[24].mxu1 }
 0x3c8   : >> { %1996 = vst.msk [vmem:[#allocation3 + $0x10] sm:$0xff] %vm805_vm1, %v1988_v17  ;;  %v1989_v1 = vadd.f32 %v1981_v14, %v1420_v15  ;;  %v1966_v27 = vadd.f32 %v1947_v19, %v1791_v28  ;;  %v1949_v49 = vpop.f32.mrb[25].mxu0  ;;  %v2244_v35 = vpop.f32.mrb[25].mxu1 }
 0x3c9   : >> { %v1950_v18 = vpop.f32.mrb[26].mxu0  ;;  %v5155_v30 = vpop.f32.mrb[26].mxu1 }
 0x3ca   : >> { %1997 = vst.msk [vmem:[#allocation3 + $0x18] sm:$0xff] %vm805_vm1, %v1989_v1  ;;  %v1974_v26 = vadd.f32 %v1966_v27, %v4460_v61  ;;  %v1967_v21 = vadd.f32 %v1950_v18, %v1794_v37  ;;  %v1952_v59 = vpop.f32.mrb[27].mxu0  ;;  %v2247_v5 = vpop.f32.mrb[27].mxu1 }
 0x3cc   : >> { %v1982_v6 = vmax.f32 %v1974_v26, 0.0  ;;  %v1975_v22 = vadd.f32 %v1967_v21, %v4463_v2  ;;  %v2563_v21 = vld [vmem:[#allocation3] sm:$0xff] }
 0x3ce   : >> { %v1990_v57 = vadd.f32 %v1982_v6, %v1421_v3  ;;  %v1983_v7 = vmax.f32 %v1975_v22, 0.0 }
 0x3cf   : >> { %v1955_v28 = vpop.f32.mrb[28].mxu0  ;;  %v5160_v33 = vpop.f32.mrb[28].mxu1 }
 0x3d0   : >> { %1998 = vst.msk [vmem:[#allocation3 + $0x20] sm:$0xff] %vm805_vm1, %v1990_v57  ;;  %v1991_v41 = vadd.f32 %v1983_v7, %v1422_v39  ;;  %v1968_v36 = vadd.f32 %v1955_v28, %v5133_v50  ;;  %v1957_v24 = vpop.f32.mrb[29].mxu0  ;;  %v2252_v29 = vpop.f32.mrb[29].mxu1  ;;  %v2564_v39 = vld [vmem:[#allocation3 + $0x8] sm:$0xff] }
 0x3d1   : >> { %v1958_v37 = vpop.f32.mrb[30].mxu0  ;;  %v5164_v43 = vpop.f32.mrb[30].mxu1 }
 0x3d2   : >> { %1999 = vst.msk [vmem:[#allocation3 + $0x28] sm:$0xff] %vm805_vm1, %v1991_v41  ;;  %v1976_v58 = vadd.f32 %v1968_v36, %v4468_v8  ;;  %v1969_v55 = vadd.f32 %v1958_v37, %v5136_v0  ;;  %v1960_v34 = vpop.f32.mrb[31].mxu0  ;;  %v2255_v60 = vpop.f32.mrb[31].mxu1  ;;  %v3978_v0 = vld [vmem:[%s5266_s3 + $0x8] sm:$0xff]  }
 0x3d3   : >> { %3806 = vmatprep.subr.bf16.mxu1 %v3978_v0  ;;  %v2565_v34 = vld [vmem:[#allocation3 + $0x10] sm:$0xff] }
 0x3d4   : >> { %v1984_v46 = vmax.f32 %v1976_v58, 0.0  ;;  %v1977_v50 = vadd.f32 %v1969_v55, %v4472_v10  ;;  %3807 = vmatpush3.bf16.msra.mxu1 %v3978_v0 }
 0x3d5   : >> { %3808 = vmatprep.subr.bf16.mxu1 %v3240_v4 }
 0x3d6   : >> { %v1992_v47 = vadd.f32 %v1984_v46, %v1423_v20  ;;  %v1985_v48 = vmax.f32 %v1977_v50, 0.0 }
 0x3d8   : >> { %2000 = vst.msk [vmem:[#allocation3 + $0x30] sm:$0xff] %vm805_vm1, %v1992_v47  ;;  %v1993_v62 = vadd.f32 %v1985_v48, %v1424_v31  ;;  %3809 = vmatpush3.bf16.msra.mxu1 %v3240_v4  ;;  %v2566_v47 = vld [vmem:[#allocation3 + $0x18] sm:$0xff] }
 0x3da   : >> { %2001 = vst.msk [vmem:[#allocation3 + $0x38] sm:$0xff] %vm805_vm1, %v1993_v62 }
 0x3e7   : >> { %v2351_v32 = vpop.f32.mrb[32].mxu0  ;;  %v2508_v54 = vpop.f32.mrb[32].mxu1 }
 0x3e8   : >> { %v2352_v42 = vadd.f32 %v2351_v32, %v5138_v45  ;;  %v2353_v38 = vpop.f32.mrb[33].mxu0  ;;  %v2510_v9 = vpop.f32.mrb[33].mxu1 }
 0x3e9   : >> { %v2354_v15 = vpop.f32.mrb[34].mxu0  ;;  %v2511_v17 = vpop.f32.mrb[34].mxu1 }
 0x3ea   : >> { %v2355_v14 = vadd.f32 %v2354_v15, %v5140_v12  ;;  %v2539_v19 = vadd.f32 %v2508_v54, %v2352_v42  ;;  %v2356_v1 = vpop.f32.mrb[35].mxu0  ;;  %v2513_v27 = vpop.f32.mrb[35].mxu1  ;;  %v2567_v42 = vld [vmem:[#allocation3 + $0x20] sm:$0xff] }
 0x3eb   : >> { %v2568_v1 = vld [vmem:[#allocation3 + $0x28] sm:$0xff] }
 0x3ec   : >> { %v2547_v49 = vadd.f32 %v2539_v19, %v4441_v51  ;;  %v2540_v35 = vadd.f32 %v2511_v17, %v2355_v14 }
 0x3ee   : >> { %v2555_v18 = vmax.f32 %v2547_v49, 0.0  ;;  %v2548_v26 = vadd.f32 %v2540_v35, %v4443_v13 }
 0x3ef   : >> { %v2359_v59 = vpop.f32.mrb[36].mxu0  ;;  %v2516_v5 = vpop.f32.mrb[36].mxu1 }
 0x3f0   : >> { %v2571_v3 = vadd.f32 %v2563_v21, %v2555_v18  ;;  %2587 = vst.msk [vmem:[#allocation2] sm:$0xff] %vm805_vm1, %v2555_v18  ;;  %v2556_v45 = vmax.f32 %v2548_v26, 0.0  ;;  %v2360_v6 = vadd.f32 %v2359_v59, %v5144_v52  ;;  %v2361_v22 = vpop.f32.mrb[37].mxu0  ;;  %v2518_v12 = vpop.f32.mrb[37].mxu1 }
 0x3f1   : >> { %v2362_v57 = vpop.f32.mrb[38].mxu0  ;;  %v2519_v7 = vpop.f32.mrb[38].mxu1 }
 0x3f2   : >> { %2579 = vst.msk [vmem:[#allocation3] sm:$0xff] %vm805_vm1, %v2571_v3  ;;  %v2572_v28 = vadd.f32 %v2564_v39, %v2556_v45  ;;  %2588 = vst.msk [vmem:[#allocation2 + $0x8] sm:$0xff] %vm805_vm1, %v2556_v45  ;;  %v2363_v41 = vadd.f32 %v2362_v57, %v5147_v63  ;;  %v2541_v36 = vadd.f32 %v2516_v5, %v2360_v6  ;;  %v2364_v24 = vpop.f32.mrb[39].mxu0  ;;  %v2521_v29 = vpop.f32.mrb[39].mxu1  ;;  %v2569_v6 = vld [vmem:[#allocation3 + $0x30] sm:$0xff]  ;;  %v2570_v39 = vld [vmem:[#allocation3 + $0x38] sm:$0xff] }
 0x3f4   : >> { %2580 = vst.msk [vmem:[#allocation3 + $0x8] sm:$0xff] %vm805_vm1, %v2572_v28  ;;  %v2549_v37 = vadd.f32 %v2541_v36, %v4452_v23  ;;  %v2542_v52 = vadd.f32 %v2519_v7, %v2363_v41 }
 0x3f6   : >> { %v2557_v58 = vmax.f32 %v2549_v37, 0.0  ;;  %v2550_v55 = vadd.f32 %v2542_v52, %v4455_v25 }
 0x3f7   : >> { %v2367_v60 = vpop.f32.mrb[40].mxu0  ;;  %v2524_v44 = vpop.f32.mrb[40].mxu1 }
 0x3f8   : >> { %v2573_v20 = vadd.f32 %v2565_v34, %v2557_v58  ;;  %2589 = vst.msk [vmem:[#allocation2 + $0x10] sm:$0xff] %vm805_vm1, %v2557_v58  ;;  %v2558_v46 = vmax.f32 %v2550_v55, 0.0  ;;  %v2368_v63 = vadd.f32 %v2367_v60, %v5152_v56  ;;  %v2369_v50 = vpop.f32.mrb[41].mxu0  ;;  %v2526_v31 = vpop.f32.mrb[41].mxu1 }
 0x3f9   : >> { %v2370_v48 = vpop.f32.mrb[42].mxu0  ;;  %v2527_v62 = vpop.f32.mrb[42].mxu1 }
 0x3fa   : >> { %2581 = vst.msk [vmem:[#allocation3 + $0x10] sm:$0xff] %vm805_vm1, %v2573_v20  ;;  %v2574_v0 = vadd.f32 %v2566_v47, %v2558_v46  ;;  %2590 = vst.msk [vmem:[#allocation2 + $0x18] sm:$0xff] %vm805_vm1, %v2558_v46  ;;  %v2371_v16 = vadd.f32 %v2370_v48, %v5155_v30  ;;  %v2543_v40 = vadd.f32 %v2524_v44, %v2368_v63  ;;  %v2372_v11 = vpop.f32.mrb[43].mxu0  ;;  %v2529_v53 = vpop.f32.mrb[43].mxu1 }
 0x3fc   : >> { %2582 = vst.msk [vmem:[#allocation3 + $0x18] sm:$0xff] %vm805_vm1, %v2574_v0  ;;  %v2551_v4 = vadd.f32 %v2543_v40, %v4460_v61  ;;  %v2544_v56 = vadd.f32 %v2527_v62, %v2371_v16 }
 0x3fe   : >> { %v2559_v32 = vmax.f32 %v2551_v4, 0.0  ;;  %v2552_v54 = vadd.f32 %v2544_v56, %v4463_v2 }
 0x3ff   : >> { %v2375_v38 = vpop.f32.mrb[44].mxu0  ;;  %v2532_v9 = vpop.f32.mrb[44].mxu1 }
 0x400   : >> { %v2575_v15 = vadd.f32 %v2567_v42, %v2559_v32  ;;  %2591 = vst.msk [vmem:[#allocation2 + $0x20] sm:$0xff] %vm805_vm1, %v2559_v32  ;;  %v2560_v17 = vmax.f32 %v2552_v54, 0.0  ;;  %v2376_v30 = vadd.f32 %v2375_v38, %v5160_v33  ;;  %v2377_v14 = vpop.f32.mrb[45].mxu0  ;;  %v2534_v19 = vpop.f32.mrb[45].mxu1 }
 0x401   : >> { %v2378_v27 = vpop.f32.mrb[46].mxu0  ;;  %v2535_v49 = vpop.f32.mrb[46].mxu1 }
 0x402   : >> { %2583 = vst.msk [vmem:[#allocation3 + $0x20] sm:$0xff] %vm805_vm1, %v2575_v15  ;;  %v2576_v35 = vadd.f32 %v2568_v1, %v2560_v17  ;;  %2592 = vst.msk [vmem:[#allocation2 + $0x28] sm:$0xff] %vm805_vm1, %v2560_v17  ;;  %v2379_v18 = vadd.f32 %v2378_v27, %v5164_v43  ;;  %v2545_v26 = vadd.f32 %v2532_v9, %v2376_v30  ;;  %v2380_v21 = vpop.f32.mrb[47].mxu0  ;;  %v2537_v59 = vpop.f32.mrb[47].mxu1 }
 0x404   : >> { %2584 = vst.msk [vmem:[#allocation3 + $0x28] sm:$0xff] %vm805_vm1, %v2576_v35  ;;  %v2553_v5 = vadd.f32 %v2545_v26, %v4468_v8  ;;  %v2546_v33 = vadd.f32 %v2535_v49, %v2379_v18 }
 0x406   : >> { %v2561_v3 = vmax.f32 %v2553_v5, 0.0  ;;  %v2554_v45 = vadd.f32 %v2546_v33, %v4472_v10 }
 0x408   : >> { %v2577_v22 = vadd.f32 %v2569_v6, %v2561_v3  ;;  %2593 = vst.msk [vmem:[#allocation2 + $0x30] sm:$0xff] %vm805_vm1, %v2561_v3  ;;  %v2562_v12 = vmax.f32 %v2554_v45, 0.0  ;;  %v3156_v3 = vld [vmem:[#allocation3] sm:$0xff] }
 0x40a   : >> { %2585 = vst.msk [vmem:[#allocation3 + $0x30] sm:$0xff] %vm805_vm1, %v2577_v22  ;;  %v2578_v43 = vadd.f32 %v2570_v39, %v2562_v12  ;;  %2594 = vst.msk [vmem:[#allocation2 + $0x38] sm:$0xff] %vm805_vm1, %v2562_v12  ;;  %v3157_v22 = vld [vmem:[#allocation3 + $0x8] sm:$0xff] }
 0x40c   : >> { %2586 = vst.msk [vmem:[#allocation3 + $0x38] sm:$0xff] %vm805_vm1, %v2578_v43 }
 0x417   : >> { %v2819_v57 = vpop.f32.mrb[48].mxu0  ;;  %v2944_v7 = vpop.f32.mrb[48].mxu1 }
 0x418   : >> { %v2945_v28 = vadd.f32 %v2944_v7, %v2819_v57  ;;  %v2821_v41 = vpop.f32.mrb[49].mxu0  ;;  %v2946_v36 = vpop.f32.mrb[49].mxu1 }
 0x419   : >> { %v2822_v24 = vpop.f32.mrb[50].mxu0  ;;  %v2947_v29 = vpop.f32.mrb[50].mxu1 }
 0x41a   : >> { %v2948_v37 = vadd.f32 %v2947_v29, %v2822_v24  ;;  %v2824_v52 = vpop.f32.mrb[51].mxu0  ;;  %v2949_v58 = vpop.f32.mrb[51].mxu1 }
 0x41f   : >> { %v2827_v55 = vpop.f32.mrb[52].mxu0  ;;  %v2952_v34 = vpop.f32.mrb[52].mxu1 }
 0x420   : >> { %v2829_v60 = vpop.f32.mrb[53].mxu0  ;;  %v2953_v44 = vadd.f32 %v2952_v34, %v2827_v55  ;;  %v2954_v20 = vpop.f32.mrb[53].mxu1  ;;  %v3159_v55 = vld [vmem:[#allocation3 + $0x18] sm:$0xff] }
 0x421   : >> { %v2830_v46 = vpop.f32.mrb[54].mxu0  ;;  %v2955_v63 = vpop.f32.mrb[54].mxu1 }
 0x422   : >> { %v2832_v50 = vpop.f32.mrb[55].mxu0  ;;  %v2956_v31 = vadd.f32 %v2955_v63, %v2830_v46  ;;  %v2957_v47 = vpop.f32.mrb[55].mxu1 }
 0x427   : >> { %v2835_v48 = vpop.f32.mrb[56].mxu0  ;;  %v2960_v62 = vpop.f32.mrb[56].mxu1 }
 0x428   : >> { %v2837_v0 = vpop.f32.mrb[57].mxu0  ;;  %v2961_v16 = vadd.f32 %v2960_v62, %v2835_v48  ;;  %v2962_v40 = vpop.f32.mrb[57].mxu1 }
 0x429   : >> { %v2838_v11 = vpop.f32.mrb[58].mxu0  ;;  %v2963_v53 = vpop.f32.mrb[58].mxu1 }
 0x42a   : >> { %v2840_v4 = vpop.f32.mrb[59].mxu0  ;;  %v2964_v56 = vadd.f32 %v2963_v53, %v2838_v11  ;;  %v2965_v32 = vpop.f32.mrb[59].mxu1  ;;  %v3160_v11 = vld [vmem:[#allocation3 + $0x20] sm:$0xff] }
 0x42b   : >> { %v3161_v4 = vld [vmem:[#allocation3 + $0x28] sm:$0xff] }
 0x42f   : >> { %v2843_v54 = vpop.f32.mrb[60].mxu0  ;;  %v2968_v42 = vpop.f32.mrb[60].mxu1 }
 0x430   : >> { %v2845_v38 = vpop.f32.mrb[61].mxu0  ;;  %v5213_v9 = vadd.f32 %v2968_v42, %v2843_v54  ;;  %v2970_v15 = vpop.f32.mrb[61].mxu1 }
 0x431   : >> { %v2846_v17 = vpop.f32.mrb[62].mxu0  ;;  %v2971_v30 = vpop.f32.mrb[62].mxu1 }
 0x432   : >> { %v2848_v14 = vpop.f32.mrb[63].mxu0  ;;  %v5215_v19 = vadd.f32 %v2971_v30, %v2846_v17  ;;  %v2973_v1 = vpop.f32.mrb[63].mxu1 }
 0x447   : >> { %v3101_v27 = vpop.f32.mrb[64].mxu0 }
 0x448   : >> { %v3132_v49 = vadd.f32 %v3101_v27, %v2945_v28  ;;  %v3103_v35 = vpop.f32.mrb[65].mxu0 }
 0x449   : >> { %v3104_v18 = vpop.f32.mrb[66].mxu0 }
 0x44a   : >> { %v3140_v26 = vadd.f32 %v3132_v49, %v4441_v51  ;;  %v3133_v21 = vadd.f32 %v3104_v18, %v2948_v37  ;;  %v3106_v59 = vpop.f32.mrb[67].mxu0  ;;  %v3158_v37 = vld [vmem:[#allocation3 + $0x10] sm:$0xff] }
 0x44b   : >> { %v3162_v18 = vld [vmem:[#allocation3 + $0x30] sm:$0xff] }
 0x44c   : >> { %v3148_v5 = vmax.f32 %v3140_v26, 0.0  ;;  %v3141_v33 = vadd.f32 %v3133_v21, %v4443_v13  ;;  %v3163_v21 = vld [vmem:[#allocation3 + $0x38] sm:$0xff] }
 0x44e   : >> { %v3164_v45 = vadd.f32 %v3156_v3, %v3148_v5  ;;  %3180 = vst.msk [vmem:[#allocation2 + $0x40] sm:$0xff] %vm805_vm1, %v3148_v5  ;;  %v3149_v6 = vmax.f32 %v3141_v33, 0.0 }
 0x44f   : >> { %v3109_v12 = vpop.f32.mrb[68].mxu0 }
 0x450   : >> { %3172 = vst.msk [vmem:[#allocation3] sm:$0xff] %vm805_vm1, %v3164_v45  ;;  %v3165_v39 = vadd.f32 %v3157_v22, %v3149_v6  ;;  %3181 = vst.msk [vmem:[#allocation2 + $0x48] sm:$0xff] %vm805_vm1, %v3149_v6  ;;  %v3134_v43 = vadd.f32 %v3109_v12, %v2953_v44  ;;  %v3111_v57 = vpop.f32.mrb[69].mxu0 }
 0x451   : >> { %v3112_v7 = vpop.f32.mrb[70].mxu0 }
 0x452   : >> { %3173 = vst.msk [vmem:[#allocation3 + $0x8] sm:$0xff] %vm805_vm1, %v3165_v39  ;;  %v3142_v28 = vadd.f32 %v3134_v43, %v4452_v23  ;;  %v3135_v41 = vadd.f32 %v3112_v7, %v2956_v31  ;;  %v3114_v36 = vpop.f32.mrb[71].mxu0 }
 0x454   : >> { %v3150_v24 = vmax.f32 %v3142_v28, 0.0  ;;  %v3143_v29 = vadd.f32 %v3135_v41, %v4455_v25 }
 0x456   : >> { %v3166_v52 = vadd.f32 %v3158_v37, %v3150_v24  ;;  %3182 = vst.msk [vmem:[#allocation2 + $0x50] sm:$0xff] %vm805_vm1, %v3150_v24  ;;  %v3151_v58 = vmax.f32 %v3143_v29, 0.0 }
 0x457   : >> { %v3117_v34 = vpop.f32.mrb[72].mxu0  ;;  %v3188_v63 = vld [vmem:[#allocation3] sm:$0xff] }
 0x458   : >> { %3174 = vst.msk [vmem:[#allocation3 + $0x10] sm:$0xff] %vm805_vm1, %v3166_v52  ;;  %v3167_v60 = vadd.f32 %v3159_v55, %v3151_v58  ;;  %3183 = vst.msk [vmem:[#allocation2 + $0x58] sm:$0xff] %vm805_vm1, %v3151_v58  ;;  %v3136_v44 = vadd.f32 %v3117_v34, %v2961_v16  ;;  %v3119_v20 = vpop.f32.mrb[73].mxu0 }
 0x459   : >> { %v3120_v46 = vpop.f32.mrb[74].mxu0  ;;  %v3189_v50 = vld [vmem:[#allocation3 + $0x8] sm:$0xff] }
 0x45a   : >> { %3175 = vst.msk [vmem:[#allocation3 + $0x18] sm:$0xff] %vm805_vm1, %v3167_v60  ;;  %v3144_v31 = vadd.f32 %v3136_v44, %v4460_v61  ;;  %v3137_v47 = vadd.f32 %v3120_v46, %v2964_v56  ;;  %v3122_v48 = vpop.f32.mrb[75].mxu0  ;;  %v3196_v62 = vpack.c.bf16 %v3189_v50, %v3188_v63 }
 0x45c   : >> { %v3152_v0 = vmax.f32 %v3144_v31, 0.0  ;;  %v3145_v40 = vadd.f32 %v3137_v47, %v4463_v2  ;;  %3810 = vmatprep.mubr.msk.bf16.mxu1 %vm805_vm1, %v3196_v62 }
 0x45e   : >> { %v3168_v53 = vadd.f32 %v3160_v11, %v3152_v0  ;;  %3184 = vst.msk [vmem:[#allocation2 + $0x60] sm:$0xff] %vm805_vm1, %v3152_v0  ;;  %v3153_v16 = vmax.f32 %v3145_v40, 0.0 }
 0x45f   : >> { %v3125_v32 = vpop.f32.mrb[76].mxu0  ;;  %v3190_v15 = vld [vmem:[#allocation3 + $0x10] sm:$0xff] }
 0x460   : >> { %3176 = vst.msk [vmem:[#allocation3 + $0x20] sm:$0xff] %vm805_vm1, %v3168_v53  ;;  %v3169_v54 = vadd.f32 %v3161_v4, %v3153_v16  ;;  %3185 = vst.msk [vmem:[#allocation2 + $0x68] sm:$0xff] %vm805_vm1, %v3153_v16  ;;  %v3138_v56 = vadd.f32 %v3125_v32, %v5213_v9  ;;  %v3127_v42 = vpop.f32.mrb[77].mxu0 }
 0x461   : >> { %v3128_v38 = vpop.f32.mrb[78].mxu0  ;;  %v3191_v17 = vld [vmem:[#allocation3 + $0x18] sm:$0xff] }
 0x462   : >> { %3177 = vst.msk [vmem:[#allocation3 + $0x28] sm:$0xff] %vm805_vm1, %v3169_v54  ;;  %v3146_v30 = vadd.f32 %v3138_v56, %v4468_v8  ;;  %v3139_v14 = vadd.f32 %v3128_v38, %v5215_v19  ;;  %v3130_v1 = vpop.f32.mrb[79].mxu0  ;;  %v3197_v27 = vpack.c.bf16 %v3191_v17, %v3190_v15 }
 0x464   : >> { %v3154_v49 = vmax.f32 %v3146_v30, 0.0  ;;  %v3147_v35 = vadd.f32 %v3139_v14, %v4472_v10  ;;  %3811 = vmatmul.mubr.msk.bf16.vlgmr.msra.gmra.mrb[64].mxu1 %vm805_vm1, %v3197_v27 }
 0x466   : >> { %v3170_v26 = vadd.f32 %v3162_v18, %v3154_v49  ;;  %3186 = vst.msk [vmem:[#allocation2 + $0x70] sm:$0xff] %vm805_vm1, %v3154_v49  ;;  %v3155_v9 = vmax.f32 %v3147_v35, 0.0 }
 0x467   : >> { %v3192_v19 = vld [vmem:[#allocation3 + $0x20] sm:$0xff] }
 0x468   : >> { %3178 = vst.msk [vmem:[#allocation3 + $0x30] sm:$0xff] %vm805_vm1, %v3170_v26  ;;  %v3171_v59 = vadd.f32 %v3163_v21, %v3155_v9  ;;  %3187 = vst.msk [vmem:[#allocation2 + $0x78] sm:$0xff] %vm805_vm1, %v3155_v9 }
 0x469   : >> { %v3193_v5 = vld [vmem:[#allocation3 + $0x28] sm:$0xff] }
 0x46a   : >> { %3179 = vst.msk [vmem:[#allocation3 + $0x38] sm:$0xff] %vm805_vm1, %v3171_v59  ;;  %v3198_v33 = vpack.c.bf16 %v3193_v5, %v3192_v19 }
 0x46c   : >> { %3814 = vmatprep.mubr.msk.bf16.mxu1 %vm805_vm1, %v3198_v33 }
 0x46f   : >> { %v3194_v3 = vld [vmem:[#allocation3 + $0x30] sm:$0xff] }
 0x471   : >> { %v3195_v45 = vld [vmem:[#allocation3 + $0x38] sm:$0xff] }
 0x472   : >> { %v3199_v6 = vpack.c.bf16 %v3195_v45, %v3194_v3 }
 0x474   : >> { %3815 = vmatmul.mubr.msk.bf16.gmra.mrb[68].mxu1 %vm805_vm1, %v3199_v6 }
 0x537   : >> { %v3812_v22 = vpop.f32.mrb[64].mxu1 }
 0x538   : >> { %v3309_v12 = vmul.f32 0.04, %v3812_v22  ;;  %v3276_v39 = vpop.f32.mrb[65].mxu1 }
 0x539   : >> { %v3307_v43 = vmul.f32 0.04, %v3276_v39  ;;  %v3813_v57 = vpop.f32.mrb[66].mxu1 }
 0x53a   : >> { %v3787_v7 = vpack.c.bf16 %v3309_v12, %v3309_v12  ;;  %v3310_v28 = vmul.f32 0.04, %v3813_v57  ;;  %v3279_v41 = vpop.f32.mrb[67].mxu1 }
 0x53b   : >> { %v3785_v36 = vpack.c.bf16 %v3307_v43, %v3307_v43  ;;  %v3308_v24 = vmul.f32 0.04, %v3279_v41 }
 0x53c   : >> { %3353 = vst.msk [vmem:[%s3349_s27 + $0x8] sm:$0xf] %vm3350_vm4, %v3787_v7  ;;  %v3788_v29 = vpack.c.bf16 %v3310_v28, %v3310_v28 }
 0x53d   : >> { %3351 = vst.msk [vmem:[%s3349_s27] sm:$0xf] %vm3350_vm4, %v3785_v36  ;;  %v3786_v37 = vpack.c.bf16 %v3308_v24, %v3308_v24 }
 0x53e   : >> { %3354 = vst.msk [vmem:[%s3349_s27 + $0xc] sm:$0xf] %vm3350_vm4, %v3788_v29 }
 0x53f   : >> { %3352 = vst.msk [vmem:[%s3349_s27 + $0x4] sm:$0xf] %vm3350_vm4, %v3786_v37 }
 0x547   : >> { %v3816_v52 = vpop.f32.mrb[68].mxu1 }
 0x548   : >> { %v3313_v58 = vmul.f32 0.04, %v3816_v52  ;;  %v3292_v55 = vpop.f32.mrb[69].mxu1 }
 0x549   : >> { %v3311_v34 = vmul.f32 0.04, %v3292_v55  ;;  %v3817_v60 = vpop.f32.mrb[70].mxu1  ;;  %1382 = sbr.rel (!%p1380_p4) target bundleno = 523 (0x20b), region = 80 }
 0x54a   : >> { %v3791_v44 = vpack.c.bf16 %v3313_v58, %v3313_v58  ;;  %v3314_v20 = vmul.f32 0.04, %v3817_v60  ;;  %v3295_v46 = vpop.f32.mrb[71].mxu1 }
 0x54b   : >> { %v3789_v63 = vpack.c.bf16 %v3311_v34, %v3311_v34  ;;  %v3312_v50 = vmul.f32 0.04, %v3295_v46 }
 0x54c   : >> { %3357 = vst.msk [vmem:[%s3349_s27 + $0x18] sm:$0xf] %vm3350_vm4, %v3791_v44  ;;  %v3792_v31 = vpack.c.bf16 %v3314_v20, %v3314_v20 }
 0x54d   : >> { %3355 = vst.msk [vmem:[%s3349_s27 + $0x10] sm:$0xf] %vm3350_vm4, %v3789_v63  ;;  %v3790_v47 = vpack.c.bf16 %v3312_v50, %v3312_v50 }
 0x54e   : >> { %3358 = vst.msk [vmem:[%s3349_s27 + $0x1c] sm:$0xf] %vm3350_vm4, %v3792_v31 }
 0x54f   : >> { %3356 = vst.msk [vmem:[%s3349_s27 + $0x14] sm:$0xf] %vm3350_vm4, %v3790_v47 }
 0x550 PF: > { %s14_s15 = sadd.s32 1, %s3990_s15  }
 0x551   : > { %p11_p5 = scmp.ge.s32.totalorder %s14_s15, 4  }
 0x553   :  { %13 = sbr.rel (!%p11_p5) target bundleno = 1 (0x1), region = 91 }

// kernel: deep_q_forward.7
= control target key start
LH: loop header
LB: loop body
LE: loop exit
PB: predicated region body
PF: predicated region fallthrough
CT: control target
= control target key end

     0   :  { %v146_v2 = vlaneseq  ;;  %v5689_v10 = vmov 1966171168   ;;  %s6157_s0 = inlined_call_operand.vmem [shape: bf16[2,20160], index: 0, kind: input, shape index: {}]   ;;  %s6158_s1 = inlined_call_operand.vmem [shape: bf16[6,20160], index: 1, kind: input, shape index: {}]   ;;  %s6159_s2 = inlined_call_operand.vmem [shape: f32[1,6], index: 2, kind: input, shape index: {}]   ;;  %s6160_s3 = inlined_call_operand.hbm [shape: f32[2,6], index: 3, kind: output, shape index: {}]  }
   0x1   :  { %v36_v0 = vld [vmem:[%s6158_s1] sm:$0x77]  ;;  %v75_v1 = vld [vmem:[%s6158_s1 + $0x138] sm:$0x77]  ;;  %v37_v8 = vld [vmem:[%s6158_s1 + $0x8] sm:$0x77]  ;;  %v144_v11 = vunpack.c.l.s4 %v5689_v10 }
   0x2   :  { %v5014_v3 = vcombine.high %v36_v0, %v36_v0  ;;  %v5013_v4 = vcombine.low %v36_v0, %v36_v0  ;;  %v5092_v5 = vcombine.high %v75_v1, %v75_v1  ;;  %v5091_v6 = vcombine.low %v75_v1, %v75_v1  ;;  %v76_v7 = vld [vmem:[%s6158_s1 + $0x140] sm:$0x77]  ;;  %v25_v9 = vld [vmem:[%s6157_s0 + $0x48] sm:$0xff]  ;;  %v26_v18 = vld [vmem:[%s6157_s0 + $0x50] sm:$0xff] }
   0x3   :  { %v147_v12 = vshrl.u32 %v146_v2, 7  ;;  %v5094_v13 = vcombine.high %v76_v7, %v76_v7  ;;  %v5016_v14 = vcombine.high %v37_v8, %v37_v8  ;;  %v145_v15 = vunpack.c.0.s8 %v144_v11  ;;  %v16_v17 = vld [vmem:[%s6157_s0] sm:$0xff] }
   0x4   :  { %1836 = vmatprep.subr.bf16.mxu1 %v5014_v3  ;;  %3396 = vmatprep.subr.bf16.mxu0 %v5092_v5  ;;  %v583_v16 = vcombine.high %v25_v9, %v25_v9 }
   0x5   :  { %1837 = vmatpush1.bf16.xpose.msra.mxu1 %v5013_v4  ;;  %3397 = vmatpush1.bf16.xpose.msra.mxu0 %v5091_v6  ;;  %v5732_v19 = vsub.s32 %v145_v15, %v147_v12 }
   0x6   :  { %3436 = vmatprep.subr.bf16.mxu0 %v5094_v13  ;;  %1876 = vmatprep.subr.bf16.mxu1 %v5016_v14 }
   0x7   :  { %v149_v20 = vrot.slane %v16_v17, %v5732_v19  ;;  %v597_v21 = vrot.slane %v583_v16, %v5732_v19  ;;  %v639_v22 = vrot.slane %v26_v18, %v5732_v19 }
   0x8   :  { %8 = vsyncpa [#allocation3], 0  ;;  %v142_v28 = vcombine.high %v16_v17, %v16_v17  ;;  %v5015_v31 = vcombine.low %v37_v8, %v37_v8  ;;  %v77_v32 = vld [vmem:[%s6158_s1 + $0x148] sm:$0x77]  ;;  %v38_v33 = vld [vmem:[%s6158_s1 + $0x10] sm:$0x77]  ;;  %v5093_v37 = vcombine.low %v76_v7, %v76_v7  ;;  %v632_v52 = vcombine.high %v26_v18, %v26_v18 }
   0x9   :  { %v157_v23 = vcombine.high %v149_v20, %v149_v20  ;;  %v599_v24 = vcombine.high %v597_v21, %v597_v21  ;;  %v5738_v25 = vrot.slane %v597_v21, %v5732_v19  ;;  %v165_v26 = vrot.slane %v149_v20, %v5732_v19  ;;  %v39_v43 = vld [vmem:[%s6158_s1 + $0x18] sm:$0x77]  ;;  %v78_v47 = vld [vmem:[%s6158_s1 + $0x150] sm:$0x77]  ;;  %v40_v56 = vld [vmem:[%s6158_s1 + $0x20] sm:$0x77] }
   0xa   :  { %v647_v27 = vcombine.high %v639_v22, %v639_v22  ;;  %v5096_v39 = vcombine.high %v77_v32, %v77_v32  ;;  %v5018_v40 = vcombine.high %v38_v33, %v38_v33  ;;  %v156_v41 = vrot.slane %v142_v28, %v5732_v19  ;;  %v79_v60 = vld [vmem:[%s6158_s1 + $0x158] sm:$0x77]  ;;  %v17_v63 = vld [vmem:[%s6157_s0 + $0x8] sm:$0xff]  ;;  %v80_v9 = vld [vmem:[%s6158_s1 + $0x160] sm:$0x77]  ;;  %s5690_s23 = smov [#allocation2]  }
   0xb   :  { %v179_v29 = vrot.slane %v157_v23, %v5732_v19  ;;  %v5743_v30 = vrot.slane %v599_v24, %v5732_v19  ;;  %v629_v34 = vcombine.high %v5738_v25, %v5738_v25  ;;  %v187_v44 = vcombine.high %v165_v26, %v165_v26  ;;  %v41_v5 = vld [vmem:[%s6158_s1 + $0x28] sm:$0x77]  ;;  %v27_v15 = vld [vmem:[%s6157_s0 + $0x58] sm:$0xff]  ;;  %v42_v18 = vld [vmem:[%s6158_s1 + $0x30] sm:$0x77]  ;;  %s5004_s24 = sshll.u32 %s5690_s23, 4  ;;  %s5005_s24 = int_to_ptr.vmem [resolvable:$true] %s5004_s24 }
   0xc   :  { %v669_v38 = vrot.slane %v647_v27, %v5732_v19  ;;  %v158_v42 = vcombine.high %v156_v41, %v156_v41  ;;  %v5017_v45 = vcombine.low %v38_v33, %v38_v33  ;;  %v655_v48 = vrot.slane %v639_v22, %v5732_v19  ;;  %v81_v23 = vld [vmem:[%s6158_s1 + $0x168] sm:$0x77]  ;;  %s5665_s25 = scalar_lea.vmem %s5005_s24, 32  ;;  %p5670_p1 = scmp.lt.s32.totalorder %s5005_s24, %s5005_s24 }
   0xd   :  { %v189_v35 = vcombine.high %v179_v29, %v179_v29  ;;  %1868 = vmatprep.mubr.bf16.mxu1 %v179_v29  ;;  %v631_v36 = vcombine.high %v5743_v30, %v5743_v30  ;;  %v5020_v49 = vcombine.high %v39_v43, %v39_v43  ;;  %v5095_v50 = vcombine.low %v77_v32, %v77_v32  ;;  %p5666_p0 = scmp.ne.s32.totalorder %s5005_s24, %s5665_s25  ;;  %p5671_p2 = scmp.lt.s32.totalorder %s5665_s25, %s5665_s25 }
   0xe   :  { %1869 = vmatmul.mubr.bf16.vlgmr.msra.gmra.mrb[0].mxu1 %v165_v26  ;;  %v186_v46 = vrot.slane %v158_v42, %v5732_v19  ;;  %v679_v51 = vcombine.high %v669_v38, %v669_v38  ;;  %v5098_v53 = vcombine.high %v78_v47, %v78_v47  ;;  %v646_v54 = vrot.slane %v632_v52, %v5732_v19 }
   0xf   :  { %3428 = vmatprep.mubr.bf16.mxu0 %v631_v36  ;;  %1877 = vmatpush1.bf16.xpose.msra.mxu1 %v5015_v31  ;;  %v172_v57 = vrot.slane %v156_v41, %v5732_v19  ;;  %v5019_v58 = vcombine.low %v39_v43, %v39_v43  ;;  %v677_v61 = vcombine.high %v655_v48, %v655_v48  ;;  %vm1829_vm0 = vcmask 523264   ;;  %p5672_p3 = por %p5671_p2, %p5670_p1 }
  0x10   :  { %3429 = vmatmul.mubr.bf16.vlgmr.msra.gmra.mrb[0].mxu0 %v629_v34  ;;  %1908 = vmatprep.mubr.bf16.mxu1 %v189_v35  ;;  %v648_v55 = vcombine.high %v646_v54, %v646_v54  ;;  %v190_v59 = vcombine.high %v186_v46, %v186_v46  ;;  %v5022_v62 = vcombine.high %v40_v56, %v40_v56  ;;  %v43_v34 = vld [vmem:[%s6158_s1 + $0x38] sm:$0x77]  ;;  %vm4996_vm1 = vcmask 41984  }
  0x11   :  { %3437 = vmatpush1.bf16.xpose.msra.mxu0 %v5093_v37  ;;  %3468 = vmatprep.mubr.bf16.mxu0 %v669_v38  ;;  %v5097_v0 = vcombine.low %v78_v47, %v78_v47  ;;  %v5100_v2 = vcombine.high %v79_v60, %v79_v60  ;;  %v198_v3 = vrot.slane %v17_v63, %v5732_v19  ;;  %v82_v38 = vld [vmem:[%s6158_s1 + $0x170] sm:$0x77]  ;;  %v44_v47 = vld [vmem:[%s6158_s1 + $0x40] sm:$0x77]  ;;  %p5673_p4 = pnand %p5672_p3, %p5666_p0 }
  0x12   :  { %3476 = vmatprep.subr.bf16.mxu0 %v5096_v39  ;;  %1916 = vmatprep.subr.bf16.mxu1 %v5018_v40  ;;  %v676_v1 = vrot.slane %v648_v55, %v5732_v19  ;;  %v188_v6 = vcombine.high %v172_v57, %v172_v57  ;;  %v5021_v7 = vcombine.low %v40_v56, %v40_v56 }
  0x13   :  { %v206_v4 = vcombine.high %v198_v3, %v198_v3  ;;  %v662_v10 = vrot.slane %v646_v54, %v5732_v19  ;;  %v5024_v11 = vcombine.high %v41_v5, %v41_v5  ;;  %v5099_v12 = vcombine.low %v79_v60, %v79_v60  ;;  %v18_v54 = vld [vmem:[%s6157_s0 + $0x10] sm:$0xff]  ;;  %v45_v60 = vld [vmem:[%s6158_s1 + $0x48] sm:$0x77] }
  0x14   :  { %v680_v13 = vcombine.high %v676_v1, %v676_v1  ;;  %v5102_v14 = vcombine.high %v80_v9, %v80_v9  ;;  %v688_v16 = vrot.slane %v27_v15, %v5732_v19  ;;  %v214_v20 = vrot.slane %v198_v3, %v5732_v19 }
  0x15   :  { %v228_v8 = vrot.slane %v206_v4, %v5732_v19  ;;  %v5023_v21 = vcombine.low %v41_v5, %v41_v5  ;;  %v191_v24 = vcombine.high %v17_v63, %v17_v63  ;;  %v678_v26 = vcombine.high %v662_v10, %v662_v10 }
  0x16   :  { %v696_v17 = vcombine.high %v688_v16, %v688_v16  ;;  %v5026_v27 = vcombine.high %v42_v18, %v42_v18  ;;  %v5101_v28 = vcombine.low %v80_v9, %v80_v9  ;;  %v5104_v31 = vcombine.high %v81_v23, %v81_v23  ;;  %v46_v9 = vld [vmem:[%s6158_s1 + $0x50] sm:$0x77] }
  0x17   :  { %v238_v22 = vcombine.high %v228_v8, %v228_v8  ;;  %v205_v32 = vrot.slane %v191_v24, %v5732_v19  ;;  %v236_v35 = vcombine.high %v214_v20, %v214_v20  ;;  %v5025_v36 = vcombine.low %v42_v18, %v42_v18 }
  0x18   :  { %v718_v29 = vrot.slane %v696_v17, %v5732_v19  ;;  %v704_v39 = vrot.slane %v688_v16, %v5732_v19  ;;  %v5028_v40 = vcombine.high %v43_v34, %v43_v34  ;;  %v5103_v41 = vcombine.low %v81_v23, %v81_v23  ;;  %v47_v23 = vld [vmem:[%s6158_s1 + $0x58] sm:$0x77] }
  0x19   :  { %v207_v33 = vcombine.high %v205_v32, %v205_v32  ;;  %v681_v43 = vcombine.high %v27_v15, %v27_v15  ;;  %v5105_v55 = vcombine.low %v82_v38, %v82_v38  ;;  %v5034_v16 = vcombine.high %v46_v9, %v46_v9 }
  0x1a   :  { %1909 = vmatmul.mubr.bf16.vlgmr.msra.gmra.mrb[0].mxu1 %v187_v44  ;;  %v728_v42 = vcombine.high %v718_v29, %v718_v29  ;;  %v5106_v44 = vcombine.high %v82_v38, %v82_v38  ;;  %v726_v52 = vcombine.high %v704_v39, %v704_v39  ;;  %v48_v38 = vld [vmem:[%s6158_s1 + $0x60] sm:$0x77] }
  0x1b   :  { %1917 = vmatpush1.bf16.xpose.msra.mxu1 %v5017_v45  ;;  %1948 = vmatprep.mubr.bf16.mxu1 %v186_v46  ;;  %v235_v37 = vrot.slane %v207_v33, %v5732_v19  ;;  %v695_v45 = vrot.slane %v681_v43, %v5732_v19 }
  0x1c   :  { %3469 = vmatmul.mubr.bf16.vlgmr.msra.gmra.mrb[0].mxu0 %v655_v48  ;;  %1956 = vmatprep.subr.bf16.mxu1 %v5020_v49  ;;  %v221_v48 = vrot.slane %v205_v32, %v5732_v19  ;;  %v5027_v49 = vcombine.low %v43_v34, %v43_v34 }
  0x1d   :  { %3477 = vmatpush1.bf16.xpose.msra.mxu0 %v5095_v50  ;;  %3508 = vmatprep.mubr.bf16.mxu0 %v679_v51  ;;  %v697_v46 = vcombine.high %v695_v45, %v695_v45  ;;  %v239_v50 = vcombine.high %v235_v37, %v235_v37  ;;  %v83_v51 = vld [vmem:[%s6158_s1 + $0x178] sm:$0x77] }
  0x1e   :  { %3516 = vmatprep.subr.bf16.mxu0 %v5098_v53  ;;  %v5030_v53 = vcombine.high %v44_v47, %v44_v47  ;;  %v5107_v3 = vcombine.low %v83_v51, %v83_v51 }
  0x1f   :  { %v725_v56 = vrot.slane %v697_v46, %v5732_v19 }
  0x21   :  { %v729_v4 = vcombine.high %v725_v56, %v725_v56 }
  0x26   :  { %1949 = vmatmul.mubr.bf16.vlgmr.msra.gmra.mrb[0].mxu1 %v172_v57  ;;  %v5108_v57 = vcombine.high %v83_v51, %v83_v51  ;;  %v49_v51 = vld [vmem:[%s6158_s1 + $0x68] sm:$0x77] }
  0x27   :  { %1957 = vmatpush1.bf16.xpose.msra.mxu1 %v5019_v58  ;;  %1988 = vmatprep.mubr.bf16.mxu1 %v190_v59  ;;  %v247_v58 = vrot.slane %v18_v54, %v5732_v19 }
  0x28   :  { %3509 = vmatmul.mubr.bf16.vlgmr.msra.gmra.mrb[0].mxu0 %v677_v61  ;;  %1996 = vmatprep.subr.bf16.mxu1 %v5022_v62  ;;  %v237_v61 = vcombine.high %v221_v48, %v221_v48  ;;  %v5029_v62 = vcombine.low %v44_v47, %v44_v47 }
  0x29   :  { %3517 = vmatpush1.bf16.xpose.msra.mxu0 %v5097_v0  ;;  %3548 = vmatprep.mubr.bf16.mxu0 %v676_v1  ;;  %v255_v59 = vcombine.high %v247_v58, %v247_v58  ;;  %v84_v0 = vld [vmem:[%s6158_s1 + $0x180] sm:$0x77]  ;;  %v711_v1 = vrot.slane %v695_v45, %v5732_v19  ;;  %v19_v45 = vld [vmem:[%s6157_s0 + $0x18] sm:$0xff] }
  0x2a   :  { %3556 = vmatprep.subr.bf16.mxu0 %v5100_v2  ;;  %v5032_v2 = vcombine.high %v45_v60, %v45_v60  ;;  %v5110_v5 = vcombine.high %v84_v0, %v84_v0  ;;  %v5109_v17 = vcombine.low %v84_v0, %v84_v0  ;;  %v50_v0 = vld [vmem:[%s6158_s1 + $0x70] sm:$0x77] }
  0x2b   :  { %v277_v63 = vrot.slane %v255_v59, %v5732_v19  ;;  %v727_v15 = vcombine.high %v711_v1, %v711_v1 }
  0x32   :  { %1989 = vmatmul.mubr.bf16.vlgmr.msra.gmra.mrb[0].mxu1 %v188_v6  ;;  %v28_v6 = vld [vmem:[%s6157_s0 + $0x60] sm:$0xff] }
  0x33   :  { %1997 = vmatpush1.bf16.xpose.msra.mxu1 %v5021_v7  ;;  %2028 = vmatprep.mubr.bf16.mxu1 %v228_v8  ;;  %v737_v7 = vrot.slane %v28_v6, %v5732_v19  ;;  %v730_v34 = vcombine.high %v28_v6, %v28_v6 }
  0x34   :  { %3549 = vmatmul.mubr.bf16.vlgmr.msra.gmra.mrb[0].mxu0 %v662_v10  ;;  %2036 = vmatprep.subr.bf16.mxu1 %v5024_v11  ;;  %v263_v10 = vrot.slane %v247_v58, %v5732_v19  ;;  %v5031_v11 = vcombine.low %v45_v60, %v45_v60 }
  0x35   :  { %3557 = vmatpush1.bf16.xpose.msra.mxu0 %v5099_v12  ;;  %3588 = vmatprep.mubr.bf16.mxu0 %v680_v13  ;;  %v745_v8 = vcombine.high %v737_v7, %v737_v7  ;;  %v287_v12 = vcombine.high %v277_v63, %v277_v63  ;;  %v85_v13 = vld [vmem:[%s6158_s1 + $0x188] sm:$0x77] }
  0x36   :  { %3596 = vmatprep.subr.bf16.mxu0 %v5102_v14  ;;  %v240_v14 = vcombine.high %v18_v54, %v18_v54  ;;  %v285_v24 = vcombine.high %v263_v10, %v263_v10  ;;  %v5111_v32 = vcombine.low %v85_v13, %v85_v13 }
  0x37   :  { %v767_v18 = vrot.slane %v745_v8, %v5732_v19 }
  0x39   :  { %v777_v33 = vcombine.high %v767_v18, %v767_v18 }
  0x3e   :  { %2029 = vmatmul.mubr.bf16.vlgmr.msra.gmra.mrb[0].mxu1 %v214_v20  ;;  %v5112_v20 = vcombine.high %v85_v13, %v85_v13  ;;  %v51_v13 = vld [vmem:[%s6158_s1 + $0x78] sm:$0x77] }
  0x3f   :  { %2037 = vmatpush1.bf16.xpose.msra.mxu1 %v5023_v21  ;;  %2068 = vmatprep.mubr.bf16.mxu1 %v238_v22  ;;  %v254_v21 = vrot.slane %v240_v14, %v5732_v19 }
  0x40   :  { %3589 = vmatmul.mubr.bf16.vlgmr.msra.gmra.mrb[0].mxu0 %v678_v26  ;;  %2076 = vmatprep.subr.bf16.mxu1 %v5026_v27  ;;  %v5033_v26 = vcombine.low %v46_v9, %v46_v9 }
  0x41   :  { %3597 = vmatpush1.bf16.xpose.msra.mxu0 %v5101_v28  ;;  %3628 = vmatprep.mubr.bf16.mxu0 %v718_v29  ;;  %v256_v22 = vcombine.high %v254_v21, %v254_v21  ;;  %v86_v28 = vld [vmem:[%s6158_s1 + $0x190] sm:$0x77]  ;;  %v753_v29 = vrot.slane %v737_v7, %v5732_v19  ;;  %v5042_v7 = vcombine.high %v50_v0, %v50_v0 }
  0x42   :  { %3636 = vmatprep.subr.bf16.mxu0 %v5104_v31  ;;  %v5036_v31 = vcombine.high %v47_v23, %v47_v23  ;;  %v5113_v46 = vcombine.low %v86_v28, %v86_v28 }
  0x43   :  { %v284_v27 = vrot.slane %v256_v22, %v5732_v19  ;;  %v775_v43 = vcombine.high %v753_v29, %v753_v29 }
  0x4a   :  { %2069 = vmatmul.mubr.bf16.vlgmr.msra.gmra.mrb[0].mxu1 %v236_v35  ;;  %v5114_v35 = vcombine.high %v86_v28, %v86_v28  ;;  %v52_v28 = vld [vmem:[%s6158_s1 + $0x80] sm:$0x77] }
  0x4b   :  { %2077 = vmatpush1.bf16.xpose.msra.mxu1 %v5025_v36  ;;  %2108 = vmatprep.mubr.bf16.mxu1 %v235_v37  ;;  %v744_v36 = vrot.slane %v730_v34, %v5732_v19 }
  0x4c   :  { %3629 = vmatmul.mubr.bf16.vlgmr.msra.gmra.mrb[0].mxu0 %v704_v39  ;;  %2116 = vmatprep.subr.bf16.mxu1 %v5028_v40  ;;  %v270_v39 = vrot.slane %v254_v21, %v5732_v19  ;;  %v5035_v40 = vcombine.low %v47_v23, %v47_v23 }
  0x4d   :  { %3637 = vmatpush1.bf16.xpose.msra.mxu0 %v5103_v41  ;;  %3668 = vmatprep.mubr.bf16.mxu0 %v728_v42  ;;  %v746_v37 = vcombine.high %v744_v36, %v744_v36  ;;  %v288_v41 = vcombine.high %v284_v27, %v284_v27  ;;  %v87_v42 = vld [vmem:[%s6158_s1 + $0x198] sm:$0x77] }
  0x4e   :  { %3676 = vmatprep.subr.bf16.mxu0 %v5106_v44  ;;  %v5038_v44 = vcombine.high %v48_v38, %v48_v38  ;;  %v5115_v58 = vcombine.low %v87_v42, %v87_v42 }
  0x4f   :  { %v774_v47 = vrot.slane %v746_v37, %v5732_v19 }
  0x51   :  { %v778_v59 = vcombine.high %v774_v47, %v774_v47 }
  0x56   :  { %2109 = vmatmul.mubr.bf16.vlgmr.msra.gmra.mrb[0].mxu1 %v221_v48  ;;  %v5116_v48 = vcombine.high %v87_v42, %v87_v42  ;;  %v53_v42 = vld [vmem:[%s6158_s1 + $0x88] sm:$0x77] }
  0x57   :  { %2117 = vmatpush1.bf16.xpose.msra.mxu1 %v5027_v49  ;;  %2148 = vmatprep.mubr.bf16.mxu1 %v239_v50  ;;  %v296_v49 = vrot.slane %v19_v45, %v5732_v19 }
  0x58   :  { %3669 = vmatmul.mubr.bf16.vlgmr.msra.gmra.mrb[0].mxu0 %v726_v52  ;;  %2156 = vmatprep.subr.bf16.mxu1 %v5030_v53  ;;  %v286_v52 = vcombine.high %v270_v39, %v270_v39  ;;  %v5037_v53 = vcombine.low %v48_v38, %v48_v38 }
  0x59   :  { %3677 = vmatpush1.bf16.xpose.msra.mxu0 %v5105_v55  ;;  %3708 = vmatprep.mubr.bf16.mxu0 %v725_v56  ;;  %v304_v50 = vcombine.high %v296_v49, %v296_v49  ;;  %v88_v55 = vld [vmem:[%s6158_s1 + $0x1a0] sm:$0x77]  ;;  %v760_v56 = vrot.slane %v744_v36, %v5732_v19 }
  0x5a   :  { %3716 = vmatprep.subr.bf16.mxu0 %v5108_v57  ;;  %v5040_v57 = vcombine.high %v49_v51, %v49_v51  ;;  %v5118_v60 = vcombine.high %v88_v55, %v88_v55  ;;  %v5117_v8 = vcombine.low %v88_v55, %v88_v55  ;;  %v20_v36 = vld [vmem:[%s6157_s0 + $0x20] sm:$0xff]  ;;  %v54_v55 = vld [vmem:[%s6158_s1 + $0x90] sm:$0x77] }
  0x5b   :  { %v326_v54 = vrot.slane %v304_v50, %v5732_v19  ;;  %v776_v6 = vcombine.high %v760_v56, %v760_v56 }
  0x62   :  { %2149 = vmatmul.mubr.bf16.vlgmr.msra.gmra.mrb[0].mxu1 %v237_v61  ;;  %v29_v61 = vld [vmem:[%s6157_s0 + $0x68] sm:$0xff] }
  0x63   :  { %2157 = vmatpush1.bf16.xpose.msra.mxu1 %v5029_v62  ;;  %2188 = vmatprep.mubr.bf16.mxu1 %v277_v63  ;;  %v786_v62 = vrot.slane %v29_v61, %v5732_v19  ;;  %v779_v23 = vcombine.high %v29_v61, %v29_v61 }
  0x64   :  { %3709 = vmatmul.mubr.bf16.vlgmr.msra.gmra.mrb[0].mxu0 %v711_v1  ;;  %2196 = vmatprep.subr.bf16.mxu1 %v5032_v2  ;;  %v312_v1 = vrot.slane %v296_v49, %v5732_v19  ;;  %v5039_v2 = vcombine.low %v49_v51, %v49_v51 }
  0x65   :  { %3717 = vmatpush1.bf16.xpose.msra.mxu0 %v5107_v3  ;;  %3748 = vmatprep.mubr.bf16.mxu0 %v729_v4  ;;  %v794_v63 = vcombine.high %v786_v62, %v786_v62  ;;  %v336_v3 = vcombine.high %v326_v54, %v326_v54  ;;  %v89_v4 = vld [vmem:[%s6158_s1 + $0x1a8] sm:$0x77] }
  0x66   :  { %3756 = vmatprep.subr.bf16.mxu0 %v5110_v5  ;;  %v289_v5 = vcombine.high %v19_v45, %v19_v45  ;;  %v334_v14 = vcombine.high %v312_v1, %v312_v1  ;;  %v5119_v21 = vcombine.low %v89_v4, %v89_v4 }
  0x67   :  { %v816_v9 = vrot.slane %v794_v63, %v5732_v19 }
  0x69   :  { %v826_v22 = vcombine.high %v816_v9, %v816_v9 }
  0x6e   :  { %2189 = vmatmul.mubr.bf16.vlgmr.msra.gmra.mrb[0].mxu1 %v263_v10  ;;  %v5120_v10 = vcombine.high %v89_v4, %v89_v4  ;;  %v55_v4 = vld [vmem:[%s6158_s1 + $0x98] sm:$0x77] }
  0x6f   :  { %2197 = vmatpush1.bf16.xpose.msra.mxu1 %v5031_v11  ;;  %2228 = vmatprep.mubr.bf16.mxu1 %v287_v12  ;;  %v303_v11 = vrot.slane %v289_v5, %v5732_v19 }
  0x70   :  { %3749 = vmatmul.mubr.bf16.vlgmr.msra.gmra.mrb[0].mxu0 %v727_v15  ;;  %2236 = vmatprep.subr.bf16.mxu1 %v5034_v16  ;;  %v5041_v15 = vcombine.low %v50_v0, %v50_v0 }
  0x71   :  { %3757 = vmatpush1.bf16.xpose.msra.mxu0 %v5109_v17  ;;  %3788 = vmatprep.mubr.bf16.mxu0 %v767_v18  ;;  %v305_v12 = vcombine.high %v303_v11, %v303_v11  ;;  %v90_v17 = vld [vmem:[%s6158_s1 + $0x1b0] sm:$0x77]  ;;  %v802_v18 = vrot.slane %v786_v62, %v5732_v19  ;;  %v5050_v62 = vcombine.high %v54_v55, %v54_v55 }
  0x72   :  { %3796 = vmatprep.subr.bf16.mxu0 %v5112_v20  ;;  %v5044_v20 = vcombine.high %v51_v13, %v51_v13  ;;  %v5121_v37 = vcombine.low %v90_v17, %v90_v17 }
  0x73   :  { %v333_v16 = vrot.slane %v305_v12, %v5732_v19  ;;  %v824_v34 = vcombine.high %v802_v18, %v802_v18 }
  0x7a   :  { %2229 = vmatmul.mubr.bf16.vlgmr.msra.gmra.mrb[0].mxu1 %v285_v24  ;;  %v5122_v24 = vcombine.high %v90_v17, %v90_v17  ;;  %v56_v17 = vld [vmem:[%s6158_s1 + $0xa0] sm:$0x77] }
  0x7b   :  { %2237 = vmatpush1.bf16.xpose.msra.mxu1 %v5033_v26  ;;  %2268 = vmatprep.mubr.bf16.mxu1 %v284_v27  ;;  %v793_v26 = vrot.slane %v779_v23, %v5732_v19 }
  0x7c   :  { %3789 = vmatmul.mubr.bf16.vlgmr.msra.gmra.mrb[0].mxu0 %v753_v29  ;;  %2276 = vmatprep.subr.bf16.mxu1 %v5036_v31  ;;  %v319_v29 = vrot.slane %v303_v11, %v5732_v19  ;;  %v5043_v31 = vcombine.low %v51_v13, %v51_v13 }
  0x7d   :  { %3797 = vmatpush1.bf16.xpose.msra.mxu0 %v5111_v32  ;;  %3828 = vmatprep.mubr.bf16.mxu0 %v777_v33  ;;  %v795_v27 = vcombine.high %v793_v26, %v793_v26  ;;  %v337_v32 = vcombine.high %v333_v16, %v333_v16  ;;  %v91_v33 = vld [vmem:[%s6158_s1 + $0x1b8] sm:$0x77] }
  0x7e   :  { %3836 = vmatprep.subr.bf16.mxu0 %v5114_v35  ;;  %v5046_v35 = vcombine.high %v52_v28, %v52_v28  ;;  %v5123_v49 = vcombine.low %v91_v33, %v91_v33 }
  0x7f   :  { %v823_v38 = vrot.slane %v795_v27, %v5732_v19 }
  0x81   :  { %v827_v50 = vcombine.high %v823_v38, %v823_v38 }
  0x86   :  { %2269 = vmatmul.mubr.bf16.vlgmr.msra.gmra.mrb[0].mxu1 %v270_v39  ;;  %v5124_v39 = vcombine.high %v91_v33, %v91_v33  ;;  %v57_v33 = vld [vmem:[%s6158_s1 + $0xa8] sm:$0x77] }
  0x87   :  { %2277 = vmatpush1.bf16.xpose.msra.mxu1 %v5035_v40  ;;  %2308 = vmatprep.mubr.bf16.mxu1 %v288_v41  ;;  %v345_v40 = vrot.slane %v20_v36, %v5732_v19 }
  0x88   :  { %3829 = vmatmul.mubr.bf16.vlgmr.msra.gmra.mrb[0].mxu0 %v775_v43  ;;  %2316 = vmatprep.subr.bf16.mxu1 %v5038_v44  ;;  %v335_v43 = vcombine.high %v319_v29, %v319_v29  ;;  %v5045_v44 = vcombine.low %v52_v28, %v52_v28 }
  0x89   :  { %3837 = vmatpush1.bf16.xpose.msra.mxu0 %v5113_v46  ;;  %3868 = vmatprep.mubr.bf16.mxu0 %v774_v47  ;;  %v353_v41 = vcombine.high %v345_v40, %v345_v40  ;;  %v92_v46 = vld [vmem:[%s6158_s1 + $0x1c0] sm:$0x77]  ;;  %v809_v47 = vrot.slane %v793_v26, %v5732_v19  ;;  %v21_v26 = vld [vmem:[%s6157_s0 + $0x28] sm:$0xff] }
  0x8a   :  { %3876 = vmatprep.subr.bf16.mxu0 %v5116_v48  ;;  %v5048_v48 = vcombine.high %v53_v42, %v53_v42  ;;  %v5126_v51 = vcombine.high %v92_v46, %v92_v46  ;;  %v5125_v63 = vcombine.low %v92_v46, %v92_v46  ;;  %v58_v46 = vld [vmem:[%s6158_s1 + $0xb0] sm:$0x77] }
  0x8b   :  { %v375_v45 = vrot.slane %v353_v41, %v5732_v19  ;;  %v825_v61 = vcombine.high %v809_v47, %v809_v47 }
  0x92   :  { %2309 = vmatmul.mubr.bf16.vlgmr.msra.gmra.mrb[0].mxu1 %v286_v52  ;;  %v30_v52 = vld [vmem:[%s6157_s0 + $0x70] sm:$0xff] }
  0x93   :  { %2317 = vmatpush1.bf16.xpose.msra.mxu1 %v5037_v53  ;;  %2348 = vmatprep.mubr.bf16.mxu1 %v326_v54  ;;  %v835_v53 = vrot.slane %v30_v52, %v5732_v19  ;;  %v828_v13 = vcombine.high %v30_v52, %v30_v52 }
  0x94   :  { %3869 = vmatmul.mubr.bf16.vlgmr.msra.gmra.mrb[0].mxu0 %v760_v56  ;;  %2356 = vmatprep.subr.bf16.mxu1 %v5040_v57  ;;  %v361_v56 = vrot.slane %v345_v40, %v5732_v19  ;;  %v5047_v57 = vcombine.low %v53_v42, %v53_v42 }
  0x95   :  { %3877 = vmatpush1.bf16.xpose.msra.mxu0 %v5115_v58  ;;  %3908 = vmatprep.mubr.bf16.mxu0 %v778_v59  ;;  %v843_v54 = vcombine.high %v835_v53, %v835_v53  ;;  %v385_v58 = vcombine.high %v375_v45, %v375_v45  ;;  %v93_v59 = vld [vmem:[%s6158_s1 + $0x1c8] sm:$0x77] }
  0x96   :  { %3916 = vmatprep.subr.bf16.mxu0 %v5118_v60  ;;  %v338_v60 = vcombine.high %v20_v36, %v20_v36  ;;  %v383_v5 = vcombine.high %v361_v56, %v361_v56  ;;  %v5127_v11 = vcombine.low %v93_v59, %v93_v59 }
  0x97   :  { %v865_v0 = vrot.slane %v843_v54, %v5732_v19 }
  0x99   :  { %v875_v12 = vcombine.high %v865_v0, %v865_v0 }
  0x9e   :  { %2349 = vmatmul.mubr.bf16.vlgmr.msra.gmra.mrb[0].mxu1 %v312_v1  ;;  %v5128_v1 = vcombine.high %v93_v59, %v93_v59  ;;  %v59_v59 = vld [vmem:[%s6158_s1 + $0xb8] sm:$0x77] }
  0x9f   :  { %2357 = vmatpush1.bf16.xpose.msra.mxu1 %v5039_v2  ;;  %2388 = vmatprep.mubr.bf16.mxu1 %v336_v3  ;;  %v352_v2 = vrot.slane %v338_v60, %v5732_v19 }
  0xa0   :  { %3909 = vmatmul.mubr.bf16.vlgmr.msra.gmra.mrb[0].mxu0 %v776_v6  ;;  %2396 = vmatprep.subr.bf16.mxu1 %v5042_v7  ;;  %v5049_v6 = vcombine.low %v54_v55, %v54_v55 }
  0xa1   :  { %3917 = vmatpush1.bf16.xpose.msra.mxu0 %v5117_v8  ;;  %3948 = vmatprep.mubr.bf16.mxu0 %v816_v9  ;;  %v354_v3 = vcombine.high %v352_v2, %v352_v2  ;;  %v94_v8 = vld [vmem:[%s6158_s1 + $0x1d0] sm:$0x77]  ;;  %v851_v9 = vrot.slane %v835_v53, %v5732_v19  ;;  %v5058_v53 = vcombine.high %v58_v46, %v58_v46 }
  0xa2   :  { %3956 = vmatprep.subr.bf16.mxu0 %v5120_v10  ;;  %v5052_v10 = vcombine.high %v55_v4, %v55_v4  ;;  %v5129_v27 = vcombine.low %v94_v8, %v94_v8 }
  0xa3   :  { %v382_v7 = vrot.slane %v354_v3, %v5732_v19  ;;  %v873_v23 = vcombine.high %v851_v9, %v851_v9 }
  0xaa   :  { %2389 = vmatmul.mubr.bf16.vlgmr.msra.gmra.mrb[0].mxu1 %v334_v14  ;;  %v5130_v14 = vcombine.high %v94_v8, %v94_v8  ;;  %v60_v8 = vld [vmem:[%s6158_s1 + $0xc0] sm:$0x77] }
  0xab   :  { %2397 = vmatpush1.bf16.xpose.msra.mxu1 %v5041_v15  ;;  %2428 = vmatprep.mubr.bf16.mxu1 %v333_v16  ;;  %v842_v15 = vrot.slane %v828_v13, %v5732_v19 }
  0xac   :  { %3949 = vmatmul.mubr.bf16.vlgmr.msra.gmra.mrb[0].mxu0 %v802_v18  ;;  %2436 = vmatprep.subr.bf16.mxu1 %v5044_v20  ;;  %v368_v18 = vrot.slane %v352_v2, %v5732_v19  ;;  %v5051_v20 = vcombine.low %v55_v4, %v55_v4 }
  0xad   :  { %3957 = vmatpush1.bf16.xpose.msra.mxu0 %v5119_v21  ;;  %3988 = vmatprep.mubr.bf16.mxu0 %v826_v22  ;;  %v844_v16 = vcombine.high %v842_v15, %v842_v15  ;;  %v386_v21 = vcombine.high %v382_v7, %v382_v7  ;;  %v95_v22 = vld [vmem:[%s6158_s1 + $0x1d8] sm:$0x77] }
  0xae   :  { %3996 = vmatprep.subr.bf16.mxu0 %v5122_v24  ;;  %v5054_v24 = vcombine.high %v56_v17, %v56_v17  ;;  %v5131_v40 = vcombine.low %v95_v22, %v95_v22 }
  0xaf   :  { %v872_v28 = vrot.slane %v844_v16, %v5732_v19 }
  0xb1   :  { %v876_v41 = vcombine.high %v872_v28, %v872_v28 }
  0xb6   :  { %2429 = vmatmul.mubr.bf16.vlgmr.msra.gmra.mrb[0].mxu1 %v319_v29  ;;  %v5132_v29 = vcombine.high %v95_v22, %v95_v22  ;;  %v61_v22 = vld [vmem:[%s6158_s1 + $0xc8] sm:$0x77] }
  0xb7   :  { %2437 = vmatpush1.bf16.xpose.msra.mxu1 %v5043_v31  ;;  %2468 = vmatprep.mubr.bf16.mxu1 %v337_v32  ;;  %v394_v31 = vrot.slane %v21_v26, %v5732_v19 }
  0xb8   :  { %3989 = vmatmul.mubr.bf16.vlgmr.msra.gmra.mrb[0].mxu0 %v824_v34  ;;  %2476 = vmatprep.subr.bf16.mxu1 %v5046_v35  ;;  %v384_v34 = vcombine.high %v368_v18, %v368_v18  ;;  %v5053_v35 = vcombine.low %v56_v17, %v56_v17 }
  0xb9   :  { %3997 = vmatpush1.bf16.xpose.msra.mxu0 %v5121_v37  ;;  %4028 = vmatprep.mubr.bf16.mxu0 %v823_v38  ;;  %v402_v32 = vcombine.high %v394_v31, %v394_v31  ;;  %v96_v37 = vld [vmem:[%s6158_s1 + $0x1e0] sm:$0x77]  ;;  %v858_v38 = vrot.slane %v842_v15, %v5732_v19  ;;  %v22_v15 = vld [vmem:[%s6157_s0 + $0x30] sm:$0xff] }
  0xba   :  { %4036 = vmatprep.subr.bf16.mxu0 %v5124_v39  ;;  %v5056_v39 = vcombine.high %v57_v33, %v57_v33  ;;  %v5134_v42 = vcombine.high %v96_v37, %v96_v37  ;;  %v5133_v54 = vcombine.low %v96_v37, %v96_v37  ;;  %v62_v37 = vld [vmem:[%s6158_s1 + $0xd0] sm:$0x77] }
  0xbb   :  { %v424_v36 = vrot.slane %v402_v32, %v5732_v19  ;;  %v874_v52 = vcombine.high %v858_v38, %v858_v38 }
  0xc2   :  { %2469 = vmatmul.mubr.bf16.vlgmr.msra.gmra.mrb[0].mxu1 %v335_v43  ;;  %v31_v43 = vld [vmem:[%s6157_s0 + $0x78] sm:$0xff] }
  0xc3   :  { %2477 = vmatpush1.bf16.xpose.msra.mxu1 %v5045_v44  ;;  %2508 = vmatprep.mubr.bf16.mxu1 %v375_v45  ;;  %v884_v44 = vrot.slane %v31_v43, %v5732_v19  ;;  %v877_v4 = vcombine.high %v31_v43, %v31_v43 }
  0xc4   :  { %4029 = vmatmul.mubr.bf16.vlgmr.msra.gmra.mrb[0].mxu0 %v809_v47  ;;  %2516 = vmatprep.subr.bf16.mxu1 %v5048_v48  ;;  %v410_v47 = vrot.slane %v394_v31, %v5732_v19  ;;  %v5055_v48 = vcombine.low %v57_v33, %v57_v33 }
  0xc5   :  { %4037 = vmatpush1.bf16.xpose.msra.mxu0 %v5123_v49  ;;  %4068 = vmatprep.mubr.bf16.mxu0 %v827_v50  ;;  %v892_v45 = vcombine.high %v884_v44, %v884_v44  ;;  %v434_v49 = vcombine.high %v424_v36, %v424_v36  ;;  %v97_v50 = vld [vmem:[%s6158_s1 + $0x1e8] sm:$0x77] }
  0xc6   :  { %4076 = vmatprep.subr.bf16.mxu0 %v5126_v51  ;;  %v387_v51 = vcombine.high %v21_v26, %v21_v26  ;;  %v432_v60 = vcombine.high %v410_v47, %v410_v47  ;;  %v5135_v2 = vcombine.low %v97_v50, %v97_v50 }
  0xc7   :  { %v914_v55 = vrot.slane %v892_v45, %v5732_v19 }
  0xc9   :  { %v924_v3 = vcombine.high %v914_v55, %v914_v55 }
  0xce   :  { %2509 = vmatmul.mubr.bf16.vlgmr.msra.gmra.mrb[0].mxu1 %v361_v56  ;;  %v5136_v56 = vcombine.high %v97_v50, %v97_v50  ;;  %v63_v50 = vld [vmem:[%s6158_s1 + $0xd8] sm:$0x77] }
  0xcf   :  { %2517 = vmatpush1.bf16.xpose.msra.mxu1 %v5047_v57  ;;  %2548 = vmatprep.mubr.bf16.mxu1 %v385_v58  ;;  %v401_v57 = vrot.slane %v387_v51, %v5732_v19 }
  0xd0   :  { %4069 = vmatmul.mubr.bf16.vlgmr.msra.gmra.mrb[0].mxu0 %v825_v61  ;;  %2556 = vmatprep.subr.bf16.mxu1 %v5050_v62  ;;  %v5057_v61 = vcombine.low %v58_v46, %v58_v46 }
  0xd1   :  { %4077 = vmatpush1.bf16.xpose.msra.mxu0 %v5125_v63  ;;  %4108 = vmatprep.mubr.bf16.mxu0 %v865_v0  ;;  %v403_v58 = vcombine.high %v401_v57, %v401_v57  ;;  %v98_v63 = vld [vmem:[%s6158_s1 + $0x1f0] sm:$0x77]  ;;  %v900_v0 = vrot.slane %v884_v44, %v5732_v19  ;;  %v5066_v44 = vcombine.high %v62_v37, %v62_v37 }
  0xd2   :  { %4116 = vmatprep.subr.bf16.mxu0 %v5128_v1  ;;  %v5060_v1 = vcombine.high %v59_v59, %v59_v59  ;;  %v5137_v16 = vcombine.low %v98_v63, %v98_v63 }
  0xd3   :  { %v431_v62 = vrot.slane %v403_v58, %v5732_v19  ;;  %v922_v13 = vcombine.high %v900_v0, %v900_v0 }
  0xda   :  { %2549 = vmatmul.mubr.bf16.vlgmr.msra.gmra.mrb[0].mxu1 %v383_v5  ;;  %v5138_v5 = vcombine.high %v98_v63, %v98_v63  ;;  %v64_v63 = vld [vmem:[%s6158_s1 + $0xe0] sm:$0x77] }
  0xdb   :  { %2557 = vmatpush1.bf16.xpose.msra.mxu1 %v5049_v6  ;;  %2588 = vmatprep.mubr.bf16.mxu1 %v382_v7  ;;  %v891_v6 = vrot.slane %v877_v4, %v5732_v19 }
  0xdc   :  { %4109 = vmatmul.mubr.bf16.vlgmr.msra.gmra.mrb[0].mxu0 %v851_v9  ;;  %2596 = vmatprep.subr.bf16.mxu1 %v5052_v10  ;;  %v417_v9 = vrot.slane %v401_v57, %v5732_v19  ;;  %v5059_v10 = vcombine.low %v59_v59, %v59_v59 }
  0xdd   :  { %4117 = vmatpush1.bf16.xpose.msra.mxu0 %v5127_v11  ;;  %4148 = vmatprep.mubr.bf16.mxu0 %v875_v12  ;;  %v893_v7 = vcombine.high %v891_v6, %v891_v6  ;;  %v435_v11 = vcombine.high %v431_v62, %v431_v62  ;;  %v99_v12 = vld [vmem:[%s6158_s1 + $0x1f8] sm:$0x77] }
  0xde   :  { %4156 = vmatprep.subr.bf16.mxu0 %v5130_v14  ;;  %v5062_v14 = vcombine.high %v60_v8, %v60_v8  ;;  %v5139_v31 = vcombine.low %v99_v12, %v99_v12 }
  0xdf   :  { %v921_v17 = vrot.slane %v893_v7, %v5732_v19 }
  0xe1   :  { %v925_v32 = vcombine.high %v921_v17, %v921_v17 }
  0xe6   :  { %2589 = vmatmul.mubr.bf16.vlgmr.msra.gmra.mrb[0].mxu1 %v368_v18  ;;  %v5140_v18 = vcombine.high %v99_v12, %v99_v12  ;;  %v65_v12 = vld [vmem:[%s6158_s1 + $0xe8] sm:$0x77] }
  0xe7   :  { %2597 = vmatpush1.bf16.xpose.msra.mxu1 %v5051_v20  ;;  %2628 = vmatprep.mubr.bf16.mxu1 %v386_v21  ;;  %v443_v20 = vrot.slane %v22_v15, %v5732_v19 }
  0xe8   :  { %4149 = vmatmul.mubr.bf16.vlgmr.msra.gmra.mrb[0].mxu0 %v873_v23  ;;  %2636 = vmatprep.subr.bf16.mxu1 %v5054_v24  ;;  %v433_v23 = vcombine.high %v417_v9, %v417_v9  ;;  %v5061_v24 = vcombine.low %v60_v8, %v60_v8 }
  0xe9   :  { %4157 = vmatpush1.bf16.xpose.msra.mxu0 %v5129_v27  ;;  %4188 = vmatprep.mubr.bf16.mxu0 %v872_v28  ;;  %v451_v21 = vcombine.high %v443_v20, %v443_v20  ;;  %v100_v27 = vld [vmem:[%s6158_s1 + $0x200] sm:$0x77]  ;;  %v907_v28 = vrot.slane %v891_v6, %v5732_v19  ;;  %v23_v6 = vld [vmem:[%s6157_s0 + $0x38] sm:$0xff] }
  0xea   :  { %4196 = vmatprep.subr.bf16.mxu0 %v5132_v29  ;;  %v5064_v29 = vcombine.high %v61_v22, %v61_v22  ;;  %v5142_v33 = vcombine.high %v100_v27, %v100_v27  ;;  %v5141_v45 = vcombine.low %v100_v27, %v100_v27  ;;  %v66_v27 = vld [vmem:[%s6158_s1 + $0xf0] sm:$0x77] }
  0xeb   :  { %v473_v26 = vrot.slane %v451_v21, %v5732_v19  ;;  %v923_v43 = vcombine.high %v907_v28, %v907_v28 }
  0xf2   :  { %2629 = vmatmul.mubr.bf16.vlgmr.msra.gmra.mrb[0].mxu1 %v384_v34  ;;  %v32_v34 = vld [vmem:[%s6157_s0 + $0x80] sm:$0xff] }
  0xf3   :  { %2637 = vmatpush1.bf16.xpose.msra.mxu1 %v5053_v35  ;;  %2668 = vmatprep.mubr.bf16.mxu1 %v424_v36  ;;  %v933_v35 = vrot.slane %v32_v34, %v5732_v19  ;;  %v926_v59 = vcombine.high %v32_v34, %v32_v34 }
  0xf4   :  { %4189 = vmatmul.mubr.bf16.vlgmr.msra.gmra.mrb[0].mxu0 %v858_v38  ;;  %2676 = vmatprep.subr.bf16.mxu1 %v5056_v39  ;;  %v459_v38 = vrot.slane %v443_v20, %v5732_v19  ;;  %v5063_v39 = vcombine.low %v61_v22, %v61_v22 }
  0xf5   :  { %4197 = vmatpush1.bf16.xpose.msra.mxu0 %v5131_v40  ;;  %4228 = vmatprep.mubr.bf16.mxu0 %v876_v41  ;;  %v941_v36 = vcombine.high %v933_v35, %v933_v35  ;;  %v483_v40 = vcombine.high %v473_v26, %v473_v26  ;;  %v101_v41 = vld [vmem:[%s6158_s1 + $0x208] sm:$0x77] }
  0xf6   :  { %4236 = vmatprep.subr.bf16.mxu0 %v5134_v42  ;;  %v436_v42 = vcombine.high %v22_v15, %v22_v15  ;;  %v481_v51 = vcombine.high %v459_v38, %v459_v38  ;;  %v5143_v57 = vcombine.low %v101_v41, %v101_v41 }
  0xf7   :  { %v963_v46 = vrot.slane %v941_v36, %v5732_v19 }
  0xf9   :  { %v973_v58 = vcombine.high %v963_v46, %v963_v46 }
  0xfe   :  { %2669 = vmatmul.mubr.bf16.vlgmr.msra.gmra.mrb[0].mxu1 %v410_v47  ;;  %v5144_v47 = vcombine.high %v101_v41, %v101_v41  ;;  %v67_v41 = vld [vmem:[%s6158_s1 + $0xf8] sm:$0x77] }
  0xff   :  { %2677 = vmatpush1.bf16.xpose.msra.mxu1 %v5055_v48  ;;  %2708 = vmatprep.mubr.bf16.mxu1 %v434_v49  ;;  %v450_v48 = vrot.slane %v436_v42, %v5732_v19 }
 0x100   :  { %4229 = vmatmul.mubr.bf16.vlgmr.msra.gmra.mrb[0].mxu0 %v874_v52  ;;  %2716 = vmatprep.subr.bf16.mxu1 %v5058_v53  ;;  %v5065_v52 = vcombine.low %v62_v37, %v62_v37 }
 0x101   :  { %4237 = vmatpush1.bf16.xpose.msra.mxu0 %v5133_v54  ;;  %4268 = vmatprep.mubr.bf16.mxu0 %v914_v55  ;;  %v452_v49 = vcombine.high %v450_v48, %v450_v48  ;;  %v102_v54 = vld [vmem:[%s6158_s1 + $0x210] sm:$0x77]  ;;  %v949_v55 = vrot.slane %v933_v35, %v5732_v19  ;;  %v5074_v35 = vcombine.high %v66_v27, %v66_v27 }
 0x102   :  { %4276 = vmatprep.subr.bf16.mxu0 %v5136_v56  ;;  %v5068_v56 = vcombine.high %v63_v50, %v63_v50  ;;  %v5145_v7 = vcombine.low %v102_v54, %v102_v54 }
 0x103   :  { %v480_v53 = vrot.slane %v452_v49, %v5732_v19  ;;  %v971_v4 = vcombine.high %v949_v55, %v949_v55 }
 0x10a   :  { %2709 = vmatmul.mubr.bf16.vlgmr.msra.gmra.mrb[0].mxu1 %v432_v60  ;;  %v5146_v60 = vcombine.high %v102_v54, %v102_v54  ;;  %v68_v54 = vld [vmem:[%s6158_s1 + $0x100] sm:$0x77] }
 0x10b   :  { %2717 = vmatpush1.bf16.xpose.msra.mxu1 %v5057_v61  ;;  %2748 = vmatprep.mubr.bf16.mxu1 %v431_v62  ;;  %v940_v61 = vrot.slane %v926_v59, %v5732_v19 }
 0x10c   :  { %4269 = vmatmul.mubr.bf16.vlgmr.msra.gmra.mrb[0].mxu0 %v900_v0  ;;  %2756 = vmatprep.subr.bf16.mxu1 %v5060_v1  ;;  %v466_v0 = vrot.slane %v450_v48, %v5732_v19  ;;  %v5067_v1 = vcombine.low %v63_v50, %v63_v50 }
 0x10d   :  { %4277 = vmatpush1.bf16.xpose.msra.mxu0 %v5135_v2  ;;  %4308 = vmatprep.mubr.bf16.mxu0 %v924_v3  ;;  %v942_v62 = vcombine.high %v940_v61, %v940_v61  ;;  %v484_v2 = vcombine.high %v480_v53, %v480_v53  ;;  %v103_v3 = vld [vmem:[%s6158_s1 + $0x218] sm:$0x77] }
 0x10e   :  { %4316 = vmatprep.subr.bf16.mxu0 %v5138_v5  ;;  %v5070_v5 = vcombine.high %v64_v63, %v64_v63  ;;  %v5147_v20 = vcombine.low %v103_v3, %v103_v3 }
 0x10f   :  { %v970_v8 = vrot.slane %v942_v62, %v5732_v19 }
 0x111   :  { %v974_v21 = vcombine.high %v970_v8, %v970_v8 }
 0x116   :  { %2749 = vmatmul.mubr.bf16.vlgmr.msra.gmra.mrb[0].mxu1 %v417_v9  ;;  %v5148_v9 = vcombine.high %v103_v3, %v103_v3  ;;  %v69_v3 = vld [vmem:[%s6158_s1 + $0x108] sm:$0x77] }
 0x117   :  { %2757 = vmatpush1.bf16.xpose.msra.mxu1 %v5059_v10  ;;  %2788 = vmatprep.mubr.bf16.mxu1 %v435_v11  ;;  %v492_v10 = vrot.slane %v23_v6, %v5732_v19 }
 0x118   :  { %4309 = vmatmul.mubr.bf16.vlgmr.msra.gmra.mrb[0].mxu0 %v922_v13  ;;  %2796 = vmatprep.subr.bf16.mxu1 %v5062_v14  ;;  %v482_v13 = vcombine.high %v466_v0, %v466_v0  ;;  %v5069_v14 = vcombine.low %v64_v63, %v64_v63 }
 0x119   :  { %4317 = vmatpush1.bf16.xpose.msra.mxu0 %v5137_v16  ;;  %4348 = vmatprep.mubr.bf16.mxu0 %v921_v17  ;;  %v500_v11 = vcombine.high %v492_v10, %v492_v10  ;;  %v104_v16 = vld [vmem:[%s6158_s1 + $0x220] sm:$0x77]  ;;  %v956_v17 = vrot.slane %v940_v61, %v5732_v19 }
 0x11a   :  { %4356 = vmatprep.subr.bf16.mxu0 %v5140_v18  ;;  %v5072_v18 = vcombine.high %v65_v12, %v65_v12  ;;  %v5150_v22 = vcombine.high %v104_v16, %v104_v16  ;;  %v5149_v36 = vcombine.low %v104_v16, %v104_v16  ;;  %v24_v61 = vld [vmem:[%s6157_s0 + $0x40] sm:$0xff]  ;;  %v70_v16 = vld [vmem:[%s6158_s1 + $0x110] sm:$0x77] }
 0x11b   :  { %v522_v15 = vrot.slane %v500_v11, %v5732_v19  ;;  %v972_v34 = vcombine.high %v956_v17, %v956_v17 }
 0x122   :  { %2789 = vmatmul.mubr.bf16.vlgmr.msra.gmra.mrb[0].mxu1 %v433_v23  ;;  %v33_v23 = vld [vmem:[%s6157_s0 + $0x88] sm:$0xff] }
 0x123   :  { %2797 = vmatpush1.bf16.xpose.msra.mxu1 %v5061_v24  ;;  %2828 = vmatprep.mubr.bf16.mxu1 %v473_v26  ;;  %v982_v24 = vrot.slane %v33_v23, %v5732_v19  ;;  %v975_v50 = vcombine.high %v33_v23, %v33_v23 }
 0x124   :  { %4349 = vmatmul.mubr.bf16.vlgmr.msra.gmra.mrb[0].mxu0 %v907_v28  ;;  %2836 = vmatprep.subr.bf16.mxu1 %v5064_v29  ;;  %v508_v28 = vrot.slane %v492_v10, %v5732_v19  ;;  %v5071_v29 = vcombine.low %v65_v12, %v65_v12 }
 0x125   :  { %4357 = vmatpush1.bf16.xpose.msra.mxu0 %v5139_v31  ;;  %4388 = vmatprep.mubr.bf16.mxu0 %v925_v32  ;;  %v990_v26 = vcombine.high %v982_v24, %v982_v24  ;;  %v532_v31 = vcombine.high %v522_v15, %v522_v15  ;;  %v105_v32 = vld [vmem:[%s6158_s1 + $0x228] sm:$0x77] }
 0x126   :  { %4396 = vmatprep.subr.bf16.mxu0 %v5142_v33  ;;  %v485_v33 = vcombine.high %v23_v6, %v23_v6  ;;  %v530_v42 = vcombine.high %v508_v28, %v508_v28  ;;  %v5151_v48 = vcombine.low %v105_v32, %v105_v32 }
 0x127   :  { %v1012_v37 = vrot.slane %v990_v26, %v5732_v19 }
 0x129   :  { %v1022_v49 = vcombine.high %v1012_v37, %v1012_v37 }
 0x12e   :  { %2829 = vmatmul.mubr.bf16.vlgmr.msra.gmra.mrb[0].mxu1 %v459_v38  ;;  %v5152_v38 = vcombine.high %v105_v32, %v105_v32  ;;  %v71_v32 = vld [vmem:[%s6158_s1 + $0x118] sm:$0x77] }
 0x12f   :  { %2837 = vmatpush1.bf16.xpose.msra.mxu1 %v5063_v39  ;;  %2868 = vmatprep.mubr.bf16.mxu1 %v483_v40  ;;  %v499_v39 = vrot.slane %v485_v33, %v5732_v19 }
 0x130   :  { %4389 = vmatmul.mubr.bf16.vlgmr.msra.gmra.mrb[0].mxu0 %v923_v43  ;;  %2876 = vmatprep.subr.bf16.mxu1 %v5066_v44  ;;  %v5073_v43 = vcombine.low %v66_v27, %v66_v27 }
 0x131   :  { %4397 = vmatpush1.bf16.xpose.msra.mxu0 %v5141_v45  ;;  %4428 = vmatprep.mubr.bf16.mxu0 %v963_v46  ;;  %v501_v40 = vcombine.high %v499_v39, %v499_v39  ;;  %v106_v45 = vld [vmem:[%s6158_s1 + $0x230] sm:$0x77]  ;;  %v998_v46 = vrot.slane %v982_v24, %v5732_v19  ;;  %v5082_v24 = vcombine.high %v70_v16, %v70_v16 }
 0x132   :  { %4436 = vmatprep.subr.bf16.mxu0 %v5144_v47  ;;  %v5076_v47 = vcombine.high %v67_v41, %v67_v41  ;;  %v5153_v62 = vcombine.low %v106_v45, %v106_v45 }
 0x133   :  { %v529_v44 = vrot.slane %v501_v40, %v5732_v19  ;;  %v1020_v59 = vcombine.high %v998_v46, %v998_v46 }
 0x13a   :  { %2869 = vmatmul.mubr.bf16.vlgmr.msra.gmra.mrb[0].mxu1 %v481_v51  ;;  %v5154_v51 = vcombine.high %v106_v45, %v106_v45  ;;  %v72_v45 = vld [vmem:[%s6158_s1 + $0x120] sm:$0x77] }
 0x13b   :  { %2877 = vmatpush1.bf16.xpose.msra.mxu1 %v5065_v52  ;;  %2908 = vmatprep.mubr.bf16.mxu1 %v480_v53  ;;  %v989_v52 = vrot.slane %v975_v50, %v5732_v19 }
 0x13c   :  { %4429 = vmatmul.mubr.bf16.vlgmr.msra.gmra.mrb[0].mxu0 %v949_v55  ;;  %2916 = vmatprep.subr.bf16.mxu1 %v5068_v56  ;;  %v515_v55 = vrot.slane %v499_v39, %v5732_v19  ;;  %v5075_v56 = vcombine.low %v67_v41, %v67_v41 }
 0x13d   :  { %4437 = vmatpush1.bf16.xpose.msra.mxu0 %v5143_v57  ;;  %4468 = vmatprep.mubr.bf16.mxu0 %v973_v58  ;;  %v991_v53 = vcombine.high %v989_v52, %v989_v52  ;;  %v533_v57 = vcombine.high %v529_v44, %v529_v44  ;;  %v107_v58 = vld [vmem:[%s6158_s1 + $0x238] sm:$0x77] }
 0x13e   :  { %4476 = vmatprep.subr.bf16.mxu0 %v5146_v60  ;;  %v5078_v60 = vcombine.high %v68_v54, %v68_v54  ;;  %v5155_v10 = vcombine.low %v107_v58, %v107_v58 }
 0x13f   :  { %v1019_v63 = vrot.slane %v991_v53, %v5732_v19 }
 0x141   :  { %v1023_v11 = vcombine.high %v1019_v63, %v1019_v63 }
 0x146   :  { %2909 = vmatmul.mubr.bf16.vlgmr.msra.gmra.mrb[0].mxu1 %v466_v0  ;;  %v5156_v0 = vcombine.high %v107_v58, %v107_v58 }
 0x147   :  { %2917 = vmatpush1.bf16.xpose.msra.mxu1 %v5067_v1  ;;  %2948 = vmatprep.mubr.bf16.mxu1 %v484_v2  ;;  %v541_v1 = vrot.slane %v24_v61, %v5732_v19 }
 0x148   :  { %4469 = vmatmul.mubr.bf16.vlgmr.msra.gmra.mrb[0].mxu0 %v971_v4  ;;  %2956 = vmatprep.subr.bf16.mxu1 %v5070_v5  ;;  %v531_v4 = vcombine.high %v515_v55, %v515_v55  ;;  %v5077_v5 = vcombine.low %v68_v54, %v68_v54 }
 0x149   :  { %4477 = vmatpush1.bf16.xpose.msra.mxu0 %v5145_v7  ;;  %4508 = vmatprep.mubr.bf16.mxu0 %v970_v8  ;;  %v549_v2 = vcombine.high %v541_v1, %v541_v1  ;;  %v108_v7 = vld [vmem:[%s6158_s1 + $0x240] sm:$0x77]  ;;  %v1005_v8 = vrot.slane %v989_v52, %v5732_v19 }
 0x14a   :  { %4516 = vmatprep.subr.bf16.mxu0 %v5148_v9  ;;  %v5080_v9 = vcombine.high %v69_v3, %v69_v3  ;;  %v5158_v12 = vcombine.high %v108_v7, %v108_v7  ;;  %v5157_v26 = vcombine.low %v108_v7, %v108_v7 }
 0x14b   :  { %v571_v6 = vrot.slane %v549_v2, %v5732_v19  ;;  %v1021_v23 = vcombine.high %v1005_v8, %v1005_v8 }
 0x152   :  { %2949 = vmatmul.mubr.bf16.vlgmr.msra.gmra.mrb[0].mxu1 %v482_v13  ;;  %v34_v13 = vld [vmem:[%s6157_s0 + $0x90] sm:$0xff] }
 0x153   :  { %2957 = vmatpush1.bf16.xpose.msra.mxu1 %v5069_v14  ;;  %2988 = vmatprep.mubr.bf16.mxu1 %v522_v15  ;;  %v1031_v14 = vrot.slane %v34_v13, %v5732_v19  ;;  %v1024_v41 = vcombine.high %v34_v13, %v34_v13 }
 0x154   :  { %4509 = vmatmul.mubr.bf16.vlgmr.msra.gmra.mrb[0].mxu0 %v956_v17  ;;  %2996 = vmatprep.subr.bf16.mxu1 %v5072_v18  ;;  %v557_v17 = vrot.slane %v541_v1, %v5732_v19  ;;  %v5079_v18 = vcombine.low %v69_v3, %v69_v3  ;;  %v35_v3 = vld [vmem:[%s6157_s0 + $0x98] sm:$0x3f] }
 0x155   :  { %4517 = vmatpush1.bf16.xpose.msra.mxu0 %v5147_v20  ;;  %4548 = vmatprep.mubr.bf16.mxu0 %v974_v21  ;;  %v1039_v15 = vcombine.high %v1031_v14, %v1031_v14  ;;  %v581_v20 = vcombine.high %v571_v6, %v571_v6  ;;  %v109_v21 = vld [vmem:[%s6158_s1 + $0x248] sm:$0x77] }
 0x156   :  { %4556 = vmatprep.subr.bf16.mxu0 %v5150_v22  ;;  %v534_v22 = vcombine.high %v24_v61, %v24_v61  ;;  %v579_v33 = vcombine.high %v557_v17, %v557_v17  ;;  %v5159_v39 = vcombine.low %v109_v21, %v109_v21  ;;  %v112_v61 = vld [vmem:[%s6158_s1 + $0x260] sm:$0x77] }
 0x157   :  { %v1061_v27 = vrot.slane %v1039_v15, %v5732_v19  ;;  %v5166_v2 = vcombine.high %v112_v61, %v112_v61  ;;  %v5165_v13 = vcombine.low %v112_v61, %v112_v61 }
 0x159   :  { %v1071_v40 = vcombine.high %v1061_v27, %v1061_v27 }
 0x15e   :  { %2989 = vmatmul.mubr.bf16.vlgmr.msra.gmra.mrb[0].mxu1 %v508_v28  ;;  %v5160_v28 = vcombine.high %v109_v21, %v109_v21  ;;  %v1073_v21 = vcombine.high %v35_v3, %v35_v3 }
 0x15f   :  { %2997 = vmatpush1.bf16.xpose.msra.mxu1 %v5071_v29  ;;  %3028 = vmatprep.mubr.bf16.mxu1 %v532_v31  ;;  %v548_v29 = vrot.slane %v534_v22, %v5732_v19 }
 0x160   :  { %4549 = vmatmul.mubr.bf16.vlgmr.msra.gmra.mrb[0].mxu0 %v972_v34  ;;  %3036 = vmatprep.subr.bf16.mxu1 %v5074_v35  ;;  %v5081_v34 = vcombine.low %v70_v16, %v70_v16 }
 0x161   :  { %4557 = vmatpush1.bf16.xpose.msra.mxu0 %v5149_v36  ;;  %4588 = vmatprep.mubr.bf16.mxu0 %v1012_v37  ;;  %v550_v31 = vcombine.high %v548_v29, %v548_v29  ;;  %v110_v36 = vld [vmem:[%s6158_s1 + $0x250] sm:$0x77]  ;;  %v1047_v37 = vrot.slane %v1031_v14, %v5732_v19 }
 0x162   :  { %4596 = vmatprep.subr.bf16.mxu0 %v5152_v38  ;;  %v5084_v38 = vcombine.high %v71_v32, %v71_v32  ;;  %v5161_v52 = vcombine.low %v110_v36, %v110_v36 }
 0x163   :  { %v578_v35 = vrot.slane %v550_v31, %v5732_v19  ;;  %v1069_v50 = vcombine.high %v1047_v37, %v1047_v37 }
 0x16a   :  { %3029 = vmatmul.mubr.bf16.vlgmr.msra.gmra.mrb[0].mxu1 %v530_v42  ;;  %v5162_v42 = vcombine.high %v110_v36, %v110_v36  ;;  %v5012_v36 = vld [vmem:[%s6159_s2] ss:$0 sm:$0xff] }
 0x16b   :  { %3037 = vmatpush1.bf16.xpose.msra.mxu1 %v5073_v43  ;;  %3068 = vmatprep.mubr.bf16.mxu1 %v529_v44  ;;  %v1038_v43 = vrot.slane %v1024_v41, %v5732_v19 }
 0x16c   :  { %4589 = vmatmul.mubr.bf16.vlgmr.msra.gmra.mrb[0].mxu0 %v998_v46  ;;  %3076 = vmatprep.subr.bf16.mxu1 %v5076_v47  ;;  %v564_v46 = vrot.slane %v548_v29, %v5732_v19  ;;  %v5083_v47 = vcombine.low %v71_v32, %v71_v32 }
 0x16d   :  { %4597 = vmatpush1.bf16.xpose.msra.mxu0 %v5151_v48  ;;  %4628 = vmatprep.mubr.bf16.mxu0 %v1022_v49  ;;  %v1040_v44 = vcombine.high %v1038_v43, %v1038_v43  ;;  %v582_v48 = vcombine.high %v578_v35, %v578_v35  ;;  %v111_v49 = vld [vmem:[%s6158_s1 + $0x258] sm:$0x77] }
 0x16e   :  { %4636 = vmatprep.subr.bf16.mxu0 %v5154_v51  ;;  %v5086_v51 = vcombine.high %v72_v45, %v72_v45  ;;  %v5164_v54 = vcombine.high %v111_v49, %v111_v49  ;;  %v580_v58 = vcombine.high %v564_v46, %v564_v46 }
 0x16f   :  { %v1068_v53 = vrot.slane %v1040_v44, %v5732_v19 }
 0x171   :  { %v1072_v1 = vcombine.high %v1068_v53, %v1068_v53 }
 0x176   :  { %3069 = vmatmul.mubr.bf16.vlgmr.msra.gmra.mrb[0].mxu1 %v515_v55  ;;  %v5664_v55 = vld.sshfl [vmem:[%s6157_s0 + $0x48] sm:$0xff pattern:$0x75316420] }
 0x177   :  { %3077 = vmatpush1.bf16.xpose.msra.mxu1 %v5075_v56  ;;  %3108 = vmatprep.mubr.bf16.mxu1 %v533_v57  ;;  %v598_v56 = vcombine.high %v5664_v55, %v5664_v55  ;;  %v73_v57 = vld [vmem:[%s6158_s1 + $0x128] sm:$0x77]  ;;  %v606_v7 = vrot.slane %v5664_v55, %v5732_v19 }
 0x178   :  { %4629 = vmatmul.mubr.bf16.vlgmr.msra.gmra.mrb[0].mxu0 %v1020_v59  ;;  %3116 = vmatprep.subr.bf16.mxu1 %v5078_v60  ;;  %v5085_v59 = vcombine.low %v72_v45, %v72_v45 }
 0x179   :  { %4637 = vmatpush1.bf16.xpose.msra.mxu0 %v5153_v62  ;;  %4668 = vmatprep.mubr.bf16.mxu0 %v1019_v63  ;;  %v620_v60 = vrot.slane %v598_v56, %v5732_v19  ;;  %v1054_v62 = vrot.slane %v1038_v43, %v5732_v19  ;;  %v5088_v63 = vcombine.high %v73_v57, %v73_v57 }
 0x17a   :  { %4676 = vmatprep.subr.bf16.mxu0 %v5156_v0  ;;  %v5163_v0 = vcombine.low %v111_v49, %v111_v49  ;;  %v628_v16 = vcombine.high %v606_v7, %v606_v7 }
 0x182   :  { %3109 = vmatmul.mubr.bf16.vlgmr.msra.gmra.mrb[0].mxu1 %v531_v4  ;;  %v1080_v4 = vrot.slane %v35_v3, %v5732_v19 }
 0x183   :  { %3117 = vmatpush1.bf16.xpose.msra.mxu1 %v5077_v5  ;;  %3148 = vmatprep.mubr.bf16.mxu1 %v571_v6  ;;  %v74_v6 = vld [vmem:[%s6158_s1 + $0x130] sm:$0x77] }
 0x184   :  { %4669 = vmatmul.mubr.bf16.vlgmr.msra.gmra.mrb[0].mxu0 %v1005_v8  ;;  %3156 = vmatprep.subr.bf16.mxu1 %v5080_v9  ;;  %v1088_v5 = vcombine.high %v1080_v4, %v1080_v4  ;;  %v5087_v8 = vcombine.low %v73_v57, %v73_v57  ;;  %v630_v9 = vcombine.high %v620_v60, %v620_v60 }
 0x185   :  { %4677 = vmatpush1.bf16.xpose.msra.mxu0 %v5155_v10  ;;  %4708 = vmatprep.mubr.bf16.mxu0 %v1023_v11  ;;  %v113_v10 = vld [vmem:[%s6158_s1 + $0x268] sm:$0x77]  ;;  %v1070_v11 = vcombine.high %v1054_v62, %v1054_v62 }
 0x186   :  { %4716 = vmatprep.subr.bf16.mxu0 %v5158_v12  ;;  %v5090_v12 = vcombine.high %v74_v6, %v74_v6  ;;  %v1110_v14 = vrot.slane %v1088_v5, %v5732_v19  ;;  %v5168_v15 = vcombine.high %v113_v10, %v113_v10  ;;  %v5167_v22 = vcombine.low %v113_v10, %v113_v10 }
 0x18e   :  { %3149 = vmatmul.mubr.bf16.vlgmr.msra.gmra.mrb[0].mxu1 %v557_v17  ;;  %v5089_v17 = vcombine.low %v74_v6, %v74_v6 }
 0x18f   :  { %3157 = vmatpush1.bf16.xpose.msra.mxu1 %v5079_v18  ;;  %3188 = vmatprep.mubr.bf16.mxu1 %v581_v20  ;;  %v114_v18 = vld [vmem:[%s6158_s1 + $0x270] sm:$0x77]  ;;  %v1096_v20 = vrot.slane %v1080_v4, %v5732_v19 }
 0x190   :  { %4709 = vmatmul.mubr.bf16.vlgmr.msra.gmra.mrb[0].mxu0 %v1021_v23  ;;  %3196 = vmatprep.subr.bf16.mxu1 %v5082_v24  ;;  %v1119_v23 = vcombine.high %v1110_v14, %v1110_v14  ;;  %v5170_v24 = vcombine.high %v114_v18, %v114_v18  ;;  %v5169_v29 = vcombine.low %v114_v18, %v114_v18 }
 0x191   :  { %4717 = vmatpush1.bf16.xpose.msra.mxu0 %v5157_v26  ;;  %4748 = vmatprep.mubr.bf16.mxu0 %v1061_v27  ;;  %v1087_v26 = vrot.slane %v1073_v21, %v5732_v19 }
 0x192   :  { %4756 = vmatprep.subr.bf16.mxu0 %v5160_v28  ;;  %v1118_v28 = vcombine.high %v1096_v20, %v1096_v20 }
 0x193   :  { %v1089_v27 = vcombine.high %v1087_v26, %v1087_v26  ;;  %v1103_v32 = vrot.slane %v1087_v26, %v5732_v19 }
 0x195   :  { %v1117_v31 = vrot.slane %v1089_v27, %v5732_v19 }
 0x19a   :  { %3189 = vmatmul.mubr.bf16.vlgmr.msra.gmra.mrb[0].mxu1 %v579_v33 }
 0x19b   :  { %3197 = vmatpush1.bf16.xpose.msra.mxu1 %v5081_v34  ;;  %3228 = vmatprep.mubr.bf16.mxu1 %v578_v35 }
 0x19c   :  { %4749 = vmatmul.mubr.bf16.vlgmr.msra.gmra.mrb[0].mxu0 %v1047_v37  ;;  %3236 = vmatprep.subr.bf16.mxu1 %v5084_v38 }
 0x19d   :  { %4757 = vmatpush1.bf16.xpose.msra.mxu0 %v5159_v39  ;;  %4788 = vmatprep.mubr.bf16.mxu0 %v1071_v40 }
 0x19e   :  { %4796 = vmatprep.subr.bf16.mxu0 %v5162_v42 }
 0x1a6   :  { %3229 = vmatmul.mubr.bf16.vlgmr.msra.gmra.mrb[0].mxu1 %v564_v46 }
 0x1a7   :  { %3237 = vmatpush1.bf16.xpose.msra.mxu1 %v5083_v47  ;;  %3268 = vmatprep.mubr.bf16.mxu1 %v582_v48 }
 0x1a8   :  { %4789 = vmatmul.mubr.bf16.vlgmr.msra.gmra.mrb[0].mxu0 %v1069_v50  ;;  %3276 = vmatprep.subr.bf16.mxu1 %v5086_v51 }
 0x1a9   :  { %4797 = vmatpush1.bf16.xpose.msra.mxu0 %v5161_v52  ;;  %4828 = vmatprep.mubr.bf16.mxu0 %v1068_v53 }
 0x1aa   :  { %4836 = vmatprep.subr.bf16.mxu0 %v5164_v54 }
 0x1b2   :  { %3269 = vmatmul.mubr.bf16.vlgmr.msra.gmra.mrb[0].mxu1 %v580_v58 }
 0x1b3   :  { %3277 = vmatpush1.bf16.xpose.msra.mxu1 %v5085_v59  ;;  %3308 = vmatprep.mubr.bf16.mxu1 %v620_v60 }
 0x1b4   :  { %4829 = vmatmul.mubr.bf16.vlgmr.msra.gmra.mrb[0].mxu0 %v1054_v62  ;;  %3316 = vmatprep.subr.bf16.mxu1 %v5088_v63 }
 0x1b5   :  { %4837 = vmatpush1.bf16.xpose.msra.mxu0 %v5163_v0  ;;  %4868 = vmatprep.mubr.bf16.mxu0 %v1072_v1 }
 0x1b6   :  { %4876 = vmatprep.subr.bf16.mxu0 %v5166_v2 }
 0x1be   :  { %3309 = vmatmul.mubr.bf16.vlgmr.msra.gmra.mrb[0].mxu1 %v606_v7 }
 0x1bf   :  { %3317 = vmatpush1.bf16.xpose.msra.mxu1 %v5087_v8  ;;  %3348 = vmatprep.mubr.bf16.mxu1 %v630_v9 }
 0x1c0   :  { %4869 = vmatmul.mubr.bf16.vlgmr.msra.gmra.mrb[0].mxu0 %v1070_v11  ;;  %3356 = vmatprep.subr.bf16.mxu1 %v5090_v12 }
 0x1c1   :  { %4877 = vmatpush1.bf16.xpose.msra.mxu0 %v5165_v13  ;;  %4908 = vmatprep.mubr.bf16.mxu0 %v1110_v14 }
 0x1c2   :  { %4916 = vmatprep.subr.bf16.mxu0 %v5168_v15 }
 0x1ca   :  { %3349 = vmatmul.mubr.bf16.vlgmr.msra.gmra.mrb[0].mxu1 %v628_v16 }
 0x1cb   :  { %3357 = vmatpush1.bf16.xpose.msra.mxu1 %v5089_v17  ;;  %3388 = vmatprep.mubr.bf16.mxu1 %v5743_v30 }
 0x1cc   :  { %4909 = vmatmul.mubr.bf16.vlgmr.msra.gmra.mrb[0].mxu0 %v1096_v20 }
 0x1cd   :  { %4917 = vmatpush1.bf16.xpose.msra.mxu0 %v5167_v22  ;;  %4948 = vmatprep.mubr.bf16.mxu0 %v1119_v23 }
 0x1ce   :  { %5171 = vmatprep.subr.msk.bf16.mxu0 %vm1829_vm0, %v5170_v24 }
 0x1d6   :  { %3389 = vmatmul.mubr.bf16.vlgmr.msra.gmra.mrb[0].mxu1 %v5738_v25 }
 0x1d8   :  { %4949 = vmatmul.mubr.bf16.vlgmr.msra.gmra.mrb[0].mxu0 %v1118_v28 }
 0x1d9   :  { %4957 = vmatpush1.bf16.xpose.msra.mxu0 %v5169_v29  ;;  %5172 = vmatprep.mubr.msk.bf16.mxu0 %vm1829_vm0, %v1117_v31 }
 0x1e4   :  { %4989 = vmatmul.mubr.bf16.vlgmr.msra.gmra.mrb[0].mxu0 %v1103_v32 }
 0x2a9   :  { %v3390_v30 = vpop.f32.mrb[0].mxu1 }
 0x2aa   :  { %v3392_v33 = vpop.f32.mrb[1].mxu1  ;;  %v5173_v37 = vadd.f32 %v5012_v36, %v3390_v30 }
 0x2ab   :  { %v3393_v34 = vpop.f32.mrb[2].mxu1 }
 0x2ac   :  { %v3394_v35 = vpop.f32.mrb[3].mxu1 }
 0x2b7   :  { %v4990_v38 = vpop.f32.mrb[0].mxu0 }
 0x2b8   :  { %v5174_v25 = vadd.f32 %v5173_v37, %v4990_v38  ;;  %v4992_v39 = vpop.f32.mrb[1].mxu0 }
 0x2b9   :  { %v4993_v40 = vpop.f32.mrb[2].mxu0 }
 0x2ba   :  { %v4994_v41 = vpop.f32.mrb[3].mxu0  ;;  %4997 = vst.msk [vmem:[#allocation2] sm:$0x3] %vm4996_vm1, %v5174_v25 }
 0x2bb   :  { %5676 = shalt.err (!%p5673_p4)
}
 0x2bc   :  { %s5677_s27 = scalar_lea.hbm %s6160_s3, 32 }
 0x2bd   :  { %p5678_p5 = scmp.ne.s32.totalorder %s6160_s3, %s5677_s27  ;;  %p5681_p6 = scmp.lt.u32.totalorder %s5677_s27, %s6160_s3 }
 0x2bf   :  { %p5683_p7 = pnand %p5681_p6, %p5678_p5 }
 0x2c1   :  { %5686 = shalt.err (!%p5683_p7)
}
 0x2c2   :  { %5007 = dma.vmem_to_hbm [thread:$0]  %s5005_s24, 32, %s6160_s3, [#allocation3]  }
 0x2c3   :  { %5687 = dma.done.wait [#allocation3], 32  }
 0x2c4   :  { %5688 = vsyncadd [#allocation3], 4294967264 }
 0x2c5   :  { %5011 = vsyncpa [#allocation3], 1 }

</bundles_post_ra>
